<compile_context>
chip_gen: v5e
topology: v5e:2x2
jax: 0.10.0
libtpu: 0.0.40
codegen_flags: <defaults>
</compile_context>

<pallas_src>
import jax
import jax.numpy as jnp
from jax.experimental import pallas as pl
from jax.experimental.pallas import tpu as pltpu

BN_EPS = 1e-5


def _pick_row_tile(h, target):
    """Largest even divisor of h that is <= target (feature maps here have even H)."""
    for th in range(min(h, max(2, target)), 1, -1):
        if h % th == 0 and th % 2 == 0:
            return th
    return h


def conv_bn_relu_block(x_nhwc, w_hwio, gamma, beta, *, pool, final_tanh, row_tile=64):
    """Conv2d(3x3, pad=1) -> BatchNorm2d(batch stats) -> ReLU [-> MaxPool2x2][-> tanh]."""
    N, H, W, Cin = x_nhwc.shape
    KH, KW, _, Cout = w_hwio.shape
    assert (KH, KW) == (3, 3)
    assert H % 2 == 0 and W % 2 == 0, "UNet feature maps must have even H/W"
    TH = _pick_row_tile(H, row_tile)
    n_tiles = H // TH
    Wp = W + 2

    # Glue (pure data movement): zero-pad H/W by 1 and cast MXU operands to bf16.
    xp = jnp.pad(x_nhwc, ((0, 0), (1, 1), (1, 1), (0, 0))).astype(jnp.bfloat16)
    wb = w_hwio.astype(jnp.bfloat16)

    grid = (N, n_tiles)
    # Main row block of the padded input + the 2-row halo that belongs to the next
    # row block (same array passed twice -> still one padded copy in HBM).
    a_spec = pl.BlockSpec((None, TH, Wp, Cin), lambda n, t: (n, t, 0, 0))
    h_spec = pl.BlockSpec((None, 2, Wp, Cin),
                          lambda n, t: (n, (t + 1) * (TH // 2), 0, 0))
    w_spec = pl.BlockSpec((KH, KW, Cin, Cout), lambda n, t: (0, 0, 0, 0))  # resident
    cparams = pltpu.CompilerParams(
        dimension_semantics=("parallel", "parallel"),
        vmem_limit_bytes=32 * 1024 * 1024,
    )

    def conv_tile(xa_ref, xh_ref, w_ref):
        # (TH+2, Wp, Cin) padded window covering this tile's TH output rows.
        x = jnp.concatenate([xa_ref[...], xh_ref[...]], axis=0)
        wv = w_ref[...]
        acc = jnp.zeros((TH * W, Cout), jnp.float32)
        for kh in range(3):
            for kw in range(3):
                win = x[kh:kh + TH, kw:kw + W, :].reshape(TH * W, Cin)
                acc = acc + jnp.dot(win, wv[kh, kw],
                                    preferred_element_type=jnp.float32)
        return acc  # f32 (TH*W, Cout)

    # ---- phase 1: per-tile partial sums for the *global* batch-norm statistics ----
    def stats_kernel(xa_ref, xh_ref, w_ref, s_ref, q_ref):
        y = conv_tile(xa_ref, xh_ref, w_ref)
        s_ref[...] = jnp.sum(y, axis=0, keepdims=True)
        q_ref[...] = jnp.sum(y * y, axis=0, keepdims=True)

    stat_spec = pl.BlockSpec((None, None, 1, Cout), lambda n, t: (n, t, 0, 0))
    psum, psq = pl.pallas_call(
        stats_kernel,
        grid=grid,
        in_specs=[a_spec, h_spec, w_spec],
        out_specs=(stat_spec, stat_spec),
        out_shape=(jax.ShapeDtypeStruct((N, n_tiles, 1, Cout), jnp.float32),) * 2,
        compiler_params=cparams,
    )(xp, xp, wb)

    # Tiny cross-tile reduction; fold BN into a single per-channel scale/shift FMA.
    cnt = float(N * H * W)
    mean = jnp.sum(psum, axis=(0, 1, 2)) / cnt
    var = jnp.maximum(jnp.sum(psq, axis=(0, 1, 2)) / cnt - mean * mean, 0.0)
    inv = jax.lax.rsqrt(var + BN_EPS)
    scale = (gamma * inv).reshape(1, Cout).astype(jnp.float32)
    shift = (beta - mean * gamma * inv).reshape(1, Cout).astype(jnp.float32)

    # ---- phase 2: recompute conv tile, folded BN + ReLU (+ fused pool / tanh) ----
    if pool:
        out_shape = jax.ShapeDtypeStruct((N, H // 2, W // 2, Cout), jnp.float32)
        o_spec = pl.BlockSpec((None, TH // 2, W // 2, Cout), lambda n, t: (n, t, 0, 0))
    else:
        out_shape = jax.ShapeDtypeStruct((N, H, W, Cout), jnp.float32)
        o_spec = pl.BlockSpec((None, TH, W, Cout), lambda n, t: (n, t, 0, 0))
    v_spec = pl.BlockSpec((1, Cout), lambda n, t: (0, 0))  # resident scale/shift

    def norm_kernel(xa_ref, xh_ref, w_ref, sc_ref, sh_ref, o_ref):
        y = conv_tile(xa_ref, xh_ref, w_ref)
        y = jnp.maximum(y * sc_ref[...] + sh_ref[...], 0.0)   # folded BN + ReLU
        y = y.reshape(TH, W, Cout)
        if pool:  # fused MaxPool2d(kernel=2, stride=2)
            y = y.reshape(TH // 2, 2, W, Cout)
            y = jnp.maximum(y[:, 0], y[:, 1])
            y = y.reshape(TH // 2, W // 2, 2, Cout)
            y = jnp.maximum(y[:, :, 0], y[:, :, 1])
        if final_tanh:
            y = jnp.tanh(y)
        o_ref[...] = y

    return pl.pallas_call(
        norm_kernel,
        grid=grid,
        in_specs=[a_spec, h_spec, w_spec, v_spec, v_spec],
        out_specs=o_spec,
        out_shape=out_shape,
        compiler_params=cparams,
    )(xp, xp, wb, scale, shift)


def build_unet_params(layers, target_dim, key):
    """Synthetic parameters matching the UNet module structure (HWIO conv weights).

    Conv biases are intentionally omitted: under training-mode BatchNorm the mean
    subtraction cancels a per-channel constant exactly, so the forward is identical.
    """
    enc, dec = [], []
    for cin, cout in zip(layers[:-1], layers[1:]):
        key, kw, kg, kb = jax.random.split(key, 4)
        enc.append(dict(
            w=jax.random.normal(kw, (3, 3, cin, cout), jnp.float32) / (3.0 * cin ** 0.5),
            gamma=1.0 + 0.1 * jax.random.normal(kg, (cout,), jnp.float32),
            beta=0.1 * jax.random.normal(kb, (cout,), jnp.float32),
        ))
    for i, (cin, cout) in enumerate(zip(layers[1:], layers[:-1])):
        in_ = cin + cout                      # upsampled + skip channels
        out_ = target_dim if i == 0 else cout
        key, kw, kg, kb = jax.random.split(key, 4)
        dec.append(dict(
            w=jax.random.normal(kw, (3, 3, in_, out_), jnp.float32) / (3.0 * in_ ** 0.5),
            gamma=1.0 + 0.1 * jax.random.normal(kg, (out_,), jnp.float32),
            beta=0.1 * jax.random.normal(kb, (out_,), jnp.float32),
        ))
    return dict(encoder=enc, decoder=dec)


def unet_forward(x_nchw, params, *, row_tile=64):
    x = jnp.transpose(x_nchw, (0, 2, 3, 1))  # NCHW -> NHWC
    skips = []
    for p in params["encoder"]:
        skips.append(x)
        x = conv_bn_relu_block(x, p["w"], p["gamma"], p["beta"],
                               pool=True, final_tanh=False, row_tile=row_tile)
    n_levels = len(params["encoder"])
    for i in range(n_levels):
        d = n_levels - 1 - i
        p = params["decoder"][d]
        # TODO(synk): nearest 2x upsample + skip concat are pure data movement and are
        # left as JAX glue feeding the fused conv/BN/ReLU Pallas kernels.
        x_up = jnp.repeat(jnp.repeat(x, 2, axis=1), 2, axis=2)
        x = jnp.concatenate([x_up, skips[d]], axis=-1)
        x = conv_bn_relu_block(x, p["w"], p["gamma"], p["beta"],
                               pool=False, final_tanh=(d == 0), row_tile=row_tile)
    return jnp.transpose(x, (0, 3, 1, 2))  # NHWC -> NCHW


# ----- pure-JAX reference (correctness check only) -----
def _ref_block(x, w, gamma, beta, *, pool, final_tanh):
    y = jax.lax.conv_general_dilated(
        x.astype(jnp.bfloat16), w.astype(jnp.bfloat16),
        window_strides=(1, 1), padding=((1, 1), (1, 1)),
        dimension_numbers=("NHWC", "HWIO", "NHWC"),
        preferred_element_type=jnp.float32)
    mean = jnp.mean(y, axis=(0, 1, 2), keepdims=True)
    var = jnp.mean((y - mean) ** 2, axis=(0, 1, 2), keepdims=True)
    y = (y - mean) * jax.lax.rsqrt(var + BN_EPS) * gamma + beta
    y = jnp.maximum(y, 0.0)
    if pool:
        n, h, w_, c = y.shape
        y = y.reshape(n, h // 2, 2, w_ // 2, 2, c).max(axis=(2, 4))
    if final_tanh:
        y = jnp.tanh(y)
    return y


def unet_reference(x_nchw, params):
    x = jnp.transpose(x_nchw, (0, 2, 3, 1))
    skips = []
    for p in params["encoder"]:
        skips.append(x)
        x = _ref_block(x, p["w"], p["gamma"], p["beta"], pool=True, final_tanh=False)
    n_levels = len(params["encoder"])
    for i in range(n_levels):
        d = n_levels - 1 - i
        p = params["decoder"][d]
        x_up = jnp.repeat(jnp.repeat(x, 2, axis=1), 2, axis=2)
        x = jnp.concatenate([x_up, skips[d]], axis=-1)
        x = _ref_block(x, p["w"], p["gamma"], p["beta"], pool=False, final_tanh=(d == 0))
    return jnp.transpose(x, (0, 3, 1, 2))


if __name__ == "__main__":
    key = jax.random.PRNGKey(0)
    k_in, k_p = jax.random.split(key)

    layers = [4, 8, 16]
    target_dim = 3
    x = jax.random.normal(k_in, (2, layers[0], 16, 16), jnp.float32)  # NCHW
    params = build_unet_params(layers, target_dim, k_p)

    # row_tile=8 so the 16-row levels exercise multiple row tiles (multi-tile BN reduce).
    fwd = jax.jit(lambda xx, pp: unet_forward(xx, pp, row_tile=8))
    out = jax.block_until_ready(fwd(x, params))

    ref = unet_reference(x, params)
    assert out.shape == (2, target_dim, 16, 16), out.shape
    max_err = float(jnp.max(jnp.abs(out - ref)))
    mean_err = float(jnp.mean(jnp.abs(out - ref)))
    assert max_err < 2e-2 and mean_err < 1e-3, (max_err, mean_err)
    print("KERNEL_OK")
</pallas_src>

<mosaic_0001>
module attributes {stable_mosaic.version = 11 : i64} {
  func.func @stats_kernel(%arg0: i32, %arg1: i32, %arg2: memref<1x8x18x4xbf16, #tpu.memory_space<vmem>>, %arg3: memref<1x2x18x4xbf16, #tpu.memory_space<vmem>>, %arg4: memref<3x3x4x8xbf16, #tpu.memory_space<vmem>>, %arg5: memref<1x1x1x8xf32, #tpu.memory_space<vmem>>, %arg6: memref<1x1x1x8xf32, #tpu.memory_space<vmem>>) attributes {dimension_semantics = [#tpu.dimension_semantics<parallel>, #tpu.dimension_semantics<parallel>], iteration_bounds = array<i64: 2, 2>, scalar_prefetch = 0 : i64, scratch_operands = 0 : i64, tpu.core_type = #tpu.core_type<tc>, window_params = [{transform_indices = @transform_0, window_bounds = array<i64: 1, 8, 18, 4>}, {transform_indices = @transform_1, window_bounds = array<i64: 1, 2, 18, 4>}, {pipeline_mode = #tpu.pipeline_mode<synchronous>, transform_indices = @transform_2, window_bounds = array<i64: 3, 3, 4, 8>}, {transform_indices = @transform_3, window_bounds = array<i64: 1, 1, 1, 8>}, {transform_indices = @transform_4, window_bounds = array<i64: 1, 1, 1, 8>}]} {
    %c0 = arith.constant 0 : index
    %c0_0 = arith.constant 0 : index
    %c0_1 = arith.constant 0 : index
    %c0_2 = arith.constant 0 : index
    %0 = vector.load %arg2[%c0, %c0_0, %c0_1, %c0_2] : memref<1x8x18x4xbf16, #tpu.memory_space<vmem>>, vector<1x8x18x4xbf16>
    %1 = vector.shape_cast %0 : vector<1x8x18x4xbf16> to vector<8x18x4xbf16>
    %c0_3 = arith.constant 0 : index
    %c0_4 = arith.constant 0 : index
    %c0_5 = arith.constant 0 : index
    %c0_6 = arith.constant 0 : index
    %2 = vector.load %arg3[%c0_3, %c0_4, %c0_5, %c0_6] : memref<1x2x18x4xbf16, #tpu.memory_space<vmem>>, vector<1x2x18x4xbf16>
    %3 = vector.shape_cast %2 : vector<1x2x18x4xbf16> to vector<2x18x4xbf16>
    %4 = tpu.concatenate %1, %3 in 0 : vector<8x18x4xbf16>, vector<2x18x4xbf16> -> vector<10x18x4xbf16>
    %c0_7 = arith.constant 0 : index
    %c0_8 = arith.constant 0 : index
    %c0_9 = arith.constant 0 : index
    %c0_10 = arith.constant 0 : index
    %5 = vector.load %arg4[%c0_7, %c0_8, %c0_9, %c0_10] : memref<3x3x4x8xbf16, #tpu.memory_space<vmem>>, vector<3x3x4x8xbf16>
    %cst = arith.constant 0.000000e+00 : f32
    %6 = vector.broadcast %cst : f32 to vector<128x8xf32>
    %7 = vector.extract_strided_slice %4 {offsets = [0, 0, 0], sizes = [8, 16, 4], strides = [1, 1, 1]} : vector<10x18x4xbf16> to vector<8x16x4xbf16>
    %8 = vector.shape_cast %7 : vector<8x16x4xbf16> to vector<128x4xbf16>
    %9 = vector.extract_strided_slice %5 {offsets = [0, 0, 0, 0], sizes = [1, 1, 4, 8], strides = [1, 1, 1, 1]} : vector<3x3x4x8xbf16> to vector<1x1x4x8xbf16>
    %10 = vector.shape_cast %9 : vector<1x1x4x8xbf16> to vector<4x8xbf16>
    %cst_11 = arith.constant dense<0.000000e+00> : vector<128x8xf32>
    %11 = tpu.matmul %8, %10, %cst_11 {dimension_numbers = #tpu.dot_dimension_numbers<[1], [0], [0], [1], [0, 0, 1, 1], [], []>} : vector<128x4xbf16>, vector<4x8xbf16>, vector<128x8xf32> -> vector<128x8xf32>
    %12 = arith.addf %6, %11 : vector<128x8xf32>
    %13 = vector.extract_strided_slice %4 {offsets = [0, 1, 0], sizes = [8, 16, 4], strides = [1, 1, 1]} : vector<10x18x4xbf16> to vector<8x16x4xbf16>
    %14 = vector.shape_cast %13 : vector<8x16x4xbf16> to vector<128x4xbf16>
    %15 = vector.extract_strided_slice %5 {offsets = [0, 1, 0, 0], sizes = [1, 1, 4, 8], strides = [1, 1, 1, 1]} : vector<3x3x4x8xbf16> to vector<1x1x4x8xbf16>
    %16 = vector.shape_cast %15 : vector<1x1x4x8xbf16> to vector<4x8xbf16>
    %cst_12 = arith.constant dense<0.000000e+00> : vector<128x8xf32>
    %17 = tpu.matmul %14, %16, %cst_12 {dimension_numbers = #tpu.dot_dimension_numbers<[1], [0], [0], [1], [0, 0, 1, 1], [], []>} : vector<128x4xbf16>, vector<4x8xbf16>, vector<128x8xf32> -> vector<128x8xf32>
    %18 = arith.addf %12, %17 : vector<128x8xf32>
    %19 = vector.extract_strided_slice %4 {offsets = [0, 2, 0], sizes = [8, 16, 4], strides = [1, 1, 1]} : vector<10x18x4xbf16> to vector<8x16x4xbf16>
    %20 = vector.shape_cast %19 : vector<8x16x4xbf16> to vector<128x4xbf16>
    %21 = vector.extract_strided_slice %5 {offsets = [0, 2, 0, 0], sizes = [1, 1, 4, 8], strides = [1, 1, 1, 1]} : vector<3x3x4x8xbf16> to vector<1x1x4x8xbf16>
    %22 = vector.shape_cast %21 : vector<1x1x4x8xbf16> to vector<4x8xbf16>
    %cst_13 = arith.constant dense<0.000000e+00> : vector<128x8xf32>
    %23 = tpu.matmul %20, %22, %cst_13 {dimension_numbers = #tpu.dot_dimension_numbers<[1], [0], [0], [1], [0, 0, 1, 1], [], []>} : vector<128x4xbf16>, vector<4x8xbf16>, vector<128x8xf32> -> vector<128x8xf32>
    %24 = arith.addf %18, %23 : vector<128x8xf32>
    %25 = vector.extract_strided_slice %4 {offsets = [1, 0, 0], sizes = [8, 16, 4], strides = [1, 1, 1]} : vector<10x18x4xbf16> to vector<8x16x4xbf16>
    %26 = vector.shape_cast %25 : vector<8x16x4xbf16> to vector<128x4xbf16>
    %27 = vector.extract_strided_slice %5 {offsets = [1, 0, 0, 0], sizes = [1, 1, 4, 8], strides = [1, 1, 1, 1]} : vector<3x3x4x8xbf16> to vector<1x1x4x8xbf16>
    %28 = vector.shape_cast %27 : vector<1x1x4x8xbf16> to vector<4x8xbf16>
    %cst_14 = arith.constant dense<0.000000e+00> : vector<128x8xf32>
    %29 = tpu.matmul %26, %28, %cst_14 {dimension_numbers = #tpu.dot_dimension_numbers<[1], [0], [0], [1], [0, 0, 1, 1], [], []>} : vector<128x4xbf16>, vector<4x8xbf16>, vector<128x8xf32> -> vector<128x8xf32>
    %30 = arith.addf %24, %29 : vector<128x8xf32>
    %31 = vector.extract_strided_slice %4 {offsets = [1, 1, 0], sizes = [8, 16, 4], strides = [1, 1, 1]} : vector<10x18x4xbf16> to vector<8x16x4xbf16>
    %32 = vector.shape_cast %31 : vector<8x16x4xbf16> to vector<128x4xbf16>
    %33 = vector.extract_strided_slice %5 {offsets = [1, 1, 0, 0], sizes = [1, 1, 4, 8], strides = [1, 1, 1, 1]} : vector<3x3x4x8xbf16> to vector<1x1x4x8xbf16>
    %34 = vector.shape_cast %33 : vector<1x1x4x8xbf16> to vector<4x8xbf16>
    %cst_15 = arith.constant dense<0.000000e+00> : vector<128x8xf32>
    %35 = tpu.matmul %32, %34, %cst_15 {dimension_numbers = #tpu.dot_dimension_numbers<[1], [0], [0], [1], [0, 0, 1, 1], [], []>} : vector<128x4xbf16>, vector<4x8xbf16>, vector<128x8xf32> -> vector<128x8xf32>
    %36 = arith.addf %30, %35 : vector<128x8xf32>
    %37 = vector.extract_strided_slice %4 {offsets = [1, 2, 0], sizes = [8, 16, 4], strides = [1, 1, 1]} : vector<10x18x4xbf16> to vector<8x16x4xbf16>
    %38 = vector.shape_cast %37 : vector<8x16x4xbf16> to vector<128x4xbf16>
    %39 = vector.extract_strided_slice %5 {offsets = [1, 2, 0, 0], sizes = [1, 1, 4, 8], strides = [1, 1, 1, 1]} : vector<3x3x4x8xbf16> to vector<1x1x4x8xbf16>
    %40 = vector.shape_cast %39 : vector<1x1x4x8xbf16> to vector<4x8xbf16>
    %cst_16 = arith.constant dense<0.000000e+00> : vector<128x8xf32>
    %41 = tpu.matmul %38, %40, %cst_16 {dimension_numbers = #tpu.dot_dimension_numbers<[1], [0], [0], [1], [0, 0, 1, 1], [], []>} : vector<128x4xbf16>, vector<4x8xbf16>, vector<128x8xf32> -> vector<128x8xf32>
    %42 = arith.addf %36, %41 : vector<128x8xf32>
    %43 = vector.extract_strided_slice %4 {offsets = [2, 0, 0], sizes = [8, 16, 4], strides = [1, 1, 1]} : vector<10x18x4xbf16> to vector<8x16x4xbf16>
    %44 = vector.shape_cast %43 : vector<8x16x4xbf16> to vector<128x4xbf16>
    %45 = vector.extract_strided_slice %5 {offsets = [2, 0, 0, 0], sizes = [1, 1, 4, 8], strides = [1, 1, 1, 1]} : vector<3x3x4x8xbf16> to vector<1x1x4x8xbf16>
    %46 = vector.shape_cast %45 : vector<1x1x4x8xbf16> to vector<4x8xbf16>
    %cst_17 = arith.constant dense<0.000000e+00> : vector<128x8xf32>
    %47 = tpu.matmul %44, %46, %cst_17 {dimension_numbers = #tpu.dot_dimension_numbers<[1], [0], [0], [1], [0, 0, 1, 1], [], []>} : vector<128x4xbf16>, vector<4x8xbf16>, vector<128x8xf32> -> vector<128x8xf32>
    %48 = arith.addf %42, %47 : vector<128x8xf32>
    %49 = vector.extract_strided_slice %4 {offsets = [2, 1, 0], sizes = [8, 16, 4], strides = [1, 1, 1]} : vector<10x18x4xbf16> to vector<8x16x4xbf16>
    %50 = vector.shape_cast %49 : vector<8x16x4xbf16> to vector<128x4xbf16>
    %51 = vector.extract_strided_slice %5 {offsets = [2, 1, 0, 0], sizes = [1, 1, 4, 8], strides = [1, 1, 1, 1]} : vector<3x3x4x8xbf16> to vector<1x1x4x8xbf16>
    %52 = vector.shape_cast %51 : vector<1x1x4x8xbf16> to vector<4x8xbf16>
    %cst_18 = arith.constant dense<0.000000e+00> : vector<128x8xf32>
    %53 = tpu.matmul %50, %52, %cst_18 {dimension_numbers = #tpu.dot_dimension_numbers<[1], [0], [0], [1], [0, 0, 1, 1], [], []>} : vector<128x4xbf16>, vector<4x8xbf16>, vector<128x8xf32> -> vector<128x8xf32>
    %54 = arith.addf %48, %53 : vector<128x8xf32>
    %55 = vector.extract_strided_slice %4 {offsets = [2, 2, 0], sizes = [8, 16, 4], strides = [1, 1, 1]} : vector<10x18x4xbf16> to vector<8x16x4xbf16>
    %56 = vector.shape_cast %55 : vector<8x16x4xbf16> to vector<128x4xbf16>
    %57 = vector.extract_strided_slice %5 {offsets = [2, 2, 0, 0], sizes = [1, 1, 4, 8], strides = [1, 1, 1, 1]} : vector<3x3x4x8xbf16> to vector<1x1x4x8xbf16>
    %58 = vector.shape_cast %57 : vector<1x1x4x8xbf16> to vector<4x8xbf16>
    %cst_19 = arith.constant dense<0.000000e+00> : vector<128x8xf32>
    %59 = tpu.matmul %56, %58, %cst_19 {dimension_numbers = #tpu.dot_dimension_numbers<[1], [0], [0], [1], [0, 0, 1, 1], [], []>} : vector<128x4xbf16>, vector<4x8xbf16>, vector<128x8xf32> -> vector<128x8xf32>
    %60 = arith.addf %54, %59 : vector<128x8xf32>
    %cst_20 = arith.constant dense<0.000000e+00> : vector<8xf32>
    %61 = vector.multi_reduction <add>, %60, %cst_20 [0] : vector<128x8xf32> to vector<8xf32>
    %62 = vector.shape_cast %61 : vector<8xf32> to vector<1x8xf32>
    %c0_21 = arith.constant 0 : index
    %c0_22 = arith.constant 0 : index
    %c0_23 = arith.constant 0 : index
    %c0_24 = arith.constant 0 : index
    %63 = vector.load %arg5[%c0_21, %c0_22, %c0_23, %c0_24] : memref<1x1x1x8xf32, #tpu.memory_space<vmem>>, vector<1x1x1x8xf32>
    %64 = vector.shape_cast %63 : vector<1x1x1x8xf32> to vector<1x8xf32>
    %65 = vector.shape_cast %62 : vector<1x8xf32> to vector<1x1x1x8xf32>
    tpu.vector_store %arg5[%c0_21, %c0_22, %c0_23, %c0_24], %65 {strides = array<i32>} : memref<1x1x1x8xf32, #tpu.memory_space<vmem>>, vector<1x1x1x8xf32>,
    %66 = arith.mulf %60, %60 : vector<128x8xf32>
    %cst_25 = arith.constant dense<0.000000e+00> : vector<8xf32>
    %67 = vector.multi_reduction <add>, %66, %cst_25 [0] : vector<128x8xf32> to vector<8xf32>
    %68 = vector.shape_cast %67 : vector<8xf32> to vector<1x8xf32>
    %c0_26 = arith.constant 0 : index
    %c0_27 = arith.constant 0 : index
    %c0_28 = arith.constant 0 : index
    %c0_29 = arith.constant 0 : index
    %69 = vector.load %arg6[%c0_26, %c0_27, %c0_28, %c0_29] : memref<1x1x1x8xf32, #tpu.memory_space<vmem>>, vector<1x1x1x8xf32>
    %70 = vector.shape_cast %69 : vector<1x1x1x8xf32> to vector<1x8xf32>
    %71 = vector.shape_cast %68 : vector<1x8xf32> to vector<1x1x1x8xf32>
    tpu.vector_store %arg6[%c0_26, %c0_27, %c0_28, %c0_29], %71 {strides = array<i32>} : memref<1x1x1x8xf32, #tpu.memory_space<vmem>>, vector<1x1x1x8xf32>,
    return
  }
  func.func @transform_0(%arg0: i32, %arg1: i32) -> (i32, i32, i32, i32) {
    %c0_i32 = arith.constant 0 : i32
    %c0_i32_0 = arith.constant 0 : i32
    %c0_i32_1 = arith.constant 0 : i32
    return %arg0, %arg1, %c0_i32, %c0_i32_0 : i32, i32, i32, i32
  }
  func.func @transform_1(%arg0: i32, %arg1: i32) -> (i32, i32, i32, i32) {
    %c1_i32 = arith.constant 1 : i32
    %0 = arith.addi %arg1, %c1_i32 : i32
    %c4_i32 = arith.constant 4 : i32
    %1 = arith.muli %0, %c4_i32 : i32
    %c0_i32 = arith.constant 0 : i32
    %c0_i32_0 = arith.constant 0 : i32
    %c0_i32_1 = arith.constant 0 : i32
    return %arg0, %1, %c0_i32, %c0_i32_0 : i32, i32, i32, i32
  }
  func.func @transform_2(%arg0: i32, %arg1: i32) -> (i32, i32, i32, i32) {
    %c0_i32 = arith.constant 0 : i32
    %c0_i32_0 = arith.constant 0 : i32
    %c0_i32_1 = arith.constant 0 : i32
    %c0_i32_2 = arith.constant 0 : i32
    %c0_i32_3 = arith.constant 0 : i32
    return %c0_i32, %c0_i32_0, %c0_i32_1, %c0_i32_2 : i32, i32, i32, i32
  }
  func.func @transform_3(%arg0: i32, %arg1: i32) -> (i32, i32, i32, i32) {
    %c0_i32 = arith.constant 0 : i32
    %c0_i32_0 = arith.constant 0 : i32
    %c0_i32_1 = arith.constant 0 : i32
    return %arg0, %arg1, %c0_i32, %c0_i32_0 : i32, i32, i32, i32
  }
  func.func @transform_4(%arg0: i32, %arg1: i32) -> (i32, i32, i32, i32) {
    %c0_i32 = arith.constant 0 : i32
    %c0_i32_0 = arith.constant 0 : i32
    %c0_i32_1 = arith.constant 0 : i32
    return %arg0, %arg1, %c0_i32, %c0_i32_0 : i32, i32, i32, i32
  }
}

module attributes {stable_mosaic.version = 11 : i64} {
  func.func @norm_kernel(%arg0: i32, %arg1: i32, %arg2: memref<1x8x18x4xbf16, #tpu.memory_space<vmem>>, %arg3: memref<1x2x18x4xbf16, #tpu.memory_space<vmem>>, %arg4: memref<3x3x4x8xbf16, #tpu.memory_space<vmem>>, %arg5: memref<1x8xf32, #tpu.memory_space<vmem>>, %arg6: memref<1x8xf32, #tpu.memory_space<vmem>>, %arg7: memref<1x4x8x8xf32, #tpu.memory_space<vmem>>) attributes {dimension_semantics = [#tpu.dimension_semantics<parallel>, #tpu.dimension_semantics<parallel>], iteration_bounds = array<i64: 2, 2>, scalar_prefetch = 0 : i64, scratch_operands = 0 : i64, tpu.core_type = #tpu.core_type<tc>, window_params = [{transform_indices = @transform_0, window_bounds = array<i64: 1, 8, 18, 4>}, {transform_indices = @transform_1, window_bounds = array<i64: 1, 2, 18, 4>}, {pipeline_mode = #tpu.pipeline_mode<synchronous>, transform_indices = @transform_2, window_bounds = array<i64: 3, 3, 4, 8>}, {pipeline_mode = #tpu.pipeline_mode<synchronous>, transform_indices = @transform_3, window_bounds = array<i64: 1, 8>}, {pipeline_mode = #tpu.pipeline_mode<synchronous>, transform_indices = @transform_4, window_bounds = array<i64: 1, 8>}, {transform_indices = @transform_5, window_bounds = array<i64: 1, 4, 8, 8>}]} {
    %c0 = arith.constant 0 : index
    %c0_0 = arith.constant 0 : index
    %c0_1 = arith.constant 0 : index
    %c0_2 = arith.constant 0 : index
    %0 = vector.load %arg2[%c0, %c0_0, %c0_1, %c0_2] : memref<1x8x18x4xbf16, #tpu.memory_space<vmem>>, vector<1x8x18x4xbf16>
    %1 = vector.shape_cast %0 : vector<1x8x18x4xbf16> to vector<8x18x4xbf16>
    %c0_3 = arith.constant 0 : index
    %c0_4 = arith.constant 0 : index
    %c0_5 = arith.constant 0 : index
    %c0_6 = arith.constant 0 : index
    %2 = vector.load %arg3[%c0_3, %c0_4, %c0_5, %c0_6] : memref<1x2x18x4xbf16, #tpu.memory_space<vmem>>, vector<1x2x18x4xbf16>
    %3 = vector.shape_cast %2 : vector<1x2x18x4xbf16> to vector<2x18x4xbf16>
    %4 = tpu.concatenate %1, %3 in 0 : vector<8x18x4xbf16>, vector<2x18x4xbf16> -> vector<10x18x4xbf16>
    %c0_7 = arith.constant 0 : index
    %c0_8 = arith.constant 0 : index
    %c0_9 = arith.constant 0 : index
    %c0_10 = arith.constant 0 : index
    %5 = vector.load %arg4[%c0_7, %c0_8, %c0_9, %c0_10] : memref<3x3x4x8xbf16, #tpu.memory_space<vmem>>, vector<3x3x4x8xbf16>
    %cst = arith.constant 0.000000e+00 : f32
    %6 = vector.broadcast %cst : f32 to vector<128x8xf32>
    %7 = vector.extract_strided_slice %4 {offsets = [0, 0, 0], sizes = [8, 16, 4], strides = [1, 1, 1]} : vector<10x18x4xbf16> to vector<8x16x4xbf16>
    %8 = vector.shape_cast %7 : vector<8x16x4xbf16> to vector<128x4xbf16>
    %9 = vector.extract_strided_slice %5 {offsets = [0, 0, 0, 0], sizes = [1, 1, 4, 8], strides = [1, 1, 1, 1]} : vector<3x3x4x8xbf16> to vector<1x1x4x8xbf16>
    %10 = vector.shape_cast %9 : vector<1x1x4x8xbf16> to vector<4x8xbf16>
    %cst_11 = arith.constant dense<0.000000e+00> : vector<128x8xf32>
    %11 = tpu.matmul %8, %10, %cst_11 {dimension_numbers = #tpu.dot_dimension_numbers<[1], [0], [0], [1], [0, 0, 1, 1], [], []>} : vector<128x4xbf16>, vector<4x8xbf16>, vector<128x8xf32> -> vector<128x8xf32>
    %12 = arith.addf %6, %11 : vector<128x8xf32>
    %13 = vector.extract_strided_slice %4 {offsets = [0, 1, 0], sizes = [8, 16, 4], strides = [1, 1, 1]} : vector<10x18x4xbf16> to vector<8x16x4xbf16>
    %14 = vector.shape_cast %13 : vector<8x16x4xbf16> to vector<128x4xbf16>
    %15 = vector.extract_strided_slice %5 {offsets = [0, 1, 0, 0], sizes = [1, 1, 4, 8], strides = [1, 1, 1, 1]} : vector<3x3x4x8xbf16> to vector<1x1x4x8xbf16>
    %16 = vector.shape_cast %15 : vector<1x1x4x8xbf16> to vector<4x8xbf16>
    %cst_12 = arith.constant dense<0.000000e+00> : vector<128x8xf32>
    %17 = tpu.matmul %14, %16, %cst_12 {dimension_numbers = #tpu.dot_dimension_numbers<[1], [0], [0], [1], [0, 0, 1, 1], [], []>} : vector<128x4xbf16>, vector<4x8xbf16>, vector<128x8xf32> -> vector<128x8xf32>
    %18 = arith.addf %12, %17 : vector<128x8xf32>
    %19 = vector.extract_strided_slice %4 {offsets = [0, 2, 0], sizes = [8, 16, 4], strides = [1, 1, 1]} : vector<10x18x4xbf16> to vector<8x16x4xbf16>
    %20 = vector.shape_cast %19 : vector<8x16x4xbf16> to vector<128x4xbf16>
    %21 = vector.extract_strided_slice %5 {offsets = [0, 2, 0, 0], sizes = [1, 1, 4, 8], strides = [1, 1, 1, 1]} : vector<3x3x4x8xbf16> to vector<1x1x4x8xbf16>
    %22 = vector.shape_cast %21 : vector<1x1x4x8xbf16> to vector<4x8xbf16>
    %cst_13 = arith.constant dense<0.000000e+00> : vector<128x8xf32>
    %23 = tpu.matmul %20, %22, %cst_13 {dimension_numbers = #tpu.dot_dimension_numbers<[1], [0], [0], [1], [0, 0, 1, 1], [], []>} : vector<128x4xbf16>, vector<4x8xbf16>, vector<128x8xf32> -> vector<128x8xf32>
    %24 = arith.addf %18, %23 : vector<128x8xf32>
    %25 = vector.extract_strided_slice %4 {offsets = [1, 0, 0], sizes = [8, 16, 4], strides = [1, 1, 1]} : vector<10x18x4xbf16> to vector<8x16x4xbf16>
    %26 = vector.shape_cast %25 : vector<8x16x4xbf16> to vector<128x4xbf16>
    %27 = vector.extract_strided_slice %5 {offsets = [1, 0, 0, 0], sizes = [1, 1, 4, 8], strides = [1, 1, 1, 1]} : vector<3x3x4x8xbf16> to vector<1x1x4x8xbf16>
    %28 = vector.shape_cast %27 : vector<1x1x4x8xbf16> to vector<4x8xbf16>
    %cst_14 = arith.constant dense<0.000000e+00> : vector<128x8xf32>
    %29 = tpu.matmul %26, %28, %cst_14 {dimension_numbers = #tpu.dot_dimension_numbers<[1], [0], [0], [1], [0, 0, 1, 1], [], []>} : vector<128x4xbf16>, vector<4x8xbf16>, vector<128x8xf32> -> vector<128x8xf32>
    %30 = arith.addf %24, %29 : vector<128x8xf32>
    %31 = vector.extract_strided_slice %4 {offsets = [1, 1, 0], sizes = [8, 16, 4], strides = [1, 1, 1]} : vector<10x18x4xbf16> to vector<8x16x4xbf16>
    %32 = vector.shape_cast %31 : vector<8x16x4xbf16> to vector<128x4xbf16>
    %33 = vector.extract_strided_slice %5 {offsets = [1, 1, 0, 0], sizes = [1, 1, 4, 8], strides = [1, 1, 1, 1]} : vector<3x3x4x8xbf16> to vector<1x1x4x8xbf16>
    %34 = vector.shape_cast %33 : vector<1x1x4x8xbf16> to vector<4x8xbf16>
    %cst_15 = arith.constant dense<0.000000e+00> : vector<128x8xf32>
    %35 = tpu.matmul %32, %34, %cst_15 {dimension_numbers = #tpu.dot_dimension_numbers<[1], [0], [0], [1], [0, 0, 1, 1], [], []>} : vector<128x4xbf16>, vector<4x8xbf16>, vector<128x8xf32> -> vector<128x8xf32>
    %36 = arith.addf %30, %35 : vector<128x8xf32>
    %37 = vector.extract_strided_slice %4 {offsets = [1, 2, 0], sizes = [8, 16, 4], strides = [1, 1, 1]} : vector<10x18x4xbf16> to vector<8x16x4xbf16>
    %38 = vector.shape_cast %37 : vector<8x16x4xbf16> to vector<128x4xbf16>
    %39 = vector.extract_strided_slice %5 {offsets = [1, 2, 0, 0], sizes = [1, 1, 4, 8], strides = [1, 1, 1, 1]} : vector<3x3x4x8xbf16> to vector<1x1x4x8xbf16>
    %40 = vector.shape_cast %39 : vector<1x1x4x8xbf16> to vector<4x8xbf16>
    %cst_16 = arith.constant dense<0.000000e+00> : vector<128x8xf32>
    %41 = tpu.matmul %38, %40, %cst_16 {dimension_numbers = #tpu.dot_dimension_numbers<[1], [0], [0], [1], [0, 0, 1, 1], [], []>} : vector<128x4xbf16>, vector<4x8xbf16>, vector<128x8xf32> -> vector<128x8xf32>
    %42 = arith.addf %36, %41 : vector<128x8xf32>
    %43 = vector.extract_strided_slice %4 {offsets = [2, 0, 0], sizes = [8, 16, 4], strides = [1, 1, 1]} : vector<10x18x4xbf16> to vector<8x16x4xbf16>
    %44 = vector.shape_cast %43 : vector<8x16x4xbf16> to vector<128x4xbf16>
    %45 = vector.extract_strided_slice %5 {offsets = [2, 0, 0, 0], sizes = [1, 1, 4, 8], strides = [1, 1, 1, 1]} : vector<3x3x4x8xbf16> to vector<1x1x4x8xbf16>
    %46 = vector.shape_cast %45 : vector<1x1x4x8xbf16> to vector<4x8xbf16>
    %cst_17 = arith.constant dense<0.000000e+00> : vector<128x8xf32>
    %47 = tpu.matmul %44, %46, %cst_17 {dimension_numbers = #tpu.dot_dimension_numbers<[1], [0], [0], [1], [0, 0, 1, 1], [], []>} : vector<128x4xbf16>, vector<4x8xbf16>, vector<128x8xf32> -> vector<128x8xf32>
    %48 = arith.addf %42, %47 : vector<128x8xf32>
    %49 = vector.extract_strided_slice %4 {offsets = [2, 1, 0], sizes = [8, 16, 4], strides = [1, 1, 1]} : vector<10x18x4xbf16> to vector<8x16x4xbf16>
    %50 = vector.shape_cast %49 : vector<8x16x4xbf16> to vector<128x4xbf16>
    %51 = vector.extract_strided_slice %5 {offsets = [2, 1, 0, 0], sizes = [1, 1, 4, 8], strides = [1, 1, 1, 1]} : vector<3x3x4x8xbf16> to vector<1x1x4x8xbf16>
    %52 = vector.shape_cast %51 : vector<1x1x4x8xbf16> to vector<4x8xbf16>
    %cst_18 = arith.constant dense<0.000000e+00> : vector<128x8xf32>
    %53 = tpu.matmul %50, %52, %cst_18 {dimension_numbers = #tpu.dot_dimension_numbers<[1], [0], [0], [1], [0, 0, 1, 1], [], []>} : vector<128x4xbf16>, vector<4x8xbf16>, vector<128x8xf32> -> vector<128x8xf32>
    %54 = arith.addf %48, %53 : vector<128x8xf32>
    %55 = vector.extract_strided_slice %4 {offsets = [2, 2, 0], sizes = [8, 16, 4], strides = [1, 1, 1]} : vector<10x18x4xbf16> to vector<8x16x4xbf16>
    %56 = vector.shape_cast %55 : vector<8x16x4xbf16> to vector<128x4xbf16>
    %57 = vector.extract_strided_slice %5 {offsets = [2, 2, 0, 0], sizes = [1, 1, 4, 8], strides = [1, 1, 1, 1]} : vector<3x3x4x8xbf16> to vector<1x1x4x8xbf16>
    %58 = vector.shape_cast %57 : vector<1x1x4x8xbf16> to vector<4x8xbf16>
    %cst_19 = arith.constant dense<0.000000e+00> : vector<128x8xf32>
    %59 = tpu.matmul %56, %58, %cst_19 {dimension_numbers = #tpu.dot_dimension_numbers<[1], [0], [0], [1], [0, 0, 1, 1], [], []>} : vector<128x4xbf16>, vector<4x8xbf16>, vector<128x8xf32> -> vector<128x8xf32>
    %60 = arith.addf %54, %59 : vector<128x8xf32>
    %c0_20 = arith.constant 0 : index
    %c0_21 = arith.constant 0 : index
    %61 = vector.load %arg5[%c0_20, %c0_21] : memref<1x8xf32, #tpu.memory_space<vmem>>, vector<1x8xf32>
    %62 = vector.broadcast %61 : vector<1x8xf32> to vector<128x8xf32>
    %63 = arith.mulf %60, %62 : vector<128x8xf32>
    %c0_22 = arith.constant 0 : index
    %c0_23 = arith.constant 0 : index
    %64 = vector.load %arg6[%c0_22, %c0_23] : memref<1x8xf32, #tpu.memory_space<vmem>>, vector<1x8xf32>
    %65 = vector.broadcast %64 : vector<1x8xf32> to vector<128x8xf32>
    %66 = arith.addf %63, %65 : vector<128x8xf32>
    %cst_24 = arith.constant 0.000000e+00 : f32
    %67 = vector.broadcast %cst_24 : f32 to vector<128x8xf32>
    %68 = arith.maximumf %66, %67 : vector<128x8xf32>
    %69 = vector.shape_cast %68 : vector<128x8xf32> to vector<8x16x8xf32>
    %70 = vector.shape_cast %69 : vector<8x16x8xf32> to vector<4x2x16x8xf32>
    %71 = vector.extract_strided_slice %70 {offsets = [0, 0, 0, 0], sizes = [4, 1, 16, 8], strides = [1, 1, 1, 1]} : vector<4x2x16x8xf32> to vector<4x1x16x8xf32>
    %72 = vector.shape_cast %71 : vector<4x1x16x8xf32> to vector<4x16x8xf32>
    %73 = vector.extract_strided_slice %70 {offsets = [0, 1, 0, 0], sizes = [4, 1, 16, 8], strides = [1, 1, 1, 1]} : vector<4x2x16x8xf32> to vector<4x1x16x8xf32>
    %74 = vector.shape_cast %73 : vector<4x1x16x8xf32> to vector<4x16x8xf32>
    %75 = arith.maximumf %72, %74 : vector<4x16x8xf32>
    %76 = vector.shape_cast %75 : vector<4x16x8xf32> to vector<4x8x2x8xf32>
    %77 = vector.extract_strided_slice %76 {offsets = [0, 0, 0, 0], sizes = [4, 8, 1, 8], strides = [1, 1, 1, 1]} : vector<4x8x2x8xf32> to vector<4x8x1x8xf32>
    %78 = vector.shape_cast %77 : vector<4x8x1x8xf32> to vector<4x8x8xf32>
    %79 = vector.extract_strided_slice %76 {offsets = [0, 0, 1, 0], sizes = [4, 8, 1, 8], strides = [1, 1, 1, 1]} : vector<4x8x2x8xf32> to vector<4x8x1x8xf32>
    %80 = vector.shape_cast %79 : vector<4x8x1x8xf32> to vector<4x8x8xf32>
    %81 = arith.maximumf %78, %80 : vector<4x8x8xf32>
    %c0_25 = arith.constant 0 : index
    %c0_26 = arith.constant 0 : index
    %c0_27 = arith.constant 0 : index
    %c0_28 = arith.constant 0 : index
    %82 = vector.load %arg7[%c0_25, %c0_26, %c0_27, %c0_28] : memref<1x4x8x8xf32, #tpu.memory_space<vmem>>, vector<1x4x8x8xf32>
    %83 = vector.shape_cast %82 : vector<1x4x8x8xf32> to vector<4x8x8xf32>
    %84 = vector.shape_cast %81 : vector<4x8x8xf32> to vector<1x4x8x8xf32>
    tpu.vector_store %arg7[%c0_25, %c0_26, %c0_27, %c0_28], %84 {strides = array<i32>} : memref<1x4x8x8xf32, #tpu.memory_space<vmem>>, vector<1x4x8x8xf32>,
    return
  }
  func.func @transform_0(%arg0: i32, %arg1: i32) -> (i32, i32, i32, i32) {
    %c0_i32 = arith.constant 0 : i32
    %c0_i32_0 = arith.constant 0 : i32
    %c0_i32_1 = arith.constant 0 : i32
    return %arg0, %arg1, %c0_i32, %c0_i32_0 : i32, i32, i32, i32
  }
  func.func @transform_1(%arg0: i32, %arg1: i32) -> (i32, i32, i32, i32) {
    %c1_i32 = arith.constant 1 : i32
    %0 = arith.addi %arg1, %c1_i32 : i32
    %c4_i32 = arith.constant 4 : i32
    %1 = arith.muli %0, %c4_i32 : i32
    %c0_i32 = arith.constant 0 : i32
    %c0_i32_0 = arith.constant 0 : i32
    %c0_i32_1 = arith.constant 0 : i32
    return %arg0, %1, %c0_i32, %c0_i32_0 : i32, i32, i32, i32
  }
  func.func @transform_2(%arg0: i32, %arg1: i32) -> (i32, i32, i32, i32) {
    %c0_i32 = arith.constant 0 : i32
    %c0_i32_0 = arith.constant 0 : i32
    %c0_i32_1 = arith.constant 0 : i32
    %c0_i32_2 = arith.constant 0 : i32
    %c0_i32_3 = arith.constant 0 : i32
    return %c0_i32, %c0_i32_0, %c0_i32_1, %c0_i32_2 : i32, i32, i32, i32
  }
  func.func @transform_3(%arg0: i32, %arg1: i32) -> (i32, i32) {
    %c0_i32 = arith.constant 0 : i32
    %c0_i32_0 = arith.constant 0 : i32
    %c0_i32_1 = arith.constant 0 : i32
    return %c0_i32, %c0_i32_0 : i32, i32
  }
  func.func @transform_4(%arg0: i32, %arg1: i32) -> (i32, i32) {
    %c0_i32 = arith.constant 0 : i32
    %c0_i32_0 = arith.constant 0 : i32
    %c0_i32_1 = arith.constant 0 : i32
    return %c0_i32, %c0_i32_0 : i32, i32
  }
  func.func @transform_5(%arg0: i32, %arg1: i32) -> (i32, i32, i32, i32) {
    %c0_i32 = arith.constant 0 : i32
    %c0_i32_0 = arith.constant 0 : i32
    %c0_i32_1 = arith.constant 0 : i32
    return %arg0, %arg1, %c0_i32, %c0_i32_0 : i32, i32, i32, i32
  }
}

module attributes {stable_mosaic.version = 11 : i64} {
  func.func @stats_kernel(%arg0: i32, %arg1: i32, %arg2: memref<1x8x10x8xbf16, #tpu.memory_space<vmem>>, %arg3: memref<1x2x10x8xbf16, #tpu.memory_space<vmem>>, %arg4: memref<3x3x8x16xbf16, #tpu.memory_space<vmem>>, %arg5: memref<1x1x1x16xf32, #tpu.memory_space<vmem>>, %arg6: memref<1x1x1x16xf32, #tpu.memory_space<vmem>>) attributes {dimension_semantics = [#tpu.dimension_semantics<parallel>, #tpu.dimension_semantics<parallel>], iteration_bounds = array<i64: 2, 1>, scalar_prefetch = 0 : i64, scratch_operands = 0 : i64, tpu.core_type = #tpu.core_type<tc>, window_params = [{transform_indices = @transform_0, window_bounds = array<i64: 1, 8, 10, 8>}, {transform_indices = @transform_1, window_bounds = array<i64: 1, 2, 10, 8>}, {pipeline_mode = #tpu.pipeline_mode<synchronous>, transform_indices = @transform_2, window_bounds = array<i64: 3, 3, 8, 16>}, {transform_indices = @transform_3, window_bounds = array<i64: 1, 1, 1, 16>}, {transform_indices = @transform_4, window_bounds = array<i64: 1, 1, 1, 16>}]} {
    %c0 = arith.constant 0 : index
    %c0_0 = arith.constant 0 : index
    %c0_1 = arith.constant 0 : index
    %c0_2 = arith.constant 0 : index
    %0 = vector.load %arg2[%c0, %c0_0, %c0_1, %c0_2] : memref<1x8x10x8xbf16, #tpu.memory_space<vmem>>, vector<1x8x10x8xbf16>
    %1 = vector.shape_cast %0 : vector<1x8x10x8xbf16> to vector<8x10x8xbf16>
    %c0_3 = arith.constant 0 : index
    %c0_4 = arith.constant 0 : index
    %c0_5 = arith.constant 0 : index
    %c0_6 = arith.constant 0 : index
    %2 = vector.load %arg3[%c0_3, %c0_4, %c0_5, %c0_6] : memref<1x2x10x8xbf16, #tpu.memory_space<vmem>>, vector<1x2x10x8xbf16>
    %3 = vector.shape_cast %2 : vector<1x2x10x8xbf16> to vector<2x10x8xbf16>
    %4 = tpu.concatenate %1, %3 in 0 : vector<8x10x8xbf16>, vector<2x10x8xbf16> -> vector<10x10x8xbf16>
    %c0_7 = arith.constant 0 : index
    %c0_8 = arith.constant 0 : index
    %c0_9 = arith.constant 0 : index
    %c0_10 = arith.constant 0 : index
    %5 = vector.load %arg4[%c0_7, %c0_8, %c0_9, %c0_10] : memref<3x3x8x16xbf16, #tpu.memory_space<vmem>>, vector<3x3x8x16xbf16>
    %cst = arith.constant 0.000000e+00 : f32
    %6 = vector.broadcast %cst : f32 to vector<64x16xf32>
    %7 = vector.extract_strided_slice %4 {offsets = [0, 0, 0], sizes = [8, 8, 8], strides = [1, 1, 1]} : vector<10x10x8xbf16> to vector<8x8x8xbf16>
    %8 = vector.shape_cast %7 : vector<8x8x8xbf16> to vector<64x8xbf16>
    %9 = vector.extract_strided_slice %5 {offsets = [0, 0, 0, 0], sizes = [1, 1, 8, 16], strides = [1, 1, 1, 1]} : vector<3x3x8x16xbf16> to vector<1x1x8x16xbf16>
    %10 = vector.shape_cast %9 : vector<1x1x8x16xbf16> to vector<8x16xbf16>
    %cst_11 = arith.constant dense<0.000000e+00> : vector<64x16xf32>
    %11 = tpu.matmul %8, %10, %cst_11 {dimension_numbers = #tpu.dot_dimension_numbers<[1], [0], [0], [1], [0, 0, 1, 1], [], []>} : vector<64x8xbf16>, vector<8x16xbf16>, vector<64x16xf32> -> vector<64x16xf32>
    %12 = arith.addf %6, %11 : vector<64x16xf32>
    %13 = vector.extract_strided_slice %4 {offsets = [0, 1, 0], sizes = [8, 8, 8], strides = [1, 1, 1]} : vector<10x10x8xbf16> to vector<8x8x8xbf16>
    %14 = vector.shape_cast %13 : vector<8x8x8xbf16> to vector<64x8xbf16>
    %15 = vector.extract_strided_slice %5 {offsets = [0, 1, 0, 0], sizes = [1, 1, 8, 16], strides = [1, 1, 1, 1]} : vector<3x3x8x16xbf16> to vector<1x1x8x16xbf16>
    %16 = vector.shape_cast %15 : vector<1x1x8x16xbf16> to vector<8x16xbf16>
    %cst_12 = arith.constant dense<0.000000e+00> : vector<64x16xf32>
    %17 = tpu.matmul %14, %16, %cst_12 {dimension_numbers = #tpu.dot_dimension_numbers<[1], [0], [0], [1], [0, 0, 1, 1], [], []>} : vector<64x8xbf16>, vector<8x16xbf16>, vector<64x16xf32> -> vector<64x16xf32>
    %18 = arith.addf %12, %17 : vector<64x16xf32>
    %19 = vector.extract_strided_slice %4 {offsets = [0, 2, 0], sizes = [8, 8, 8], strides = [1, 1, 1]} : vector<10x10x8xbf16> to vector<8x8x8xbf16>
    %20 = vector.shape_cast %19 : vector<8x8x8xbf16> to vector<64x8xbf16>
    %21 = vector.extract_strided_slice %5 {offsets = [0, 2, 0, 0], sizes = [1, 1, 8, 16], strides = [1, 1, 1, 1]} : vector<3x3x8x16xbf16> to vector<1x1x8x16xbf16>
    %22 = vector.shape_cast %21 : vector<1x1x8x16xbf16> to vector<8x16xbf16>
    %cst_13 = arith.constant dense<0.000000e+00> : vector<64x16xf32>
    %23 = tpu.matmul %20, %22, %cst_13 {dimension_numbers = #tpu.dot_dimension_numbers<[1], [0], [0], [1], [0, 0, 1, 1], [], []>} : vector<64x8xbf16>, vector<8x16xbf16>, vector<64x16xf32> -> vector<64x16xf32>
    %24 = arith.addf %18, %23 : vector<64x16xf32>
    %25 = vector.extract_strided_slice %4 {offsets = [1, 0, 0], sizes = [8, 8, 8], strides = [1, 1, 1]} : vector<10x10x8xbf16> to vector<8x8x8xbf16>
    %26 = vector.shape_cast %25 : vector<8x8x8xbf16> to vector<64x8xbf16>
    %27 = vector.extract_strided_slice %5 {offsets = [1, 0, 0, 0], sizes = [1, 1, 8, 16], strides = [1, 1, 1, 1]} : vector<3x3x8x16xbf16> to vector<1x1x8x16xbf16>
    %28 = vector.shape_cast %27 : vector<1x1x8x16xbf16> to vector<8x16xbf16>
    %cst_14 = arith.constant dense<0.000000e+00> : vector<64x16xf32>
    %29 = tpu.matmul %26, %28, %cst_14 {dimension_numbers = #tpu.dot_dimension_numbers<[1], [0], [0], [1], [0, 0, 1, 1], [], []>} : vector<64x8xbf16>, vector<8x16xbf16>, vector<64x16xf32> -> vector<64x16xf32>
    %30 = arith.addf %24, %29 : vector<64x16xf32>
    %31 = vector.extract_strided_slice %4 {offsets = [1, 1, 0], sizes = [8, 8, 8], strides = [1, 1, 1]} : vector<10x10x8xbf16> to vector<8x8x8xbf16>
    %32 = vector.shape_cast %31 : vector<8x8x8xbf16> to vector<64x8xbf16>
    %33 = vector.extract_strided_slice %5 {offsets = [1, 1, 0, 0], sizes = [1, 1, 8, 16], strides = [1, 1, 1, 1]} : vector<3x3x8x16xbf16> to vector<1x1x8x16xbf16>
    %34 = vector.shape_cast %33 : vector<1x1x8x16xbf16> to vector<8x16xbf16>
    %cst_15 = arith.constant dense<0.000000e+00> : vector<64x16xf32>
    %35 = tpu.matmul %32, %34, %cst_15 {dimension_numbers = #tpu.dot_dimension_numbers<[1], [0], [0], [1], [0, 0, 1, 1], [], []>} : vector<64x8xbf16>, vector<8x16xbf16>, vector<64x16xf32> -> vector<64x16xf32>
    %36 = arith.addf %30, %35 : vector<64x16xf32>
    %37 = vector.extract_strided_slice %4 {offsets = [1, 2, 0], sizes = [8, 8, 8], strides = [1, 1, 1]} : vector<10x10x8xbf16> to vector<8x8x8xbf16>
    %38 = vector.shape_cast %37 : vector<8x8x8xbf16> to vector<64x8xbf16>
    %39 = vector.extract_strided_slice %5 {offsets = [1, 2, 0, 0], sizes = [1, 1, 8, 16], strides = [1, 1, 1, 1]} : vector<3x3x8x16xbf16> to vector<1x1x8x16xbf16>
    %40 = vector.shape_cast %39 : vector<1x1x8x16xbf16> to vector<8x16xbf16>
    %cst_16 = arith.constant dense<0.000000e+00> : vector<64x16xf32>
    %41 = tpu.matmul %38, %40, %cst_16 {dimension_numbers = #tpu.dot_dimension_numbers<[1], [0], [0], [1], [0, 0, 1, 1], [], []>} : vector<64x8xbf16>, vector<8x16xbf16>, vector<64x16xf32> -> vector<64x16xf32>
    %42 = arith.addf %36, %41 : vector<64x16xf32>
    %43 = vector.extract_strided_slice %4 {offsets = [2, 0, 0], sizes = [8, 8, 8], strides = [1, 1, 1]} : vector<10x10x8xbf16> to vector<8x8x8xbf16>
    %44 = vector.shape_cast %43 : vector<8x8x8xbf16> to vector<64x8xbf16>
    %45 = vector.extract_strided_slice %5 {offsets = [2, 0, 0, 0], sizes = [1, 1, 8, 16], strides = [1, 1, 1, 1]} : vector<3x3x8x16xbf16> to vector<1x1x8x16xbf16>
    %46 = vector.shape_cast %45 : vector<1x1x8x16xbf16> to vector<8x16xbf16>
    %cst_17 = arith.constant dense<0.000000e+00> : vector<64x16xf32>
    %47 = tpu.matmul %44, %46, %cst_17 {dimension_numbers = #tpu.dot_dimension_numbers<[1], [0], [0], [1], [0, 0, 1, 1], [], []>} : vector<64x8xbf16>, vector<8x16xbf16>, vector<64x16xf32> -> vector<64x16xf32>
    %48 = arith.addf %42, %47 : vector<64x16xf32>
    %49 = vector.extract_strided_slice %4 {offsets = [2, 1, 0], sizes = [8, 8, 8], strides = [1, 1, 1]} : vector<10x10x8xbf16> to vector<8x8x8xbf16>
    %50 = vector.shape_cast %49 : vector<8x8x8xbf16> to vector<64x8xbf16>
    %51 = vector.extract_strided_slice %5 {offsets = [2, 1, 0, 0], sizes = [1, 1, 8, 16], strides = [1, 1, 1, 1]} : vector<3x3x8x16xbf16> to vector<1x1x8x16xbf16>
    %52 = vector.shape_cast %51 : vector<1x1x8x16xbf16> to vector<8x16xbf16>
    %cst_18 = arith.constant dense<0.000000e+00> : vector<64x16xf32>
    %53 = tpu.matmul %50, %52, %cst_18 {dimension_numbers = #tpu.dot_dimension_numbers<[1], [0], [0], [1], [0, 0, 1, 1], [], []>} : vector<64x8xbf16>, vector<8x16xbf16>, vector<64x16xf32> -> vector<64x16xf32>
    %54 = arith.addf %48, %53 : vector<64x16xf32>
    %55 = vector.extract_strided_slice %4 {offsets = [2, 2, 0], sizes = [8, 8, 8], strides = [1, 1, 1]} : vector<10x10x8xbf16> to vector<8x8x8xbf16>
    %56 = vector.shape_cast %55 : vector<8x8x8xbf16> to vector<64x8xbf16>
    %57 = vector.extract_strided_slice %5 {offsets = [2, 2, 0, 0], sizes = [1, 1, 8, 16], strides = [1, 1, 1, 1]} : vector<3x3x8x16xbf16> to vector<1x1x8x16xbf16>
    %58 = vector.shape_cast %57 : vector<1x1x8x16xbf16> to vector<8x16xbf16>
    %cst_19 = arith.constant dense<0.000000e+00> : vector<64x16xf32>
    %59 = tpu.matmul %56, %58, %cst_19 {dimension_numbers = #tpu.dot_dimension_numbers<[1], [0], [0], [1], [0, 0, 1, 1], [], []>} : vector<64x8xbf16>, vector<8x16xbf16>, vector<64x16xf32> -> vector<64x16xf32>
    %60 = arith.addf %54, %59 : vector<64x16xf32>
    %cst_20 = arith.constant dense<0.000000e+00> : vector<16xf32>
    %61 = vector.multi_reduction <add>, %60, %cst_20 [0] : vector<64x16xf32> to vector<16xf32>
    %62 = vector.shape_cast %61 : vector<16xf32> to vector<1x16xf32>
    %c0_21 = arith.constant 0 : index
    %c0_22 = arith.constant 0 : index
    %c0_23 = arith.constant 0 : index
    %c0_24 = arith.constant 0 : index
    %63 = vector.load %arg5[%c0_21, %c0_22, %c0_23, %c0_24] : memref<1x1x1x16xf32, #tpu.memory_space<vmem>>, vector<1x1x1x16xf32>
    %64 = vector.shape_cast %63 : vector<1x1x1x16xf32> to vector<1x16xf32>
    %65 = vector.shape_cast %62 : vector<1x16xf32> to vector<1x1x1x16xf32>
    tpu.vector_store %arg5[%c0_21, %c0_22, %c0_23, %c0_24], %65 {strides = array<i32>} : memref<1x1x1x16xf32, #tpu.memory_space<vmem>>, vector<1x1x1x16xf32>,
    %66 = arith.mulf %60, %60 : vector<64x16xf32>
    %cst_25 = arith.constant dense<0.000000e+00> : vector<16xf32>
    %67 = vector.multi_reduction <add>, %66, %cst_25 [0] : vector<64x16xf32> to vector<16xf32>
    %68 = vector.shape_cast %67 : vector<16xf32> to vector<1x16xf32>
    %c0_26 = arith.constant 0 : index
    %c0_27 = arith.constant 0 : index
    %c0_28 = arith.constant 0 : index
    %c0_29 = arith.constant 0 : index
    %69 = vector.load %arg6[%c0_26, %c0_27, %c0_28, %c0_29] : memref<1x1x1x16xf32, #tpu.memory_space<vmem>>, vector<1x1x1x16xf32>
    %70 = vector.shape_cast %69 : vector<1x1x1x16xf32> to vector<1x16xf32>
    %71 = vector.shape_cast %68 : vector<1x16xf32> to vector<1x1x1x16xf32>
    tpu.vector_store %arg6[%c0_26, %c0_27, %c0_28, %c0_29], %71 {strides = array<i32>} : memref<1x1x1x16xf32, #tpu.memory_space<vmem>>, vector<1x1x1x16xf32>,
    return
  }
  func.func @transform_0(%arg0: i32, %arg1: i32) -> (i32, i32, i32, i32) {
    %c0_i32 = arith.constant 0 : i32
    %c0_i32_0 = arith.constant 0 : i32
    %c0_i32_1 = arith.constant 0 : i32
    return %arg0, %arg1, %c0_i32, %c0_i32_0 : i32, i32, i32, i32
  }
  func.func @transform_1(%arg0: i32, %arg1: i32) -> (i32, i32, i32, i32) {
    %c1_i32 = arith.constant 1 : i32
    %0 = arith.addi %arg1, %c1_i32 : i32
    %c4_i32 = arith.constant 4 : i32
    %1 = arith.muli %0, %c4_i32 : i32
    %c0_i32 = arith.constant 0 : i32
    %c0_i32_0 = arith.constant 0 : i32
    %c0_i32_1 = arith.constant 0 : i32
    return %arg0, %1, %c0_i32, %c0_i32_0 : i32, i32, i32, i32
  }
  func.func @transform_2(%arg0: i32, %arg1: i32) -> (i32, i32, i32, i32) {
    %c0_i32 = arith.constant 0 : i32
    %c0_i32_0 = arith.constant 0 : i32
    %c0_i32_1 = arith.constant 0 : i32
    %c0_i32_2 = arith.constant 0 : i32
    %c0_i32_3 = arith.constant 0 : i32
    return %c0_i32, %c0_i32_0, %c0_i32_1, %c0_i32_2 : i32, i32, i32, i32
  }
  func.func @transform_3(%arg0: i32, %arg1: i32) -> (i32, i32, i32, i32) {
    %c0_i32 = arith.constant 0 : i32
    %c0_i32_0 = arith.constant 0 : i32
    %c0_i32_1 = arith.constant 0 : i32
    return %arg0, %arg1, %c0_i32, %c0_i32_0 : i32, i32, i32, i32
  }
  func.func @transform_4(%arg0: i32, %arg1: i32) -> (i32, i32, i32, i32) {
    %c0_i32 = arith.constant 0 : i32
    %c0_i32_0 = arith.constant 0 : i32
    %c0_i32_1 = arith.constant 0 : i32
    return %arg0, %arg1, %c0_i32, %c0_i32_0 : i32, i32, i32, i32
  }
}

module attributes {stable_mosaic.version = 11 : i64} {
  func.func @norm_kernel(%arg0: i32, %arg1: i32, %arg2: memref<1x8x10x8xbf16, #tpu.memory_space<vmem>>, %arg3: memref<1x2x10x8xbf16, #tpu.memory_space<vmem>>, %arg4: memref<3x3x8x16xbf16, #tpu.memory_space<vmem>>, %arg5: memref<1x16xf32, #tpu.memory_space<vmem>>, %arg6: memref<1x16xf32, #tpu.memory_space<vmem>>, %arg7: memref<1x4x4x16xf32, #tpu.memory_space<vmem>>) attributes {dimension_semantics = [#tpu.dimension_semantics<parallel>, #tpu.dimension_semantics<parallel>], iteration_bounds = array<i64: 2, 1>, scalar_prefetch = 0 : i64, scratch_operands = 0 : i64, tpu.core_type = #tpu.core_type<tc>, window_params = [{transform_indices = @transform_0, window_bounds = array<i64: 1, 8, 10, 8>}, {transform_indices = @transform_1, window_bounds = array<i64: 1, 2, 10, 8>}, {pipeline_mode = #tpu.pipeline_mode<synchronous>, transform_indices = @transform_2, window_bounds = array<i64: 3, 3, 8, 16>}, {pipeline_mode = #tpu.pipeline_mode<synchronous>, transform_indices = @transform_3, window_bounds = array<i64: 1, 16>}, {pipeline_mode = #tpu.pipeline_mode<synchronous>, transform_indices = @transform_4, window_bounds = array<i64: 1, 16>}, {transform_indices = @transform_5, window_bounds = array<i64: 1, 4, 4, 16>}]} {
    %c0 = arith.constant 0 : index
    %c0_0 = arith.constant 0 : index
    %c0_1 = arith.constant 0 : index
    %c0_2 = arith.constant 0 : index
    %0 = vector.load %arg2[%c0, %c0_0, %c0_1, %c0_2] : memref<1x8x10x8xbf16, #tpu.memory_space<vmem>>, vector<1x8x10x8xbf16>
    %1 = vector.shape_cast %0 : vector<1x8x10x8xbf16> to vector<8x10x8xbf16>
    %c0_3 = arith.constant 0 : index
    %c0_4 = arith.constant 0 : index
    %c0_5 = arith.constant 0 : index
    %c0_6 = arith.constant 0 : index
    %2 = vector.load %arg3[%c0_3, %c0_4, %c0_5, %c0_6] : memref<1x2x10x8xbf16, #tpu.memory_space<vmem>>, vector<1x2x10x8xbf16>
    %3 = vector.shape_cast %2 : vector<1x2x10x8xbf16> to vector<2x10x8xbf16>
    %4 = tpu.concatenate %1, %3 in 0 : vector<8x10x8xbf16>, vector<2x10x8xbf16> -> vector<10x10x8xbf16>
    %c0_7 = arith.constant 0 : index
    %c0_8 = arith.constant 0 : index
    %c0_9 = arith.constant 0 : index
    %c0_10 = arith.constant 0 : index
    %5 = vector.load %arg4[%c0_7, %c0_8, %c0_9, %c0_10] : memref<3x3x8x16xbf16, #tpu.memory_space<vmem>>, vector<3x3x8x16xbf16>
    %cst = arith.constant 0.000000e+00 : f32
    %6 = vector.broadcast %cst : f32 to vector<64x16xf32>
    %7 = vector.extract_strided_slice %4 {offsets = [0, 0, 0], sizes = [8, 8, 8], strides = [1, 1, 1]} : vector<10x10x8xbf16> to vector<8x8x8xbf16>
    %8 = vector.shape_cast %7 : vector<8x8x8xbf16> to vector<64x8xbf16>
    %9 = vector.extract_strided_slice %5 {offsets = [0, 0, 0, 0], sizes = [1, 1, 8, 16], strides = [1, 1, 1, 1]} : vector<3x3x8x16xbf16> to vector<1x1x8x16xbf16>
    %10 = vector.shape_cast %9 : vector<1x1x8x16xbf16> to vector<8x16xbf16>
    %cst_11 = arith.constant dense<0.000000e+00> : vector<64x16xf32>
    %11 = tpu.matmul %8, %10, %cst_11 {dimension_numbers = #tpu.dot_dimension_numbers<[1], [0], [0], [1], [0, 0, 1, 1], [], []>} : vector<64x8xbf16>, vector<8x16xbf16>, vector<64x16xf32> -> vector<64x16xf32>
    %12 = arith.addf %6, %11 : vector<64x16xf32>
    %13 = vector.extract_strided_slice %4 {offsets = [0, 1, 0], sizes = [8, 8, 8], strides = [1, 1, 1]} : vector<10x10x8xbf16> to vector<8x8x8xbf16>
    %14 = vector.shape_cast %13 : vector<8x8x8xbf16> to vector<64x8xbf16>
    %15 = vector.extract_strided_slice %5 {offsets = [0, 1, 0, 0], sizes = [1, 1, 8, 16], strides = [1, 1, 1, 1]} : vector<3x3x8x16xbf16> to vector<1x1x8x16xbf16>
    %16 = vector.shape_cast %15 : vector<1x1x8x16xbf16> to vector<8x16xbf16>
    %cst_12 = arith.constant dense<0.000000e+00> : vector<64x16xf32>
    %17 = tpu.matmul %14, %16, %cst_12 {dimension_numbers = #tpu.dot_dimension_numbers<[1], [0], [0], [1], [0, 0, 1, 1], [], []>} : vector<64x8xbf16>, vector<8x16xbf16>, vector<64x16xf32> -> vector<64x16xf32>
    %18 = arith.addf %12, %17 : vector<64x16xf32>
    %19 = vector.extract_strided_slice %4 {offsets = [0, 2, 0], sizes = [8, 8, 8], strides = [1, 1, 1]} : vector<10x10x8xbf16> to vector<8x8x8xbf16>
    %20 = vector.shape_cast %19 : vector<8x8x8xbf16> to vector<64x8xbf16>
    %21 = vector.extract_strided_slice %5 {offsets = [0, 2, 0, 0], sizes = [1, 1, 8, 16], strides = [1, 1, 1, 1]} : vector<3x3x8x16xbf16> to vector<1x1x8x16xbf16>
    %22 = vector.shape_cast %21 : vector<1x1x8x16xbf16> to vector<8x16xbf16>
    %cst_13 = arith.constant dense<0.000000e+00> : vector<64x16xf32>
    %23 = tpu.matmul %20, %22, %cst_13 {dimension_numbers = #tpu.dot_dimension_numbers<[1], [0], [0], [1], [0, 0, 1, 1], [], []>} : vector<64x8xbf16>, vector<8x16xbf16>, vector<64x16xf32> -> vector<64x16xf32>
    %24 = arith.addf %18, %23 : vector<64x16xf32>
    %25 = vector.extract_strided_slice %4 {offsets = [1, 0, 0], sizes = [8, 8, 8], strides = [1, 1, 1]} : vector<10x10x8xbf16> to vector<8x8x8xbf16>
    %26 = vector.shape_cast %25 : vector<8x8x8xbf16> to vector<64x8xbf16>
    %27 = vector.extract_strided_slice %5 {offsets = [1, 0, 0, 0], sizes = [1, 1, 8, 16], strides = [1, 1, 1, 1]} : vector<3x3x8x16xbf16> to vector<1x1x8x16xbf16>
    %28 = vector.shape_cast %27 : vector<1x1x8x16xbf16> to vector<8x16xbf16>
    %cst_14 = arith.constant dense<0.000000e+00> : vector<64x16xf32>
    %29 = tpu.matmul %26, %28, %cst_14 {dimension_numbers = #tpu.dot_dimension_numbers<[1], [0], [0], [1], [0, 0, 1, 1], [], []>} : vector<64x8xbf16>, vector<8x16xbf16>, vector<64x16xf32> -> vector<64x16xf32>
    %30 = arith.addf %24, %29 : vector<64x16xf32>
    %31 = vector.extract_strided_slice %4 {offsets = [1, 1, 0], sizes = [8, 8, 8], strides = [1, 1, 1]} : vector<10x10x8xbf16> to vector<8x8x8xbf16>
    %32 = vector.shape_cast %31 : vector<8x8x8xbf16> to vector<64x8xbf16>
    %33 = vector.extract_strided_slice %5 {offsets = [1, 1, 0, 0], sizes = [1, 1, 8, 16], strides = [1, 1, 1, 1]} : vector<3x3x8x16xbf16> to vector<1x1x8x16xbf16>
    %34 = vector.shape_cast %33 : vector<1x1x8x16xbf16> to vector<8x16xbf16>
    %cst_15 = arith.constant dense<0.000000e+00> : vector<64x16xf32>
    %35 = tpu.matmul %32, %34, %cst_15 {dimension_numbers = #tpu.dot_dimension_numbers<[1], [0], [0], [1], [0, 0, 1, 1], [], []>} : vector<64x8xbf16>, vector<8x16xbf16>, vector<64x16xf32> -> vector<64x16xf32>
    %36 = arith.addf %30, %35 : vector<64x16xf32>
    %37 = vector.extract_strided_slice %4 {offsets = [1, 2, 0], sizes = [8, 8, 8], strides = [1, 1, 1]} : vector<10x10x8xbf16> to vector<8x8x8xbf16>
    %38 = vector.shape_cast %37 : vector<8x8x8xbf16> to vector<64x8xbf16>
    %39 = vector.extract_strided_slice %5 {offsets = [1, 2, 0, 0], sizes = [1, 1, 8, 16], strides = [1, 1, 1, 1]} : vector<3x3x8x16xbf16> to vector<1x1x8x16xbf16>
    %40 = vector.shape_cast %39 : vector<1x1x8x16xbf16> to vector<8x16xbf16>
    %cst_16 = arith.constant dense<0.000000e+00> : vector<64x16xf32>
    %41 = tpu.matmul %38, %40, %cst_16 {dimension_numbers = #tpu.dot_dimension_numbers<[1], [0], [0], [1], [0, 0, 1, 1], [], []>} : vector<64x8xbf16>, vector<8x16xbf16>, vector<64x16xf32> -> vector<64x16xf32>
    %42 = arith.addf %36, %41 : vector<64x16xf32>
    %43 = vector.extract_strided_slice %4 {offsets = [2, 0, 0], sizes = [8, 8, 8], strides = [1, 1, 1]} : vector<10x10x8xbf16> to vector<8x8x8xbf16>
    %44 = vector.shape_cast %43 : vector<8x8x8xbf16> to vector<64x8xbf16>
    %45 = vector.extract_strided_slice %5 {offsets = [2, 0, 0, 0], sizes = [1, 1, 8, 16], strides = [1, 1, 1, 1]} : vector<3x3x8x16xbf16> to vector<1x1x8x16xbf16>
    %46 = vector.shape_cast %45 : vector<1x1x8x16xbf16> to vector<8x16xbf16>
    %cst_17 = arith.constant dense<0.000000e+00> : vector<64x16xf32>
    %47 = tpu.matmul %44, %46, %cst_17 {dimension_numbers = #tpu.dot_dimension_numbers<[1], [0], [0], [1], [0, 0, 1, 1], [], []>} : vector<64x8xbf16>, vector<8x16xbf16>, vector<64x16xf32> -> vector<64x16xf32>
    %48 = arith.addf %42, %47 : vector<64x16xf32>
    %49 = vector.extract_strided_slice %4 {offsets = [2, 1, 0], sizes = [8, 8, 8], strides = [1, 1, 1]} : vector<10x10x8xbf16> to vector<8x8x8xbf16>
    %50 = vector.shape_cast %49 : vector<8x8x8xbf16> to vector<64x8xbf16>
    %51 = vector.extract_strided_slice %5 {offsets = [2, 1, 0, 0], sizes = [1, 1, 8, 16], strides = [1, 1, 1, 1]} : vector<3x3x8x16xbf16> to vector<1x1x8x16xbf16>
    %52 = vector.shape_cast %51 : vector<1x1x8x16xbf16> to vector<8x16xbf16>
    %cst_18 = arith.constant dense<0.000000e+00> : vector<64x16xf32>
    %53 = tpu.matmul %50, %52, %cst_18 {dimension_numbers = #tpu.dot_dimension_numbers<[1], [0], [0], [1], [0, 0, 1, 1], [], []>} : vector<64x8xbf16>, vector<8x16xbf16>, vector<64x16xf32> -> vector<64x16xf32>
    %54 = arith.addf %48, %53 : vector<64x16xf32>
    %55 = vector.extract_strided_slice %4 {offsets = [2, 2, 0], sizes = [8, 8, 8], strides = [1, 1, 1]} : vector<10x10x8xbf16> to vector<8x8x8xbf16>
    %56 = vector.shape_cast %55 : vector<8x8x8xbf16> to vector<64x8xbf16>
    %57 = vector.extract_strided_slice %5 {offsets = [2, 2, 0, 0], sizes = [1, 1, 8, 16], strides = [1, 1, 1, 1]} : vector<3x3x8x16xbf16> to vector<1x1x8x16xbf16>
    %58 = vector.shape_cast %57 : vector<1x1x8x16xbf16> to vector<8x16xbf16>
    %cst_19 = arith.constant dense<0.000000e+00> : vector<64x16xf32>
    %59 = tpu.matmul %56, %58, %cst_19 {dimension_numbers = #tpu.dot_dimension_numbers<[1], [0], [0], [1], [0, 0, 1, 1], [], []>} : vector<64x8xbf16>, vector<8x16xbf16>, vector<64x16xf32> -> vector<64x16xf32>
    %60 = arith.addf %54, %59 : vector<64x16xf32>
    %c0_20 = arith.constant 0 : index
    %c0_21 = arith.constant 0 : index
    %61 = vector.load %arg5[%c0_20, %c0_21] : memref<1x16xf32, #tpu.memory_space<vmem>>, vector<1x16xf32>
    %62 = vector.broadcast %61 : vector<1x16xf32> to vector<64x16xf32>
    %63 = arith.mulf %60, %62 : vector<64x16xf32>
    %c0_22 = arith.constant 0 : index
    %c0_23 = arith.constant 0 : index
    %64 = vector.load %arg6[%c0_22, %c0_23] : memref<1x16xf32, #tpu.memory_space<vmem>>, vector<1x16xf32>
    %65 = vector.broadcast %64 : vector<1x16xf32> to vector<64x16xf32>
    %66 = arith.addf %63, %65 : vector<64x16xf32>
    %cst_24 = arith.constant 0.000000e+00 : f32
    %67 = vector.broadcast %cst_24 : f32 to vector<64x16xf32>
    %68 = arith.maximumf %66, %67 : vector<64x16xf32>
    %69 = vector.shape_cast %68 : vector<64x16xf32> to vector<8x8x16xf32>
    %70 = vector.shape_cast %69 : vector<8x8x16xf32> to vector<4x2x8x16xf32>
    %71 = vector.extract_strided_slice %70 {offsets = [0, 0, 0, 0], sizes = [4, 1, 8, 16], strides = [1, 1, 1, 1]} : vector<4x2x8x16xf32> to vector<4x1x8x16xf32>
    %72 = vector.shape_cast %71 : vector<4x1x8x16xf32> to vector<4x8x16xf32>
    %73 = vector.extract_strided_slice %70 {offsets = [0, 1, 0, 0], sizes = [4, 1, 8, 16], strides = [1, 1, 1, 1]} : vector<4x2x8x16xf32> to vector<4x1x8x16xf32>
    %74 = vector.shape_cast %73 : vector<4x1x8x16xf32> to vector<4x8x16xf32>
    %75 = arith.maximumf %72, %74 : vector<4x8x16xf32>
    %76 = vector.shape_cast %75 : vector<4x8x16xf32> to vector<4x4x2x16xf32>
    %77 = vector.extract_strided_slice %76 {offsets = [0, 0, 0, 0], sizes = [4, 4, 1, 16], strides = [1, 1, 1, 1]} : vector<4x4x2x16xf32> to vector<4x4x1x16xf32>
    %78 = vector.shape_cast %77 : vector<4x4x1x16xf32> to vector<4x4x16xf32>
    %79 = vector.extract_strided_slice %76 {offsets = [0, 0, 1, 0], sizes = [4, 4, 1, 16], strides = [1, 1, 1, 1]} : vector<4x4x2x16xf32> to vector<4x4x1x16xf32>
    %80 = vector.shape_cast %79 : vector<4x4x1x16xf32> to vector<4x4x16xf32>
    %81 = arith.maximumf %78, %80 : vector<4x4x16xf32>
    %c0_25 = arith.constant 0 : index
    %c0_26 = arith.constant 0 : index
    %c0_27 = arith.constant 0 : index
    %c0_28 = arith.constant 0 : index
    %82 = vector.load %arg7[%c0_25, %c0_26, %c0_27, %c0_28] : memref<1x4x4x16xf32, #tpu.memory_space<vmem>>, vector<1x4x4x16xf32>
    %83 = vector.shape_cast %82 : vector<1x4x4x16xf32> to vector<4x4x16xf32>
    %84 = vector.shape_cast %81 : vector<4x4x16xf32> to vector<1x4x4x16xf32>
    tpu.vector_store %arg7[%c0_25, %c0_26, %c0_27, %c0_28], %84 {strides = array<i32>} : memref<1x4x4x16xf32, #tpu.memory_space<vmem>>, vector<1x4x4x16xf32>,
    return
  }
  func.func @transform_0(%arg0: i32, %arg1: i32) -> (i32, i32, i32, i32) {
    %c0_i32 = arith.constant 0 : i32
    %c0_i32_0 = arith.constant 0 : i32
    %c0_i32_1 = arith.constant 0 : i32
    return %arg0, %arg1, %c0_i32, %c0_i32_0 : i32, i32, i32, i32
  }
  func.func @transform_1(%arg0: i32, %arg1: i32) -> (i32, i32, i32, i32) {
    %c1_i32 = arith.constant 1 : i32
    %0 = arith.addi %arg1, %c1_i32 : i32
    %c4_i32 = arith.constant 4 : i32
    %1 = arith.muli %0, %c4_i32 : i32
    %c0_i32 = arith.constant 0 : i32
    %c0_i32_0 = arith.constant 0 : i32
    %c0_i32_1 = arith.constant 0 : i32
    return %arg0, %1, %c0_i32, %c0_i32_0 : i32, i32, i32, i32
  }
  func.func @transform_2(%arg0: i32, %arg1: i32) -> (i32, i32, i32, i32) {
    %c0_i32 = arith.constant 0 : i32
    %c0_i32_0 = arith.constant 0 : i32
    %c0_i32_1 = arith.constant 0 : i32
    %c0_i32_2 = arith.constant 0 : i32
    %c0_i32_3 = arith.constant 0 : i32
    return %c0_i32, %c0_i32_0, %c0_i32_1, %c0_i32_2 : i32, i32, i32, i32
  }
  func.func @transform_3(%arg0: i32, %arg1: i32) -> (i32, i32) {
    %c0_i32 = arith.constant 0 : i32
    %c0_i32_0 = arith.constant 0 : i32
    %c0_i32_1 = arith.constant 0 : i32
    return %c0_i32, %c0_i32_0 : i32, i32
  }
  func.func @transform_4(%arg0: i32, %arg1: i32) -> (i32, i32) {
    %c0_i32 = arith.constant 0 : i32
    %c0_i32_0 = arith.constant 0 : i32
    %c0_i32_1 = arith.constant 0 : i32
    return %c0_i32, %c0_i32_0 : i32, i32
  }
  func.func @transform_5(%arg0: i32, %arg1: i32) -> (i32, i32, i32, i32) {
    %c0_i32 = arith.constant 0 : i32
    %c0_i32_0 = arith.constant 0 : i32
    %c0_i32_1 = arith.constant 0 : i32
    return %arg0, %arg1, %c0_i32, %c0_i32_0 : i32, i32, i32, i32
  }
}

module attributes {stable_mosaic.version = 11 : i64} {
  func.func @stats_kernel(%arg0: i32, %arg1: i32, %arg2: memref<1x8x10x24xbf16, #tpu.memory_space<vmem>>, %arg3: memref<1x2x10x24xbf16, #tpu.memory_space<vmem>>, %arg4: memref<3x3x24x8xbf16, #tpu.memory_space<vmem>>, %arg5: memref<1x1x1x8xf32, #tpu.memory_space<vmem>>, %arg6: memref<1x1x1x8xf32, #tpu.memory_space<vmem>>) attributes {dimension_semantics = [#tpu.dimension_semantics<parallel>, #tpu.dimension_semantics<parallel>], iteration_bounds = array<i64: 2, 1>, scalar_prefetch = 0 : i64, scratch_operands = 0 : i64, tpu.core_type = #tpu.core_type<tc>, window_params = [{transform_indices = @transform_0, window_bounds = array<i64: 1, 8, 10, 24>}, {transform_indices = @transform_1, window_bounds = array<i64: 1, 2, 10, 24>}, {pipeline_mode = #tpu.pipeline_mode<synchronous>, transform_indices = @transform_2, window_bounds = array<i64: 3, 3, 24, 8>}, {transform_indices = @transform_3, window_bounds = array<i64: 1, 1, 1, 8>}, {transform_indices = @transform_4, window_bounds = array<i64: 1, 1, 1, 8>}]} {
    %c0 = arith.constant 0 : index
    %c0_0 = arith.constant 0 : index
    %c0_1 = arith.constant 0 : index
    %c0_2 = arith.constant 0 : index
    %0 = vector.load %arg2[%c0, %c0_0, %c0_1, %c0_2] : memref<1x8x10x24xbf16, #tpu.memory_space<vmem>>, vector<1x8x10x24xbf16>
    %1 = vector.shape_cast %0 : vector<1x8x10x24xbf16> to vector<8x10x24xbf16>
    %c0_3 = arith.constant 0 : index
    %c0_4 = arith.constant 0 : index
    %c0_5 = arith.constant 0 : index
    %c0_6 = arith.constant 0 : index
    %2 = vector.load %arg3[%c0_3, %c0_4, %c0_5, %c0_6] : memref<1x2x10x24xbf16, #tpu.memory_space<vmem>>, vector<1x2x10x24xbf16>
    %3 = vector.shape_cast %2 : vector<1x2x10x24xbf16> to vector<2x10x24xbf16>
    %4 = tpu.concatenate %1, %3 in 0 : vector<8x10x24xbf16>, vector<2x10x24xbf16> -> vector<10x10x24xbf16>
    %c0_7 = arith.constant 0 : index
    %c0_8 = arith.constant 0 : index
    %c0_9 = arith.constant 0 : index
    %c0_10 = arith.constant 0 : index
    %5 = vector.load %arg4[%c0_7, %c0_8, %c0_9, %c0_10] : memref<3x3x24x8xbf16, #tpu.memory_space<vmem>>, vector<3x3x24x8xbf16>
    %cst = arith.constant 0.000000e+00 : f32
    %6 = vector.broadcast %cst : f32 to vector<64x8xf32>
    %7 = vector.extract_strided_slice %4 {offsets = [0, 0, 0], sizes = [8, 8, 24], strides = [1, 1, 1]} : vector<10x10x24xbf16> to vector<8x8x24xbf16>
    %8 = vector.shape_cast %7 : vector<8x8x24xbf16> to vector<64x24xbf16>
    %9 = vector.extract_strided_slice %5 {offsets = [0, 0, 0, 0], sizes = [1, 1, 24, 8], strides = [1, 1, 1, 1]} : vector<3x3x24x8xbf16> to vector<1x1x24x8xbf16>
    %10 = vector.shape_cast %9 : vector<1x1x24x8xbf16> to vector<24x8xbf16>
    %cst_11 = arith.constant dense<0.000000e+00> : vector<64x8xf32>
    %11 = tpu.matmul %8, %10, %cst_11 {dimension_numbers = #tpu.dot_dimension_numbers<[1], [0], [0], [1], [0, 0, 1, 1], [], []>} : vector<64x24xbf16>, vector<24x8xbf16>, vector<64x8xf32> -> vector<64x8xf32>
    %12 = arith.addf %6, %11 : vector<64x8xf32>
    %13 = vector.extract_strided_slice %4 {offsets = [0, 1, 0], sizes = [8, 8, 24], strides = [1, 1, 1]} : vector<10x10x24xbf16> to vector<8x8x24xbf16>
    %14 = vector.shape_cast %13 : vector<8x8x24xbf16> to vector<64x24xbf16>
    %15 = vector.extract_strided_slice %5 {offsets = [0, 1, 0, 0], sizes = [1, 1, 24, 8], strides = [1, 1, 1, 1]} : vector<3x3x24x8xbf16> to vector<1x1x24x8xbf16>
    %16 = vector.shape_cast %15 : vector<1x1x24x8xbf16> to vector<24x8xbf16>
    %cst_12 = arith.constant dense<0.000000e+00> : vector<64x8xf32>
    %17 = tpu.matmul %14, %16, %cst_12 {dimension_numbers = #tpu.dot_dimension_numbers<[1], [0], [0], [1], [0, 0, 1, 1], [], []>} : vector<64x24xbf16>, vector<24x8xbf16>, vector<64x8xf32> -> vector<64x8xf32>
    %18 = arith.addf %12, %17 : vector<64x8xf32>
    %19 = vector.extract_strided_slice %4 {offsets = [0, 2, 0], sizes = [8, 8, 24], strides = [1, 1, 1]} : vector<10x10x24xbf16> to vector<8x8x24xbf16>
    %20 = vector.shape_cast %19 : vector<8x8x24xbf16> to vector<64x24xbf16>
    %21 = vector.extract_strided_slice %5 {offsets = [0, 2, 0, 0], sizes = [1, 1, 24, 8], strides = [1, 1, 1, 1]} : vector<3x3x24x8xbf16> to vector<1x1x24x8xbf16>
    %22 = vector.shape_cast %21 : vector<1x1x24x8xbf16> to vector<24x8xbf16>
    %cst_13 = arith.constant dense<0.000000e+00> : vector<64x8xf32>
    %23 = tpu.matmul %20, %22, %cst_13 {dimension_numbers = #tpu.dot_dimension_numbers<[1], [0], [0], [1], [0, 0, 1, 1], [], []>} : vector<64x24xbf16>, vector<24x8xbf16>, vector<64x8xf32> -> vector<64x8xf32>
    %24 = arith.addf %18, %23 : vector<64x8xf32>
    %25 = vector.extract_strided_slice %4 {offsets = [1, 0, 0], sizes = [8, 8, 24], strides = [1, 1, 1]} : vector<10x10x24xbf16> to vector<8x8x24xbf16>
    %26 = vector.shape_cast %25 : vector<8x8x24xbf16> to vector<64x24xbf16>
    %27 = vector.extract_strided_slice %5 {offsets = [1, 0, 0, 0], sizes = [1, 1, 24, 8], strides = [1, 1, 1, 1]} : vector<3x3x24x8xbf16> to vector<1x1x24x8xbf16>
    %28 = vector.shape_cast %27 : vector<1x1x24x8xbf16> to vector<24x8xbf16>
    %cst_14 = arith.constant dense<0.000000e+00> : vector<64x8xf32>
    %29 = tpu.matmul %26, %28, %cst_14 {dimension_numbers = #tpu.dot_dimension_numbers<[1], [0], [0], [1], [0, 0, 1, 1], [], []>} : vector<64x24xbf16>, vector<24x8xbf16>, vector<64x8xf32> -> vector<64x8xf32>
    %30 = arith.addf %24, %29 : vector<64x8xf32>
    %31 = vector.extract_strided_slice %4 {offsets = [1, 1, 0], sizes = [8, 8, 24], strides = [1, 1, 1]} : vector<10x10x24xbf16> to vector<8x8x24xbf16>
    %32 = vector.shape_cast %31 : vector<8x8x24xbf16> to vector<64x24xbf16>
    %33 = vector.extract_strided_slice %5 {offsets = [1, 1, 0, 0], sizes = [1, 1, 24, 8], strides = [1, 1, 1, 1]} : vector<3x3x24x8xbf16> to vector<1x1x24x8xbf16>
    %34 = vector.shape_cast %33 : vector<1x1x24x8xbf16> to vector<24x8xbf16>
    %cst_15 = arith.constant dense<0.000000e+00> : vector<64x8xf32>
    %35 = tpu.matmul %32, %34, %cst_15 {dimension_numbers = #tpu.dot_dimension_numbers<[1], [0], [0], [1], [0, 0, 1, 1], [], []>} : vector<64x24xbf16>, vector<24x8xbf16>, vector<64x8xf32> -> vector<64x8xf32>
    %36 = arith.addf %30, %35 : vector<64x8xf32>
    %37 = vector.extract_strided_slice %4 {offsets = [1, 2, 0], sizes = [8, 8, 24], strides = [1, 1, 1]} : vector<10x10x24xbf16> to vector<8x8x24xbf16>
    %38 = vector.shape_cast %37 : vector<8x8x24xbf16> to vector<64x24xbf16>
    %39 = vector.extract_strided_slice %5 {offsets = [1, 2, 0, 0], sizes = [1, 1, 24, 8], strides = [1, 1, 1, 1]} : vector<3x3x24x8xbf16> to vector<1x1x24x8xbf16>
    %40 = vector.shape_cast %39 : vector<1x1x24x8xbf16> to vector<24x8xbf16>
    %cst_16 = arith.constant dense<0.000000e+00> : vector<64x8xf32>
    %41 = tpu.matmul %38, %40, %cst_16 {dimension_numbers = #tpu.dot_dimension_numbers<[1], [0], [0], [1], [0, 0, 1, 1], [], []>} : vector<64x24xbf16>, vector<24x8xbf16>, vector<64x8xf32> -> vector<64x8xf32>
    %42 = arith.addf %36, %41 : vector<64x8xf32>
    %43 = vector.extract_strided_slice %4 {offsets = [2, 0, 0], sizes = [8, 8, 24], strides = [1, 1, 1]} : vector<10x10x24xbf16> to vector<8x8x24xbf16>
    %44 = vector.shape_cast %43 : vector<8x8x24xbf16> to vector<64x24xbf16>
    %45 = vector.extract_strided_slice %5 {offsets = [2, 0, 0, 0], sizes = [1, 1, 24, 8], strides = [1, 1, 1, 1]} : vector<3x3x24x8xbf16> to vector<1x1x24x8xbf16>
    %46 = vector.shape_cast %45 : vector<1x1x24x8xbf16> to vector<24x8xbf16>
    %cst_17 = arith.constant dense<0.000000e+00> : vector<64x8xf32>
    %47 = tpu.matmul %44, %46, %cst_17 {dimension_numbers = #tpu.dot_dimension_numbers<[1], [0], [0], [1], [0, 0, 1, 1], [], []>} : vector<64x24xbf16>, vector<24x8xbf16>, vector<64x8xf32> -> vector<64x8xf32>
    %48 = arith.addf %42, %47 : vector<64x8xf32>
    %49 = vector.extract_strided_slice %4 {offsets = [2, 1, 0], sizes = [8, 8, 24], strides = [1, 1, 1]} : vector<10x10x24xbf16> to vector<8x8x24xbf16>
    %50 = vector.shape_cast %49 : vector<8x8x24xbf16> to vector<64x24xbf16>
    %51 = vector.extract_strided_slice %5 {offsets = [2, 1, 0, 0], sizes = [1, 1, 24, 8], strides = [1, 1, 1, 1]} : vector<3x3x24x8xbf16> to vector<1x1x24x8xbf16>
    %52 = vector.shape_cast %51 : vector<1x1x24x8xbf16> to vector<24x8xbf16>
    %cst_18 = arith.constant dense<0.000000e+00> : vector<64x8xf32>
    %53 = tpu.matmul %50, %52, %cst_18 {dimension_numbers = #tpu.dot_dimension_numbers<[1], [0], [0], [1], [0, 0, 1, 1], [], []>} : vector<64x24xbf16>, vector<24x8xbf16>, vector<64x8xf32> -> vector<64x8xf32>
    %54 = arith.addf %48, %53 : vector<64x8xf32>
    %55 = vector.extract_strided_slice %4 {offsets = [2, 2, 0], sizes = [8, 8, 24], strides = [1, 1, 1]} : vector<10x10x24xbf16> to vector<8x8x24xbf16>
    %56 = vector.shape_cast %55 : vector<8x8x24xbf16> to vector<64x24xbf16>
    %57 = vector.extract_strided_slice %5 {offsets = [2, 2, 0, 0], sizes = [1, 1, 24, 8], strides = [1, 1, 1, 1]} : vector<3x3x24x8xbf16> to vector<1x1x24x8xbf16>
    %58 = vector.shape_cast %57 : vector<1x1x24x8xbf16> to vector<24x8xbf16>
    %cst_19 = arith.constant dense<0.000000e+00> : vector<64x8xf32>
    %59 = tpu.matmul %56, %58, %cst_19 {dimension_numbers = #tpu.dot_dimension_numbers<[1], [0], [0], [1], [0, 0, 1, 1], [], []>} : vector<64x24xbf16>, vector<24x8xbf16>, vector<64x8xf32> -> vector<64x8xf32>
    %60 = arith.addf %54, %59 : vector<64x8xf32>
    %cst_20 = arith.constant dense<0.000000e+00> : vector<8xf32>
    %61 = vector.multi_reduction <add>, %60, %cst_20 [0] : vector<64x8xf32> to vector<8xf32>
    %62 = vector.shape_cast %61 : vector<8xf32> to vector<1x8xf32>
    %c0_21 = arith.constant 0 : index
    %c0_22 = arith.constant 0 : index
    %c0_23 = arith.constant 0 : index
    %c0_24 = arith.constant 0 : index
    %63 = vector.load %arg5[%c0_21, %c0_22, %c0_23, %c0_24] : memref<1x1x1x8xf32, #tpu.memory_space<vmem>>, vector<1x1x1x8xf32>
    %64 = vector.shape_cast %63 : vector<1x1x1x8xf32> to vector<1x8xf32>
    %65 = vector.shape_cast %62 : vector<1x8xf32> to vector<1x1x1x8xf32>
    tpu.vector_store %arg5[%c0_21, %c0_22, %c0_23, %c0_24], %65 {strides = array<i32>} : memref<1x1x1x8xf32, #tpu.memory_space<vmem>>, vector<1x1x1x8xf32>,
    %66 = arith.mulf %60, %60 : vector<64x8xf32>
    %cst_25 = arith.constant dense<0.000000e+00> : vector<8xf32>
    %67 = vector.multi_reduction <add>, %66, %cst_25 [0] : vector<64x8xf32> to vector<8xf32>
    %68 = vector.shape_cast %67 : vector<8xf32> to vector<1x8xf32>
    %c0_26 = arith.constant 0 : index
    %c0_27 = arith.constant 0 : index
    %c0_28 = arith.constant 0 : index
    %c0_29 = arith.constant 0 : index
    %69 = vector.load %arg6[%c0_26, %c0_27, %c0_28, %c0_29] : memref<1x1x1x8xf32, #tpu.memory_space<vmem>>, vector<1x1x1x8xf32>
    %70 = vector.shape_cast %69 : vector<1x1x1x8xf32> to vector<1x8xf32>
    %71 = vector.shape_cast %68 : vector<1x8xf32> to vector<1x1x1x8xf32>
    tpu.vector_store %arg6[%c0_26, %c0_27, %c0_28, %c0_29], %71 {strides = array<i32>} : memref<1x1x1x8xf32, #tpu.memory_space<vmem>>, vector<1x1x1x8xf32>,
    return
  }
  func.func @transform_0(%arg0: i32, %arg1: i32) -> (i32, i32, i32, i32) {
    %c0_i32 = arith.constant 0 : i32
    %c0_i32_0 = arith.constant 0 : i32
    %c0_i32_1 = arith.constant 0 : i32
    return %arg0, %arg1, %c0_i32, %c0_i32_0 : i32, i32, i32, i32
  }
  func.func @transform_1(%arg0: i32, %arg1: i32) -> (i32, i32, i32, i32) {
    %c1_i32 = arith.constant 1 : i32
    %0 = arith.addi %arg1, %c1_i32 : i32
    %c4_i32 = arith.constant 4 : i32
    %1 = arith.muli %0, %c4_i32 : i32
    %c0_i32 = arith.constant 0 : i32
    %c0_i32_0 = arith.constant 0 : i32
    %c0_i32_1 = arith.constant 0 : i32
    return %arg0, %1, %c0_i32, %c0_i32_0 : i32, i32, i32, i32
  }
  func.func @transform_2(%arg0: i32, %arg1: i32) -> (i32, i32, i32, i32) {
    %c0_i32 = arith.constant 0 : i32
    %c0_i32_0 = arith.constant 0 : i32
    %c0_i32_1 = arith.constant 0 : i32
    %c0_i32_2 = arith.constant 0 : i32
    %c0_i32_3 = arith.constant 0 : i32
    return %c0_i32, %c0_i32_0, %c0_i32_1, %c0_i32_2 : i32, i32, i32, i32
  }
  func.func @transform_3(%arg0: i32, %arg1: i32) -> (i32, i32, i32, i32) {
    %c0_i32 = arith.constant 0 : i32
    %c0_i32_0 = arith.constant 0 : i32
    %c0_i32_1 = arith.constant 0 : i32
    return %arg0, %arg1, %c0_i32, %c0_i32_0 : i32, i32, i32, i32
  }
  func.func @transform_4(%arg0: i32, %arg1: i32) -> (i32, i32, i32, i32) {
    %c0_i32 = arith.constant 0 : i32
    %c0_i32_0 = arith.constant 0 : i32
    %c0_i32_1 = arith.constant 0 : i32
    return %arg0, %arg1, %c0_i32, %c0_i32_0 : i32, i32, i32, i32
  }
}

module attributes {stable_mosaic.version = 11 : i64} {
  func.func @norm_kernel(%arg0: i32, %arg1: i32, %arg2: memref<1x8x10x24xbf16, #tpu.memory_space<vmem>>, %arg3: memref<1x2x10x24xbf16, #tpu.memory_space<vmem>>, %arg4: memref<3x3x24x8xbf16, #tpu.memory_space<vmem>>, %arg5: memref<1x8xf32, #tpu.memory_space<vmem>>, %arg6: memref<1x8xf32, #tpu.memory_space<vmem>>, %arg7: memref<1x8x8x8xf32, #tpu.memory_space<vmem>>) attributes {dimension_semantics = [#tpu.dimension_semantics<parallel>, #tpu.dimension_semantics<parallel>], iteration_bounds = array<i64: 2, 1>, scalar_prefetch = 0 : i64, scratch_operands = 0 : i64, tpu.core_type = #tpu.core_type<tc>, window_params = [{transform_indices = @transform_0, window_bounds = array<i64: 1, 8, 10, 24>}, {transform_indices = @transform_1, window_bounds = array<i64: 1, 2, 10, 24>}, {pipeline_mode = #tpu.pipeline_mode<synchronous>, transform_indices = @transform_2, window_bounds = array<i64: 3, 3, 24, 8>}, {pipeline_mode = #tpu.pipeline_mode<synchronous>, transform_indices = @transform_3, window_bounds = array<i64: 1, 8>}, {pipeline_mode = #tpu.pipeline_mode<synchronous>, transform_indices = @transform_4, window_bounds = array<i64: 1, 8>}, {transform_indices = @transform_5, window_bounds = array<i64: 1, 8, 8, 8>}]} {
    %c0 = arith.constant 0 : index
    %c0_0 = arith.constant 0 : index
    %c0_1 = arith.constant 0 : index
    %c0_2 = arith.constant 0 : index
    %0 = vector.load %arg2[%c0, %c0_0, %c0_1, %c0_2] : memref<1x8x10x24xbf16, #tpu.memory_space<vmem>>, vector<1x8x10x24xbf16>
    %1 = vector.shape_cast %0 : vector<1x8x10x24xbf16> to vector<8x10x24xbf16>
    %c0_3 = arith.constant 0 : index
    %c0_4 = arith.constant 0 : index
    %c0_5 = arith.constant 0 : index
    %c0_6 = arith.constant 0 : index
    %2 = vector.load %arg3[%c0_3, %c0_4, %c0_5, %c0_6] : memref<1x2x10x24xbf16, #tpu.memory_space<vmem>>, vector<1x2x10x24xbf16>
    %3 = vector.shape_cast %2 : vector<1x2x10x24xbf16> to vector<2x10x24xbf16>
    %4 = tpu.concatenate %1, %3 in 0 : vector<8x10x24xbf16>, vector<2x10x24xbf16> -> vector<10x10x24xbf16>
    %c0_7 = arith.constant 0 : index
    %c0_8 = arith.constant 0 : index
    %c0_9 = arith.constant 0 : index
    %c0_10 = arith.constant 0 : index
    %5 = vector.load %arg4[%c0_7, %c0_8, %c0_9, %c0_10] : memref<3x3x24x8xbf16, #tpu.memory_space<vmem>>, vector<3x3x24x8xbf16>
    %cst = arith.constant 0.000000e+00 : f32
    %6 = vector.broadcast %cst : f32 to vector<64x8xf32>
    %7 = vector.extract_strided_slice %4 {offsets = [0, 0, 0], sizes = [8, 8, 24], strides = [1, 1, 1]} : vector<10x10x24xbf16> to vector<8x8x24xbf16>
    %8 = vector.shape_cast %7 : vector<8x8x24xbf16> to vector<64x24xbf16>
    %9 = vector.extract_strided_slice %5 {offsets = [0, 0, 0, 0], sizes = [1, 1, 24, 8], strides = [1, 1, 1, 1]} : vector<3x3x24x8xbf16> to vector<1x1x24x8xbf16>
    %10 = vector.shape_cast %9 : vector<1x1x24x8xbf16> to vector<24x8xbf16>
    %cst_11 = arith.constant dense<0.000000e+00> : vector<64x8xf32>
    %11 = tpu.matmul %8, %10, %cst_11 {dimension_numbers = #tpu.dot_dimension_numbers<[1], [0], [0], [1], [0, 0, 1, 1], [], []>} : vector<64x24xbf16>, vector<24x8xbf16>, vector<64x8xf32> -> vector<64x8xf32>
    %12 = arith.addf %6, %11 : vector<64x8xf32>
    %13 = vector.extract_strided_slice %4 {offsets = [0, 1, 0], sizes = [8, 8, 24], strides = [1, 1, 1]} : vector<10x10x24xbf16> to vector<8x8x24xbf16>
    %14 = vector.shape_cast %13 : vector<8x8x24xbf16> to vector<64x24xbf16>
    %15 = vector.extract_strided_slice %5 {offsets = [0, 1, 0, 0], sizes = [1, 1, 24, 8], strides = [1, 1, 1, 1]} : vector<3x3x24x8xbf16> to vector<1x1x24x8xbf16>
    %16 = vector.shape_cast %15 : vector<1x1x24x8xbf16> to vector<24x8xbf16>
    %cst_12 = arith.constant dense<0.000000e+00> : vector<64x8xf32>
    %17 = tpu.matmul %14, %16, %cst_12 {dimension_numbers = #tpu.dot_dimension_numbers<[1], [0], [0], [1], [0, 0, 1, 1], [], []>} : vector<64x24xbf16>, vector<24x8xbf16>, vector<64x8xf32> -> vector<64x8xf32>
    %18 = arith.addf %12, %17 : vector<64x8xf32>
    %19 = vector.extract_strided_slice %4 {offsets = [0, 2, 0], sizes = [8, 8, 24], strides = [1, 1, 1]} : vector<10x10x24xbf16> to vector<8x8x24xbf16>
    %20 = vector.shape_cast %19 : vector<8x8x24xbf16> to vector<64x24xbf16>
    %21 = vector.extract_strided_slice %5 {offsets = [0, 2, 0, 0], sizes = [1, 1, 24, 8], strides = [1, 1, 1, 1]} : vector<3x3x24x8xbf16> to vector<1x1x24x8xbf16>
    %22 = vector.shape_cast %21 : vector<1x1x24x8xbf16> to vector<24x8xbf16>
    %cst_13 = arith.constant dense<0.000000e+00> : vector<64x8xf32>
    %23 = tpu.matmul %20, %22, %cst_13 {dimension_numbers = #tpu.dot_dimension_numbers<[1], [0], [0], [1], [0, 0, 1, 1], [], []>} : vector<64x24xbf16>, vector<24x8xbf16>, vector<64x8xf32> -> vector<64x8xf32>
    %24 = arith.addf %18, %23 : vector<64x8xf32>
    %25 = vector.extract_strided_slice %4 {offsets = [1, 0, 0], sizes = [8, 8, 24], strides = [1, 1, 1]} : vector<10x10x24xbf16> to vector<8x8x24xbf16>
    %26 = vector.shape_cast %25 : vector<8x8x24xbf16> to vector<64x24xbf16>
    %27 = vector.extract_strided_slice %5 {offsets = [1, 0, 0, 0], sizes = [1, 1, 24, 8], strides = [1, 1, 1, 1]} : vector<3x3x24x8xbf16> to vector<1x1x24x8xbf16>
    %28 = vector.shape_cast %27 : vector<1x1x24x8xbf16> to vector<24x8xbf16>
    %cst_14 = arith.constant dense<0.000000e+00> : vector<64x8xf32>
    %29 = tpu.matmul %26, %28, %cst_14 {dimension_numbers = #tpu.dot_dimension_numbers<[1], [0], [0], [1], [0, 0, 1, 1], [], []>} : vector<64x24xbf16>, vector<24x8xbf16>, vector<64x8xf32> -> vector<64x8xf32>
    %30 = arith.addf %24, %29 : vector<64x8xf32>
    %31 = vector.extract_strided_slice %4 {offsets = [1, 1, 0], sizes = [8, 8, 24], strides = [1, 1, 1]} : vector<10x10x24xbf16> to vector<8x8x24xbf16>
    %32 = vector.shape_cast %31 : vector<8x8x24xbf16> to vector<64x24xbf16>
    %33 = vector.extract_strided_slice %5 {offsets = [1, 1, 0, 0], sizes = [1, 1, 24, 8], strides = [1, 1, 1, 1]} : vector<3x3x24x8xbf16> to vector<1x1x24x8xbf16>
    %34 = vector.shape_cast %33 : vector<1x1x24x8xbf16> to vector<24x8xbf16>
    %cst_15 = arith.constant dense<0.000000e+00> : vector<64x8xf32>
    %35 = tpu.matmul %32, %34, %cst_15 {dimension_numbers = #tpu.dot_dimension_numbers<[1], [0], [0], [1], [0, 0, 1, 1], [], []>} : vector<64x24xbf16>, vector<24x8xbf16>, vector<64x8xf32> -> vector<64x8xf32>
    %36 = arith.addf %30, %35 : vector<64x8xf32>
    %37 = vector.extract_strided_slice %4 {offsets = [1, 2, 0], sizes = [8, 8, 24], strides = [1, 1, 1]} : vector<10x10x24xbf16> to vector<8x8x24xbf16>
    %38 = vector.shape_cast %37 : vector<8x8x24xbf16> to vector<64x24xbf16>
    %39 = vector.extract_strided_slice %5 {offsets = [1, 2, 0, 0], sizes = [1, 1, 24, 8], strides = [1, 1, 1, 1]} : vector<3x3x24x8xbf16> to vector<1x1x24x8xbf16>
    %40 = vector.shape_cast %39 : vector<1x1x24x8xbf16> to vector<24x8xbf16>
    %cst_16 = arith.constant dense<0.000000e+00> : vector<64x8xf32>
    %41 = tpu.matmul %38, %40, %cst_16 {dimension_numbers = #tpu.dot_dimension_numbers<[1], [0], [0], [1], [0, 0, 1, 1], [], []>} : vector<64x24xbf16>, vector<24x8xbf16>, vector<64x8xf32> -> vector<64x8xf32>
    %42 = arith.addf %36, %41 : vector<64x8xf32>
    %43 = vector.extract_strided_slice %4 {offsets = [2, 0, 0], sizes = [8, 8, 24], strides = [1, 1, 1]} : vector<10x10x24xbf16> to vector<8x8x24xbf16>
    %44 = vector.shape_cast %43 : vector<8x8x24xbf16> to vector<64x24xbf16>
    %45 = vector.extract_strided_slice %5 {offsets = [2, 0, 0, 0], sizes = [1, 1, 24, 8], strides = [1, 1, 1, 1]} : vector<3x3x24x8xbf16> to vector<1x1x24x8xbf16>
    %46 = vector.shape_cast %45 : vector<1x1x24x8xbf16> to vector<24x8xbf16>
    %cst_17 = arith.constant dense<0.000000e+00> : vector<64x8xf32>
    %47 = tpu.matmul %44, %46, %cst_17 {dimension_numbers = #tpu.dot_dimension_numbers<[1], [0], [0], [1], [0, 0, 1, 1], [], []>} : vector<64x24xbf16>, vector<24x8xbf16>, vector<64x8xf32> -> vector<64x8xf32>
    %48 = arith.addf %42, %47 : vector<64x8xf32>
    %49 = vector.extract_strided_slice %4 {offsets = [2, 1, 0], sizes = [8, 8, 24], strides = [1, 1, 1]} : vector<10x10x24xbf16> to vector<8x8x24xbf16>
    %50 = vector.shape_cast %49 : vector<8x8x24xbf16> to vector<64x24xbf16>
    %51 = vector.extract_strided_slice %5 {offsets = [2, 1, 0, 0], sizes = [1, 1, 24, 8], strides = [1, 1, 1, 1]} : vector<3x3x24x8xbf16> to vector<1x1x24x8xbf16>
    %52 = vector.shape_cast %51 : vector<1x1x24x8xbf16> to vector<24x8xbf16>
    %cst_18 = arith.constant dense<0.000000e+00> : vector<64x8xf32>
    %53 = tpu.matmul %50, %52, %cst_18 {dimension_numbers = #tpu.dot_dimension_numbers<[1], [0], [0], [1], [0, 0, 1, 1], [], []>} : vector<64x24xbf16>, vector<24x8xbf16>, vector<64x8xf32> -> vector<64x8xf32>
    %54 = arith.addf %48, %53 : vector<64x8xf32>
    %55 = vector.extract_strided_slice %4 {offsets = [2, 2, 0], sizes = [8, 8, 24], strides = [1, 1, 1]} : vector<10x10x24xbf16> to vector<8x8x24xbf16>
    %56 = vector.shape_cast %55 : vector<8x8x24xbf16> to vector<64x24xbf16>
    %57 = vector.extract_strided_slice %5 {offsets = [2, 2, 0, 0], sizes = [1, 1, 24, 8], strides = [1, 1, 1, 1]} : vector<3x3x24x8xbf16> to vector<1x1x24x8xbf16>
    %58 = vector.shape_cast %57 : vector<1x1x24x8xbf16> to vector<24x8xbf16>
    %cst_19 = arith.constant dense<0.000000e+00> : vector<64x8xf32>
    %59 = tpu.matmul %56, %58, %cst_19 {dimension_numbers = #tpu.dot_dimension_numbers<[1], [0], [0], [1], [0, 0, 1, 1], [], []>} : vector<64x24xbf16>, vector<24x8xbf16>, vector<64x8xf32> -> vector<64x8xf32>
    %60 = arith.addf %54, %59 : vector<64x8xf32>
    %c0_20 = arith.constant 0 : index
    %c0_21 = arith.constant 0 : index
    %61 = vector.load %arg5[%c0_20, %c0_21] : memref<1x8xf32, #tpu.memory_space<vmem>>, vector<1x8xf32>
    %62 = vector.broadcast %61 : vector<1x8xf32> to vector<64x8xf32>
    %63 = arith.mulf %60, %62 : vector<64x8xf32>
    %c0_22 = arith.constant 0 : index
    %c0_23 = arith.constant 0 : index
    %64 = vector.load %arg6[%c0_22, %c0_23] : memref<1x8xf32, #tpu.memory_space<vmem>>, vector<1x8xf32>
    %65 = vector.broadcast %64 : vector<1x8xf32> to vector<64x8xf32>
    %66 = arith.addf %63, %65 : vector<64x8xf32>
    %cst_24 = arith.constant 0.000000e+00 : f32
    %67 = vector.broadcast %cst_24 : f32 to vector<64x8xf32>
    %68 = arith.maximumf %66, %67 : vector<64x8xf32>
    %69 = vector.shape_cast %68 : vector<64x8xf32> to vector<8x8x8xf32>
    %c0_25 = arith.constant 0 : index
    %c0_26 = arith.constant 0 : index
    %c0_27 = arith.constant 0 : index
    %c0_28 = arith.constant 0 : index
    %70 = vector.load %arg7[%c0_25, %c0_26, %c0_27, %c0_28] : memref<1x8x8x8xf32, #tpu.memory_space<vmem>>, vector<1x8x8x8xf32>
    %71 = vector.shape_cast %70 : vector<1x8x8x8xf32> to vector<8x8x8xf32>
    %72 = vector.shape_cast %69 : vector<8x8x8xf32> to vector<1x8x8x8xf32>
    tpu.vector_store %arg7[%c0_25, %c0_26, %c0_27, %c0_28], %72 {strides = array<i32>} : memref<1x8x8x8xf32, #tpu.memory_space<vmem>>, vector<1x8x8x8xf32>,
    return
  }
  func.func @transform_0(%arg0: i32, %arg1: i32) -> (i32, i32, i32, i32) {
    %c0_i32 = arith.constant 0 : i32
    %c0_i32_0 = arith.constant 0 : i32
    %c0_i32_1 = arith.constant 0 : i32
    return %arg0, %arg1, %c0_i32, %c0_i32_0 : i32, i32, i32, i32
  }
  func.func @transform_1(%arg0: i32, %arg1: i32) -> (i32, i32, i32, i32) {
    %c1_i32 = arith.constant 1 : i32
    %0 = arith.addi %arg1, %c1_i32 : i32
    %c4_i32 = arith.constant 4 : i32
    %1 = arith.muli %0, %c4_i32 : i32
    %c0_i32 = arith.constant 0 : i32
    %c0_i32_0 = arith.constant 0 : i32
    %c0_i32_1 = arith.constant 0 : i32
    return %arg0, %1, %c0_i32, %c0_i32_0 : i32, i32, i32, i32
  }
  func.func @transform_2(%arg0: i32, %arg1: i32) -> (i32, i32, i32, i32) {
    %c0_i32 = arith.constant 0 : i32
    %c0_i32_0 = arith.constant 0 : i32
    %c0_i32_1 = arith.constant 0 : i32
    %c0_i32_2 = arith.constant 0 : i32
    %c0_i32_3 = arith.constant 0 : i32
    return %c0_i32, %c0_i32_0, %c0_i32_1, %c0_i32_2 : i32, i32, i32, i32
  }
  func.func @transform_3(%arg0: i32, %arg1: i32) -> (i32, i32) {
    %c0_i32 = arith.constant 0 : i32
    %c0_i32_0 = arith.constant 0 : i32
    %c0_i32_1 = arith.constant 0 : i32
    return %c0_i32, %c0_i32_0 : i32, i32
  }
  func.func @transform_4(%arg0: i32, %arg1: i32) -> (i32, i32) {
    %c0_i32 = arith.constant 0 : i32
    %c0_i32_0 = arith.constant 0 : i32
    %c0_i32_1 = arith.constant 0 : i32
    return %c0_i32, %c0_i32_0 : i32, i32
  }
  func.func @transform_5(%arg0: i32, %arg1: i32) -> (i32, i32, i32, i32) {
    %c0_i32 = arith.constant 0 : i32
    %c0_i32_0 = arith.constant 0 : i32
    %c0_i32_1 = arith.constant 0 : i32
    return %arg0, %arg1, %c0_i32, %c0_i32_0 : i32, i32, i32, i32
  }
}

module attributes {stable_mosaic.version = 11 : i64} {
  func.func @stats_kernel(%arg0: i32, %arg1: i32, %arg2: memref<1x8x18x12xbf16, #tpu.memory_space<vmem>>, %arg3: memref<1x2x18x12xbf16, #tpu.memory_space<vmem>>, %arg4: memref<3x3x12x3xbf16, #tpu.memory_space<vmem>>, %arg5: memref<1x1x1x3xf32, #tpu.memory_space<vmem>>, %arg6: memref<1x1x1x3xf32, #tpu.memory_space<vmem>>) attributes {dimension_semantics = [#tpu.dimension_semantics<parallel>, #tpu.dimension_semantics<parallel>], iteration_bounds = array<i64: 2, 2>, scalar_prefetch = 0 : i64, scratch_operands = 0 : i64, tpu.core_type = #tpu.core_type<tc>, window_params = [{transform_indices = @transform_0, window_bounds = array<i64: 1, 8, 18, 12>}, {transform_indices = @transform_1, window_bounds = array<i64: 1, 2, 18, 12>}, {pipeline_mode = #tpu.pipeline_mode<synchronous>, transform_indices = @transform_2, window_bounds = array<i64: 3, 3, 12, 3>}, {transform_indices = @transform_3, window_bounds = array<i64: 1, 1, 1, 3>}, {transform_indices = @transform_4, window_bounds = array<i64: 1, 1, 1, 3>}]} {
    %c0 = arith.constant 0 : index
    %c0_0 = arith.constant 0 : index
    %c0_1 = arith.constant 0 : index
    %c0_2 = arith.constant 0 : index
    %0 = vector.load %arg2[%c0, %c0_0, %c0_1, %c0_2] : memref<1x8x18x12xbf16, #tpu.memory_space<vmem>>, vector<1x8x18x12xbf16>
    %1 = vector.shape_cast %0 : vector<1x8x18x12xbf16> to vector<8x18x12xbf16>
    %c0_3 = arith.constant 0 : index
    %c0_4 = arith.constant 0 : index
    %c0_5 = arith.constant 0 : index
    %c0_6 = arith.constant 0 : index
    %2 = vector.load %arg3[%c0_3, %c0_4, %c0_5, %c0_6] : memref<1x2x18x12xbf16, #tpu.memory_space<vmem>>, vector<1x2x18x12xbf16>
    %3 = vector.shape_cast %2 : vector<1x2x18x12xbf16> to vector<2x18x12xbf16>
    %4 = tpu.concatenate %1, %3 in 0 : vector<8x18x12xbf16>, vector<2x18x12xbf16> -> vector<10x18x12xbf16>
    %c0_7 = arith.constant 0 : index
    %c0_8 = arith.constant 0 : index
    %c0_9 = arith.constant 0 : index
    %c0_10 = arith.constant 0 : index
    %5 = vector.load %arg4[%c0_7, %c0_8, %c0_9, %c0_10] : memref<3x3x12x3xbf16, #tpu.memory_space<vmem>>, vector<3x3x12x3xbf16>
    %cst = arith.constant 0.000000e+00 : f32
    %6 = vector.broadcast %cst : f32 to vector<128x3xf32>
    %7 = vector.extract_strided_slice %4 {offsets = [0, 0, 0], sizes = [8, 16, 12], strides = [1, 1, 1]} : vector<10x18x12xbf16> to vector<8x16x12xbf16>
    %8 = vector.shape_cast %7 : vector<8x16x12xbf16> to vector<128x12xbf16>
    %9 = vector.extract_strided_slice %5 {offsets = [0, 0, 0, 0], sizes = [1, 1, 12, 3], strides = [1, 1, 1, 1]} : vector<3x3x12x3xbf16> to vector<1x1x12x3xbf16>
    %10 = vector.shape_cast %9 : vector<1x1x12x3xbf16> to vector<12x3xbf16>
    %cst_11 = arith.constant dense<0.000000e+00> : vector<128x3xf32>
    %11 = tpu.matmul %8, %10, %cst_11 {dimension_numbers = #tpu.dot_dimension_numbers<[1], [0], [0], [1], [0, 0, 1, 1], [], []>} : vector<128x12xbf16>, vector<12x3xbf16>, vector<128x3xf32> -> vector<128x3xf32>
    %12 = arith.addf %6, %11 : vector<128x3xf32>
    %13 = vector.extract_strided_slice %4 {offsets = [0, 1, 0], sizes = [8, 16, 12], strides = [1, 1, 1]} : vector<10x18x12xbf16> to vector<8x16x12xbf16>
    %14 = vector.shape_cast %13 : vector<8x16x12xbf16> to vector<128x12xbf16>
    %15 = vector.extract_strided_slice %5 {offsets = [0, 1, 0, 0], sizes = [1, 1, 12, 3], strides = [1, 1, 1, 1]} : vector<3x3x12x3xbf16> to vector<1x1x12x3xbf16>
    %16 = vector.shape_cast %15 : vector<1x1x12x3xbf16> to vector<12x3xbf16>
    %cst_12 = arith.constant dense<0.000000e+00> : vector<128x3xf32>
    %17 = tpu.matmul %14, %16, %cst_12 {dimension_numbers = #tpu.dot_dimension_numbers<[1], [0], [0], [1], [0, 0, 1, 1], [], []>} : vector<128x12xbf16>, vector<12x3xbf16>, vector<128x3xf32> -> vector<128x3xf32>
    %18 = arith.addf %12, %17 : vector<128x3xf32>
    %19 = vector.extract_strided_slice %4 {offsets = [0, 2, 0], sizes = [8, 16, 12], strides = [1, 1, 1]} : vector<10x18x12xbf16> to vector<8x16x12xbf16>
    %20 = vector.shape_cast %19 : vector<8x16x12xbf16> to vector<128x12xbf16>
    %21 = vector.extract_strided_slice %5 {offsets = [0, 2, 0, 0], sizes = [1, 1, 12, 3], strides = [1, 1, 1, 1]} : vector<3x3x12x3xbf16> to vector<1x1x12x3xbf16>
    %22 = vector.shape_cast %21 : vector<1x1x12x3xbf16> to vector<12x3xbf16>
    %cst_13 = arith.constant dense<0.000000e+00> : vector<128x3xf32>
    %23 = tpu.matmul %20, %22, %cst_13 {dimension_numbers = #tpu.dot_dimension_numbers<[1], [0], [0], [1], [0, 0, 1, 1], [], []>} : vector<128x12xbf16>, vector<12x3xbf16>, vector<128x3xf32> -> vector<128x3xf32>
    %24 = arith.addf %18, %23 : vector<128x3xf32>
    %25 = vector.extract_strided_slice %4 {offsets = [1, 0, 0], sizes = [8, 16, 12], strides = [1, 1, 1]} : vector<10x18x12xbf16> to vector<8x16x12xbf16>
    %26 = vector.shape_cast %25 : vector<8x16x12xbf16> to vector<128x12xbf16>
    %27 = vector.extract_strided_slice %5 {offsets = [1, 0, 0, 0], sizes = [1, 1, 12, 3], strides = [1, 1, 1, 1]} : vector<3x3x12x3xbf16> to vector<1x1x12x3xbf16>
    %28 = vector.shape_cast %27 : vector<1x1x12x3xbf16> to vector<12x3xbf16>
    %cst_14 = arith.constant dense<0.000000e+00> : vector<128x3xf32>
    %29 = tpu.matmul %26, %28, %cst_14 {dimension_numbers = #tpu.dot_dimension_numbers<[1], [0], [0], [1], [0, 0, 1, 1], [], []>} : vector<128x12xbf16>, vector<12x3xbf16>, vector<128x3xf32> -> vector<128x3xf32>
    %30 = arith.addf %24, %29 : vector<128x3xf32>
    %31 = vector.extract_strided_slice %4 {offsets = [1, 1, 0], sizes = [8, 16, 12], strides = [1, 1, 1]} : vector<10x18x12xbf16> to vector<8x16x12xbf16>
    %32 = vector.shape_cast %31 : vector<8x16x12xbf16> to vector<128x12xbf16>
    %33 = vector.extract_strided_slice %5 {offsets = [1, 1, 0, 0], sizes = [1, 1, 12, 3], strides = [1, 1, 1, 1]} : vector<3x3x12x3xbf16> to vector<1x1x12x3xbf16>
    %34 = vector.shape_cast %33 : vector<1x1x12x3xbf16> to vector<12x3xbf16>
    %cst_15 = arith.constant dense<0.000000e+00> : vector<128x3xf32>
    %35 = tpu.matmul %32, %34, %cst_15 {dimension_numbers = #tpu.dot_dimension_numbers<[1], [0], [0], [1], [0, 0, 1, 1], [], []>} : vector<128x12xbf16>, vector<12x3xbf16>, vector<128x3xf32> -> vector<128x3xf32>
    %36 = arith.addf %30, %35 : vector<128x3xf32>
    %37 = vector.extract_strided_slice %4 {offsets = [1, 2, 0], sizes = [8, 16, 12], strides = [1, 1, 1]} : vector<10x18x12xbf16> to vector<8x16x12xbf16>
    %38 = vector.shape_cast %37 : vector<8x16x12xbf16> to vector<128x12xbf16>
    %39 = vector.extract_strided_slice %5 {offsets = [1, 2, 0, 0], sizes = [1, 1, 12, 3], strides = [1, 1, 1, 1]} : vector<3x3x12x3xbf16> to vector<1x1x12x3xbf16>
    %40 = vector.shape_cast %39 : vector<1x1x12x3xbf16> to vector<12x3xbf16>
    %cst_16 = arith.constant dense<0.000000e+00> : vector<128x3xf32>
    %41 = tpu.matmul %38, %40, %cst_16 {dimension_numbers = #tpu.dot_dimension_numbers<[1], [0], [0], [1], [0, 0, 1, 1], [], []>} : vector<128x12xbf16>, vector<12x3xbf16>, vector<128x3xf32> -> vector<128x3xf32>
    %42 = arith.addf %36, %41 : vector<128x3xf32>
    %43 = vector.extract_strided_slice %4 {offsets = [2, 0, 0], sizes = [8, 16, 12], strides = [1, 1, 1]} : vector<10x18x12xbf16> to vector<8x16x12xbf16>
    %44 = vector.shape_cast %43 : vector<8x16x12xbf16> to vector<128x12xbf16>
    %45 = vector.extract_strided_slice %5 {offsets = [2, 0, 0, 0], sizes = [1, 1, 12, 3], strides = [1, 1, 1, 1]} : vector<3x3x12x3xbf16> to vector<1x1x12x3xbf16>
    %46 = vector.shape_cast %45 : vector<1x1x12x3xbf16> to vector<12x3xbf16>
    %cst_17 = arith.constant dense<0.000000e+00> : vector<128x3xf32>
    %47 = tpu.matmul %44, %46, %cst_17 {dimension_numbers = #tpu.dot_dimension_numbers<[1], [0], [0], [1], [0, 0, 1, 1], [], []>} : vector<128x12xbf16>, vector<12x3xbf16>, vector<128x3xf32> -> vector<128x3xf32>
    %48 = arith.addf %42, %47 : vector<128x3xf32>
    %49 = vector.extract_strided_slice %4 {offsets = [2, 1, 0], sizes = [8, 16, 12], strides = [1, 1, 1]} : vector<10x18x12xbf16> to vector<8x16x12xbf16>
    %50 = vector.shape_cast %49 : vector<8x16x12xbf16> to vector<128x12xbf16>
    %51 = vector.extract_strided_slice %5 {offsets = [2, 1, 0, 0], sizes = [1, 1, 12, 3], strides = [1, 1, 1, 1]} : vector<3x3x12x3xbf16> to vector<1x1x12x3xbf16>
    %52 = vector.shape_cast %51 : vector<1x1x12x3xbf16> to vector<12x3xbf16>
    %cst_18 = arith.constant dense<0.000000e+00> : vector<128x3xf32>
    %53 = tpu.matmul %50, %52, %cst_18 {dimension_numbers = #tpu.dot_dimension_numbers<[1], [0], [0], [1], [0, 0, 1, 1], [], []>} : vector<128x12xbf16>, vector<12x3xbf16>, vector<128x3xf32> -> vector<128x3xf32>
    %54 = arith.addf %48, %53 : vector<128x3xf32>
    %55 = vector.extract_strided_slice %4 {offsets = [2, 2, 0], sizes = [8, 16, 12], strides = [1, 1, 1]} : vector<10x18x12xbf16> to vector<8x16x12xbf16>
    %56 = vector.shape_cast %55 : vector<8x16x12xbf16> to vector<128x12xbf16>
    %57 = vector.extract_strided_slice %5 {offsets = [2, 2, 0, 0], sizes = [1, 1, 12, 3], strides = [1, 1, 1, 1]} : vector<3x3x12x3xbf16> to vector<1x1x12x3xbf16>
    %58 = vector.shape_cast %57 : vector<1x1x12x3xbf16> to vector<12x3xbf16>
    %cst_19 = arith.constant dense<0.000000e+00> : vector<128x3xf32>
    %59 = tpu.matmul %56, %58, %cst_19 {dimension_numbers = #tpu.dot_dimension_numbers<[1], [0], [0], [1], [0, 0, 1, 1], [], []>} : vector<128x12xbf16>, vector<12x3xbf16>, vector<128x3xf32> -> vector<128x3xf32>
    %60 = arith.addf %54, %59 : vector<128x3xf32>
    %cst_20 = arith.constant dense<0.000000e+00> : vector<3xf32>
    %61 = vector.multi_reduction <add>, %60, %cst_20 [0] : vector<128x3xf32> to vector<3xf32>
    %62 = vector.shape_cast %61 : vector<3xf32> to vector<1x3xf32>
    %c0_21 = arith.constant 0 : index
    %c0_22 = arith.constant 0 : index
    %c0_23 = arith.constant 0 : index
    %c0_24 = arith.constant 0 : index
    %63 = vector.load %arg5[%c0_21, %c0_22, %c0_23, %c0_24] : memref<1x1x1x3xf32, #tpu.memory_space<vmem>>, vector<1x1x1x3xf32>
    %64 = vector.shape_cast %63 : vector<1x1x1x3xf32> to vector<1x3xf32>
    %65 = vector.shape_cast %62 : vector<1x3xf32> to vector<1x1x1x3xf32>
    tpu.vector_store %arg5[%c0_21, %c0_22, %c0_23, %c0_24], %65 {strides = array<i32>} : memref<1x1x1x3xf32, #tpu.memory_space<vmem>>, vector<1x1x1x3xf32>,
    %66 = arith.mulf %60, %60 : vector<128x3xf32>
    %cst_25 = arith.constant dense<0.000000e+00> : vector<3xf32>
    %67 = vector.multi_reduction <add>, %66, %cst_25 [0] : vector<128x3xf32> to vector<3xf32>
    %68 = vector.shape_cast %67 : vector<3xf32> to vector<1x3xf32>
    %c0_26 = arith.constant 0 : index
    %c0_27 = arith.constant 0 : index
    %c0_28 = arith.constant 0 : index
    %c0_29 = arith.constant 0 : index
    %69 = vector.load %arg6[%c0_26, %c0_27, %c0_28, %c0_29] : memref<1x1x1x3xf32, #tpu.memory_space<vmem>>, vector<1x1x1x3xf32>
    %70 = vector.shape_cast %69 : vector<1x1x1x3xf32> to vector<1x3xf32>
    %71 = vector.shape_cast %68 : vector<1x3xf32> to vector<1x1x1x3xf32>
    tpu.vector_store %arg6[%c0_26, %c0_27, %c0_28, %c0_29], %71 {strides = array<i32>} : memref<1x1x1x3xf32, #tpu.memory_space<vmem>>, vector<1x1x1x3xf32>,
    return
  }
  func.func @transform_0(%arg0: i32, %arg1: i32) -> (i32, i32, i32, i32) {
    %c0_i32 = arith.constant 0 : i32
    %c0_i32_0 = arith.constant 0 : i32
    %c0_i32_1 = arith.constant 0 : i32
    return %arg0, %arg1, %c0_i32, %c0_i32_0 : i32, i32, i32, i32
  }
  func.func @transform_1(%arg0: i32, %arg1: i32) -> (i32, i32, i32, i32) {
    %c1_i32 = arith.constant 1 : i32
    %0 = arith.addi %arg1, %c1_i32 : i32
    %c4_i32 = arith.constant 4 : i32
    %1 = arith.muli %0, %c4_i32 : i32
    %c0_i32 = arith.constant 0 : i32
    %c0_i32_0 = arith.constant 0 : i32
    %c0_i32_1 = arith.constant 0 : i32
    return %arg0, %1, %c0_i32, %c0_i32_0 : i32, i32, i32, i32
  }
  func.func @transform_2(%arg0: i32, %arg1: i32) -> (i32, i32, i32, i32) {
    %c0_i32 = arith.constant 0 : i32
    %c0_i32_0 = arith.constant 0 : i32
    %c0_i32_1 = arith.constant 0 : i32
    %c0_i32_2 = arith.constant 0 : i32
    %c0_i32_3 = arith.constant 0 : i32
    return %c0_i32, %c0_i32_0, %c0_i32_1, %c0_i32_2 : i32, i32, i32, i32
  }
  func.func @transform_3(%arg0: i32, %arg1: i32) -> (i32, i32, i32, i32) {
    %c0_i32 = arith.constant 0 : i32
    %c0_i32_0 = arith.constant 0 : i32
    %c0_i32_1 = arith.constant 0 : i32
    return %arg0, %arg1, %c0_i32, %c0_i32_0 : i32, i32, i32, i32
  }
  func.func @transform_4(%arg0: i32, %arg1: i32) -> (i32, i32, i32, i32) {
    %c0_i32 = arith.constant 0 : i32
    %c0_i32_0 = arith.constant 0 : i32
    %c0_i32_1 = arith.constant 0 : i32
    return %arg0, %arg1, %c0_i32, %c0_i32_0 : i32, i32, i32, i32
  }
}

module attributes {stable_mosaic.version = 11 : i64} {
  func.func @norm_kernel(%arg0: i32, %arg1: i32, %arg2: memref<1x8x18x12xbf16, #tpu.memory_space<vmem>>, %arg3: memref<1x2x18x12xbf16, #tpu.memory_space<vmem>>, %arg4: memref<3x3x12x3xbf16, #tpu.memory_space<vmem>>, %arg5: memref<1x3xf32, #tpu.memory_space<vmem>>, %arg6: memref<1x3xf32, #tpu.memory_space<vmem>>, %arg7: memref<1x8x16x3xf32, #tpu.memory_space<vmem>>) attributes {dimension_semantics = [#tpu.dimension_semantics<parallel>, #tpu.dimension_semantics<parallel>], iteration_bounds = array<i64: 2, 2>, scalar_prefetch = 0 : i64, scratch_operands = 0 : i64, tpu.core_type = #tpu.core_type<tc>, window_params = [{transform_indices = @transform_0, window_bounds = array<i64: 1, 8, 18, 12>}, {transform_indices = @transform_1, window_bounds = array<i64: 1, 2, 18, 12>}, {pipeline_mode = #tpu.pipeline_mode<synchronous>, transform_indices = @transform_2, window_bounds = array<i64: 3, 3, 12, 3>}, {pipeline_mode = #tpu.pipeline_mode<synchronous>, transform_indices = @transform_3, window_bounds = array<i64: 1, 3>}, {pipeline_mode = #tpu.pipeline_mode<synchronous>, transform_indices = @transform_4, window_bounds = array<i64: 1, 3>}, {transform_indices = @transform_5, window_bounds = array<i64: 1, 8, 16, 3>}]} {
    %c0 = arith.constant 0 : index
    %c0_0 = arith.constant 0 : index
    %c0_1 = arith.constant 0 : index
    %c0_2 = arith.constant 0 : index
    %0 = vector.load %arg2[%c0, %c0_0, %c0_1, %c0_2] : memref<1x8x18x12xbf16, #tpu.memory_space<vmem>>, vector<1x8x18x12xbf16>
    %1 = vector.shape_cast %0 : vector<1x8x18x12xbf16> to vector<8x18x12xbf16>
    %c0_3 = arith.constant 0 : index
    %c0_4 = arith.constant 0 : index
    %c0_5 = arith.constant 0 : index
    %c0_6 = arith.constant 0 : index
    %2 = vector.load %arg3[%c0_3, %c0_4, %c0_5, %c0_6] : memref<1x2x18x12xbf16, #tpu.memory_space<vmem>>, vector<1x2x18x12xbf16>
    %3 = vector.shape_cast %2 : vector<1x2x18x12xbf16> to vector<2x18x12xbf16>
    %4 = tpu.concatenate %1, %3 in 0 : vector<8x18x12xbf16>, vector<2x18x12xbf16> -> vector<10x18x12xbf16>
    %c0_7 = arith.constant 0 : index
    %c0_8 = arith.constant 0 : index
    %c0_9 = arith.constant 0 : index
    %c0_10 = arith.constant 0 : index
    %5 = vector.load %arg4[%c0_7, %c0_8, %c0_9, %c0_10] : memref<3x3x12x3xbf16, #tpu.memory_space<vmem>>, vector<3x3x12x3xbf16>
    %cst = arith.constant 0.000000e+00 : f32
    %6 = vector.broadcast %cst : f32 to vector<128x3xf32>
    %7 = vector.extract_strided_slice %4 {offsets = [0, 0, 0], sizes = [8, 16, 12], strides = [1, 1, 1]} : vector<10x18x12xbf16> to vector<8x16x12xbf16>
    %8 = vector.shape_cast %7 : vector<8x16x12xbf16> to vector<128x12xbf16>
    %9 = vector.extract_strided_slice %5 {offsets = [0, 0, 0, 0], sizes = [1, 1, 12, 3], strides = [1, 1, 1, 1]} : vector<3x3x12x3xbf16> to vector<1x1x12x3xbf16>
    %10 = vector.shape_cast %9 : vector<1x1x12x3xbf16> to vector<12x3xbf16>
    %cst_11 = arith.constant dense<0.000000e+00> : vector<128x3xf32>
    %11 = tpu.matmul %8, %10, %cst_11 {dimension_numbers = #tpu.dot_dimension_numbers<[1], [0], [0], [1], [0, 0, 1, 1], [], []>} : vector<128x12xbf16>, vector<12x3xbf16>, vector<128x3xf32> -> vector<128x3xf32>
    %12 = arith.addf %6, %11 : vector<128x3xf32>
    %13 = vector.extract_strided_slice %4 {offsets = [0, 1, 0], sizes = [8, 16, 12], strides = [1, 1, 1]} : vector<10x18x12xbf16> to vector<8x16x12xbf16>
    %14 = vector.shape_cast %13 : vector<8x16x12xbf16> to vector<128x12xbf16>
    %15 = vector.extract_strided_slice %5 {offsets = [0, 1, 0, 0], sizes = [1, 1, 12, 3], strides = [1, 1, 1, 1]} : vector<3x3x12x3xbf16> to vector<1x1x12x3xbf16>
    %16 = vector.shape_cast %15 : vector<1x1x12x3xbf16> to vector<12x3xbf16>
    %cst_12 = arith.constant dense<0.000000e+00> : vector<128x3xf32>
    %17 = tpu.matmul %14, %16, %cst_12 {dimension_numbers = #tpu.dot_dimension_numbers<[1], [0], [0], [1], [0, 0, 1, 1], [], []>} : vector<128x12xbf16>, vector<12x3xbf16>, vector<128x3xf32> -> vector<128x3xf32>
    %18 = arith.addf %12, %17 : vector<128x3xf32>
    %19 = vector.extract_strided_slice %4 {offsets = [0, 2, 0], sizes = [8, 16, 12], strides = [1, 1, 1]} : vector<10x18x12xbf16> to vector<8x16x12xbf16>
    %20 = vector.shape_cast %19 : vector<8x16x12xbf16> to vector<128x12xbf16>
    %21 = vector.extract_strided_slice %5 {offsets = [0, 2, 0, 0], sizes = [1, 1, 12, 3], strides = [1, 1, 1, 1]} : vector<3x3x12x3xbf16> to vector<1x1x12x3xbf16>
    %22 = vector.shape_cast %21 : vector<1x1x12x3xbf16> to vector<12x3xbf16>
    %cst_13 = arith.constant dense<0.000000e+00> : vector<128x3xf32>
    %23 = tpu.matmul %20, %22, %cst_13 {dimension_numbers = #tpu.dot_dimension_numbers<[1], [0], [0], [1], [0, 0, 1, 1], [], []>} : vector<128x12xbf16>, vector<12x3xbf16>, vector<128x3xf32> -> vector<128x3xf32>
    %24 = arith.addf %18, %23 : vector<128x3xf32>
    %25 = vector.extract_strided_slice %4 {offsets = [1, 0, 0], sizes = [8, 16, 12], strides = [1, 1, 1]} : vector<10x18x12xbf16> to vector<8x16x12xbf16>
    %26 = vector.shape_cast %25 : vector<8x16x12xbf16> to vector<128x12xbf16>
    %27 = vector.extract_strided_slice %5 {offsets = [1, 0, 0, 0], sizes = [1, 1, 12, 3], strides = [1, 1, 1, 1]} : vector<3x3x12x3xbf16> to vector<1x1x12x3xbf16>
    %28 = vector.shape_cast %27 : vector<1x1x12x3xbf16> to vector<12x3xbf16>
    %cst_14 = arith.constant dense<0.000000e+00> : vector<128x3xf32>
    %29 = tpu.matmul %26, %28, %cst_14 {dimension_numbers = #tpu.dot_dimension_numbers<[1], [0], [0], [1], [0, 0, 1, 1], [], []>} : vector<128x12xbf16>, vector<12x3xbf16>, vector<128x3xf32> -> vector<128x3xf32>
    %30 = arith.addf %24, %29 : vector<128x3xf32>
    %31 = vector.extract_strided_slice %4 {offsets = [1, 1, 0], sizes = [8, 16, 12], strides = [1, 1, 1]} : vector<10x18x12xbf16> to vector<8x16x12xbf16>
    %32 = vector.shape_cast %31 : vector<8x16x12xbf16> to vector<128x12xbf16>
    %33 = vector.extract_strided_slice %5 {offsets = [1, 1, 0, 0], sizes = [1, 1, 12, 3], strides = [1, 1, 1, 1]} : vector<3x3x12x3xbf16> to vector<1x1x12x3xbf16>
    %34 = vector.shape_cast %33 : vector<1x1x12x3xbf16> to vector<12x3xbf16>
    %cst_15 = arith.constant dense<0.000000e+00> : vector<128x3xf32>
    %35 = tpu.matmul %32, %34, %cst_15 {dimension_numbers = #tpu.dot_dimension_numbers<[1], [0], [0], [1], [0, 0, 1, 1], [], []>} : vector<128x12xbf16>, vector<12x3xbf16>, vector<128x3xf32> -> vector<128x3xf32>
    %36 = arith.addf %30, %35 : vector<128x3xf32>
    %37 = vector.extract_strided_slice %4 {offsets = [1, 2, 0], sizes = [8, 16, 12], strides = [1, 1, 1]} : vector<10x18x12xbf16> to vector<8x16x12xbf16>
    %38 = vector.shape_cast %37 : vector<8x16x12xbf16> to vector<128x12xbf16>
    %39 = vector.extract_strided_slice %5 {offsets = [1, 2, 0, 0], sizes = [1, 1, 12, 3], strides = [1, 1, 1, 1]} : vector<3x3x12x3xbf16> to vector<1x1x12x3xbf16>
    %40 = vector.shape_cast %39 : vector<1x1x12x3xbf16> to vector<12x3xbf16>
    %cst_16 = arith.constant dense<0.000000e+00> : vector<128x3xf32>
    %41 = tpu.matmul %38, %40, %cst_16 {dimension_numbers = #tpu.dot_dimension_numbers<[1], [0], [0], [1], [0, 0, 1, 1], [], []>} : vector<128x12xbf16>, vector<12x3xbf16>, vector<128x3xf32> -> vector<128x3xf32>
    %42 = arith.addf %36, %41 : vector<128x3xf32>
    %43 = vector.extract_strided_slice %4 {offsets = [2, 0, 0], sizes = [8, 16, 12], strides = [1, 1, 1]} : vector<10x18x12xbf16> to vector<8x16x12xbf16>
    %44 = vector.shape_cast %43 : vector<8x16x12xbf16> to vector<128x12xbf16>
    %45 = vector.extract_strided_slice %5 {offsets = [2, 0, 0, 0], sizes = [1, 1, 12, 3], strides = [1, 1, 1, 1]} : vector<3x3x12x3xbf16> to vector<1x1x12x3xbf16>
    %46 = vector.shape_cast %45 : vector<1x1x12x3xbf16> to vector<12x3xbf16>
    %cst_17 = arith.constant dense<0.000000e+00> : vector<128x3xf32>
    %47 = tpu.matmul %44, %46, %cst_17 {dimension_numbers = #tpu.dot_dimension_numbers<[1], [0], [0], [1], [0, 0, 1, 1], [], []>} : vector<128x12xbf16>, vector<12x3xbf16>, vector<128x3xf32> -> vector<128x3xf32>
    %48 = arith.addf %42, %47 : vector<128x3xf32>
    %49 = vector.extract_strided_slice %4 {offsets = [2, 1, 0], sizes = [8, 16, 12], strides = [1, 1, 1]} : vector<10x18x12xbf16> to vector<8x16x12xbf16>
    %50 = vector.shape_cast %49 : vector<8x16x12xbf16> to vector<128x12xbf16>
    %51 = vector.extract_strided_slice %5 {offsets = [2, 1, 0, 0], sizes = [1, 1, 12, 3], strides = [1, 1, 1, 1]} : vector<3x3x12x3xbf16> to vector<1x1x12x3xbf16>
    %52 = vector.shape_cast %51 : vector<1x1x12x3xbf16> to vector<12x3xbf16>
    %cst_18 = arith.constant dense<0.000000e+00> : vector<128x3xf32>
    %53 = tpu.matmul %50, %52, %cst_18 {dimension_numbers = #tpu.dot_dimension_numbers<[1], [0], [0], [1], [0, 0, 1, 1], [], []>} : vector<128x12xbf16>, vector<12x3xbf16>, vector<128x3xf32> -> vector<128x3xf32>
    %54 = arith.addf %48, %53 : vector<128x3xf32>
    %55 = vector.extract_strided_slice %4 {offsets = [2, 2, 0], sizes = [8, 16, 12], strides = [1, 1, 1]} : vector<10x18x12xbf16> to vector<8x16x12xbf16>
    %56 = vector.shape_cast %55 : vector<8x16x12xbf16> to vector<128x12xbf16>
    %57 = vector.extract_strided_slice %5 {offsets = [2, 2, 0, 0], sizes = [1, 1, 12, 3], strides = [1, 1, 1, 1]} : vector<3x3x12x3xbf16> to vector<1x1x12x3xbf16>
    %58 = vector.shape_cast %57 : vector<1x1x12x3xbf16> to vector<12x3xbf16>
    %cst_19 = arith.constant dense<0.000000e+00> : vector<128x3xf32>
    %59 = tpu.matmul %56, %58, %cst_19 {dimension_numbers = #tpu.dot_dimension_numbers<[1], [0], [0], [1], [0, 0, 1, 1], [], []>} : vector<128x12xbf16>, vector<12x3xbf16>, vector<128x3xf32> -> vector<128x3xf32>
    %60 = arith.addf %54, %59 : vector<128x3xf32>
    %c0_20 = arith.constant 0 : index
    %c0_21 = arith.constant 0 : index
    %61 = vector.load %arg5[%c0_20, %c0_21] : memref<1x3xf32, #tpu.memory_space<vmem>>, vector<1x3xf32>
    %62 = vector.broadcast %61 : vector<1x3xf32> to vector<128x3xf32>
    %63 = arith.mulf %60, %62 : vector<128x3xf32>
    %c0_22 = arith.constant 0 : index
    %c0_23 = arith.constant 0 : index
    %64 = vector.load %arg6[%c0_22, %c0_23] : memref<1x3xf32, #tpu.memory_space<vmem>>, vector<1x3xf32>
    %65 = vector.broadcast %64 : vector<1x3xf32> to vector<128x3xf32>
    %66 = arith.addf %63, %65 : vector<128x3xf32>
    %cst_24 = arith.constant 0.000000e+00 : f32
    %67 = vector.broadcast %cst_24 : f32 to vector<128x3xf32>
    %68 = arith.maximumf %66, %67 : vector<128x3xf32>
    %69 = vector.shape_cast %68 : vector<128x3xf32> to vector<8x16x3xf32>
    %70 = math.tanh %69 : vector<8x16x3xf32>
    %c0_25 = arith.constant 0 : index
    %c0_26 = arith.constant 0 : index
    %c0_27 = arith.constant 0 : index
    %c0_28 = arith.constant 0 : index
    %71 = vector.load %arg7[%c0_25, %c0_26, %c0_27, %c0_28] : memref<1x8x16x3xf32, #tpu.memory_space<vmem>>, vector<1x8x16x3xf32>
    %72 = vector.shape_cast %71 : vector<1x8x16x3xf32> to vector<8x16x3xf32>
    %73 = vector.shape_cast %70 : vector<8x16x3xf32> to vector<1x8x16x3xf32>
    tpu.vector_store %arg7[%c0_25, %c0_26, %c0_27, %c0_28], %73 {strides = array<i32>} : memref<1x8x16x3xf32, #tpu.memory_space<vmem>>, vector<1x8x16x3xf32>,
    return
  }
  func.func @transform_0(%arg0: i32, %arg1: i32) -> (i32, i32, i32, i32) {
    %c0_i32 = arith.constant 0 : i32
    %c0_i32_0 = arith.constant 0 : i32
    %c0_i32_1 = arith.constant 0 : i32
    return %arg0, %arg1, %c0_i32, %c0_i32_0 : i32, i32, i32, i32
  }
  func.func @transform_1(%arg0: i32, %arg1: i32) -> (i32, i32, i32, i32) {
    %c1_i32 = arith.constant 1 : i32
    %0 = arith.addi %arg1, %c1_i32 : i32
    %c4_i32 = arith.constant 4 : i32
    %1 = arith.muli %0, %c4_i32 : i32
    %c0_i32 = arith.constant 0 : i32
    %c0_i32_0 = arith.constant 0 : i32
    %c0_i32_1 = arith.constant 0 : i32
    return %arg0, %1, %c0_i32, %c0_i32_0 : i32, i32, i32, i32
  }
  func.func @transform_2(%arg0: i32, %arg1: i32) -> (i32, i32, i32, i32) {
    %c0_i32 = arith.constant 0 : i32
    %c0_i32_0 = arith.constant 0 : i32
    %c0_i32_1 = arith.constant 0 : i32
    %c0_i32_2 = arith.constant 0 : i32
    %c0_i32_3 = arith.constant 0 : i32
    return %c0_i32, %c0_i32_0, %c0_i32_1, %c0_i32_2 : i32, i32, i32, i32
  }
  func.func @transform_3(%arg0: i32, %arg1: i32) -> (i32, i32) {
    %c0_i32 = arith.constant 0 : i32
    %c0_i32_0 = arith.constant 0 : i32
    %c0_i32_1 = arith.constant 0 : i32
    return %c0_i32, %c0_i32_0 : i32, i32
  }
  func.func @transform_4(%arg0: i32, %arg1: i32) -> (i32, i32) {
    %c0_i32 = arith.constant 0 : i32
    %c0_i32_0 = arith.constant 0 : i32
    %c0_i32_1 = arith.constant 0 : i32
    return %c0_i32, %c0_i32_0 : i32, i32
  }
  func.func @transform_5(%arg0: i32, %arg1: i32) -> (i32, i32, i32, i32) {
    %c0_i32 = arith.constant 0 : i32
    %c0_i32_0 = arith.constant 0 : i32
    %c0_i32_1 = arith.constant 0 : i32
    return %arg0, %arg1, %c0_i32, %c0_i32_0 : i32, i32, i32, i32
  }
}

</mosaic_0001>

<bundles_post_ra>
// kernel: _lambda_.10
= control target key start
LH: loop header
LB: loop body
LE: loop exit
PB: predicated region body
PF: predicated region fallthrough
CT: control target
= control target key end

     0   :  { %s1368_s15 = smov 0   ;;  %s1370_s16 = smov 0   ;;  %s1754_s0 = inlined_call_operand.vmem [shape: bf16[2,10,10,8], index: 0, kind: input, shape index: {}, may-alias: {0,1}]   ;;  %s1755_s1 = inlined_call_operand.vmem [shape: bf16[2,10,10,8], index: 1, kind: input, shape index: {}, may-alias: {0,1}]   ;;  %s1756_s2 = inlined_call_operand.vmem [shape: bf16[3,3,8,16], index: 2, kind: input, shape index: {}]   ;;  %s1757_s3 = inlined_call_operand.vmem [shape: f32[2,1,1,16], index: 3, kind: output, shape index: {0}]   ;;  %s1758_s4 = inlined_call_operand.vmem [shape: f32[2,1,1,16], index: 4, kind: output, shape index: {1}]  }
   0x1   :  { %s1372_s17 = smov 0  }
   0x2 LB: > { %s27_s18 = sadd.s32 1, %s1337_s16  ;;  %p1236_p0 = scmp.ge.s32.totalorder %s1341_s17, 1  ;;  %s1341_s17 = sphi %s1372_s17, %s15_s17   ;;  %s1337_s16 = sphi %s1370_s16, %s1764_s16   ;;  %s1333_s15 = sphi %s1368_s15, %s1763_s15  }
   0x3   : > { %p29_p1 = scmp.ge.s32.totalorder %s27_s18, 2  ;;  %p225_p2 = scmp.lt.s32.totalorder %s1341_s17, 3 }
   0x5   : > { %s1766_s18 = smov (%p29_p1, %s27_s18), 0  ;;  %p226_p3 = pnand %p1236_p0, %p225_p2 }
   0x6   : > { %p286_p4 = scmp.lt.s32.totalorder (!%p226_p3), %s1333_s15, 1 }
   0x7   : > { %229 = sbr.rel (%p226_p3) target bundleno = 331 (0x14b), region = 32 }
   0xc   : > { %v350_v0 = vld [vmem:[%s1756_s2 + $0x4] sm:$0xf]  ;;  %vm498_vm0 = vcmask 1043456   ;;  %v351_v2 = vld [vmem:[%s1756_s2 + $0x8] sm:$0xf]  ;;  %s1768_s15 = smov (!%p286_p4, %s1333_s15), 1 }
   0xd   : > { %v500_v1 = vsel %vm498_vm0, %v350_v0, 0  ;;  %v663_v3 = vsel %vm498_vm0, %v351_v2, 0  ;;  %s1292_s23 = smul.u32 80, %s1768_s15  ;;  %v352_v4 = vld [vmem:[%s1756_s2 + $0xc] sm:$0xf]  ;;  %vm485_vm3 = vcmask 64512   ;;  %s321_s25 = scalar_lea.vmem %s1757_s3, %s1768_s15 }
   0xe   : > { %1289 = vmatpush.bf16.msra.mxu1 %v500_v1  ;;  %1290 = vmatpush.bf16.msra.mxu2 %v500_v1  ;;  %v349_v5 = vld [vmem:[%s1756_s2] sm:$0xf]  ;;  %v721_v6 = vsel %vm498_vm0, %v352_v4, 0  ;;  %v353_v8 = vld [vmem:[%s1756_s2 + $0x10] sm:$0xf]  ;;  %vm603_vm5 = vcmask 1042432   ;;  %s327_s28 = scalar_lea.vmem %s1758_s4, %s1768_s15 }
   0xf   : > { %1291 = vmatpush.bf16.msra.mxu3 %v500_v1  ;;  %509 = vmatpush.bf16.msra.mxu0 %v500_v1  ;;  %v564_v7 = vsel %vm498_vm0, %v349_v5, 0  ;;  %s1413_s6 = scalar_lea.vmem %s1754_s0, %s1292_s23  ;;  %vm358_vm1 = vsmask.f32 3328  ;;  %vm359_vm2 = vsmask.f32 7440  ;;  %v792_v9 = vsel %vm498_vm0, %v353_v8, 0 }
  0x10   : > { %v1417_v10 = vld [vmem:[%s1413_s6 + $0x10] sm:$0xf]  ;;  %v1420_v11 = vld [vmem:[%s1413_s6 + $0x14] sm:$0x1]  ;;  %v1423_v12 = vld [vmem:[%s1413_s6 + $0x18] sm:$0xf] }
  0x11   : > { %v1426_v13 = vld [vmem:[%s1413_s6 + $0x1c] sm:$0x1]  ;;  %v390_v14 = vshrl.u32 %v1417_v10, 16  ;;  %v393_v15 = vshll.u32 %v1417_v10, 16  ;;  %v399_v16 = vshll.u32 %v1420_v11, 16  ;;  %v404_v17 = vshrl.u32 %v1423_v12, 16  ;;  %vm1456_vm4 = vmor %vm358_vm1, %vm359_vm2 }
  0x12   : > { %672 = vmatpush.bf16.msrb.mxu2 %v663_v3  ;;  %573 = vmatpush.bf16.msrb.mxu1 %v564_v7  ;;  %v407_v18 = vshll.u32 %v1423_v12, 16  ;;  %v413_v19 = vshll.u32 %v1426_v13, 16  ;;  %v1435_v20 = vld [vmem:[%s1413_s6 + $0x20] sm:$0xf]  ;;  %v1438_v21 = vld [vmem:[%s1413_s6 + $0x24] sm:$0x1] }
  0x13   : > { %730 = vmatpush.bf16.msrb.mxu3 %v721_v6  ;;  %801 = vmatpush.bf16.msrb.mxu0 %v792_v9  ;;  %v392_v22 = vrot.slane %v390_v14, 4  ;;  %v395_v23 = vrot.slane %v393_v15, 5  ;;  %v401_v24 = vrot.slane %v399_v16, 5  ;;  %v406_v25 = vrot.slane %v404_v17, 4  ;;  %v1441_v26 = vld [vmem:[%s1413_s6 + $0x28] sm:$0xf] }
  0x14   : > { %v409_v27 = vrot.slane %v407_v18, 5  ;;  %v415_v28 = vrot.slane %v413_v19, 5  ;;  %v1444_v29 = vld [vmem:[%s1413_s6 + $0x2c] sm:$0x1]  ;;  %v418_v30 = vshrl.u32 %v1435_v20, 16  ;;  %v421_v31 = vshll.u32 %v1435_v20, 16 }
  0x15   : > { %v396_v32 = vor.u32 %v395_v23, %v392_v22  ;;  %v427_v33 = vshll.u32 %v1438_v21, 16  ;;  %v432_v34 = vshrl.u32 %v1441_v26, 16  ;;  %v435_v35 = vshll.u32 %v1441_v26, 16  ;;  %v1452_v36 = vld [vmem:[%s1413_s6 + $0x30] sm:$0xf]  ;;  %s1288_s19 = sadd.s32 64, %s1292_s23 }
  0x16   : > { %v410_v38 = vor.u32 %v409_v27, %v406_v25  ;;  %v420_v39 = vrot.slane %v418_v30, 4  ;;  %v423_v40 = vrot.slane %v421_v31, 5  ;;  %v441_v41 = vshll.u32 %v1444_v29, 16  ;;  %v1462_v42 = vld [vmem:[%s1413_s6 + $0x34] sm:$0x1]  ;;  %s1594_s22 = scalar_lea.vmem %s1755_s1, %s1288_s19 }
  0x17   : > { %v397_v43 = vrot.slane %v396_v32, 4  ;;  %v429_v44 = vrot.slane %v427_v33, 5  ;;  %v434_v45 = vrot.slane %v432_v34, 4  ;;  %v437_v46 = vrot.slane %v435_v35, 5  ;;  %v1468_v53 = vld [vmem:[%s1413_s6 + $0x38] sm:$0xf] }
  0x18   : > { %v411_v47 = vrot.slane %v410_v38, 4  ;;  %v424_v48 = vor.u32 %v423_v40, %v420_v39  ;;  %v443_v49 = vrot.slane %v441_v41, 5  ;;  %v446_v50 = vshrl.u32 %v1452_v36, 16  ;;  %v1471_v54 = vld [vmem:[%s1413_s6 + $0x3c] sm:$0x1] }
  0x19   : > { %v402_v51 = vsel %vm1456_vm4, %v397_v43, %v401_v24  ;;  %v438_v52 = vor.u32 %v437_v46, %v434_v45  ;;  %v449_v55 = vshll.u32 %v1452_v36, 16  ;;  %v455_v56 = vshll.u32 %v1462_v42, 16  ;;  %v1482_v1 = vld [vmem:[%s1413_s6] sm:$0xf]  ;;  %v330_v6 = vld [vmem:[%s1413_s6 + $0x4] sm:$0x1] }
  0x1a   : > { %v416_v57 = vsel %vm1456_vm4, %v411_v47, %v415_v28  ;;  %v1477_v58 = vunpack.c.l.b16 %v402_v51  ;;  %v425_v59 = vrot.slane %v424_v48, 4  ;;  %v448_v60 = vrot.slane %v446_v50, 4  ;;  %v1499_v15 = vld [vmem:[%s1413_s6 + $0x8] sm:$0xf]  ;;  %v332_v30 = vld [vmem:[%s1413_s6 + $0xc] sm:$0x1] }
  0x1b   : > { %v1479_v61 = vunpack.c.l.b16 %v416_v57  ;;  %v439_v62 = vrot.slane %v438_v52, 4  ;;  %v451_v63 = vrot.slane %v449_v55, 5  ;;  %v457_v0 = vrot.slane %v455_v56, 5  ;;  %v355_v51 = vld [vmem:[%s1756_s2 + $0x18] sm:$0xf] }
  0x1c   : > { %v430_v2 = vsel %vm1456_vm4, %v425_v59, %v429_v44  ;;  %v460_v3 = vshrl.u32 %v1468_v53, 16  ;;  %v463_v4 = vshll.u32 %v1468_v53, 16  ;;  %v469_v5 = vshll.u32 %v1471_v54, 16 }
  0x1d   : > { %v1492_v7 = vpack.c.b16 %v1479_v61, %v1477_v58  ;;  %v444_v8 = vsel %vm1456_vm4, %v439_v62, %v443_v49  ;;  %v1496_v9 = vunpack.c.l.b16 %v430_v2  ;;  %v452_v14 = vor.u32 %v451_v63, %v448_v60  ;;  %v354_v2 = vld [vmem:[%s1756_s2 + $0x14] sm:$0xf] }
  0x1e   : > { %v1501_v16 = vunpack.c.l.b16 %v444_v8  ;;  %v462_v17 = vrot.slane %v460_v3, 4  ;;  %v465_v18 = vrot.slane %v463_v4, 5  ;;  %v471_v19 = vrot.slane %v469_v5, 5 }
  0x1f   : > { %1240 = vmatmul.msk.bf16.vlgmr.msra.gmra.mxu1 %vm485_vm3, %v1492_v7  ;;  %v453_v22 = vrot.slane %v452_v14, 4  ;;  %v362_v23 = vshrl.u32 %v1482_v1, 16  ;;  %v365_v24 = vshll.u32 %v1482_v1, 16  ;;  %v371_v25 = vshll.u32 %v330_v6, 16 }
  0x20   : > { %v1509_v27 = vpack.c.b16 %v1501_v16, %v1496_v9  ;;  %v466_v28 = vor.u32 %v465_v18, %v462_v17  ;;  %v376_v31 = vshrl.u32 %v1499_v15, 16  ;;  %v379_v32 = vshll.u32 %v1499_v15, 16 }
  0x21   : > { %v458_v33 = vsel %vm1456_vm4, %v453_v22, %v457_v0  ;;  %v364_v34 = vrot.slane %v362_v23, 4  ;;  %v367_v35 = vrot.slane %v365_v24, 5  ;;  %vm604_vm6 = vcmask 1046532   ;;  %v356_v0 = vld [vmem:[%s1756_s2 + $0x1c] sm:$0xf] }
  0x22   : > { %1241 = vmatmul.msk.bf16.vlgmr.msra.gmra.mxu2 %vm485_vm3, %v1509_v27  ;;  %v467_v38 = vrot.slane %v466_v28, 4  ;;  %v373_v39 = vrot.slane %v371_v25, 5  ;;  %v378_v40 = vrot.slane %v376_v31, 4  ;;  %v381_v41 = vrot.slane %v379_v32, 5  ;;  %vm1523_vm7 = vmor %vm603_vm5, %vm604_vm6 }
  0x23   : > { %v1518_v43 = vunpack.c.l.b16 %v458_v33  ;;  %v368_v44 = vor.u32 %v367_v35, %v364_v34  ;;  %v385_v45 = vshll.u32 %v332_v30, 16  ;;  %v608_v46 = vrot.slane %v330_v6, 5 }
  0x24   : > { %v472_v47 = vsel %vm1456_vm4, %v467_v38, %v471_v19  ;;  %v382_v48 = vor.u32 %v381_v41, %v378_v40  ;;  %v612_v49 = vrot.slane %v332_v30, 5  ;;  %v1247_v57 = vrot.slane %v1482_v1, 9 }
  0x25   : > { %v1530_v52 = vunpack.c.l.b16 %v472_v47  ;;  %v369_v55 = vrot.slane %v368_v44, 4  ;;  %v387_v56 = vrot.slane %v385_v45, 5  ;;  %v539_v60 = vunpack.c.l.b16 %v1482_v1 }
  0x26   : > { %v383_v59 = vrot.slane %v382_v48, 4  ;;  %v540_v62 = vunpack.c.l.b16 %v1499_v15  ;;  %v1248_v63 = vrot.slane %v1499_v15, 9  ;;  %v609_v1 = vsel %vm1523_vm7, %v1247_v57, %v608_v46  ;;  %v357_v15 = vld [vmem:[%s1756_s2 + $0x20] sm:$0xf]  ;;  %v1612_v57 = vld [vmem:[%s1594_s22 + $0x4] sm:$0x1] }
  0x27   : > { %v1544_v3 = vpack.c.b16 %v1530_v52, %v1518_v43  ;;  %v374_v4 = vsel %vm1456_vm4, %v369_v55, %v373_v39  ;;  %v900_v5 = vsel %vm498_vm0, %v355_v51, 0  ;;  %v959_v18 = vsel %vm498_vm0, %v356_v0, 0 }
  0x28   : > { %v388_v6 = vsel %vm1456_vm4, %v383_v59, %v387_v56  ;;  %v473_v8 = vunpack.c.l.b16 %v374_v4  ;;  %v1555_v14 = vsel %vm1523_vm7, %v1248_v63, %v612_v49  ;;  %909 = vmatpush.bf16.msra.mxu2 %v900_v5  ;;  %v854_v19 = vsel %vm498_vm0, %v354_v2, 0 }
  0x29   : > { %1242 = vmatmul.msk.bf16.vlgmr.msra.gmra.mxu3 %vm485_vm3, %v1544_v3  ;;  %v474_v17 = vunpack.c.l.b16 %v388_v6  ;;  %v638_v22 = vunpack.c.l.b16 %v609_v1  ;;  %v639_v23 = vunpack.c.l.b16 %v1555_v14  ;;  %863 = vmatpush.bf16.msra.mxu1 %v854_v19  ;;  %v547_v25 = vpack.c.b16 %v540_v62, %v539_v60 }
  0x2a   : > { %968 = vmatpush.bf16.msra.mxu3 %v959_v18  ;;  %v1009_v28 = vsel %vm498_vm0, %v357_v15, 0  ;;  %v541_v31 = vunpack.c.l.b16 %v1417_v10  ;;  %v1249_v32 = vrot.slane %v1417_v10, 9  ;;  %v616_v33 = vrot.slane %v1420_v11, 5 }
  0x2b   : > { %v481_v24 = vpack.c.b16 %v474_v17, %v473_v8  ;;  %v646_v30 = vpack.c.b16 %v639_v23, %v638_v22  ;;  %v1250_v34 = vrot.slane %v1423_v12, 9  ;;  %v620_v35 = vrot.slane %v1426_v13, 5 }
  0x2c   : > { %v704_v38 = vpack.c.b16 %v541_v31, %v540_v62  ;;  %v542_v39 = vunpack.c.l.b16 %v1423_v12  ;;  %v1579_v40 = vsel %vm1523_vm7, %v1249_v32, %v616_v33  ;;  %v775_v10 = vpack.c.b16 %v1477_v58, %v474_v17  ;;  %v1601_v58 = vld [vmem:[%s1594_s22] sm:$0xf]  ;;  %v347_v33 = vld [vmem:[%s1594_s22 + $0x8] sm:$0xf] }
  0x2d   : > { %1239 = vmatmul.msk.bf16.vlgmr.msra.gmra.mxu0 %vm485_vm3, %v481_v24  ;;  %v1583_v41 = vsel %vm1523_vm7, %v1250_v34, %v620_v35  ;;  %v640_v11 = vunpack.c.l.b16 %v1579_v40  ;;  %v761_v45 = vshrl.u32 %v1601_v58, 16  ;;  %v764_v46 = vshll.u32 %v1601_v58, 16 }
  0x2e   : > { %1018 = vmatpush.bf16.msra.mxu0 %v1009_v28  ;;  %v641_v13 = vunpack.c.l.b16 %v1583_v41  ;;  %v548_v44 = vpack.c.b16 %v542_v39, %v541_v31  ;;  %v543_v47 = vunpack.c.l.b16 %v1435_v20  ;;  %v1251_v48 = vrot.slane %v1435_v20, 9 }
  0x2f   : > { %1243 = vmatmul.msk.bf16.vlgmr.msrb.gmra.mxu1 %vm485_vm3, %v547_v25  ;;  %v763_v49 = vrot.slane %v761_v45, 4  ;;  %v624_v51 = vrot.slane %v1438_v21, 5  ;;  %v1252_v55 = vrot.slane %v1441_v26, 9  ;;  %v628_v56 = vrot.slane %v1444_v29, 5 }
  0x30   : > { %v647_v12 = vpack.c.b16 %v641_v13, %v640_v11  ;;  %v766_v59 = vrot.slane %v764_v46, 5  ;;  %v770_v60 = vshll.u32 %v1612_v57, 16  ;;  %v705_v62 = vpack.c.b16 %v543_v47, %v542_v39 }
  0x31   : > { %v544_v2 = vunpack.c.l.b16 %v1441_v26  ;;  %v625_v20 = vsel %vm1523_vm7, %v1251_v48, %v624_v51  ;;  %v1620_v21 = vsel %vm1523_vm7, %v1252_v55, %v628_v56  ;;  %v776_v29 = vpack.c.b16 %v1496_v9, %v1479_v61 }
  0x32   : > { %1255 = vmatmul.msk.bf16.vlgmr.msrb.gmra.mxu2 %vm485_vm3, %v646_v30  ;;  %v767_v63 = vor.u32 %v766_v59, %v763_v49  ;;  %v772_v0 = vrot.slane %v770_v60, 5  ;;  %v642_v5 = vunpack.c.l.b16 %v625_v20  ;;  %v643_v6 = vunpack.c.l.b16 %v1620_v21 }
  0x33   : > { %v549_v8 = vpack.c.b16 %v544_v2, %v543_v47  ;;  %v545_v18 = vunpack.c.l.b16 %v1452_v36  ;;  %v1253_v61 = vrot.slane %v1452_v36, 9  ;;  %v632_v9 = vrot.slane %v1462_v42, 5 }
  0x34   : > { %v768_v4 = vrot.slane %v767_v63, 4  ;;  %v648_v17 = vpack.c.b16 %v643_v6, %v642_v5  ;;  %v1254_v19 = vrot.slane %v1468_v53, 9  ;;  %v636_v22 = vrot.slane %v1471_v54, 5 }
  0x35   : > { %v706_v24 = vpack.c.b16 %v545_v18, %v544_v2  ;;  %v633_v25 = vsel %vm1523_vm7, %v1253_v61, %v632_v9  ;;  %v777_v36 = vpack.c.b16 %v1518_v43, %v1501_v16  ;;  %v837_v16 = vpack.c.b16 %v640_v11, %v639_v23 }
  0x36   : > { %v773_v1 = vsel %vm1456_vm4, %v768_v4, %v772_v0  ;;  %v637_v28 = vsel %vm1523_vm7, %v1254_v19, %v636_v22  ;;  %v644_v30 = vunpack.c.l.b16 %v633_v25  ;;  %v838_v43 = vpack.c.b16 %v642_v5, %v641_v13 }
  0x37   : > { %v1628_v26 = vunpack.c.l.b16 %v773_v1  ;;  %v645_v42 = vunpack.c.l.b16 %v637_v28  ;;  %v940_v34 = vshrl.u32 %v347_v33, 16  ;;  %v943_v35 = vshll.u32 %v347_v33, 16 }
  0x38   : > { %v839_v51 = vpack.c.b16 %v644_v30, %v643_v6  ;;  %v894_v37 = vunpack.c.l.b16 %v347_v33  ;;  %vm1048_vm8 = vcmask 130048   ;;  %vm1070_vm9 = vcmask 122880  }
  0x39   : > { %1259 = vmatmul.msk.bf16.vlgmr.msrb.gmra.mxu3 %vm485_vm3, %v704_v38  ;;  %v778_v15 = vpack.c.b16 %v1628_v26, %v1530_v52  ;;  %v546_v52 = vunpack.c.l.b16 %v1468_v53  ;;  %v649_v54 = vpack.c.b16 %v645_v42, %v644_v30  ;;  %v703_v53 = vunpack.c.l.b16 %v1601_v58  ;;  %v348_v38 = vld [vmem:[%s1594_s22 + $0xc] sm:$0x1] }
  0x3a   : > { %v942_v14 = vrot.slane %v940_v34, 4  ;;  %v945_v23 = vrot.slane %v943_v35, 5  ;;  %v949_v40 = vshll.u32 %v348_v38, 16  ;;  %v1001_v45 = vrot.slane %v348_v38, 5 }
  0x3b   : > { %v550_v31 = vpack.c.b16 %v546_v52, %v545_v18  ;;  %v707_v32 = vpack.c.b16 %v703_v53, %v546_v52 }
  0x3c   : > { %v946_v39 = vor.u32 %v945_v23, %v942_v14  ;;  %v951_v11 = vrot.slane %v949_v40, 5 }
  0x3d   : > { %1263 = vmatmul.msk.bf16.vlgmr.msrb.gmra.mxu0 %vm485_vm3, %v775_v10  ;;  %v1267_v10 = vrot.slane %v1601_v58, 9 }
  0x3e   : > { %v947_v41 = vrot.slane %v946_v39, 4 }
  0x3f   : > { %1244 = vmatmul.msk.bf16.gmra.mxu1 %vm485_vm3, %v548_v44 }
  0x42   : > { %1256 = vmatmul.msk.bf16.gmra.mxu2 %vm485_vm3, %v647_v12 }
  0x49   : > { %1260 = vmatmul.msk.bf16.gmra.mxu3 %vm485_vm3, %v705_v62 }
  0x4d   : > { %1264 = vmatmul.msk.bf16.gmra.mxu0 %vm485_vm3, %v776_v29 }
  0x4f   : > { %1245 = vmatmul.msk.bf16.gmra.mxu1 %vm485_vm3, %v549_v8 }
  0x52   : > { %1257 = vmatmul.msk.bf16.gmra.mxu2 %vm485_vm3, %v648_v17 }
  0x59   : > { %1261 = vmatmul.msk.bf16.gmra.mxu3 %vm485_vm3, %v706_v24 }
  0x5d   : > { %1265 = vmatmul.msk.bf16.gmra.mxu0 %vm485_vm3, %v777_v36 }
  0x5f   : > { %1246 = vmatmul.msk.bf16.gmra.mxu1 %vm485_vm3, %v550_v31 }
  0x62   : > { %1258 = vmatmul.msk.bf16.gmra.mxu2 %vm485_vm3, %v649_v54 }
  0x69   : > { %1262 = vmatmul.msk.bf16.gmra.mxu3 %vm485_vm3, %v707_v32 }
  0x6d   : > { %1266 = vmatmul.msk.bf16.gmra.mxu0 %vm485_vm3, %v778_v15 }
  0x6f   : > { %1268 = vmatmul.msk.bf16.vlgmr.msra.gmra.mxu1 %vm485_vm3, %v837_v16 }
  0x72   : > { %1272 = vmatmul.msk.bf16.vlgmr.msra.gmra.mxu2 %vm485_vm3, %v548_v44  ;;  %v952_v44 = vsel %vm1456_vm4, %v947_v41, %v951_v11 }
  0x73   : > { %v953_v46 = vunpack.c.l.b16 %v952_v44 }
  0x75   : > { %v954_v48 = vpack.c.b16 %v953_v46, %v1628_v26 }
  0x79   : > { %1276 = vmatmul.msk.bf16.vlgmr.msra.gmra.mxu3 %vm485_vm3, %v1492_v7  ;;  %v834_v7 = vrot.slane %v1612_v57, 5 }
  0x7b   : > { %v835_v13 = vsel %vm1523_vm7, %v1267_v10, %v834_v7 }
  0x7c   : > { %v836_v58 = vunpack.c.l.b16 %v835_v13 }
  0x7d   : > { %1281 = vmatmul.msk.bf16.vlgmr.msra.gmra.mxu0 %vm485_vm3, %v647_v12  ;;  %v1280_v12 = vrot.slane %v347_v33, 9 }
  0x7e   : > { %v840_v50 = vpack.c.b16 %v836_v58, %v645_v42 }
  0x7f   : > { %1269 = vmatmul.msk.bf16.gmra.mxu1 %vm485_vm3, %v838_v43  ;;  %v1002_v47 = vsel %vm1523_vm7, %v1280_v12, %v1001_v45 }
  0x80   : > { %v1003_v49 = vunpack.c.l.b16 %v1002_v47 }
  0x82   : > { %1273 = vmatmul.msk.bf16.gmra.mxu2 %vm485_vm3, %v549_v8  ;;  %v1004_v55 = vpack.c.b16 %v1003_v49, %v836_v58 }
  0x89   : > { %1277 = vmatmul.msk.bf16.gmra.mxu3 %vm485_vm3, %v1509_v27  ;;  %v895_v27 = vpack.c.b16 %v894_v37, %v703_v53 }
  0x8d   : > { %1282 = vmatmul.msk.bf16.gmra.mxu0 %vm485_vm3, %v648_v17 }
  0x8f   : > { %1270 = vmatmul.msk.bf16.gmra.mxu1 %vm485_vm3, %v839_v51 }
  0x92   : > { %1274 = vmatmul.msk.bf16.gmra.mxu2 %vm485_vm3, %v550_v31 }
  0x99   : > { %1278 = vmatmul.msk.bf16.gmra.mxu3 %vm485_vm3, %v1544_v3 }
  0x9c   : > { %v516_v56 = vpop.f32.mrf.mxu1 }
  0x9d   : > { %1283 = vmatmul.msk.bf16.gmra.mxu0 %vm485_vm3, %v649_v54 }
  0x9f   : > { %1271 = vmatmul.msk.bf16.gmra.mxu1 %vm485_vm3, %v840_v50 }
  0xa2   : > { %1275 = vmatmul.msk.bf16.gmra.mxu2 %vm485_vm3, %v895_v27 }
  0xa4   : > { %v518_v57 = vpop.f32.mrf.mxu1 }
  0xa5   : > { %v521_v59 = vpop.f32.mrf.mxu2 }
  0xa9   : > { %1279 = vmatmul.msk.bf16.gmra.mxu3 %vm485_vm3, %v954_v48 }
  0xaa   : > { %v511_v60 = vpop.f32.mrf.mxu0 }
  0xac   : > { %v1687_v62 = vpop.f32.mrf.mxu3  ;;  %v575_v63 = vpop.f32.mrf.mxu1 }
  0xad   : > { %1284 = vmatmul.msk.bf16.gmra.mxu0 %vm485_vm3, %v1004_v55  ;;  %v523_v3 = vpop.f32.mrf.mxu2  ;;  %v576_v0 = vadd.f32 %v575_v63, %v511_v60 }
  0xb2   : > { %v513_v2 = vpop.f32.mrf.mxu0 }
  0xb4   : > { %v1690_v20 = vpop.f32.mrf.mxu3  ;;  %v577_v21 = vpop.f32.mrf.mxu1 }
  0xb5   : > { %v674_v4 = vpop.f32.mrf.mxu2  ;;  %v578_v29 = vadd.f32 %v577_v21, %v513_v2 }
  0xb6   : > { %v694_v1 = vadd.f32 %v674_v4, %v576_v0 }
  0xba   : > { %v803_v5 = vpop.f32.mrf.mxu0 }
  0xbc   : > { %v732_v6 = vpop.f32.mrf.mxu3  ;;  %v580_v26 = vpop.f32.mrf.mxu1 }
  0xbd   : > { %v752_v8 = vadd.f32 %v732_v6, %v694_v1  ;;  %v676_v15 = vpop.f32.mrf.mxu2  ;;  %v581_v17 = vadd.f32 %v580_v26, %v516_v56 }
  0xbe   : > { %v695_v18 = vadd.f32 %v676_v15, %v578_v29 }
  0xbf   : > { %v823_v61 = vadd.f32 %v803_v5, %v752_v8 }
  0xc2   : > { %v805_v9 = vpop.f32.mrf.mxu0 }
  0xc4   : > { %v734_v19 = vpop.f32.mrf.mxu3  ;;  %v582_v22 = vpop.f32.mrf.mxu1 }
  0xc5   : > { %v753_v24 = vadd.f32 %v734_v19, %v695_v18  ;;  %v679_v52 = vpop.f32.mrf.mxu2  ;;  %v583_v25 = vadd.f32 %v582_v22, %v518_v57 }
  0xc6   : > { %v696_v28 = vadd.f32 %v679_v52, %v581_v17 }
  0xc7   : > { %v824_v36 = vadd.f32 %v805_v9, %v753_v24 }
  0xca   : > { %v808_v30 = vpop.f32.mrf.mxu0 }
  0xcc   : > { %v737_v42 = vpop.f32.mrf.mxu3  ;;  %v585_v31 = vpop.f32.mrf.mxu1 }
  0xcd   : > { %v754_v54 = vadd.f32 %v737_v42, %v696_v28  ;;  %v681_v53 = vpop.f32.mrf.mxu2  ;;  %v586_v32 = vadd.f32 %v585_v31, %v521_v59 }
  0xce   : > { %v697_v16 = vadd.f32 %v681_v53, %v583_v25 }
  0xcf   : > { %v825_v43 = vadd.f32 %v808_v30, %v754_v54 }
  0xd2   : > { %v810_v33 = vpop.f32.mrf.mxu0 }
  0xd4   : > { %v739_v34 = vpop.f32.mrf.mxu3  ;;  %v587_v35 = vpop.f32.mrf.mxu1 }
  0xd5   : > { %v755_v14 = vadd.f32 %v739_v34, %v697_v16  ;;  %v684_v23 = vpop.f32.mrf.mxu2  ;;  %v588_v38 = vadd.f32 %v587_v35, %v523_v3 }
  0xd6   : > { %v698_v39 = vadd.f32 %v684_v23, %v586_v32 }
  0xd7   : > { %v826_v40 = vadd.f32 %v810_v33, %v755_v14 }
  0xda   : > { %v813_v10 = vpop.f32.mrf.mxu0 }
  0xdc   : > { %v742_v7 = vpop.f32.mrf.mxu3  ;;  %v1692_v41 = vpop.f32.mrf.mxu1 }
  0xdd   : > { %v756_v11 = vadd.f32 %v742_v7, %v698_v39  ;;  %v686_v13 = vpop.f32.mrf.mxu2 }
  0xde   : > { %v699_v44 = vadd.f32 %v686_v13, %v588_v38 }
  0xdf   : > { %v827_v12 = vadd.f32 %v813_v10, %v756_v11 }
  0xe2   : > { %v815_v45 = vpop.f32.mrf.mxu0 }
  0xe4   : > { %v744_v46 = vpop.f32.mrf.mxu3  ;;  %v1694_v47 = vpop.f32.mrf.mxu1 }
  0xe5   : > { %v757_v58 = vadd.f32 %v744_v46, %v699_v44  ;;  %v1696_v48 = vpop.f32.mrf.mxu2 }
  0xe7   : > { %v1698_v49 = vadd.f32 %v815_v45, %v757_v58 }
  0xea   : > { %v1700_v51 = vpop.f32.mrf.mxu0 }
  0xec   : > { %v1702_v55 = vpop.f32.mrf.mxu3  ;;  %v865_v37 = vpop.f32.mrf.mxu1 }
  0xed   : > { %v1704_v50 = vpop.f32.mrf.mxu2  ;;  %v885_v60 = vadd.f32 %v865_v37, %v823_v61 }
  0xf2   : > { %v1706_v56 = vpop.f32.mrf.mxu0 }
  0xf4   : > { %v1708_v27 = vpop.f32.mrf.mxu3  ;;  %v867_v57 = vpop.f32.mrf.mxu1 }
  0xf5   : > { %v911_v59 = vpop.f32.mrf.mxu2  ;;  %v886_v29 = vadd.f32 %v867_v57, %v824_v36 }
  0xf6   : > { %v931_v3 = vadd.f32 %v911_v59, %v885_v60  ;;  %v591_v59 = vadd.f32 %v1692_v41, %v1687_v62  ;;  %v593_v41 = vadd.f32 %v1694_v47, %v1690_v20 }
  0xfa   : > { %v1020_v63 = vpop.f32.mrf.mxu0 }
  0xfc   : > { %v970_v0 = vpop.f32.mrf.mxu3  ;;  %v870_v2 = vpop.f32.mrf.mxu1 }
  0xfd   : > { %v913_v21 = vpop.f32.mrf.mxu2  ;;  %v990_v4 = vadd.f32 %v970_v0, %v931_v3  ;;  %v887_v19 = vadd.f32 %v870_v2, %v825_v43  ;;  %v700_v0 = vadd.f32 %v1696_v48, %v591_v59 }
  0xfe   : > { %v932_v1 = vadd.f32 %v913_v21, %v886_v29 }
  0xff   : > { %v1040_v6 = vadd.f32 %v1020_v63, %v990_v4  ;;  %v758_v29 = vadd.f32 %v1702_v55, %v700_v0 }
 0x101   : > { %v1072_v18 = vmul.f32 %v1040_v6, %v1040_v6  ;;  %v1049_v61 = vsel %vm1048_vm8, %v1040_v6, 0.0 }
 0x102   : > { %v1022_v5 = vpop.f32.mrf.mxu0 }
 0x103   : > { %v1080_v36 = vsel %vm1048_vm8, %v1072_v18, 0.0  ;;  %v701_v18 = vadd.f32 %v1704_v50, %v593_v41 }
 0x104   : > { %v972_v26 = vpop.f32.mrf.mxu3  ;;  %v872_v8 = vpop.f32.mrf.mxu1 }
 0x105   : > { %v991_v15 = vadd.f32 %v972_v26, %v932_v1  ;;  %v916_v17 = vpop.f32.mrf.mxu2  ;;  %v888_v33 = vadd.f32 %v872_v8, %v826_v40 }
 0x106   : > { %v933_v52 = vadd.f32 %v916_v17, %v887_v19 }
 0x107   : > { %v1041_v9 = vadd.f32 %v1022_v5, %v991_v15 }
 0x109   : > { %v1050_v22 = vsel %vm1048_vm8, %v1041_v9, 0.0  ;;  %v1073_v24 = vmul.f32 %v1041_v9, %v1041_v9 }
 0x10a   : > { %v1051_v25 = vadd.f32 %v1050_v22, %v1049_v61  ;;  %v1025_v28 = vpop.f32.mrf.mxu0  ;;  %v759_v22 = vadd.f32 %v1708_v27, %v701_v18 }
 0x10b   : > { %v1081_v30 = vsel %vm1048_vm8, %v1073_v24, 0.0 }
 0x10c   : > { %v1082_v42 = vadd.f32 %v1081_v30, %v1080_v36  ;;  %v975_v31 = vpop.f32.mrf.mxu3  ;;  %v875_v32 = vpop.f32.mrf.mxu1 }
 0x10d   : > { %v992_v54 = vadd.f32 %v975_v31, %v933_v52  ;;  %v918_v53 = vpop.f32.mrf.mxu2  ;;  %v889_v44 = vadd.f32 %v875_v32, %v827_v12  ;;  %v830_v31 = vadd.f32 %v1706_v56, %v759_v22 }
 0x10e   : > { %v934_v35 = vadd.f32 %v918_v53, %v888_v33 }
 0x10f   : > { %v1042_v16 = vadd.f32 %v1025_v28, %v992_v54 }
 0x111   : > { %v1052_v43 = vsel %vm1048_vm8, %v1042_v16, 0.0  ;;  %v1074_v34 = vmul.f32 %v1042_v16, %v1042_v16 }
 0x112   : > { %v1053_v14 = vadd.f32 %v1052_v43, %v1051_v25  ;;  %v1027_v23 = vpop.f32.mrf.mxu0 }
 0x113   : > { %v1083_v38 = vsel %vm1048_vm8, %v1074_v34, 0.0 }
 0x114   : > { %v1084_v39 = vadd.f32 %v1083_v38, %v1082_v42  ;;  %v977_v10 = vpop.f32.mrf.mxu3  ;;  %v877_v45 = vpop.f32.mrf.mxu1 }
 0x115   : > { %v993_v7 = vadd.f32 %v977_v10, %v934_v35  ;;  %v921_v11 = vpop.f32.mrf.mxu2  ;;  %v890_v12 = vadd.f32 %v877_v45, %v1698_v49  ;;  %v829_v49 = vadd.f32 %v1700_v51, %v758_v29 }
 0x116   : > { %v935_v37 = vadd.f32 %v921_v11, %v889_v44 }
 0x117   : > { %v1043_v13 = vadd.f32 %v1027_v23, %v993_v7 }
 0x119   : > { %v1054_v46 = vsel %vm1048_vm8, %v1043_v13, 0.0  ;;  %v1075_v58 = vmul.f32 %v1043_v13, %v1043_v13 }
 0x11a   : > { %v1055_v40 = vadd.f32 %v1054_v46, %v1053_v14  ;;  %v1030_v57 = vpop.f32.mrf.mxu0 }
 0x11b   : > { %v1085_v60 = vsel %vm1048_vm8, %v1075_v58, 0.0 }
 0x11c   : > { %v1086_v63 = vadd.f32 %v1085_v60, %v1084_v39  ;;  %v980_v3 = vpop.f32.mrf.mxu3  ;;  %v880_v26 = vpop.f32.mrf.mxu1 }
 0x11d   : > { %v994_v2 = vadd.f32 %v980_v3, %v935_v37  ;;  %v923_v21 = vpop.f32.mrf.mxu2  ;;  %v891_v61 = vadd.f32 %v880_v26, %v829_v49 }
 0x11e   : > { %v936_v6 = vadd.f32 %v923_v21, %v890_v12 }
 0x11f   : > { %v1044_v4 = vadd.f32 %v1030_v57, %v994_v2 }
 0x121   : > { %v1056_v1 = vsel %vm1048_vm8, %v1044_v4, 0.0  ;;  %v1076_v5 = vmul.f32 %v1044_v4, %v1044_v4 }
 0x122   : > { %v1057_v8 = vadd.f32 %v1056_v1, %v1055_v40  ;;  %v1032_v62 = vpop.f32.mrf.mxu0 }
 0x123   : > { %v1087_v15 = vsel %vm1048_vm8, %v1076_v5, 0.0 }
 0x124   : > { %v1088_v48 = vadd.f32 %v1087_v15, %v1086_v63  ;;  %v982_v17 = vpop.f32.mrf.mxu3  ;;  %v882_v47 = vpop.f32.mrf.mxu1 }
 0x125   : > { %v995_v9 = vadd.f32 %v982_v17, %v936_v6  ;;  %v926_v55 = vpop.f32.mrf.mxu2  ;;  %v892_v53 = vadd.f32 %v882_v47, %v830_v31 }
 0x126   : > { %v937_v25 = vadd.f32 %v926_v55, %v891_v61 }
 0x127   : > { %v1045_v19 = vadd.f32 %v1032_v62, %v995_v9 }
 0x129   : > { %v1058_v24 = vsel %vm1048_vm8, %v1045_v19, 0.0  ;;  %v1077_v52 = vmul.f32 %v1045_v19, %v1045_v19 }
 0x12a   : > { %v1059_v28 = vadd.f32 %v1058_v24, %v1057_v8  ;;  %v1035_v30 = vpop.f32.mrf.mxu0 }
 0x12b   : > { %v1089_v20 = vsel %vm1048_vm8, %v1077_v52, 0.0 }
 0x12c   : > { %v1090_v36 = vadd.f32 %v1089_v20, %v1088_v48  ;;  %v985_v42 = vpop.f32.mrf.mxu3 }
 0x12d   : > { %v996_v50 = vadd.f32 %v985_v42, %v937_v25  ;;  %v928_v51 = vpop.f32.mrf.mxu2 }
 0x12e   : > { %v938_v16 = vadd.f32 %v928_v51, %v892_v53 }
 0x12f   : > { %v1046_v54 = vadd.f32 %v1035_v30, %v996_v50 }
 0x131   : > { %v1060_v32 = vsel %vm1048_vm8, %v1046_v54, 0.0  ;;  %v1078_v27 = vmul.f32 %v1046_v54, %v1046_v54 }
 0x132   : > { %v1061_v33 = vadd.f32 %v1060_v32, %v1059_v28  ;;  %v1037_v23 = vpop.f32.mrf.mxu0 }
 0x133   : > { %v1091_v43 = vsel %vm1048_vm8, %v1078_v27, 0.0 }
 0x134   : > { %v1092_v34 = vadd.f32 %v1091_v43, %v1090_v36  ;;  %v987_v35 = vpop.f32.mrf.mxu3 }
 0x135   : > { %v997_v14 = vadd.f32 %v987_v35, %v938_v16 }
 0x137   : > { %v1047_v38 = vadd.f32 %v1037_v23, %v997_v14 }
 0x139   : > { %v1062_v39 = vsel %vm1048_vm8, %v1047_v38, 0.0  ;;  %v1079_v10 = vmul.f32 %v1047_v38, %v1047_v38 }
 0x13a   : > { %v1063_v56 = vadd.f32 %v1062_v39, %v1061_v33 }
 0x13b   : > { %v1093_v7 = vsel %vm1048_vm8, %v1079_v10, 0.0 }
 0x13c   : > { %v1064_v11 = vrot.slane %v1063_v56, 4  ;;  %v1094_v13 = vadd.f32 %v1093_v7, %v1092_v34 }
 0x13e   : > { %v1065_v44 = vadd.f32 %v1064_v11, %v1063_v56  ;;  %v1095_v45 = vrot.slane %v1094_v13, 4 }
 0x140   : > { %v1066_v46 = vrot.slane %v1065_v44, 2  ;;  %v1096_v58 = vadd.f32 %v1095_v45, %v1094_v13 }
 0x142   : > { %v1067_v37 = vadd.f32 %v1066_v46, %v1065_v44  ;;  %v1097_v40 = vrot.slane %v1096_v58, 2 }
 0x144   : > { %v1068_v57 = vrot.slane %v1067_v37, 1  ;;  %v1098_v59 = vadd.f32 %v1097_v40, %v1096_v58 }
 0x146   : > { %v1069_v60 = vadd.f32 %v1068_v57, %v1067_v37  ;;  %v1099_v63 = vrot.slane %v1098_v59, 1 }
 0x148   : > { %1071 = vst.msk [vmem:[%s321_s25] sm:$0x1] %vm1070_vm9, %v1069_v60  ;;  %v1100_v3 = vadd.f32 %v1099_v63, %v1098_v59 }
 0x14a   : > { %1101 = vst.msk [vmem:[%s327_s28] sm:$0x1] %vm1070_vm9, %v1100_v3 }
 0x14b PF: > { %s15_s17 = sadd.s32 1, %s1341_s17   ;;  %s1763_s15 = smov %s1337_s16 }
 0x14c   : > { %p12_p5 = scmp.ge.s32.totalorder %s15_s17, 4   ;;  %s1764_s16 = smov %s1766_s18 }
 0x14e   :  { %14 = sbr.rel (!%p12_p5) target bundleno = 2 (0x2), region = 77 }

// kernel: _lambda_.9
= control target key start
LH: loop header
LB: loop body
LE: loop exit
PB: predicated region body
PF: predicated region fallthrough
CT: control target
= control target key end

     0   :  { %s2271_s18 = smov 0   ;;  %s2273_s19 = smov 0   ;;  %s2998_s0 = inlined_call_operand.vmem [shape: bf16[2,18,18,4], index: 0, kind: input, shape index: {}, may-alias: {0,1}]   ;;  %s2999_s1 = inlined_call_operand.vmem [shape: bf16[2,18,18,4], index: 1, kind: input, shape index: {}, may-alias: {0,1}]   ;;  %s3000_s2 = inlined_call_operand.vmem [shape: bf16[3,3,4,8], index: 2, kind: input, shape index: {}]   ;;  %s3001_s3 = inlined_call_operand.vmem [shape: f32[1,8], index: 3, kind: input, shape index: {}]   ;;  %s3002_s4 = inlined_call_operand.vmem [shape: f32[1,8], index: 4, kind: input, shape index: {}]   ;;  %s3003_s5 = inlined_call_operand.vmem [shape: f32[2,8,8,8], index: 5, kind: output, shape index: {}]  }
   0x1   :  { %s2275_s20 = smov 0   ;;  %s2277_s21 = smov 0  }
   0x2   :  { %s2279_s22 = smov 0  }
   0x3 LB: > { %s24_s23 = sadd.s32 1, %s2231_s20  ;;  %s27_s24 = sadd.s32 1, %s2235_s21  ;;  %s2239_s22 = sphi %s2279_s22, %s15_s22   ;;  %s2235_s21 = sphi %s2277_s21, %s3011_s21   ;;  %s2231_s20 = sphi %s2275_s20, %s3010_s20   ;;  %s2227_s19 = sphi %s2273_s19, %s3009_s19   ;;  %s2223_s18 = sphi %s2271_s18, %s3008_s18  }
   0x4   : > { %p25_p0 = scmp.ge.s32.totalorder %s24_s23, 2  ;;  %p1969_p1 = scmp.ge.s32.totalorder %s2239_s22, 1 }
   0x5   : > { %p245_p2 = scmp.lt.s32.totalorder %s2239_s22, 5 }
   0x6   : > { %s3013_s23 = smov (%p25_p0, %s24_s23), 0  ;;  %s3015_s24 = smov (!%p25_p0, %s27_s24), %s2235_s21 }
   0x7   : > { %p246_p3 = pnand %p1969_p1, %p245_p2  ;;  %p29_p4 = scmp.ge.s32.totalorder %s3015_s24, 2 }
   0x8   : > { %s2307_s27 = sshll.u32 (!%p246_p3), %s2223_s18, 3  ;;  %p305_p5 = scmp.lt.s32.totalorder (!%p246_p3), %s2227_s19, 1 }
   0x9   : > { %s3017_s24 = smov (%p29_p4, %s3015_s24), 0  ;;  %249 = sbr.rel (%p246_p3) target bundleno = 485 (0x1e5), region = 40 }
   0xa   : > { %p307_p6 = scmp.lt.s32.totalorder (!%p246_p3), %s2307_s27, 17  ;;  %s2152_s26 = sadd.s32 (!%p246_p3), 8, %s2307_s27 }
   0xb   : > { %p325_p7 = scmp.lt.s32.totalorder (!%p246_p3), %s2152_s26, 17 }
   0xe   : > { %v377_v0 = vld [vmem:[%s3000_s2 + $0x2] sm:$0x3]  ;;  %vm629_vm0 = vcmask 1041408   ;;  %s3019_s19 = smov (!%p305_p5, %s2227_s19), 1  ;;  %v378_v2 = vld [vmem:[%s3000_s2 + $0x4] sm:$0x3] }
   0xf   : > { %v631_v1 = vsel %vm629_vm0, %v377_v0, 0  ;;  %s308_s30 = scalar_select %p307_p6, %s2307_s27, 17  ;;  %v914_v3 = vsel %vm629_vm0, %v378_v2, 0  ;;  %v379_v4 = vld [vmem:[%s3000_s2 + $0x6] sm:$0x3]  ;;  %vm604_vm3 = vcmask 31744  }
  0x10   : > { %2153 = vmatpush.bf16.msra.mxu1 %v631_v1  ;;  %2154 = vmatpush.bf16.msra.mxu2 %v631_v1  ;;  %s2157_s6 = smul.u32 54, %s3019_s19  ;;  %v376_v5 = vld [vmem:[%s3000_s2] sm:$0x3]  ;;  %v380_v6 = vld [vmem:[%s3000_s2 + $0x8] sm:$0x3]  ;;  %v990_v7 = vsel %vm629_vm0, %v379_v4, 0 }
  0x11   : > { %2155 = vmatpush.bf16.msra.mxu3 %v631_v1  ;;  %640 = vmatpush.bf16.msra.mxu0 %v631_v1  ;;  %s2156_s7 = smul.u32 3, %s308_s30  ;;  %v747_v8 = vsel %vm629_vm0, %v376_v5, 0  ;;  %v1088_v9 = vsel %vm629_vm0, %v380_v6, 0  ;;  %vm385_vm1 = vsmask.f32 3328  ;;  %s3021_s26 = smov (!%p325_p7, %s2152_s26), 17 }
  0x12   : > { %vm386_vm2 = vsmask.f32 7440  ;;  %s2158_s27 = smul.u32 3, %s3021_s26  ;;  %vm806_vm5 = vcmask 1042432   ;;  %vm807_vm6 = vcmask 1046532   ;;  %vm1805_vm8 = vcmask 1041409  }
  0x13   : > { %s311_s14 = sadd.s32 %s2157_s6, %s2156_s7  ;;  %vm2374_vm4 = vmor %vm385_vm1, %vm386_vm2  ;;  %vm1807_vm9 = vcmask 1042434   ;;  %vm1809_vm10 = vcmask 1043459   ;;  %vm1811_vm11 = vcmask 1044484   ;;  %vm1813_vm12 = vcmask 1045509  }
  0x14   : > { %923 = vmatpush.bf16.msrb.mxu2 %v914_v3  ;;  %s1971_s15 = sshll.u32 %s311_s14, 2  ;;  %756 = vmatpush.bf16.msrb.mxu1 %v747_v8  ;;  %s2482_s28 = sadd.s32 %s2158_s27, %s2157_s6  ;;  %vm2533_vm7 = vmor %vm806_vm5, %vm807_vm6  ;;  %vm1815_vm13 = vcmask 1046534   ;;  %vm1817_vm14 = vcmask 1047559   ;;  %vm1844_vm15 = vcmask 64512  }
  0x15   : > { %999 = vmatpush.bf16.msrb.mxu3 %v990_v7  ;;  %s2336_s25 = scalar_lea.vmem %s2998_s0, %s1971_s15  ;;  %1097 = vmatpush.bf16.msrb.mxu0 %v1088_v9  ;;  %s1974_s12 = sshll.u32 %s2482_s28, 2 }
  0x16   : > { %v2339_v10 = vld [vmem:[%s2336_s25 + $0x18] sm:$0xf]  ;;  %v2342_v11 = vld [vmem:[%s2336_s25 + $0x1c] sm:$0xf]  ;;  %v2345_v12 = vld [vmem:[%s2336_s25 + $0x20] sm:$0x1]  ;;  %s2665_s15 = scalar_lea.vmem %s2999_s1, %s1974_s12 }
  0x17   : > { %v437_v13 = vshrl.u32 %v2339_v10, 16  ;;  %v440_v14 = vshll.u32 %v2339_v10, 16  ;;  %v446_v15 = vshll.u32 %v2342_v11, 16  ;;  %v450_v16 = vshrl.u32 %v2342_v11, 16  ;;  %v2352_v17 = vld [vmem:[%s2336_s25 + $0x30] sm:$0xf] }
  0x18   : > { %v456_v18 = vshll.u32 %v2345_v12, 16  ;;  %v2356_v19 = vld [vmem:[%s2336_s25 + $0x34] sm:$0xf]  ;;  %v2359_v20 = vld [vmem:[%s2336_s25 + $0x38] sm:$0x1]  ;;  %v485_v21 = vshrl.u32 %v2352_v17, 16 }
  0x19   : > { %v439_v22 = vrot.slane %v437_v13, 4  ;;  %v442_v23 = vrot.slane %v440_v14, 5  ;;  %v448_v24 = vrot.slane %v446_v15, 5  ;;  %v452_v25 = vrot.slane %v450_v16, 4  ;;  %v2363_v26 = vld [vmem:[%s2336_s25 + $0x48] sm:$0xf] }
  0x1a   : > { %v458_v27 = vrot.slane %v456_v18, 5  ;;  %v487_v28 = vrot.slane %v485_v21, 4  ;;  %v488_v29 = vshll.u32 %v2352_v17, 16  ;;  %v494_v30 = vshll.u32 %v2356_v19, 16  ;;  %v2370_v35 = vld [vmem:[%s2336_s25 + $0x4c] sm:$0xf] }
  0x1b   : > { %v443_v31 = vor.u32 %v442_v23, %v439_v22  ;;  %v453_v32 = vor.u32 %v452_v25, %v448_v24  ;;  %v498_v33 = vshrl.u32 %v2356_v19, 16  ;;  %v504_v34 = vshll.u32 %v2359_v20, 16  ;;  %v2381_v46 = vld [vmem:[%s2336_s25 + $0x50] sm:$0x1]  ;;  %v2390_v54 = vld [vmem:[%s2336_s25] sm:$0xf] }
  0x1c   : > { %v490_v37 = vrot.slane %v488_v29, 5  ;;  %v496_v38 = vrot.slane %v494_v30, 5  ;;  %v533_v39 = vshrl.u32 %v2363_v26, 16  ;;  %v536_v40 = vshll.u32 %v2363_v26, 16  ;;  %v2398_v2 = vld [vmem:[%s2336_s25 + $0x4] sm:$0xf] }
  0x1d   : > { %v444_v41 = vrot.slane %v443_v31, 4  ;;  %v454_v42 = vrot.slane %v453_v32, 4  ;;  %v500_v43 = vrot.slane %v498_v33, 4  ;;  %v506_v44 = vrot.slane %v504_v34, 5  ;;  %v2404_v8 = vld [vmem:[%s2336_s25 + $0x8] sm:$0x1] }
  0x1e   : > { %v491_v45 = vor.u32 %v490_v37, %v487_v28  ;;  %v535_v47 = vrot.slane %v533_v39, 4  ;;  %v538_v48 = vrot.slane %v536_v40, 5  ;;  %v542_v49 = vshll.u32 %v2370_v35, 16  ;;  %v2412_v16 = vld [vmem:[%s2336_s25 + $0x24] sm:$0xf]  ;;  %s1975_s27 = sshll.u32 %s2223_s18, 2 }
  0x1f   : > { %v449_v50 = vsel %vm2374_vm4, %v444_v41, %v448_v24  ;;  %v459_v51 = vsel %vm2374_vm4, %v454_v42, %v458_v27  ;;  %v501_v52 = vor.u32 %v500_v43, %v496_v38  ;;  %v546_v53 = vshrl.u32 %v2370_v35, 16  ;;  %v2421_v29 = vld [vmem:[%s2336_s25 + $0x28] sm:$0xf]  ;;  %v2426_v33 = vld [vmem:[%s2336_s25 + $0x2c] sm:$0x1]  ;;  %p338_p8 = scmp.lt.s32.totalorder %s1975_s27, 7 }
  0x20   : > { %v584_v55 = vunpack.c.l.b16 %v449_v50  ;;  %v585_v56 = vunpack.c.l.b16 %v459_v51  ;;  %v492_v57 = vrot.slane %v491_v45, 4  ;;  %v539_v58 = vor.u32 %v538_v48, %v535_v47  ;;  %v2433_v41 = vld [vmem:[%s2336_s25 + $0x3c] sm:$0xf]  ;;  %v2441_v51 = vld [vmem:[%s2336_s25 + $0x40] sm:$0xf]  ;;  %s1976_s18 = sshll.u32 %s3019_s19, 3 }
  0x21   : > { %v502_v59 = vrot.slane %v501_v52, 4  ;;  %v544_v60 = vrot.slane %v542_v49, 5  ;;  %v548_v61 = vrot.slane %v546_v53, 4  ;;  %v552_v62 = vshll.u32 %v2381_v46, 16  ;;  %s3023_s27 = smov (!%p338_p8, %s1975_s27), 7 }
  0x22   : > { %v2393_v63 = vpack.c.b16 %v585_v56, %v584_v55  ;;  %v497_v0 = vsel %vm2374_vm4, %v492_v57, %v496_v38  ;;  %v540_v1 = vrot.slane %v539_v58, 4  ;;  %v389_v3 = vshrl.u32 %v2390_v54, 16  ;;  %v2444_v56 = vld [vmem:[%s2336_s25 + $0x44] sm:$0x1]  ;;  %s2904_s28 = sadd.s32 %s1976_s18, %s3023_s27 }
  0x23   : > { %v507_v4 = vsel %vm2374_vm4, %v502_v59, %v506_v44  ;;  %v588_v5 = vunpack.c.l.b16 %v497_v0  ;;  %v549_v6 = vor.u32 %v548_v61, %v544_v60  ;;  %v554_v7 = vrot.slane %v552_v62, 5  ;;  %v2453_v62 = vld [vmem:[%s2336_s25 + $0x54] sm:$0xf]  ;;  %s1977_s19 = sshll.u32 %s2904_s28, 3 }
  0x24   : > { %1980 = vmatmul.msk.bf16.vlgmr.msra.gmra.mxu1 %vm604_vm3, %v2393_v63  ;;  %v589_v9 = vunpack.c.l.b16 %v507_v4  ;;  %v545_v13 = vsel %vm2374_vm4, %v540_v1, %v544_v60  ;;  %v391_v14 = vrot.slane %v389_v3, 4  ;;  %v392_v15 = vshll.u32 %v2390_v54, 16  ;;  %s2916_s6 = scalar_lea.vmem %s3003_s5, %s1977_s19 }
  0x25   : > { %v550_v18 = vrot.slane %v549_v6, 4  ;;  %v592_v21 = vunpack.c.l.b16 %v545_v13  ;;  %v398_v22 = vshll.u32 %v2398_v2, 16  ;;  %v402_v23 = vshrl.u32 %v2398_v2, 16 }
  0x26   : > { %v2416_v24 = vpack.c.b16 %v589_v9, %v588_v5  ;;  %v394_v25 = vrot.slane %v392_v15, 5  ;;  %v408_v27 = vshll.u32 %v2404_v8, 16  ;;  %v814_v28 = vrot.slane %v2404_v8, 5 }
  0x27   : > { %v555_v30 = vsel %vm2374_vm4, %v550_v18, %v554_v7  ;;  %v400_v31 = vrot.slane %v398_v22, 5  ;;  %v404_v32 = vrot.slane %v402_v23, 4  ;;  %v461_v34 = vshrl.u32 %v2412_v16, 16 }
  0x28   : > { %1982 = vmatmul.msk.bf16.vlgmr.msra.gmra.mxu2 %vm604_vm3, %v2416_v24  ;;  %v593_v37 = vunpack.c.l.b16 %v555_v30  ;;  %v395_v38 = vor.u32 %v394_v25, %v391_v14  ;;  %v410_v39 = vrot.slane %v408_v27, 5  ;;  %v464_v40 = vshll.u32 %v2412_v16, 16  ;;  %v2465_v27 = vld [vmem:[%s2336_s25 + $0x58] sm:$0xf]  ;;  %v2468_v30 = vld [vmem:[%s2336_s25 + $0x5c] sm:$0x1] }
  0x29   : > { %v405_v42 = vor.u32 %v404_v32, %v400_v31  ;;  %v463_v43 = vrot.slane %v461_v34, 4  ;;  %v470_v44 = vshll.u32 %v2421_v29, 16  ;;  %v474_v45 = vshrl.u32 %v2421_v29, 16 }
  0x2a   : > { %v2437_v47 = vpack.c.b16 %v593_v37, %v592_v21  ;;  %v396_v48 = vrot.slane %v395_v38, 4  ;;  %v466_v49 = vrot.slane %v464_v40, 5  ;;  %v480_v50 = vshll.u32 %v2426_v33, 16  ;;  %v2473_v38 = vld [vmem:[%s2336_s25 + $0xc] sm:$0xf] }
  0x2b   : > { %v406_v52 = vrot.slane %v405_v42, 4  ;;  %v472_v53 = vrot.slane %v470_v44, 5  ;;  %v476_v55 = vrot.slane %v474_v45, 4  ;;  %v509_v57 = vshrl.u32 %v2433_v41, 16 }
  0x2c   : > { %1984 = vmatmul.msk.bf16.vlgmr.msra.gmra.mxu3 %vm604_vm3, %v2437_v47  ;;  %v401_v58 = vsel %vm2374_vm4, %v396_v48, %v400_v31  ;;  %v467_v59 = vor.u32 %v466_v49, %v463_v43  ;;  %v482_v60 = vrot.slane %v480_v50, 5  ;;  %v512_v61 = vshll.u32 %v2433_v41, 16 }
  0x2d   : > { %v411_v0 = vsel %vm2374_vm4, %v406_v52, %v410_v39  ;;  %v580_v1 = vunpack.c.l.b16 %v401_v58  ;;  %v477_v3 = vor.u32 %v476_v55, %v472_v53  ;;  %v511_v4 = vrot.slane %v509_v57, 4  ;;  %v2489_v55 = vld [vmem:[%s2336_s25 + $0x10] sm:$0xf] }
  0x2e   : > { %v581_v5 = vunpack.c.l.b16 %v411_v0  ;;  %v468_v6 = vrot.slane %v467_v59, 4  ;;  %v514_v7 = vrot.slane %v512_v61, 5  ;;  %v518_v9 = vshll.u32 %v2441_v51, 16  ;;  %v2493_v0 = vld [vmem:[%s2336_s25 + $0x14] sm:$0x1] }
  0x2f   : > { %v478_v13 = vrot.slane %v477_v3, 4  ;;  %v522_v14 = vshrl.u32 %v2441_v51, 16  ;;  %v528_v15 = vshll.u32 %v2444_v56, 16  ;;  %v557_v18 = vshrl.u32 %v2453_v62, 16 }
  0x30   : > { %v596_v21 = vpack.c.b16 %v581_v5, %v580_v1  ;;  %v473_v22 = vsel %vm2374_vm4, %v468_v6, %v472_v53  ;;  %v515_v23 = vor.u32 %v514_v7, %v511_v4  ;;  %v520_v25 = vrot.slane %v518_v9, 5 }
  0x31   : > { %v483_v31 = vsel %vm2374_vm4, %v478_v13, %v482_v60  ;;  %v586_v32 = vunpack.c.l.b16 %v473_v22  ;;  %v524_v34 = vrot.slane %v522_v14, 4  ;;  %v530_v37 = vrot.slane %v528_v15, 5 }
  0x32   : > { %1978 = vmatmul.msk.bf16.vlgmr.msra.gmra.mxu0 %vm604_vm3, %v596_v21  ;;  %v587_v39 = vunpack.c.l.b16 %v483_v31  ;;  %v516_v40 = vrot.slane %v515_v23, 4  ;;  %v559_v42 = vrot.slane %v557_v18, 4  ;;  %v560_v43 = vshll.u32 %v2453_v62, 16  ;;  %v382_v31 = vld [vmem:[%s3000_s2 + $0xc] sm:$0x3] }
  0x33   : > { %v525_v44 = vor.u32 %v524_v34, %v520_v25  ;;  %v566_v45 = vshll.u32 %v2465_v27, 16  ;;  %v570_v48 = vshrl.u32 %v2465_v27, 16  ;;  %v576_v49 = vshll.u32 %v2468_v30, 16 }
  0x34   : > { %v2484_v50 = vpack.c.b16 %v587_v39, %v586_v32  ;;  %v521_v52 = vsel %vm2374_vm4, %v516_v40, %v520_v25  ;;  %v562_v53 = vrot.slane %v560_v43, 5  ;;  %v413_v57 = vshrl.u32 %v2473_v38, 16  ;;  %v383_v40 = vld [vmem:[%s3000_s2 + $0xe] sm:$0x3] }
  0x35   : > { %v526_v58 = vrot.slane %v525_v44, 4  ;;  %v590_v59 = vunpack.c.l.b16 %v521_v52  ;;  %v568_v60 = vrot.slane %v566_v45, 5  ;;  %v572_v61 = vrot.slane %v570_v48, 4 }
  0x36   : > { %1981 = vmatmul.msk.bf16.gmra.mxu1 %vm604_vm3, %v2484_v50  ;;  %v563_v1 = vor.u32 %v562_v53, %v559_v42  ;;  %v578_v3 = vrot.slane %v576_v49, 5  ;;  %v415_v4 = vrot.slane %v413_v57, 4  ;;  %v416_v5 = vshll.u32 %v2473_v38, 16  ;;  %v381_v42 = vld [vmem:[%s3000_s2 + $0xa] sm:$0x3] }
  0x37   : > { %v531_v6 = vsel %vm2374_vm4, %v526_v58, %v530_v37  ;;  %v573_v7 = vor.u32 %v572_v61, %v568_v60  ;;  %v422_v9 = vshll.u32 %v2489_v55, 16  ;;  %v426_v13 = vshrl.u32 %v2489_v55, 16  ;;  %v384_v57 = vld [vmem:[%s3000_s2 + $0x10] sm:$0x3] }
  0x38   : > { %v591_v14 = vunpack.c.l.b16 %v531_v6  ;;  %v564_v15 = vrot.slane %v563_v1, 4  ;;  %v418_v18 = vrot.slane %v416_v5, 5  ;;  %v432_v21 = vshll.u32 %v2493_v0, 16 }
  0x39   : > { %v574_v22 = vrot.slane %v573_v7, 4  ;;  %v424_v23 = vrot.slane %v422_v9, 5  ;;  %v428_v25 = vrot.slane %v426_v13, 4  ;;  %v2026_v52 = vrot.slane %v2390_v54, 9 }
  0x3a   : > { %v2506_v32 = vpack.c.b16 %v591_v14, %v590_v59  ;;  %v569_v34 = vsel %vm2374_vm4, %v564_v15, %v568_v60  ;;  %v419_v37 = vor.u32 %v418_v18, %v415_v4  ;;  %v434_v39 = vrot.slane %v432_v21, 5  ;;  %v2141_v15 = vld [vmem:[%s2336_s25] sm:$0xff] }
  0x3b   : > { %v579_v43 = vsel %vm2374_vm4, %v574_v22, %v578_v3  ;;  %v594_v44 = vunpack.c.l.b16 %v569_v34  ;;  %v429_v45 = vor.u32 %v428_v25, %v424_v23  ;;  %v811_v53 = vrot.slane %v2398_v2, 5 }
  0x3c   : > { %1983 = vmatmul.msk.bf16.gmra.mxu2 %vm604_vm3, %v2506_v32  ;;  %v595_v48 = vunpack.c.l.b16 %v579_v43  ;;  %v420_v49 = vrot.slane %v419_v37, 4  ;;  %v1246_v59 = vsel %vm629_vm0, %v382_v31, 0  ;;  %v1344_v60 = vsel %vm629_vm0, %v383_v40, 0 }
  0x3d   : > { %v430_v58 = vrot.slane %v429_v45, 4  ;;  %v1170_v61 = vsel %vm629_vm0, %v381_v42, 0  ;;  %v813_v2 = vrot.slane %v811_v53, 4  ;;  %1255 = vmatpush.bf16.msra.mxu2 %v1246_v59  ;;  %1353 = vmatpush.bf16.msra.mxu3 %v1344_v60  ;;  %v1426_v6 = vsel %vm629_vm0, %v384_v57, 0  ;;  %v2142_v42 = vld [vmem:[%s2336_s25 + $0xc] sm:$0xff] }
  0x3e   : > { %v2528_v1 = vpack.c.b16 %v595_v48, %v594_v44  ;;  %v425_v3 = vsel %vm2374_vm4, %v420_v49, %v424_v23  ;;  %1179 = vmatpush.bf16.msra.mxu1 %v1170_v61  ;;  %1435 = vmatpush.bf16.msra.mxu0 %v1426_v6  ;;  %v812_v9 = vsel %vm2533_vm7, %v2026_v52, %v811_v53  ;;  %v2028_v22 = vrot.slane %v2339_v10, 9 }
  0x3f   : > { %v435_v4 = vsel %vm2374_vm4, %v430_v58, %v434_v39  ;;  %v582_v5 = vunpack.c.l.b16 %v425_v3  ;;  %v815_v13 = vsel %vm2533_vm7, %v813_v2, %v814_v28  ;;  %v865_v18 = vunpack.c.l.b16 %v812_v9  ;;  %v2609_v3 = vld [vmem:[%s2336_s25 + $0x30] sm:$0xff] }
  0x40   : > { %1985 = vmatmul.msk.bf16.gmra.mxu3 %vm604_vm3, %v2528_v1  ;;  %v583_v7 = vunpack.c.l.b16 %v435_v4  ;;  %v866_v21 = vunpack.c.l.b16 %v815_v13  ;;  %v825_v23 = vrot.slane %v2342_v11, 5  ;;  %v828_v25 = vrot.slane %v2345_v12, 5  ;;  %v2629_v13 = vld [vmem:[%s2336_s25 + $0x3c] sm:$0xff] }
  0x41   : > { %v818_v34 = vrot.slane %v2489_v55, 5  ;;  %v2027_v10 = vrot.slane %v2473_v38, 9  ;;  %v821_v12 = vrot.slane %v2493_v0, 5  ;;  %v2029_v38 = vrot.slane %v2412_v16, 9  ;;  %v2584_v16 = vld [vmem:[%s2336_s25 + $0x18] sm:$0xff] }
  0x42   : > { %v597_v14 = vpack.c.b16 %v583_v7, %v582_v5  ;;  %v881_v31 = vpack.c.b16 %v866_v21, %v865_v18  ;;  %v826_v8 = vsel %vm2533_vm7, %v2028_v22, %v825_v23  ;;  %v827_v28 = vrot.slane %v825_v23, 4 }
  0x43   : > { %v869_v37 = vunpack.c.l.b16 %v826_v8  ;;  %v820_v11 = vrot.slane %v818_v34, 4  ;;  %v819_v55 = vsel %vm2533_vm7, %v2027_v10, %v818_v34  ;;  %v832_v0 = vrot.slane %v2421_v29, 5 }
  0x44   : > { %1979 = vmatmul.msk.bf16.gmra.mxu0 %vm604_vm3, %v597_v14  ;;  %v829_v39 = vsel %vm2533_vm7, %v827_v28, %v828_v25  ;;  %v867_v45 = vunpack.c.l.b16 %v819_v55  ;;  %v835_v49 = vrot.slane %v2426_v33, 5  ;;  %v2597_v33 = vld [vmem:[%s2336_s25 + $0x24] sm:$0xff]  ;;  %v839_v61 = vrot.slane %v2356_v19, 5 }
  0x45   : > { %v870_v40 = vunpack.c.l.b16 %v829_v39  ;;  %v822_v44 = vsel %vm2533_vm7, %v820_v11, %v821_v12  ;;  %v833_v53 = vsel %vm2533_vm7, %v2029_v38, %v832_v0  ;;  %v834_v57 = vrot.slane %v832_v0, 4  ;;  %v2649_v25 = vld [vmem:[%s2336_s25 + $0x48] sm:$0xff]  ;;  %v2670_v39 = vld [vmem:[%s2665_s15] sm:$0xf]  ;;  %v2691_v38 = vld [vmem:[%s2336_s25 + $0x54] sm:$0xff] }
  0x46   : > { %2018 = vmatmul.msk.bf16.vlgmr.msrb.gmra.mxu1 %vm604_vm3, %v2141_v15  ;;  %v868_v48 = vunpack.c.l.b16 %v822_v44  ;;  %v871_v58 = vunpack.c.l.b16 %v833_v53  ;;  %v2030_v2 = vrot.slane %v2352_v17, 9  ;;  %v841_v4 = vrot.slane %v839_v61, 4 }
  0x47   : > { %v2563_v43 = vpack.c.b16 %v870_v40, %v869_v37  ;;  %v836_v59 = vsel %vm2533_vm7, %v834_v57, %v835_v49  ;;  %v842_v5 = vrot.slane %v2359_v20, 5  ;;  %v846_v20 = vrot.slane %v2441_v51, 5  ;;  %v2673_v40 = vld [vmem:[%s2665_s15 + $0x4] sm:$0xf] }
  0x48   : > { %v2575_v52 = vpack.c.b16 %v868_v48, %v867_v45  ;;  %v872_v60 = vunpack.c.l.b16 %v836_v59  ;;  %v840_v6 = vsel %vm2533_vm7, %v2030_v2, %v839_v61  ;;  %v849_v18 = vrot.slane %v2444_v56, 5  ;;  %v2696_v61 = vld [vmem:[%s2665_s15 + $0x8] sm:$0x1] }
  0x49   : > { %v843_v19 = vsel %vm2533_vm7, %v841_v4, %v842_v5  ;;  %v873_v7 = vunpack.c.l.b16 %v840_v6  ;;  %v848_v15 = vrot.slane %v846_v20, 4  ;;  %v853_v56 = vrot.slane %v2370_v35, 5 }
  0x4a   : > { %v2586_v29 = vpack.c.b16 %v872_v60, %v871_v58  ;;  %v874_v9 = vunpack.c.l.b16 %v843_v19  ;;  %v856_v28 = vrot.slane %v2381_v46, 5  ;;  %v1058_v10 = vshrl.u32 %v2670_v39, 16 }
  0x4b   : > { %v850_v51 = vsel %vm2533_vm7, %v848_v15, %v849_v18  ;;  %v855_v8 = vrot.slane %v853_v56, 4  ;;  %v1061_v11 = vshll.u32 %v2670_v39, 16  ;;  %v1067_v12 = vshll.u32 %v2673_v40, 16 }
  0x4c   : > { %2034 = vmatmul.msk.bf16.vlgmr.msrb.gmra.mxu2 %vm604_vm3, %v881_v31  ;;  %v2623_v17 = vpack.c.b16 %v874_v9, %v873_v7  ;;  %v876_v23 = vunpack.c.l.b16 %v850_v51  ;;  %v2032_v31 = vrot.slane %v2363_v26, 9  ;;  %v860_v44 = vrot.slane %v2465_v27, 5 }
  0x4d   : > { %v857_v35 = vsel %vm2533_vm7, %v855_v8, %v856_v28  ;;  %v1071_v45 = vshrl.u32 %v2673_v40, 16  ;;  %v1060_v0 = vrot.slane %v1058_v10, 4  ;;  %v1063_v49 = vrot.slane %v1061_v11, 5  ;;  %v2728_v8 = vld [vmem:[%s2665_s15] sm:$0xff] }
  0x4e   : > { %v854_v37 = vsel %vm2533_vm7, %v2032_v31, %v853_v56  ;;  %v878_v46 = vunpack.c.l.b16 %v857_v35  ;;  %v1069_v53 = vrot.slane %v1067_v12, 5  ;;  %v2033_v57 = vrot.slane %v2453_v62, 9 }
  0x4f   : > { %v877_v26 = vunpack.c.l.b16 %v854_v37  ;;  %v862_v58 = vrot.slane %v860_v44, 4  ;;  %v863_v59 = vrot.slane %v2468_v30, 5  ;;  %v1073_v60 = vrot.slane %v1071_v45, 4 }
  0x50   : > { %2046 = vmatmul.msk.bf16.vlgmr.msrb.gmra.mxu3 %vm604_vm3, %v2142_v42  ;;  %v1064_v4 = vor.u32 %v1063_v49, %v1060_v0  ;;  %v861_v5 = vsel %vm2533_vm7, %v2033_v57, %v860_v44  ;;  %v1077_v19 = vshll.u32 %v2696_v61, 16 }
  0x51   : > { %v864_v6 = vsel %vm2533_vm7, %v862_v58, %v863_v59  ;;  %v1074_v62 = vor.u32 %v1073_v60, %v1069_v53  ;;  %v879_v7 = vunpack.c.l.b16 %v861_v5 }
  0x52   : > { %v880_v9 = vunpack.c.l.b16 %v864_v6  ;;  %v1079_v18 = vrot.slane %v1077_v19, 5 }
  0x53   : > { %v1075_v15 = vrot.slane %v1074_v62, 4 }
  0x54   : > { %2054 = vmatmul.msk.bf16.vlgmr.msrb.gmra.mxu0 %vm604_vm3, %v597_v14  ;;  %v2031_v14 = vrot.slane %v2433_v41, 9  ;;  %v2715_v51 = vpack.c.b16 %v880_v9, %v879_v7 }
  0x55   : > { %v1080_v56 = vsel %vm2374_vm4, %v1075_v15, %v1079_v18 }
  0x56   : > { %2019 = vmatmul.msk.bf16.gmra.mxu1 %vm604_vm3, %v2142_v42  ;;  %v847_v21 = vsel %vm2533_vm7, %v2031_v14, %v846_v20  ;;  %v2677_v42 = vpack.c.b16 %v878_v46, %v877_v26  ;;  %v1065_v14 = vrot.slane %v1064_v4, 4  ;;  %v1082_v37 = vunpack.c.l.b16 %v1080_v56 }
  0x57   : > { %v875_v22 = vunpack.c.l.b16 %v847_v21 }
  0x59   : > { %v2643_v41 = vpack.c.b16 %v876_v23, %v875_v22  ;;  %v1070_v23 = vsel %vm2374_vm4, %v1065_v14, %v1069_v53 }
  0x5a   : > { %v1081_v28 = vunpack.c.l.b16 %v1070_v23 }
  0x5c   : > { %2035 = vmatmul.msk.bf16.gmra.mxu2 %vm604_vm3, %v2575_v52  ;;  %v2734_v26 = vpack.c.b16 %v1082_v37, %v1081_v28 }
  0x60   : > { %2047 = vmatmul.msk.bf16.gmra.mxu3 %vm604_vm3, %v2584_v16 }
  0x64   : > { %2055 = vmatmul.msk.bf16.gmra.mxu0 %vm604_vm3, %v2393_v63 }
  0x66   : > { %2020 = vmatmul.msk.bf16.gmra.mxu1 %vm604_vm3, %v2584_v16 }
  0x6c   : > { %2036 = vmatmul.msk.bf16.gmra.mxu2 %vm604_vm3, %v2563_v43 }
  0x70   : > { %2048 = vmatmul.msk.bf16.gmra.mxu3 %vm604_vm3, %v2597_v33 }
  0x74   : > { %2056 = vmatmul.msk.bf16.gmra.mxu0 %vm604_vm3, %v2484_v50 }
  0x76   : > { %2021 = vmatmul.msk.bf16.gmra.mxu1 %vm604_vm3, %v2597_v33 }
  0x7c   : > { %2037 = vmatmul.msk.bf16.gmra.mxu2 %vm604_vm3, %v2586_v29 }
  0x80   : > { %2049 = vmatmul.msk.bf16.gmra.mxu3 %vm604_vm3, %v2609_v3 }
  0x84   : > { %2057 = vmatmul.msk.bf16.gmra.mxu0 %vm604_vm3, %v2416_v24 }
  0x86   : > { %2022 = vmatmul.msk.bf16.gmra.mxu1 %vm604_vm3, %v2609_v3 }
  0x8c   : > { %2038 = vmatmul.msk.bf16.gmra.mxu2 %vm604_vm3, %v2623_v17 }
  0x90   : > { %2050 = vmatmul.msk.bf16.gmra.mxu3 %vm604_vm3, %v2629_v13 }
  0x94   : > { %2058 = vmatmul.msk.bf16.gmra.mxu0 %vm604_vm3, %v2506_v32 }
  0x96   : > { %2023 = vmatmul.msk.bf16.gmra.mxu1 %vm604_vm3, %v2629_v13 }
  0x9c   : > { %2039 = vmatmul.msk.bf16.gmra.mxu2 %vm604_vm3, %v2643_v41 }
  0xa0   : > { %2051 = vmatmul.msk.bf16.gmra.mxu3 %vm604_vm3, %v2649_v25 }
  0xa1   : > { %v2656_v34 = vpop.f32.mrf.mxu1 }
  0xa4   : > { %2059 = vmatmul.msk.bf16.gmra.mxu0 %vm604_vm3, %v2437_v47 }
  0xa6   : > { %2024 = vmatmul.msk.bf16.gmra.mxu1 %vm604_vm3, %v2649_v25 }
  0xa9   : > { %v2682_v55 = vpop.f32.mrf.mxu1 }
  0xab   : > { %v2686_v48 = vpop.f32.mrf.mxu2 }
  0xac   : > { %2040 = vmatmul.msk.bf16.gmra.mxu2 %vm604_vm3, %v2677_v42 }
  0xaf   : > { %v642_v27 = vpop.f32.mrf.mxu0  ;;  %v2698_v2 = vpop.f32.mrf.mxu3 }
  0xb0   : > { %2052 = vmatmul.msk.bf16.gmra.mxu3 %vm604_vm3, %v2691_v38 }
  0xb3   : > { %v2707_v30 = vpop.f32.mrf.mxu1  ;;  %v2711_v20 = vpop.f32.mrf.mxu2 }
  0xb4   : > { %2060 = vmatmul.msk.bf16.gmra.mxu0 %vm604_vm3, %v2528_v1 }
  0xb6   : > { %2025 = vmatmul.msk.bf16.gmra.mxu1 %vm604_vm3, %v2691_v38 }
  0xb7   : > { %v644_v21 = vpop.f32.mrf.mxu0  ;;  %v2717_v22 = vpop.f32.mrf.mxu3 }
  0xbb   : > { %v2723_v31 = vpop.f32.mrf.mxu1 }
  0xbc   : > { %2041 = vmatmul.msk.bf16.gmra.mxu2 %vm604_vm3, %v2715_v51 }
  0xbf   : > { %v2730_v35 = vpop.f32.mrf.mxu2 }
  0xc0   : > { %2053 = vmatmul.msk.bf16.gmra.mxu3 %vm604_vm3, %v2728_v8 }
  0xc1   : > { %v647_v46 = vpop.f32.mrf.mxu0 }
  0xc3   : > { %v2736_v10 = vpop.f32.mrf.mxu3  ;;  %v758_v11 = vpop.f32.mrf.mxu1 }
  0xc4   : > { %2061 = vmatmul.msk.bf16.gmra.mxu0 %vm604_vm3, %v2734_v26  ;;  %v759_v12 = vadd.f32 %v758_v11, %v642_v27 }
  0xc6   : > { %2063 = vmatmul.msk.bf16.vlgmr.msra.gmra.mxu1 %vm604_vm3, %v2575_v52 }
  0xc7   : > { %v2742_v44 = vpop.f32.mrf.mxu2 }
  0xc9   : > { %v649_v45 = vpop.f32.mrf.mxu0 }
  0xcb   : > { %v2744_v0 = vpop.f32.mrf.mxu3  ;;  %v760_v49 = vpop.f32.mrf.mxu1 }
  0xcc   : > { %2075 = vmatmul.msk.bf16.vlgmr.msra.gmra.mxu2 %vm604_vm3, %v2584_v16  ;;  %v761_v53 = vadd.f32 %v760_v49, %v644_v21 }
  0xcf   : > { %v925_v57 = vpop.f32.mrf.mxu2 }
  0xd0   : > { %2083 = vmatmul.msk.bf16.vlgmr.msra.gmra.mxu3 %vm604_vm3, %v2393_v63  ;;  %v965_v58 = vadd.f32 %v925_v57, %v759_v12 }
  0xd1   : > { %v1099_v59 = vpop.f32.mrf.mxu0 }
  0xd3   : > { %v1001_v60 = vpop.f32.mrf.mxu3  ;;  %v763_v27 = vpop.f32.mrf.mxu1 }
  0xd4   : > { %2092 = vmatmul.msk.bf16.vlgmr.msra.gmra.mxu0 %vm604_vm3, %v2563_v43  ;;  %v1041_v52 = vadd.f32 %v1001_v60, %v965_v58  ;;  %v764_v4 = vadd.f32 %v763_v27, %v647_v46 }
  0xd6   : > { %2064 = vmatmul.msk.bf16.gmra.mxu1 %vm604_vm3, %v2563_v43  ;;  %v2754_v5 = vadd.f32 %v1099_v59, %v1041_v52 }
  0xd7   : > { %v927_v16 = vpop.f32.mrf.mxu2 }
  0xd8   : > { %v966_v6 = vadd.f32 %v927_v16, %v761_v53 }
  0xd9   : > { %v1101_v62 = vpop.f32.mrf.mxu0 }
  0xdb   : > { %v1003_v19 = vpop.f32.mrf.mxu3  ;;  %v765_v7 = vpop.f32.mrf.mxu1 }
  0xdc   : > { %v1042_v63 = vadd.f32 %v1003_v19, %v966_v6  ;;  %2076 = vmatmul.msk.bf16.gmra.mxu2 %vm604_vm3, %v2597_v33  ;;  %v766_v9 = vadd.f32 %v765_v7, %v649_v45 }
  0xde   : > { %v2758_v14 = vadd.f32 %v1101_v62, %v1042_v63 }
  0xdf   : > { %v930_v15 = vpop.f32.mrf.mxu2 }
  0xe0   : > { %2084 = vmatmul.msk.bf16.gmra.mxu3 %vm604_vm3, %v2484_v50  ;;  %v967_v18 = vadd.f32 %v930_v15, %v764_v4 }
  0xe1   : > { %v1104_v43 = vpop.f32.mrf.mxu0 }
  0xe3   : > { %v1006_v21 = vpop.f32.mrf.mxu3  ;;  %v768_v23 = vpop.f32.mrf.mxu1 }
  0xe4   : > { %2093 = vmatmul.msk.bf16.gmra.mxu0 %vm604_vm3, %v2586_v29  ;;  %v1043_v56 = vadd.f32 %v1006_v21, %v967_v18  ;;  %v769_v28 = vadd.f32 %v768_v23, %v2656_v34 }
  0xe6   : > { %2065 = vmatmul.msk.bf16.gmra.mxu1 %vm604_vm3, %v2586_v29  ;;  %v2767_v33 = vadd.f32 %v1104_v43, %v1043_v56 }
  0xe7   : > { %v932_v37 = vpop.f32.mrf.mxu2 }
  0xe8   : > { %v968_v46 = vadd.f32 %v932_v37, %v766_v9 }
  0xe9   : > { %v1106_v11 = vpop.f32.mrf.mxu0 }
  0xeb   : > { %v1008_v12 = vpop.f32.mrf.mxu3  ;;  %v770_v50 = vpop.f32.mrf.mxu1 }
  0xec   : > { %v1044_v45 = vadd.f32 %v1008_v12, %v968_v46  ;;  %2077 = vmatmul.msk.bf16.gmra.mxu2 %vm604_vm3, %v2609_v3  ;;  %v771_v49 = vadd.f32 %v770_v50, %v2682_v55 }
  0xee   : > { %v2772_v53 = vadd.f32 %v1106_v11, %v1044_v45 }
  0xef   : > { %v935_v57 = vpop.f32.mrf.mxu2 }
  0xf0   : > { %2085 = vmatmul.msk.bf16.gmra.mxu3 %vm604_vm3, %v2416_v24  ;;  %v969_v29 = vadd.f32 %v935_v57, %v769_v28 }
  0xf1   : > { %v1109_v34 = vpop.f32.mrf.mxu0 }
  0xf3   : > { %v1011_v58 = vpop.f32.mrf.mxu3  ;;  %v773_v59 = vpop.f32.mrf.mxu1 }
  0xf4   : > { %2094 = vmatmul.msk.bf16.gmra.mxu0 %vm604_vm3, %v2623_v17  ;;  %v1045_v60 = vadd.f32 %v1011_v58, %v969_v29  ;;  %v774_v27 = vadd.f32 %v773_v59, %v2707_v30 }
  0xf6   : > { %2066 = vmatmul.msk.bf16.gmra.mxu1 %vm604_vm3, %v2623_v17  ;;  %v2781_v3 = vadd.f32 %v1109_v34, %v1045_v60 }
  0xf7   : > { %v937_v55 = vpop.f32.mrf.mxu2 }
  0xf8   : > { %v970_v52 = vadd.f32 %v937_v55, %v771_v49  ;;  %v2819_v55 = vld [vmem:[%s2665_s15 + $0xc] sm:$0xf] }
  0xf9   : > { %v1111_v4 = vpop.f32.mrf.mxu0 }
  0xfb   : > { %v1013_v16 = vpop.f32.mrf.mxu3  ;;  %v775_v24 = vpop.f32.mrf.mxu1 }
  0xfc   : > { %v1046_v6 = vadd.f32 %v1013_v16, %v970_v52  ;;  %2078 = vmatmul.msk.bf16.gmra.mxu2 %vm604_vm3, %v2629_v13  ;;  %v776_v62 = vadd.f32 %v775_v24, %v2723_v31  ;;  %v2822_v52 = vld [vmem:[%s2665_s15 + $0x10] sm:$0xf]  ;;  %v1314_v24 = vshrl.u32 %v2819_v55, 16 }
  0xfe   : > { %v2786_v19 = vadd.f32 %v1111_v4, %v1046_v6  ;;  %v2062_v6 = vrot.slane %v2670_v39, 9 }
  0xff   : > { %v940_v7 = vpop.f32.mrf.mxu2 }
 0x100   : > { %2086 = vmatmul.msk.bf16.gmra.mxu3 %vm604_vm3, %v2506_v32  ;;  %v971_v17 = vadd.f32 %v940_v7, %v774_v27  ;;  %v1158_v27 = vrot.slane %v2673_v40, 5  ;;  %v1327_v7 = vshrl.u32 %v2822_v52, 16 }
 0x101   : > { %v1114_v30 = vpop.f32.mrf.mxu0 }
 0x102   : > { %v1160_v40 = vrot.slane %v1158_v27, 4  ;;  %v1159_v39 = vsel %vm2533_vm7, %v2062_v6, %v1158_v27 }
 0x103   : > { %v1016_v63 = vpop.f32.mrf.mxu3  ;;  %v778_v9 = vpop.f32.mrf.mxu1 }
 0x104   : > { %2095 = vmatmul.msk.bf16.gmra.mxu0 %vm604_vm3, %v2643_v41  ;;  %v1047_v15 = vadd.f32 %v1016_v63, %v971_v17  ;;  %v779_v32 = vadd.f32 %v778_v9, %v2686_v48  ;;  %v1316_v9 = vrot.slane %v1314_v24, 4  ;;  %v2150_v24 = vld [vmem:[%s2665_s15 + $0xc] sm:$0xff] }
 0x106   : > { %2067 = vmatmul.msk.bf16.gmra.mxu1 %vm604_vm3, %v2643_v41  ;;  %v2794_v13 = vadd.f32 %v1114_v30, %v1047_v15 }
 0x107   : > { %v942_v31 = vpop.f32.mrf.mxu2 }
 0x108   : > { %v972_v18 = vadd.f32 %v942_v31, %v776_v62  ;;  %v1323_v62 = vshll.u32 %v2822_v52, 16 }
 0x109   : > { %v1116_v43 = vpop.f32.mrf.mxu0 }
 0x10b   : > { %v1018_v21 = vpop.f32.mrf.mxu3  ;;  %v780_v23 = vpop.f32.mrf.mxu1 }
 0x10c   : > { %v1048_v56 = vadd.f32 %v1018_v21, %v972_v18  ;;  %2079 = vmatmul.msk.bf16.gmra.mxu2 %vm604_vm3, %v2649_v25  ;;  %v781_v45 = vadd.f32 %v780_v23, %v2711_v20  ;;  %v1329_v21 = vrot.slane %v1327_v7, 4  ;;  %v375_v23 = vld [vmem:[%s2665_s15 + $0x14] sm:$0x1] }
 0x10e   : > { %v2799_v28 = vadd.f32 %v1116_v43, %v1048_v56  ;;  %v1325_v43 = vrot.slane %v1323_v62, 5 }
 0x10f   : > { %v945_v37 = vpop.f32.mrf.mxu2 }
 0x110   : > { %2087 = vmatmul.msk.bf16.gmra.mxu3 %vm604_vm3, %v2437_v47  ;;  %v973_v41 = vadd.f32 %v945_v37, %v779_v32 }
 0x111   : > { %v1119_v46 = vpop.f32.mrf.mxu0 }
 0x113   : > { %v1021_v11 = vpop.f32.mrf.mxu3  ;;  %v783_v12 = vpop.f32.mrf.mxu1 }
 0x114   : > { %2096 = vmatmul.msk.bf16.gmra.mxu0 %vm604_vm3, %v2677_v42  ;;  %v1049_v50 = vadd.f32 %v1021_v11, %v973_v41  ;;  %v784_v58 = vadd.f32 %v783_v12, %v2730_v35  ;;  %v1333_v11 = vshll.u32 %v375_v23, 16 }
 0x116   : > { %2068 = vmatmul.msk.bf16.gmra.mxu1 %vm604_vm3, %v2677_v42  ;;  %v2808_v25 = vadd.f32 %v1119_v46, %v1049_v50  ;;  %v1330_v46 = vor.u32 %v1329_v21, %v1325_v43 }
 0x117   : > { %v947_v48 = vpop.f32.mrf.mxu2 }
 0x118   : > { %v974_v49 = vadd.f32 %v947_v48, %v781_v45 }
 0x119   : > { %v1121_v47 = vpop.f32.mrf.mxu0 }
 0x11b   : > { %v1023_v57 = vpop.f32.mrf.mxu3  ;;  %v785_v29 = vpop.f32.mrf.mxu1 }
 0x11c   : > { %v1050_v34 = vadd.f32 %v1023_v57, %v974_v49  ;;  %2080 = vmatmul.msk.bf16.gmra.mxu2 %vm604_vm3, %v2691_v38  ;;  %v1161_v38 = vrot.slane %v2696_v61, 5  ;;  %v786_v17 = vadd.f32 %v785_v29, %v2742_v44  ;;  %v1331_v29 = vrot.slane %v1330_v46, 4 }
 0x11e   : > { %v2813_v59 = vadd.f32 %v1121_v47, %v1050_v34  ;;  %v1162_v18 = vsel %vm2533_vm7, %v1160_v40, %v1161_v38  ;;  %v1335_v34 = vrot.slane %v1333_v11, 5 }
 0x11f   : > { %v950_v20 = vpop.f32.mrf.mxu2  ;;  %v1164_v37 = vunpack.c.l.b16 %v1162_v18 }
 0x120   : > { %2088 = vmatmul.msk.bf16.gmra.mxu3 %vm604_vm3, %v2528_v1  ;;  %v975_v42 = vadd.f32 %v950_v20, %v784_v58  ;;  %v1317_v1 = vshll.u32 %v2819_v55, 16 }
 0x121   : > { %v1124_v60 = vpop.f32.mrf.mxu0 }
 0x122   : > { %v1319_v15 = vrot.slane %v1317_v1, 5 }
 0x123   : > { %v1026_v4 = vpop.f32.mrf.mxu3  ;;  %v788_v16 = vpop.f32.mrf.mxu1 }
 0x124   : > { %2097 = vmatmul.msk.bf16.gmra.mxu0 %vm604_vm3, %v2715_v51  ;;  %v1051_v35 = vadd.f32 %v1026_v4, %v975_v42  ;;  %v1320_v41 = vor.u32 %v1319_v15, %v1316_v9  ;;  %v789_v12 = vadd.f32 %v788_v16, %v2698_v2  ;;  %v1417_v4 = vrot.slane %v375_v23, 5 }
 0x126   : > { %2069 = vmatmul.msk.bf16.gmra.mxu1 %vm604_vm3, %v2715_v51  ;;  %v2835_v61 = vadd.f32 %v1124_v60, %v1051_v35  ;;  %v1163_v51 = vunpack.c.l.b16 %v1159_v39  ;;  %v1321_v47 = vrot.slane %v1320_v41, 4  ;;  %v2091_v60 = vrot.slane %v2819_v55, 9 }
 0x127   : > { %v952_v30 = vpop.f32.mrf.mxu2 }
 0x128   : > { %v976_v63 = vadd.f32 %v952_v30, %v786_v17  ;;  %v1165_v48 = vpack.c.b16 %v1164_v37, %v1163_v51  ;;  %v1326_v42 = vsel %vm2374_vm4, %v1321_v47, %v1325_v43 }
 0x129   : > { %v1126_v31 = vpop.f32.mrf.mxu0  ;;  %v1337_v1 = vunpack.c.l.b16 %v1326_v42 }
 0x12b   : > { %v1028_v44 = vpop.f32.mrf.mxu3  ;;  %v790_v56 = vpop.f32.mrf.mxu1 }
 0x12c   : > { %v1052_v32 = vadd.f32 %v1028_v44, %v976_v63  ;;  %2081 = vmatmul.msk.bf16.gmra.mxu2 %vm604_vm3, %v2728_v8  ;;  %v1414_v8 = vrot.slane %v2822_v52, 5  ;;  %v791_v16 = vadd.f32 %v790_v56, %v2717_v22 }
 0x12e   : > { %v2845_v50 = vadd.f32 %v1126_v31, %v1052_v32  ;;  %v1416_v27 = vrot.slane %v1414_v8, 4  ;;  %v1415_v36 = vsel %vm2533_vm7, %v2091_v60, %v1414_v8  ;;  %v2882_v60 = vld [vmem:[%s3001_s3] ss:$0 sm:$0xff] }
 0x12f   : > { %v955_v45 = vpop.f32.mrf.mxu2  ;;  %v1419_v30 = vunpack.c.l.b16 %v1415_v36 }
 0x130   : > { %2089 = vmatmul.msk.bf16.gmra.mxu3 %vm604_vm3, %v2734_v26  ;;  %v977_v49 = vadd.f32 %v955_v45, %v789_v12  ;;  %v1336_v26 = vsel %vm2374_vm4, %v1331_v29, %v1335_v34  ;;  %v1418_v55 = vsel %vm2533_vm7, %v1416_v27, %v1417_v4 }
 0x131   : > { %v1129_v57 = vpop.f32.mrf.mxu0  ;;  %v1338_v6 = vunpack.c.l.b16 %v1336_v26  ;;  %v1420_v63 = vunpack.c.l.b16 %v1418_v55 }
 0x133   : > { %v1031_v58 = vpop.f32.mrf.mxu3  ;;  %v793_v20 = vpop.f32.mrf.mxu1  ;;  %v1339_v22 = vpack.c.b16 %v1338_v6, %v1337_v1  ;;  %v1421_v39 = vpack.c.b16 %v1420_v63, %v1419_v30 }
 0x134   : > { %2098 = vmatmul.msk.bf16.gmra.mxu0 %vm604_vm3, %v1165_v48  ;;  %v1053_v2 = vadd.f32 %v1031_v58, %v977_v49  ;;  %v794_v9 = vadd.f32 %v793_v20, %v2736_v10 }
 0x136   : > { %2070 = vmatmul.msk.bf16.gmra.mxu1 %vm604_vm3, %v1165_v48  ;;  %v2858_v52 = vadd.f32 %v1129_v57, %v1053_v2 }
 0x137   : > { %v957_v38 = vpop.f32.mrf.mxu2 }
 0x138   : > { %v978_v35 = vadd.f32 %v957_v38, %v791_v16 }
 0x139   : > { %v1131_v40 = vpop.f32.mrf.mxu0 }
 0x13b   : > { %v1033_v62 = vpop.f32.mrf.mxu3  ;;  %v795_v7 = vpop.f32.mrf.mxu1 }
 0x13c   : > { %v1054_v17 = vadd.f32 %v1033_v62, %v978_v35  ;;  %2082 = vmatmul.msk.bf16.gmra.mxu2 %vm604_vm3, %v2150_v24  ;;  %v796_v44 = vadd.f32 %v795_v7, %v2744_v0 }
 0x13e   : > { %v2867_v15 = vadd.f32 %v1131_v40, %v1054_v17 }
 0x13f   : > { %v960_v31 = vpop.f32.mrf.mxu2 }
 0x140   : > { %2090 = vmatmul.msk.bf16.gmra.mxu3 %vm604_vm3, %v1339_v22  ;;  %v979_v18 = vadd.f32 %v960_v31, %v794_v9 }
 0x141   : > { %v1134_v43 = vpop.f32.mrf.mxu0 }
 0x143   : > { %v1036_v54 = vpop.f32.mrf.mxu3  ;;  %v1181_v21 = vpop.f32.mrf.mxu1 }
 0x144   : > { %2099 = vmatmul.msk.bf16.gmra.mxu0 %vm604_vm3, %v1421_v39  ;;  %v1055_v23 = vadd.f32 %v1036_v54, %v979_v18  ;;  %v1221_v47 = vadd.f32 %v1181_v21, %v2754_v5 }
 0x146   : > { %v2872_v56 = vadd.f32 %v1134_v43, %v1055_v23 }
 0x147   : > { %v962_v32 = vpop.f32.mrf.mxu2 }
 0x148   : > { %v980_v51 = vadd.f32 %v962_v32, %v796_v44 }
 0x149   : > { %v1136_v10 = vpop.f32.mrf.mxu0 }
 0x14b   : > { %v1038_v37 = vpop.f32.mrf.mxu3  ;;  %v1183_v41 = vpop.f32.mrf.mxu1 }
 0x14c   : > { %v1056_v46 = vadd.f32 %v1038_v37, %v980_v51  ;;  %v1222_v2 = vadd.f32 %v1183_v41, %v2758_v14 }
 0x14e   : > { %v2874_v11 = vadd.f32 %v1136_v10, %v1056_v46 }
 0x14f   : > { %v1257_v12 = vpop.f32.mrf.mxu2 }
 0x150   : > { %v1297_v29 = vadd.f32 %v1257_v12, %v1221_v47 }
 0x151   : > { %v1437_v45 = vpop.f32.mrf.mxu0 }
 0x153   : > { %v1355_v48 = vpop.f32.mrf.mxu3  ;;  %v1186_v49 = vpop.f32.mrf.mxu1 }
 0x154   : > { %v1395_v58 = vadd.f32 %v1355_v48, %v1297_v29  ;;  %v1223_v20 = vadd.f32 %v1186_v49, %v2767_v33  ;;  %v2888_v33 = vld [vmem:[%s3002_s4] ss:$0 sm:$0xff] }
 0x156   : > { %v1477_v26 = vadd.f32 %v1437_v45, %v1395_v58 }
 0x157   : > { %v1259_v57 = vpop.f32.mrf.mxu2 }
 0x158   : > { %v1298_v4 = vadd.f32 %v1259_v57, %v1222_v2  ;;  %v1497_v35 = vmul.f32 %v2882_v60, %v1477_v26 }
 0x159   : > { %v1439_v34 = vpop.f32.mrf.mxu0 }
 0x15a   : > { %v1517_v36 = vadd.f32 %v2888_v33, %v1497_v35 }
 0x15b   : > { %v1357_v0 = vpop.f32.mrf.mxu3  ;;  %v1188_v8 = vpop.f32.mrf.mxu1 }
 0x15c   : > { %v1396_v24 = vadd.f32 %v1357_v0, %v1298_v4  ;;  %v1224_v6 = vadd.f32 %v1188_v8, %v2772_v53  ;;  %v1533_v9 = vmax.f32 %v1517_v36, 0.0 }
 0x15e   : > { %v1478_v7 = vadd.f32 %v1439_v34, %v1396_v24 }
 0x15f   : > { %v1262_v42 = vpop.f32.mrf.mxu2 }
 0x160   : > { %v1299_v27 = vadd.f32 %v1262_v42, %v1223_v20  ;;  %v1498_v18 = vmul.f32 %v2882_v60, %v1478_v7 }
 0x161   : > { %v1442_v5 = vpop.f32.mrf.mxu0 }
 0x162   : > { %v1518_v51 = vadd.f32 %v2888_v33, %v1498_v18 }
 0x163   : > { %v1360_v16 = vpop.f32.mrf.mxu3  ;;  %v1191_v38 = vpop.f32.mrf.mxu1 }
 0x164   : > { %v1397_v14 = vadd.f32 %v1360_v16, %v1299_v27  ;;  %v1534_v34 = vmax.f32 %v1518_v51, 0.0  ;;  %v1225_v58 = vadd.f32 %v1191_v38, %v2781_v3 }
 0x166   : > { %v1479_v1 = vadd.f32 %v1442_v5, %v1397_v14 }
 0x167   : > { %v1264_v40 = vpop.f32.mrf.mxu2 }
 0x168   : > { %v1499_v55 = vmul.f32 %v2882_v60, %v1479_v1  ;;  %v1300_v62 = vadd.f32 %v1264_v40, %v1224_v6 }
 0x169   : > { %v1444_v17 = vpop.f32.mrf.mxu0 }
 0x16a   : > { %v1519_v22 = vadd.f32 %v2888_v33, %v1499_v55 }
 0x16b   : > { %v1362_v30 = vpop.f32.mrf.mxu3  ;;  %v2894_v63 = vpop.f32.mrf.mxu1 }
 0x16c   : > { %v1535_v31 = vmax.f32 %v1519_v22, 0.0  ;;  %v1398_v39 = vadd.f32 %v1362_v30, %v1300_v62 }
 0x16e   : > { %v1549_v53 = vmax.f32 %v1533_v9, %v1535_v31  ;;  %v1480_v43 = vadd.f32 %v1444_v17, %v1398_v39 }
 0x16f   : > { %v1267_v54 = vpop.f32.mrf.mxu2 }
 0x170   : > { %v1565_v21 = vrot.slane %v1549_v53, 2  ;;  %v1566_v23 = vrot.slane %v1549_v53, 4  ;;  %v1567_v44 = vrot.slane %v1549_v53, 6  ;;  %v2100_v32 = vrot.slane %v1549_v53, 9 }
 0x171   : > { %v1500_v10 = vmul.f32 %v2882_v60, %v1480_v43  ;;  %v1447_v37 = vpop.f32.mrf.mxu0  ;;  %v1301_v4 = vadd.f32 %v1267_v54, %v1225_v58  ;;  %v1226_v54 = vadd.f32 %v2894_v63, %v2786_v19 }
 0x172   : > { %v2101_v41 = vrot.slane %v1565_v21, 9  ;;  %v2102_v46 = vrot.slane %v1566_v23, 9  ;;  %v1709_v12 = vmax.f32 %v1549_v53, %v2100_v32  ;;  %v2103_v47 = vrot.slane %v1567_v44, 9 }
 0x173   : > { %v1520_v45 = vadd.f32 %v2888_v33, %v1500_v10  ;;  %v1365_v48 = vpop.f32.mrf.mxu3  ;;  %v1196_v49 = vpop.f32.mrf.mxu1 }
 0x174   : > { %v1710_v57 = vmax.f32 %v1565_v21, %v2101_v41  ;;  %v1711_v29 = vmax.f32 %v1566_v23, %v2102_v46  ;;  %v1773_v20 = vperm.slane %v1709_v12, 0  ;;  %v1712_v26 = vmax.f32 %v1567_v44, %v2103_v47 }
 0x175   : > { %v1536_v0 = vmax.f32 %v1520_v45, 0.0  ;;  %v1399_v7 = vadd.f32 %v1365_v48, %v1301_v4  ;;  %v1227_v39 = vadd.f32 %v1196_v49, %v2794_v13 }
 0x176   : > { %v1774_v8 = vperm.slane %v1710_v57, 0  ;;  %v1775_v27 = vperm.slane %v1711_v29, 0  ;;  %v1776_v17 = vperm.slane %v1712_v26, 0 }
 0x177   : > { %v1550_v2 = vmax.f32 %v1534_v34, %v1536_v0  ;;  %v1269_v42 = vpop.f32.mrf.mxu2  ;;  %v1481_v44 = vadd.f32 %v1447_v37, %v1399_v7 }
 0x178   : > { %v1806_v5 = vsel %vm1805_vm8, %v1774_v8, %v1773_v20  ;;  %v1302_v10 = vadd.f32 %v1269_v42, %v1226_v54 }
 0x179   : > { %v1568_v16 = vrot.slane %v1550_v2, 2  ;;  %v1569_v35 = vrot.slane %v1550_v2, 4  ;;  %v1570_v14 = vrot.slane %v1550_v2, 6  ;;  %v1449_v24 = vpop.f32.mrf.mxu0  ;;  %v2104_v1 = vrot.slane %v1550_v2, 9 }
 0x17a   : > { %v1808_v55 = vsel %vm1807_vm9, %v1775_v27, %v1806_v5  ;;  %v1501_v37 = vmul.f32 %v2882_v60, %v1481_v44 }
 0x17b   : > { %v2105_v3 = vrot.slane %v1568_v16, 9  ;;  %v2106_v38 = vrot.slane %v1569_v35, 9  ;;  %v2107_v6 = vrot.slane %v1570_v14, 9  ;;  %v1367_v40 = vpop.f32.mrf.mxu3  ;;  %v1198_v36 = vpop.f32.mrf.mxu1  ;;  %v1713_v62 = vmax.f32 %v1550_v2, %v2104_v1 }
 0x17c   : > { %v1810_v18 = vsel %vm1809_vm10, %v1776_v17, %v1808_v55  ;;  %v1400_v48 = vadd.f32 %v1367_v40, %v1302_v10  ;;  %v1228_v47 = vadd.f32 %v1198_v36, %v2799_v28  ;;  %v1521_v29 = vadd.f32 %v2888_v33, %v1501_v37 }
 0x17d   : > { %v1714_v22 = vmax.f32 %v1568_v16, %v2105_v3  ;;  %v1715_v30 = vmax.f32 %v1569_v35, %v2106_v38  ;;  %v1716_v9 = vmax.f32 %v1570_v14, %v2107_v6  ;;  %v1777_v31 = vperm.slane %v1713_v62, 0 }
 0x17e   : > { %v1482_v8 = vadd.f32 %v1449_v24, %v1400_v48  ;;  %v1537_v26 = vmax.f32 %v1521_v29, 0.0 }
 0x17f   : > { %v1778_v53 = vperm.slane %v1714_v22, 0  ;;  %v1779_v43 = vperm.slane %v1715_v30, 0  ;;  %v1272_v21 = vpop.f32.mrf.mxu2  ;;  %v1812_v23 = vsel %vm1811_vm11, %v1777_v31, %v1810_v18  ;;  %v1780_v13 = vperm.slane %v1716_v9, 0 }
 0x180   : > { %v1303_v32 = vadd.f32 %v1272_v21, %v1227_v39  ;;  %v1502_v5 = vmul.f32 %v2882_v60, %v1482_v8 }
 0x181   : > { %v1814_v51 = vsel %vm1813_vm12, %v1778_v53, %v1812_v23  ;;  %v1452_v41 = vpop.f32.mrf.mxu0 }
 0x182   : > { %v1816_v19 = vsel %vm1815_vm13, %v1779_v43, %v1814_v51  ;;  %v1522_v6 = vadd.f32 %v2888_v33, %v1502_v5 }
 0x183   : > { %v1818_v63 = vsel %vm1817_vm14, %v1780_v13, %v1816_v19  ;;  %v1370_v46 = vpop.f32.mrf.mxu3  ;;  %v1201_v12 = vpop.f32.mrf.mxu1 }
 0x184   : > { %1845 = vst.msk [vmem:[%s2916_s6] sm:$0xff] %vm1844_vm15, %v1818_v63  ;;  %v1401_v45 = vadd.f32 %v1370_v46, %v1303_v32  ;;  %v1538_v39 = vmax.f32 %v1522_v6, 0.0  ;;  %v1229_v43 = vadd.f32 %v1201_v12, %v2808_v25 }
 0x186   : > { %v1483_v49 = vadd.f32 %v1452_v41, %v1401_v45 }
 0x187   : > { %v1274_v57 = vpop.f32.mrf.mxu2 }
 0x188   : > { %v1503_v34 = vmul.f32 %v2882_v60, %v1483_v49  ;;  %v1304_v0 = vadd.f32 %v1274_v57, %v1228_v47 }
 0x189   : > { %v1454_v58 = vpop.f32.mrf.mxu0 }
 0x18a   : > { %v1523_v20 = vadd.f32 %v2888_v33, %v1503_v34 }
 0x18b   : > { %v1372_v2 = vpop.f32.mrf.mxu3  ;;  %v1203_v42 = vpop.f32.mrf.mxu1 }
 0x18c   : > { %v1539_v27 = vmax.f32 %v1523_v20, 0.0  ;;  %v1402_v4 = vadd.f32 %v1372_v2, %v1304_v0 }
 0x18e   : > { %v1551_v16 = vmax.f32 %v1537_v26, %v1539_v27  ;;  %v1484_v35 = vadd.f32 %v1454_v58, %v1402_v4  ;;  %v1230_v4 = vadd.f32 %v1203_v42, %v2813_v59 }
 0x18f   : > { %v1277_v28 = vpop.f32.mrf.mxu2 }
 0x190   : > { %v1571_v14 = vrot.slane %v1551_v16, 2  ;;  %v1572_v1 = vrot.slane %v1551_v16, 4  ;;  %v1573_v3 = vrot.slane %v1551_v16, 6  ;;  %v2108_v38 = vrot.slane %v1551_v16, 9 }
 0x191   : > { %v1504_v24 = vmul.f32 %v2882_v60, %v1484_v35  ;;  %v1457_v40 = vpop.f32.mrf.mxu0  ;;  %v1305_v13 = vadd.f32 %v1277_v28, %v1229_v43 }
 0x192   : > { %v2109_v36 = vrot.slane %v1571_v14, 9  ;;  %v2110_v55 = vrot.slane %v1572_v1, 9  ;;  %v1717_v62 = vmax.f32 %v1551_v16, %v2108_v38  ;;  %v2111_v30 = vrot.slane %v1573_v3, 9 }
 0x193   : > { %v1524_v7 = vadd.f32 %v2888_v33, %v1504_v24  ;;  %v1375_v17 = vpop.f32.mrf.mxu3  ;;  %v1206_v22 = vpop.f32.mrf.mxu1 }
 0x194   : > { %v1718_v9 = vmax.f32 %v1571_v14, %v2109_v36  ;;  %v1719_v31 = vmax.f32 %v1572_v1, %v2110_v55  ;;  %v1781_v54 = vperm.slane %v1717_v62, 0  ;;  %v1720_v44 = vmax.f32 %v1573_v3, %v2111_v30 }
 0x195   : > { %v1540_v18 = vmax.f32 %v1524_v7, 0.0  ;;  %v1403_v57 = vadd.f32 %v1375_v17, %v1305_v13  ;;  %v1231_v20 = vadd.f32 %v1206_v22, %v2835_v61 }
 0x196   : > { %v1782_v53 = vperm.slane %v1718_v9, 0  ;;  %v1783_v32 = vperm.slane %v1719_v31, 0  ;;  %v1784_v29 = vperm.slane %v1720_v44, 0 }
 0x197   : > { %v1552_v21 = vmax.f32 %v1538_v39, %v1540_v18  ;;  %v1279_v23 = vpop.f32.mrf.mxu2  ;;  %v1485_v35 = vadd.f32 %v1457_v40, %v1403_v57 }
 0x198   : > { %v1819_v51 = vsel %vm1805_vm8, %v1782_v53, %v1781_v54  ;;  %v1306_v3 = vadd.f32 %v1279_v23, %v1230_v4 }
 0x199   : > { %v1574_v10 = vrot.slane %v1552_v21, 2  ;;  %v1575_v41 = vrot.slane %v1552_v21, 4  ;;  %v1576_v19 = vrot.slane %v1552_v21, 6  ;;  %v1459_v63 = vpop.f32.mrf.mxu0  ;;  %v2112_v46 = vrot.slane %v1552_v21, 9 }
 0x19a   : > { %v1820_v25 = vsel %vm1807_vm9, %v1783_v32, %v1819_v51  ;;  %v1505_v36 = vmul.f32 %v2882_v60, %v1485_v35 }
 0x19b   : > { %v2113_v37 = vrot.slane %v1574_v10, 9  ;;  %v2114_v45 = vrot.slane %v1575_v41, 9  ;;  %v2115_v48 = vrot.slane %v1576_v19, 9  ;;  %v1377_v49 = vpop.f32.mrf.mxu3  ;;  %v1208_v47 = vpop.f32.mrf.mxu1  ;;  %v1721_v12 = vmax.f32 %v1552_v21, %v2112_v46 }
 0x19c   : > { %v1821_v2 = vsel %vm1809_vm10, %v1784_v29, %v1820_v25  ;;  %v1404_v55 = vadd.f32 %v1377_v49, %v1306_v3  ;;  %v1232_v40 = vadd.f32 %v1208_v47, %v2845_v50  ;;  %v1525_v17 = vadd.f32 %v2888_v33, %v1505_v36 }
 0x19d   : > { %v1722_v34 = vmax.f32 %v1574_v10, %v2113_v37  ;;  %v1723_v0 = vmax.f32 %v1575_v41, %v2114_v45  ;;  %v1724_v8 = vmax.f32 %v1576_v19, %v2115_v48  ;;  %v1785_v58 = vperm.slane %v1721_v12, 0 }
 0x19e   : > { %v1486_v9 = vadd.f32 %v1459_v63, %v1404_v55  ;;  %v1541_v53 = vmax.f32 %v1525_v17, 0.0 }
 0x19f   : > { %v1786_v26 = vperm.slane %v1722_v34, 0  ;;  %v1787_v27 = vperm.slane %v1723_v0, 0  ;;  %v1282_v5 = vpop.f32.mrf.mxu2  ;;  %v1822_v16 = vsel %vm1811_vm11, %v1785_v58, %v1821_v2  ;;  %v1788_v14 = vperm.slane %v1724_v8, 0 }
 0x1a0   : > { %v1307_v28 = vadd.f32 %v1282_v5, %v1231_v20  ;;  %v1506_v21 = vmul.f32 %v2882_v60, %v1486_v9 }
 0x1a1   : > { %v1823_v1 = vsel %vm1813_vm12, %v1786_v26, %v1822_v16  ;;  %v1462_v38 = vpop.f32.mrf.mxu0 }
 0x1a2   : > { %v1824_v6 = vsel %vm1815_vm13, %v1787_v27, %v1823_v1  ;;  %v1526_v19 = vadd.f32 %v2888_v33, %v1506_v21 }
 0x1a3   : > { %v1825_v61 = vsel %vm1817_vm14, %v1788_v14, %v1824_v6  ;;  %v1380_v24 = vpop.f32.mrf.mxu3  ;;  %v1211_v42 = vpop.f32.mrf.mxu1 }
 0x1a4   : > { %1846 = vst.msk [vmem:[%s2916_s6 + $0x8] sm:$0xff] %vm1844_vm15, %v1825_v61  ;;  %v1405_v59 = vadd.f32 %v1380_v24, %v1307_v28  ;;  %v1542_v29 = vmax.f32 %v1526_v19, 0.0  ;;  %v1233_v8 = vadd.f32 %v1211_v42, %v2858_v52 }
 0x1a6   : > { %v1487_v62 = vadd.f32 %v1462_v38, %v1405_v59 }
 0x1a7   : > { %v1284_v7 = vpop.f32.mrf.mxu2 }
 0x1a8   : > { %v1507_v22 = vmul.f32 %v2882_v60, %v1487_v62  ;;  %v1308_v30 = vadd.f32 %v1284_v7, %v1232_v40 }
 0x1a9   : > { %v1464_v31 = vpop.f32.mrf.mxu0 }
 0x1aa   : > { %v1527_v39 = vadd.f32 %v2888_v33, %v1507_v22 }
 0x1ab   : > { %v1382_v18 = vpop.f32.mrf.mxu3  ;;  %v1213_v32 = vpop.f32.mrf.mxu1 }
 0x1ac   : > { %v1543_v43 = vmax.f32 %v1527_v39, 0.0  ;;  %v1406_v54 = vadd.f32 %v1382_v18, %v1308_v30 }
 0x1ae   : > { %v1553_v23 = vmax.f32 %v1541_v53, %v1543_v43  ;;  %v1488_v44 = vadd.f32 %v1464_v31, %v1406_v54  ;;  %v1234_v31 = vadd.f32 %v1213_v32, %v2867_v15 }
 0x1af   : > { %v1287_v50 = vpop.f32.mrf.mxu2 }
 0x1b0   : > { %v1577_v13 = vrot.slane %v1553_v23, 2  ;;  %v1578_v51 = vrot.slane %v1553_v23, 4  ;;  %v1579_v10 = vrot.slane %v1553_v23, 6  ;;  %v2116_v41 = vrot.slane %v1553_v23, 9 }
 0x1b1   : > { %v1508_v63 = vmul.f32 %v2882_v60, %v1488_v44  ;;  %v1467_v46 = vpop.f32.mrf.mxu0  ;;  %v1309_v4 = vadd.f32 %v1287_v50, %v1233_v8 }
 0x1b2   : > { %v2117_v37 = vrot.slane %v1577_v13, 9  ;;  %v2118_v45 = vrot.slane %v1578_v51, 9  ;;  %v1725_v48 = vmax.f32 %v1553_v23, %v2116_v41  ;;  %v2119_v25 = vrot.slane %v1579_v10, 9 }
 0x1b3   : > { %v1528_v49 = vadd.f32 %v2888_v33, %v1508_v63  ;;  %v1385_v47 = vpop.f32.mrf.mxu3  ;;  %v1216_v5 = vpop.f32.mrf.mxu1 }
 0x1b4   : > { %v1726_v12 = vmax.f32 %v1577_v13, %v2117_v37  ;;  %v1727_v57 = vmax.f32 %v1578_v51, %v2118_v45  ;;  %v1789_v58 = vperm.slane %v1725_v48, 0  ;;  %v1728_v26 = vmax.f32 %v1579_v10, %v2119_v25 }
 0x1b5   : > { %v1544_v34 = vmax.f32 %v1528_v49, 0.0  ;;  %v1407_v59 = vadd.f32 %v1385_v47, %v1309_v4  ;;  %v1235_v17 = vadd.f32 %v1216_v5, %v2872_v56 }
 0x1b6   : > { %v1790_v0 = vperm.slane %v1726_v12, 0  ;;  %v1791_v27 = vperm.slane %v1727_v57, 0  ;;  %v1792_v42 = vperm.slane %v1728_v26, 0 }
 0x1b7   : > { %v1554_v20 = vmax.f32 %v1542_v29, %v1544_v34  ;;  %v1289_v2 = vpop.f32.mrf.mxu2  ;;  %v1489_v53 = vadd.f32 %v1467_v46, %v1407_v59 }
 0x1b8   : > { %v1826_v16 = vsel %vm1805_vm8, %v1790_v0, %v1789_v58  ;;  %v1310_v23 = vadd.f32 %v1289_v2, %v1234_v31 }
 0x1b9   : > { %v1580_v35 = vrot.slane %v1554_v20, 2  ;;  %v1581_v28 = vrot.slane %v1554_v20, 4  ;;  %v1582_v14 = vrot.slane %v1554_v20, 6  ;;  %v1469_v1 = vpop.f32.mrf.mxu0  ;;  %v2120_v3 = vrot.slane %v1554_v20, 9 }
 0x1ba   : > { %v1827_v52 = vsel %vm1807_vm9, %v1791_v27, %v1826_v16  ;;  %v1509_v15 = vmul.f32 %v2882_v60, %v1489_v53 }
 0x1bb   : > { %v2121_v38 = vrot.slane %v1580_v35, 9  ;;  %v2122_v6 = vrot.slane %v1581_v28, 9  ;;  %v2123_v61 = vrot.slane %v1582_v14, 9  ;;  %v1387_v24 = vpop.f32.mrf.mxu3  ;;  %v1729_v36 = vmax.f32 %v1554_v20, %v2120_v3  ;;  %v1218_v50 = vpop.f32.mrf.mxu1 }
 0x1bc   : > { %v1828_v22 = vsel %vm1809_vm10, %v1792_v42, %v1827_v52  ;;  %v1408_v10 = vadd.f32 %v1387_v24, %v1310_v23  ;;  %v1236_v19 = vadd.f32 %v1218_v50, %v2874_v11  ;;  %v1529_v46 = vadd.f32 %v2888_v33, %v1509_v15 }
 0x1bd   : > { %v1730_v55 = vmax.f32 %v1580_v35, %v2121_v38  ;;  %v1731_v62 = vmax.f32 %v1581_v28, %v2122_v6  ;;  %v1732_v40 = vmax.f32 %v1582_v14, %v2123_v61  ;;  %v1793_v7 = vperm.slane %v1729_v36, 0 }
 0x1be   : > { %v1490_v48 = vadd.f32 %v1469_v1, %v1408_v10  ;;  %v1545_v25 = vmax.f32 %v1529_v46, 0.0 }
 0x1bf   : > { %v1794_v30 = vperm.slane %v1730_v55, 0  ;;  %v1795_v9 = vperm.slane %v1731_v62, 0  ;;  %v1292_v39 = vpop.f32.mrf.mxu2  ;;  %v1829_v18 = vsel %vm1811_vm11, %v1793_v7, %v1828_v22  ;;  %v1796_v54 = vperm.slane %v1732_v40, 0 }
 0x1c0   : > { %v1311_v43 = vadd.f32 %v1292_v39, %v1235_v17  ;;  %v1510_v29 = vmul.f32 %v2882_v60, %v1490_v48 }
 0x1c1   : > { %v1830_v21 = vsel %vm1813_vm12, %v1794_v30, %v1829_v18  ;;  %v1472_v13 = vpop.f32.mrf.mxu0 }
 0x1c2   : > { %v1831_v44 = vsel %vm1815_vm13, %v1795_v9, %v1830_v21  ;;  %v1530_v26 = vadd.f32 %v2888_v33, %v1510_v29 }
 0x1c3   : > { %v1832_v56 = vsel %vm1817_vm14, %v1796_v54, %v1831_v44  ;;  %v1390_v51 = vpop.f32.mrf.mxu3 }
 0x1c4   : > { %1847 = vst.msk [vmem:[%s2916_s6 + $0x10] sm:$0xff] %vm1844_vm15, %v1832_v56  ;;  %v1409_v32 = vadd.f32 %v1390_v51, %v1311_v43  ;;  %v1546_v3 = vmax.f32 %v1530_v26, 0.0 }
 0x1c6   : > { %v1491_v41 = vadd.f32 %v1472_v13, %v1409_v32 }
 0x1c7   : > { %v1294_v63 = vpop.f32.mrf.mxu2 }
 0x1c8   : > { %v1511_v37 = vmul.f32 %v2882_v60, %v1491_v41  ;;  %v1312_v45 = vadd.f32 %v1294_v63, %v1236_v19 }
 0x1c9   : > { %v1474_v34 = vpop.f32.mrf.mxu0 }
 0x1ca   : > { %v1531_v49 = vadd.f32 %v2888_v33, %v1511_v37 }
 0x1cb   : > { %v1392_v47 = vpop.f32.mrf.mxu3 }
 0x1cc   : > { %v1547_v12 = vmax.f32 %v1531_v49, 0.0  ;;  %v1410_v57 = vadd.f32 %v1392_v47, %v1312_v45 }
 0x1ce   : > { %v1555_v0 = vmax.f32 %v1545_v25, %v1547_v12  ;;  %v1492_v8 = vadd.f32 %v1474_v34, %v1410_v57 }
 0x1d0   : > { %v1583_v58 = vrot.slane %v1555_v0, 2  ;;  %v1584_v11 = vrot.slane %v1555_v0, 4  ;;  %v1585_v20 = vrot.slane %v1555_v0, 6  ;;  %v2124_v2 = vrot.slane %v1555_v0, 9 }
 0x1d1   : > { %v1512_v27 = vmul.f32 %v2882_v60, %v1492_v8 }
 0x1d2   : > { %v2125_v4 = vrot.slane %v1583_v58, 9  ;;  %v2126_v5 = vrot.slane %v1584_v11, 9  ;;  %v1733_v16 = vmax.f32 %v1555_v0, %v2124_v2  ;;  %v2127_v28 = vrot.slane %v1585_v20, 9 }
 0x1d3   : > { %v1532_v35 = vadd.f32 %v2888_v33, %v1512_v27 }
 0x1d4   : > { %v1734_v14 = vmax.f32 %v1583_v58, %v2125_v4  ;;  %v1735_v1 = vmax.f32 %v1584_v11, %v2126_v5  ;;  %v1797_v61 = vperm.slane %v1733_v16, 0  ;;  %v1736_v52 = vmax.f32 %v1585_v20, %v2127_v28 }
 0x1d5   : > { %v1548_v38 = vmax.f32 %v1532_v35, 0.0 }
 0x1d6   : > { %v1798_v6 = vperm.slane %v1734_v14, 0  ;;  %v1799_v36 = vperm.slane %v1735_v1, 0  ;;  %v1800_v30 = vperm.slane %v1736_v52, 0 }
 0x1d7   : > { %v1556_v24 = vmax.f32 %v1546_v3, %v1548_v38 }
 0x1d8   : > { %v1833_v59 = vsel %vm1805_vm8, %v1798_v6, %v1797_v61 }
 0x1d9   : > { %v1586_v42 = vrot.slane %v1556_v24, 2  ;;  %v1587_v55 = vrot.slane %v1556_v24, 4  ;;  %v1588_v60 = vrot.slane %v1556_v24, 6  ;;  %v2128_v62 = vrot.slane %v1556_v24, 9 }
 0x1da   : > { %v1834_v33 = vsel %vm1807_vm9, %v1799_v36, %v1833_v59 }
 0x1db   : > { %v2129_v40 = vrot.slane %v1586_v42, 9  ;;  %v2130_v7 = vrot.slane %v1587_v55, 9  ;;  %v2131_v17 = vrot.slane %v1588_v60, 9  ;;  %v1737_v22 = vmax.f32 %v1556_v24, %v2128_v62 }
 0x1dc   : > { %v1835_v53 = vsel %vm1809_vm10, %v1800_v30, %v1834_v33 }
 0x1dd   : > { %v1738_v9 = vmax.f32 %v1586_v42, %v2129_v40  ;;  %v1739_v31 = vmax.f32 %v1587_v55, %v2130_v7  ;;  %v1740_v39 = vmax.f32 %v1588_v60, %v2131_v17  ;;  %v1801_v18 = vperm.slane %v1737_v22, 0 }
 0x1df   : > { %v1802_v43 = vperm.slane %v1738_v9, 0  ;;  %v1803_v54 = vperm.slane %v1739_v31, 0  ;;  %v1836_v21 = vsel %vm1811_vm11, %v1801_v18, %v1835_v53  ;;  %v1804_v23 = vperm.slane %v1740_v39, 0 }
 0x1e1   : > { %v1837_v44 = vsel %vm1813_vm12, %v1802_v43, %v1836_v21 }
 0x1e2   : > { %v1838_v50 = vsel %vm1815_vm13, %v1803_v54, %v1837_v44 }
 0x1e3   : > { %v1839_v56 = vsel %vm1817_vm14, %v1804_v23, %v1838_v50 }
 0x1e4   : > { %1848 = vst.msk [vmem:[%s2916_s6 + $0x18] sm:$0xff] %vm1844_vm15, %v1839_v56 }
 0x1e5 PF: > { %s15_s22 = sadd.s32 1, %s2239_s22   ;;  %s3008_s18 = smov %s2231_s20 }
 0x1e6   : > { %p12_p9 = scmp.ge.s32.totalorder %s15_s22, 6   ;;  %s3009_s19 = smov %s2235_s21 }
 0x1e7   : > { %s3010_s20 = smov %s3013_s23  ;;  %s3011_s21 = smov %s3017_s24 }
 0x1e8   :  { %14 = sbr.rel (!%p12_p9) target bundleno = 3 (0x3), region = 73 }

// kernel: _lambda_.11
= control target key start
LH: loop header
LB: loop body
LE: loop exit
PB: predicated region body
PF: predicated region fallthrough
CT: control target
= control target key end

     0   :  { %s1522_s18 = smov 0   ;;  %s1524_s19 = smov 0   ;;  %s1945_s0 = inlined_call_operand.vmem [shape: bf16[2,10,10,8], index: 0, kind: input, shape index: {}, may-alias: {0,1}]   ;;  %s1946_s1 = inlined_call_operand.vmem [shape: bf16[2,10,10,8], index: 1, kind: input, shape index: {}, may-alias: {0,1}]   ;;  %s1947_s2 = inlined_call_operand.vmem [shape: bf16[3,3,8,16], index: 2, kind: input, shape index: {}]   ;;  %s1948_s3 = inlined_call_operand.vmem [shape: f32[1,16], index: 3, kind: input, shape index: {}]   ;;  %s1949_s4 = inlined_call_operand.vmem [shape: f32[1,16], index: 4, kind: input, shape index: {}]   ;;  %s1950_s5 = inlined_call_operand.vmem [shape: f32[2,4,4,16], index: 5, kind: output, shape index: {}]  }
   0x1   :  { %s1526_s20 = smov 0  }
   0x2 LB: > { %s27_s21 = sadd.s32 1, %s1486_s19  ;;  %p1364_p0 = scmp.ge.s32.totalorder %s1490_s20, 1  ;;  %s1490_s20 = sphi %s1526_s20, %s15_s20   ;;  %s1486_s19 = sphi %s1524_s19, %s1956_s19   ;;  %s1482_s18 = sphi %s1522_s18, %s1955_s18  }
   0x3   : > { %p29_p1 = scmp.ge.s32.totalorder %s27_s21, 2  ;;  %p245_p2 = scmp.lt.s32.totalorder %s1490_s20, 3 }
   0x5   : > { %s1958_s21 = smov (%p29_p1, %s27_s21), 0  ;;  %p246_p3 = pnand %p1364_p0, %p245_p2 }
   0x6   : > { %p305_p4 = scmp.lt.s32.totalorder (!%p246_p3), %s1482_s18, 1 }
   0x7   : > { %249 = sbr.rel (%p246_p3) target bundleno = 333 (0x14d), region = 40 }
   0xc   : > { %v367_v0 = vld [vmem:[%s1947_s2 + $0x4] sm:$0xf]  ;;  %vm515_vm0 = vcmask 1043456   ;;  %v368_v2 = vld [vmem:[%s1947_s2 + $0x8] sm:$0xf]  ;;  %s1960_s18 = smov (!%p305_p4, %s1482_s18), 1 }
   0xd   : > { %v517_v1 = vsel %vm515_vm0, %v367_v0, 0  ;;  %v680_v3 = vsel %vm515_vm0, %v368_v2, 0  ;;  %s1439_s26 = smul.u32 80, %s1960_s18  ;;  %v369_v4 = vld [vmem:[%s1947_s2 + $0xc] sm:$0xf]  ;;  %vm502_vm3 = vcmask 64512  }
   0xe   : > { %1436 = vmatpush.bf16.msra.mxu1 %v517_v1  ;;  %1437 = vmatpush.bf16.msra.mxu2 %v517_v1  ;;  %v366_v5 = vld [vmem:[%s1947_s2] sm:$0xf]  ;;  %v738_v6 = vsel %vm515_vm0, %v369_v4, 0  ;;  %v370_v8 = vld [vmem:[%s1947_s2 + $0x10] sm:$0xf]  ;;  %vm620_vm5 = vcmask 1042432  }
   0xf   : > { %1438 = vmatpush.bf16.msra.mxu3 %v517_v1  ;;  %526 = vmatpush.bf16.msra.mxu0 %v517_v1  ;;  %v581_v7 = vsel %vm515_vm0, %v366_v5, 0  ;;  %s1567_s10 = scalar_lea.vmem %s1945_s0, %s1439_s26  ;;  %vm375_vm1 = vsmask.f32 3328  ;;  %vm376_vm2 = vsmask.f32 7440  ;;  %v809_v9 = vsel %vm515_vm0, %v370_v8, 0 }
  0x10   : > { %v1571_v10 = vld [vmem:[%s1567_s10 + $0x10] sm:$0xf]  ;;  %v1574_v11 = vld [vmem:[%s1567_s10 + $0x14] sm:$0x1]  ;;  %v1577_v12 = vld [vmem:[%s1567_s10 + $0x18] sm:$0xf] }
  0x11   : > { %v1580_v13 = vld [vmem:[%s1567_s10 + $0x1c] sm:$0x1]  ;;  %v407_v14 = vshrl.u32 %v1571_v10, 16  ;;  %v410_v15 = vshll.u32 %v1571_v10, 16  ;;  %v416_v16 = vshll.u32 %v1574_v11, 16  ;;  %v421_v17 = vshrl.u32 %v1577_v12, 16  ;;  %vm1610_vm4 = vmor %vm375_vm1, %vm376_vm2 }
  0x12   : > { %689 = vmatpush.bf16.msrb.mxu2 %v680_v3  ;;  %590 = vmatpush.bf16.msrb.mxu1 %v581_v7  ;;  %v424_v18 = vshll.u32 %v1577_v12, 16  ;;  %v430_v19 = vshll.u32 %v1580_v13, 16  ;;  %v1589_v20 = vld [vmem:[%s1567_s10 + $0x20] sm:$0xf]  ;;  %v1592_v21 = vld [vmem:[%s1567_s10 + $0x24] sm:$0x1] }
  0x13   : > { %747 = vmatpush.bf16.msrb.mxu3 %v738_v6  ;;  %818 = vmatpush.bf16.msrb.mxu0 %v809_v9  ;;  %v409_v22 = vrot.slane %v407_v14, 4  ;;  %v412_v23 = vrot.slane %v410_v15, 5  ;;  %v418_v24 = vrot.slane %v416_v16, 5  ;;  %v423_v25 = vrot.slane %v421_v17, 4  ;;  %v1595_v26 = vld [vmem:[%s1567_s10 + $0x28] sm:$0xf] }
  0x14   : > { %v426_v27 = vrot.slane %v424_v18, 5  ;;  %v432_v28 = vrot.slane %v430_v19, 5  ;;  %v1598_v29 = vld [vmem:[%s1567_s10 + $0x2c] sm:$0x1]  ;;  %v435_v30 = vshrl.u32 %v1589_v20, 16  ;;  %v438_v31 = vshll.u32 %v1589_v20, 16 }
  0x15   : > { %v413_v32 = vor.u32 %v412_v23, %v409_v22  ;;  %v444_v33 = vshll.u32 %v1592_v21, 16  ;;  %v449_v34 = vshrl.u32 %v1595_v26, 16  ;;  %v452_v35 = vshll.u32 %v1595_v26, 16  ;;  %v1606_v36 = vld [vmem:[%s1567_s10 + $0x30] sm:$0xf]  ;;  %s1434_s23 = sadd.s32 64, %s1439_s26 }
  0x16   : > { %v427_v38 = vor.u32 %v426_v27, %v423_v25  ;;  %v437_v39 = vrot.slane %v435_v30, 4  ;;  %v440_v40 = vrot.slane %v438_v31, 5  ;;  %v458_v41 = vshll.u32 %v1598_v29, 16  ;;  %v1616_v42 = vld [vmem:[%s1567_s10 + $0x34] sm:$0x1]  ;;  %s1748_s27 = scalar_lea.vmem %s1946_s1, %s1434_s23  ;;  %s1435_s6 = sshll.u32 %s1960_s18, 4 }
  0x17   : > { %v414_v43 = vrot.slane %v413_v32, 4  ;;  %v446_v44 = vrot.slane %v444_v33, 5  ;;  %v451_v45 = vrot.slane %v449_v34, 4  ;;  %v454_v46 = vrot.slane %v452_v35, 5  ;;  %v1622_v53 = vld [vmem:[%s1567_s10 + $0x38] sm:$0xf]  ;;  %s1896_s9 = scalar_lea.vmem %s1950_s5, %s1435_s6 }
  0x18   : > { %v428_v47 = vrot.slane %v427_v38, 4  ;;  %v441_v48 = vor.u32 %v440_v40, %v437_v39  ;;  %v460_v49 = vrot.slane %v458_v41, 5  ;;  %v463_v50 = vshrl.u32 %v1606_v36, 16  ;;  %v1625_v54 = vld [vmem:[%s1567_s10 + $0x3c] sm:$0x1] }
  0x19   : > { %v419_v51 = vsel %vm1610_vm4, %v414_v43, %v418_v24  ;;  %v455_v52 = vor.u32 %v454_v46, %v451_v45  ;;  %v466_v55 = vshll.u32 %v1606_v36, 16  ;;  %v472_v56 = vshll.u32 %v1616_v42, 16  ;;  %v1636_v1 = vld [vmem:[%s1567_s10] sm:$0xf]  ;;  %v347_v6 = vld [vmem:[%s1567_s10 + $0x4] sm:$0x1] }
  0x1a   : > { %v433_v57 = vsel %vm1610_vm4, %v428_v47, %v432_v28  ;;  %v1631_v58 = vunpack.c.l.b16 %v419_v51  ;;  %v442_v59 = vrot.slane %v441_v48, 4  ;;  %v465_v60 = vrot.slane %v463_v50, 4  ;;  %v1653_v15 = vld [vmem:[%s1567_s10 + $0x8] sm:$0xf]  ;;  %v349_v30 = vld [vmem:[%s1567_s10 + $0xc] sm:$0x1] }
  0x1b   : > { %v1633_v61 = vunpack.c.l.b16 %v433_v57  ;;  %v456_v62 = vrot.slane %v455_v52, 4  ;;  %v468_v63 = vrot.slane %v466_v55, 5  ;;  %v474_v0 = vrot.slane %v472_v56, 5  ;;  %v372_v51 = vld [vmem:[%s1947_s2 + $0x18] sm:$0xf] }
  0x1c   : > { %v447_v2 = vsel %vm1610_vm4, %v442_v59, %v446_v44  ;;  %v477_v3 = vshrl.u32 %v1622_v53, 16  ;;  %v480_v4 = vshll.u32 %v1622_v53, 16  ;;  %v486_v5 = vshll.u32 %v1625_v54, 16 }
  0x1d   : > { %v1646_v7 = vpack.c.b16 %v1633_v61, %v1631_v58  ;;  %v461_v8 = vsel %vm1610_vm4, %v456_v62, %v460_v49  ;;  %v1650_v9 = vunpack.c.l.b16 %v447_v2  ;;  %v469_v14 = vor.u32 %v468_v63, %v465_v60  ;;  %v371_v2 = vld [vmem:[%s1947_s2 + $0x14] sm:$0xf] }
  0x1e   : > { %v1655_v16 = vunpack.c.l.b16 %v461_v8  ;;  %v479_v17 = vrot.slane %v477_v3, 4  ;;  %v482_v18 = vrot.slane %v480_v4, 5  ;;  %v488_v19 = vrot.slane %v486_v5, 5 }
  0x1f   : > { %1370 = vmatmul.msk.bf16.vlgmr.msra.gmra.mxu1 %vm502_vm3, %v1646_v7  ;;  %v470_v22 = vrot.slane %v469_v14, 4  ;;  %v379_v23 = vshrl.u32 %v1636_v1, 16  ;;  %v382_v24 = vshll.u32 %v1636_v1, 16  ;;  %v388_v25 = vshll.u32 %v347_v6, 16 }
  0x20   : > { %v1663_v27 = vpack.c.b16 %v1655_v16, %v1650_v9  ;;  %v483_v28 = vor.u32 %v482_v18, %v479_v17  ;;  %v393_v31 = vshrl.u32 %v1653_v15, 16  ;;  %v396_v32 = vshll.u32 %v1653_v15, 16 }
  0x21   : > { %v475_v33 = vsel %vm1610_vm4, %v470_v22, %v474_v0  ;;  %v381_v34 = vrot.slane %v379_v23, 4  ;;  %v384_v35 = vrot.slane %v382_v24, 5  ;;  %vm621_vm6 = vcmask 1046532   ;;  %v373_v0 = vld [vmem:[%s1947_s2 + $0x1c] sm:$0xf] }
  0x22   : > { %1371 = vmatmul.msk.bf16.vlgmr.msra.gmra.mxu2 %vm502_vm3, %v1663_v27  ;;  %v484_v38 = vrot.slane %v483_v28, 4  ;;  %v390_v39 = vrot.slane %v388_v25, 5  ;;  %v395_v40 = vrot.slane %v393_v31, 4  ;;  %v398_v41 = vrot.slane %v396_v32, 5  ;;  %vm1677_vm7 = vmor %vm620_vm5, %vm621_vm6 }
  0x23   : > { %v1672_v43 = vunpack.c.l.b16 %v475_v33  ;;  %v385_v44 = vor.u32 %v384_v35, %v381_v34  ;;  %v402_v45 = vshll.u32 %v349_v30, 16  ;;  %v625_v46 = vrot.slane %v347_v6, 5 }
  0x24   : > { %v489_v47 = vsel %vm1610_vm4, %v484_v38, %v488_v19  ;;  %v399_v48 = vor.u32 %v398_v41, %v395_v40  ;;  %v629_v49 = vrot.slane %v349_v30, 5  ;;  %v1377_v57 = vrot.slane %v1636_v1, 9 }
  0x25   : > { %v1684_v52 = vunpack.c.l.b16 %v489_v47  ;;  %v386_v55 = vrot.slane %v385_v44, 4  ;;  %v404_v56 = vrot.slane %v402_v45, 5  ;;  %v556_v60 = vunpack.c.l.b16 %v1636_v1 }
  0x26   : > { %v400_v59 = vrot.slane %v399_v48, 4  ;;  %v557_v62 = vunpack.c.l.b16 %v1653_v15  ;;  %v1378_v63 = vrot.slane %v1653_v15, 9  ;;  %v626_v1 = vsel %vm1677_vm7, %v1377_v57, %v625_v46  ;;  %v374_v15 = vld [vmem:[%s1947_s2 + $0x20] sm:$0xf]  ;;  %v1766_v57 = vld [vmem:[%s1748_s27 + $0x4] sm:$0x1] }
  0x27   : > { %v1698_v3 = vpack.c.b16 %v1684_v52, %v1672_v43  ;;  %v391_v4 = vsel %vm1610_vm4, %v386_v55, %v390_v39  ;;  %v917_v5 = vsel %vm515_vm0, %v372_v51, 0  ;;  %v976_v18 = vsel %vm515_vm0, %v373_v0, 0 }
  0x28   : > { %v405_v6 = vsel %vm1610_vm4, %v400_v59, %v404_v56  ;;  %v490_v8 = vunpack.c.l.b16 %v391_v4  ;;  %v1709_v14 = vsel %vm1677_vm7, %v1378_v63, %v629_v49  ;;  %926 = vmatpush.bf16.msra.mxu2 %v917_v5  ;;  %v871_v19 = vsel %vm515_vm0, %v371_v2, 0 }
  0x29   : > { %1372 = vmatmul.msk.bf16.vlgmr.msra.gmra.mxu3 %vm502_vm3, %v1698_v3  ;;  %v491_v17 = vunpack.c.l.b16 %v405_v6  ;;  %v655_v22 = vunpack.c.l.b16 %v626_v1  ;;  %v656_v23 = vunpack.c.l.b16 %v1709_v14  ;;  %880 = vmatpush.bf16.msra.mxu1 %v871_v19  ;;  %v564_v25 = vpack.c.b16 %v557_v62, %v556_v60 }
  0x2a   : > { %985 = vmatpush.bf16.msra.mxu3 %v976_v18  ;;  %v1026_v28 = vsel %vm515_vm0, %v374_v15, 0  ;;  %v558_v31 = vunpack.c.l.b16 %v1571_v10  ;;  %v1379_v32 = vrot.slane %v1571_v10, 9  ;;  %v633_v33 = vrot.slane %v1574_v11, 5 }
  0x2b   : > { %v498_v24 = vpack.c.b16 %v491_v17, %v490_v8  ;;  %v663_v30 = vpack.c.b16 %v656_v23, %v655_v22  ;;  %v1380_v34 = vrot.slane %v1577_v12, 9  ;;  %v637_v35 = vrot.slane %v1580_v13, 5 }
  0x2c   : > { %v721_v38 = vpack.c.b16 %v558_v31, %v557_v62  ;;  %v559_v39 = vunpack.c.l.b16 %v1577_v12  ;;  %v1733_v40 = vsel %vm1677_vm7, %v1379_v32, %v633_v33  ;;  %v792_v10 = vpack.c.b16 %v1631_v58, %v491_v17  ;;  %v1755_v58 = vld [vmem:[%s1748_s27] sm:$0xf]  ;;  %v364_v33 = vld [vmem:[%s1748_s27 + $0x8] sm:$0xf] }
  0x2d   : > { %1369 = vmatmul.msk.bf16.vlgmr.msra.gmra.mxu0 %vm502_vm3, %v498_v24  ;;  %v1737_v41 = vsel %vm1677_vm7, %v1380_v34, %v637_v35  ;;  %v657_v11 = vunpack.c.l.b16 %v1733_v40  ;;  %v778_v45 = vshrl.u32 %v1755_v58, 16  ;;  %v781_v46 = vshll.u32 %v1755_v58, 16 }
  0x2e   : > { %1035 = vmatpush.bf16.msra.mxu0 %v1026_v28  ;;  %v658_v13 = vunpack.c.l.b16 %v1737_v41  ;;  %v565_v44 = vpack.c.b16 %v559_v39, %v558_v31  ;;  %v560_v47 = vunpack.c.l.b16 %v1589_v20  ;;  %v1381_v48 = vrot.slane %v1589_v20, 9 }
  0x2f   : > { %1373 = vmatmul.msk.bf16.vlgmr.msrb.gmra.mxu1 %vm502_vm3, %v564_v25  ;;  %v780_v49 = vrot.slane %v778_v45, 4  ;;  %v641_v51 = vrot.slane %v1592_v21, 5  ;;  %v1382_v55 = vrot.slane %v1595_v26, 9  ;;  %v645_v56 = vrot.slane %v1598_v29, 5 }
  0x30   : > { %v664_v12 = vpack.c.b16 %v658_v13, %v657_v11  ;;  %v783_v59 = vrot.slane %v781_v46, 5  ;;  %v787_v60 = vshll.u32 %v1766_v57, 16  ;;  %v722_v62 = vpack.c.b16 %v560_v47, %v559_v39 }
  0x31   : > { %v561_v2 = vunpack.c.l.b16 %v1595_v26  ;;  %v642_v20 = vsel %vm1677_vm7, %v1381_v48, %v641_v51  ;;  %v1774_v21 = vsel %vm1677_vm7, %v1382_v55, %v645_v56  ;;  %v793_v29 = vpack.c.b16 %v1650_v9, %v1633_v61 }
  0x32   : > { %1385 = vmatmul.msk.bf16.vlgmr.msrb.gmra.mxu2 %vm502_vm3, %v663_v30  ;;  %v784_v63 = vor.u32 %v783_v59, %v780_v49  ;;  %v789_v0 = vrot.slane %v787_v60, 5  ;;  %v659_v5 = vunpack.c.l.b16 %v642_v20  ;;  %v660_v6 = vunpack.c.l.b16 %v1774_v21 }
  0x33   : > { %v566_v8 = vpack.c.b16 %v561_v2, %v560_v47  ;;  %v562_v18 = vunpack.c.l.b16 %v1606_v36  ;;  %v1383_v61 = vrot.slane %v1606_v36, 9  ;;  %v649_v9 = vrot.slane %v1616_v42, 5 }
  0x34   : > { %v785_v4 = vrot.slane %v784_v63, 4  ;;  %v665_v17 = vpack.c.b16 %v660_v6, %v659_v5  ;;  %v1384_v19 = vrot.slane %v1622_v53, 9  ;;  %v653_v22 = vrot.slane %v1625_v54, 5 }
  0x35   : > { %v723_v24 = vpack.c.b16 %v562_v18, %v561_v2  ;;  %v650_v25 = vsel %vm1677_vm7, %v1383_v61, %v649_v9  ;;  %v794_v36 = vpack.c.b16 %v1672_v43, %v1655_v16  ;;  %v854_v16 = vpack.c.b16 %v657_v11, %v656_v23 }
  0x36   : > { %v790_v1 = vsel %vm1610_vm4, %v785_v4, %v789_v0  ;;  %v654_v28 = vsel %vm1677_vm7, %v1384_v19, %v653_v22  ;;  %v661_v30 = vunpack.c.l.b16 %v650_v25  ;;  %v855_v43 = vpack.c.b16 %v659_v5, %v658_v13 }
  0x37   : > { %v1782_v26 = vunpack.c.l.b16 %v790_v1  ;;  %v662_v42 = vunpack.c.l.b16 %v654_v28  ;;  %v957_v34 = vshrl.u32 %v364_v33, 16  ;;  %v960_v35 = vshll.u32 %v364_v33, 16 }
  0x38   : > { %v856_v51 = vpack.c.b16 %v661_v30, %v660_v6  ;;  %v911_v37 = vunpack.c.l.b16 %v364_v33  ;;  %vm1225_vm8 = vcmask 1041409   ;;  %vm1227_vm9 = vcmask 1042434  }
  0x39   : > { %1389 = vmatmul.msk.bf16.vlgmr.msrb.gmra.mxu3 %vm502_vm3, %v721_v38  ;;  %v795_v15 = vpack.c.b16 %v1782_v26, %v1684_v52  ;;  %v563_v52 = vunpack.c.l.b16 %v1622_v53  ;;  %v666_v54 = vpack.c.b16 %v662_v42, %v661_v30  ;;  %v720_v53 = vunpack.c.l.b16 %v1755_v58  ;;  %v365_v38 = vld [vmem:[%s1748_s27 + $0xc] sm:$0x1] }
  0x3a   : > { %v959_v14 = vrot.slane %v957_v34, 4  ;;  %v962_v23 = vrot.slane %v960_v35, 5  ;;  %v966_v40 = vshll.u32 %v365_v38, 16  ;;  %v1018_v45 = vrot.slane %v365_v38, 5 }
  0x3b   : > { %v567_v31 = vpack.c.b16 %v563_v52, %v562_v18  ;;  %v724_v32 = vpack.c.b16 %v720_v53, %v563_v52  ;;  %vm1229_vm10 = vcmask 1043459   ;;  %vm1244_vm11 = vcmask 125952  }
  0x3c   : > { %v963_v39 = vor.u32 %v962_v23, %v959_v14  ;;  %v968_v11 = vrot.slane %v966_v40, 5 }
  0x3d   : > { %1393 = vmatmul.msk.bf16.vlgmr.msrb.gmra.mxu0 %vm502_vm3, %v792_v10  ;;  %v1397_v10 = vrot.slane %v1755_v58, 9 }
  0x3e   : > { %v964_v41 = vrot.slane %v963_v39, 4 }
  0x3f   : > { %1374 = vmatmul.msk.bf16.gmra.mxu1 %vm502_vm3, %v565_v44 }
  0x42   : > { %1386 = vmatmul.msk.bf16.gmra.mxu2 %vm502_vm3, %v664_v12 }
  0x49   : > { %1390 = vmatmul.msk.bf16.gmra.mxu3 %vm502_vm3, %v722_v62 }
  0x4d   : > { %1394 = vmatmul.msk.bf16.gmra.mxu0 %vm502_vm3, %v793_v29 }
  0x4f   : > { %1375 = vmatmul.msk.bf16.gmra.mxu1 %vm502_vm3, %v566_v8 }
  0x52   : > { %1387 = vmatmul.msk.bf16.gmra.mxu2 %vm502_vm3, %v665_v17 }
  0x59   : > { %1391 = vmatmul.msk.bf16.gmra.mxu3 %vm502_vm3, %v723_v24 }
  0x5d   : > { %1395 = vmatmul.msk.bf16.gmra.mxu0 %vm502_vm3, %v794_v36 }
  0x5f   : > { %1376 = vmatmul.msk.bf16.gmra.mxu1 %vm502_vm3, %v567_v31 }
  0x62   : > { %1388 = vmatmul.msk.bf16.gmra.mxu2 %vm502_vm3, %v666_v54 }
  0x69   : > { %1392 = vmatmul.msk.bf16.gmra.mxu3 %vm502_vm3, %v724_v32 }
  0x6d   : > { %1396 = vmatmul.msk.bf16.gmra.mxu0 %vm502_vm3, %v795_v15 }
  0x6f   : > { %1398 = vmatmul.msk.bf16.vlgmr.msra.gmra.mxu1 %vm502_vm3, %v854_v16 }
  0x72   : > { %1402 = vmatmul.msk.bf16.vlgmr.msra.gmra.mxu2 %vm502_vm3, %v565_v44  ;;  %v969_v44 = vsel %vm1610_vm4, %v964_v41, %v968_v11 }
  0x73   : > { %v970_v46 = vunpack.c.l.b16 %v969_v44 }
  0x75   : > { %v971_v48 = vpack.c.b16 %v970_v46, %v1782_v26 }
  0x79   : > { %1406 = vmatmul.msk.bf16.vlgmr.msra.gmra.mxu3 %vm502_vm3, %v1646_v7  ;;  %v851_v7 = vrot.slane %v1766_v57, 5 }
  0x7b   : > { %v852_v13 = vsel %vm1677_vm7, %v1397_v10, %v851_v7 }
  0x7c   : > { %v853_v58 = vunpack.c.l.b16 %v852_v13 }
  0x7d   : > { %1411 = vmatmul.msk.bf16.vlgmr.msra.gmra.mxu0 %vm502_vm3, %v664_v12  ;;  %v1410_v12 = vrot.slane %v364_v33, 9 }
  0x7e   : > { %v857_v50 = vpack.c.b16 %v853_v58, %v662_v42 }
  0x7f   : > { %1399 = vmatmul.msk.bf16.gmra.mxu1 %vm502_vm3, %v855_v43  ;;  %v1019_v47 = vsel %vm1677_vm7, %v1410_v12, %v1018_v45 }
  0x80   : > { %v1020_v49 = vunpack.c.l.b16 %v1019_v47 }
  0x82   : > { %1403 = vmatmul.msk.bf16.gmra.mxu2 %vm502_vm3, %v566_v8  ;;  %v1021_v55 = vpack.c.b16 %v1020_v49, %v853_v58 }
  0x89   : > { %1407 = vmatmul.msk.bf16.gmra.mxu3 %vm502_vm3, %v1663_v27  ;;  %v912_v27 = vpack.c.b16 %v911_v37, %v720_v53 }
  0x8d   : > { %1412 = vmatmul.msk.bf16.gmra.mxu0 %vm502_vm3, %v665_v17 }
  0x8f   : > { %1400 = vmatmul.msk.bf16.gmra.mxu1 %vm502_vm3, %v856_v51 }
  0x92   : > { %1404 = vmatmul.msk.bf16.gmra.mxu2 %vm502_vm3, %v567_v31 }
  0x99   : > { %1408 = vmatmul.msk.bf16.gmra.mxu3 %vm502_vm3, %v1698_v3 }
  0x9c   : > { %v533_v56 = vpop.f32.mrf.mxu1 }
  0x9d   : > { %1413 = vmatmul.msk.bf16.gmra.mxu0 %vm502_vm3, %v666_v54 }
  0x9f   : > { %1401 = vmatmul.msk.bf16.gmra.mxu1 %vm502_vm3, %v857_v50 }
  0xa2   : > { %1405 = vmatmul.msk.bf16.gmra.mxu2 %vm502_vm3, %v912_v27 }
  0xa4   : > { %v1840_v57 = vpop.f32.mrf.mxu1 }
  0xa5   : > { %v538_v59 = vpop.f32.mrf.mxu2 }
  0xa9   : > { %1409 = vmatmul.msk.bf16.gmra.mxu3 %vm502_vm3, %v971_v48 }
  0xaa   : > { %v528_v60 = vpop.f32.mrf.mxu0 }
  0xac   : > { %v543_v62 = vpop.f32.mrf.mxu3  ;;  %v592_v63 = vpop.f32.mrf.mxu1 }
  0xad   : > { %1414 = vmatmul.msk.bf16.gmra.mxu0 %vm502_vm3, %v1021_v55  ;;  %v1844_v3 = vpop.f32.mrf.mxu2  ;;  %v593_v0 = vadd.f32 %v592_v63, %v528_v60 }
  0xb2   : > { %v530_v2 = vpop.f32.mrf.mxu0 }
  0xb4   : > { %v1846_v20 = vpop.f32.mrf.mxu3  ;;  %v594_v21 = vpop.f32.mrf.mxu1 }
  0xb5   : > { %v691_v4 = vpop.f32.mrf.mxu2  ;;  %v595_v58 = vadd.f32 %v594_v21, %v530_v2  ;;  %v1873_v2 = vld [vmem:[%s1948_s3] ss:$0 sm:$0xff] }
  0xb6   : > { %v711_v29 = vadd.f32 %v691_v4, %v593_v0 }
  0xba   : > { %v820_v1 = vpop.f32.mrf.mxu0 }
  0xbc   : > { %v749_v5 = vpop.f32.mrf.mxu3  ;;  %v597_v6 = vpop.f32.mrf.mxu1 }
  0xbd   : > { %v769_v26 = vadd.f32 %v749_v5, %v711_v29  ;;  %v693_v8 = vpop.f32.mrf.mxu2  ;;  %v598_v15 = vadd.f32 %v597_v6, %v533_v56 }
  0xbe   : > { %v712_v51 = vadd.f32 %v693_v8, %v595_v58  ;;  %v1880_v8 = vld [vmem:[%s1949_s4] ss:$0 sm:$0xff] }
  0xbf   : > { %v840_v17 = vadd.f32 %v820_v1, %v769_v26 }
  0xc2   : > { %v822_v18 = vpop.f32.mrf.mxu0 }
  0xc4   : > { %v751_v61 = vpop.f32.mrf.mxu3  ;;  %v599_v9 = vpop.f32.mrf.mxu1 }
  0xc5   : > { %v696_v19 = vpop.f32.mrf.mxu2  ;;  %v770_v50 = vadd.f32 %v751_v61, %v712_v51  ;;  %v600_v5 = vadd.f32 %v599_v9, %v1840_v57 }
  0xc6   : > { %v713_v22 = vadd.f32 %v696_v19, %v598_v15 }
  0xc7   : > { %v841_v63 = vadd.f32 %v822_v18, %v770_v50 }
  0xca   : > { %v825_v24 = vpop.f32.mrf.mxu0 }
  0xcc   : > { %v754_v52 = vpop.f32.mrf.mxu3  ;;  %v602_v25 = vpop.f32.mrf.mxu1 }
  0xcd   : > { %v771_v28 = vadd.f32 %v754_v52, %v713_v22  ;;  %v698_v36 = vpop.f32.mrf.mxu2  ;;  %v603_v30 = vadd.f32 %v602_v25, %v538_v59 }
  0xce   : > { %v714_v61 = vadd.f32 %v698_v36, %v600_v5 }
  0xcf   : > { %v842_v42 = vadd.f32 %v825_v24, %v771_v28 }
  0xd2   : > { %v1848_v31 = vpop.f32.mrf.mxu0 }
  0xd4   : > { %v756_v54 = vpop.f32.mrf.mxu3  ;;  %v1850_v53 = vpop.f32.mrf.mxu1 }
  0xd5   : > { %v701_v32 = vpop.f32.mrf.mxu2  ;;  %v772_v25 = vadd.f32 %v756_v54, %v714_v61  ;;  %v605_v54 = vadd.f32 %v1850_v53, %v1844_v3 }
  0xd6   : > { %v715_v16 = vadd.f32 %v701_v32, %v603_v30 }
  0xda   : > { %v830_v43 = vpop.f32.mrf.mxu0 }
  0xdc   : > { %v759_v33 = vpop.f32.mrf.mxu3  ;;  %v607_v34 = vpop.f32.mrf.mxu1 }
  0xdd   : > { %v773_v35 = vadd.f32 %v759_v33, %v715_v16  ;;  %v1852_v14 = vpop.f32.mrf.mxu2  ;;  %v608_v23 = vadd.f32 %v607_v34, %v543_v62  ;;  %v843_v34 = vadd.f32 %v1848_v31, %v772_v25 }
  0xde   : > { %v716_v31 = vadd.f32 %v1852_v14, %v605_v54 }
  0xdf   : > { %v1854_v38 = vadd.f32 %v830_v43, %v773_v35 }
  0xe2   : > { %v1856_v39 = vpop.f32.mrf.mxu0 }
  0xe4   : > { %v1858_v40 = vpop.f32.mrf.mxu3  ;;  %v1860_v10 = vpop.f32.mrf.mxu1 }
  0xe5   : > { %v706_v7 = vpop.f32.mrf.mxu2 }
  0xe6   : > { %v717_v41 = vadd.f32 %v706_v7, %v608_v23 }
  0xea   : > { %v835_v11 = vpop.f32.mrf.mxu0 }
  0xec   : > { %v764_v13 = vpop.f32.mrf.mxu3  ;;  %v882_v44 = vpop.f32.mrf.mxu1 }
  0xed   : > { %v775_v12 = vadd.f32 %v764_v13, %v717_v41  ;;  %v1862_v45 = vpop.f32.mrf.mxu2  ;;  %v902_v37 = vadd.f32 %v882_v44, %v840_v17 }
  0xef   : > { %v1864_v46 = vadd.f32 %v835_v11, %v775_v12 }
  0xf2   : > { %v1866_v47 = vpop.f32.mrf.mxu0 }
  0xf4   : > { %v1868_v48 = vpop.f32.mrf.mxu3  ;;  %v884_v49 = vpop.f32.mrf.mxu1 }
  0xf5   : > { %v928_v55 = vpop.f32.mrf.mxu2  ;;  %v903_v4 = vadd.f32 %v884_v49, %v841_v63 }
  0xf6   : > { %v948_v56 = vadd.f32 %v928_v55, %v902_v37 }
  0xfa   : > { %v1037_v27 = vpop.f32.mrf.mxu0 }
  0xfc   : > { %v987_v59 = vpop.f32.mrf.mxu3  ;;  %v887_v60 = vpop.f32.mrf.mxu1 }
  0xfd   : > { %v1007_v62 = vadd.f32 %v987_v59, %v948_v56  ;;  %v930_v0 = vpop.f32.mrf.mxu2  ;;  %v904_v22 = vadd.f32 %v887_v60, %v842_v42 }
  0xfe   : > { %v949_v21 = vadd.f32 %v930_v0, %v903_v4  ;;  %v774_v4 = vadd.f32 %v1858_v40, %v716_v31 }
  0xff   : > { %v1057_v29 = vadd.f32 %v1037_v27, %v1007_v62 }
 0x101   : > { %v1069_v26 = vmul.f32 %v1873_v2, %v1057_v29 }
 0x102   : > { %v1039_v1 = vpop.f32.mrf.mxu0 }
 0x103   : > { %v1081_v24 = vadd.f32 %v1880_v8, %v1069_v26 }
 0x104   : > { %v989_v6 = vpop.f32.mrf.mxu3  ;;  %v889_v18 = vpop.f32.mrf.mxu1 }
 0x105   : > { %v1008_v15 = vadd.f32 %v989_v6, %v949_v21  ;;  %v933_v17 = vpop.f32.mrf.mxu2  ;;  %v1089_v32 = vmax.f32 %v1081_v24, 0.0  ;;  %v905_v23 = vadd.f32 %v889_v18, %v843_v34 }
 0x106   : > { %v950_v9 = vadd.f32 %v933_v17, %v904_v22 }
 0x107   : > { %v1058_v19 = vadd.f32 %v1039_v1, %v1008_v15 }
 0x109   : > { %v1070_v52 = vmul.f32 %v1873_v2, %v1058_v19  ;;  %v845_v19 = vadd.f32 %v1856_v39, %v774_v4 }
 0x10a   : > { %v1042_v57 = vpop.f32.mrf.mxu0 }
 0x10b   : > { %v1082_v28 = vadd.f32 %v1880_v8, %v1070_v52 }
 0x10c   : > { %v992_v30 = vpop.f32.mrf.mxu3  ;;  %v892_v36 = vpop.f32.mrf.mxu1 }
 0x10d   : > { %v1090_v16 = vmax.f32 %v1082_v28, 0.0  ;;  %v935_v43 = vpop.f32.mrf.mxu2  ;;  %v1009_v33 = vadd.f32 %v992_v30, %v950_v9  ;;  %v906_v0 = vadd.f32 %v892_v36, %v1854_v38 }
 0x10e   : > { %v951_v12 = vadd.f32 %v935_v43, %v905_v23 }
 0x10f   : > { %v1097_v35 = vmax.f32 %v1089_v32, %v1090_v16  ;;  %v1059_v13 = vadd.f32 %v1042_v57, %v1009_v33  ;;  %v610_v33 = vadd.f32 %v1860_v10, %v1846_v20 }
 0x111   : > { %v1105_v42 = vrot.slane %v1097_v35, 2  ;;  %v1106_v7 = vrot.slane %v1097_v35, 4  ;;  %v1107_v41 = vrot.slane %v1097_v35, 6  ;;  %v1415_v11 = vrot.slane %v1097_v35, 9 }
 0x112   : > { %v1044_v44 = vpop.f32.mrf.mxu0  ;;  %v1071_v60 = vmul.f32 %v1873_v2, %v1059_v13  ;;  %v718_v13 = vadd.f32 %v1862_v45, %v610_v33 }
 0x113   : > { %v1416_v58 = vrot.slane %v1105_v42, 9  ;;  %v1417_v49 = vrot.slane %v1106_v7, 9  ;;  %v1418_v51 = vrot.slane %v1107_v41, 9  ;;  %v1177_v55 = vmax.f32 %v1097_v35, %v1415_v11 }
 0x114   : > { %v994_v37 = vpop.f32.mrf.mxu3  ;;  %v894_v5 = vpop.f32.mrf.mxu1  ;;  %v1083_v38 = vadd.f32 %v1880_v8, %v1071_v60 }
 0x115   : > { %v1178_v50 = vmax.f32 %v1105_v42, %v1416_v58  ;;  %v1179_v56 = vmax.f32 %v1106_v7, %v1417_v49  ;;  %v1180_v27 = vmax.f32 %v1107_v41, %v1418_v51  ;;  %v938_v59 = vpop.f32.mrf.mxu2  ;;  %v1010_v3 = vadd.f32 %v994_v37, %v951_v12 }
 0x116   : > { %v1209_v53 = vperm.slane %v1177_v55, 0  ;;  %v952_v1 = vadd.f32 %v938_v59, %v906_v0  ;;  %v1091_v24 = vmax.f32 %v1083_v38, 0.0  ;;  %v907_v25 = vadd.f32 %v894_v5, %v845_v19 }
 0x117   : > { %v1210_v62 = vperm.slane %v1178_v50, 0  ;;  %v1211_v63 = vperm.slane %v1179_v56, 0  ;;  %v1060_v14 = vadd.f32 %v1044_v44, %v1010_v3  ;;  %v1212_v29 = vperm.slane %v1180_v27, 0 }
 0x118   : > { %v776_v50 = vadd.f32 %v1868_v48, %v718_v13 }
 0x119   : > { %v1226_v21 = vsel %vm1225_vm8, %v1210_v62, %v1209_v53  ;;  %v1072_v40 = vmul.f32 %v1873_v2, %v1060_v14 }
 0x11a   : > { %v1228_v6 = vsel %vm1227_vm9, %v1211_v63, %v1226_v21  ;;  %v1047_v26 = vpop.f32.mrf.mxu0  ;;  %v847_v48 = vadd.f32 %v1866_v47, %v776_v50 }
 0x11b   : > { %v1230_v15 = vsel %vm1229_vm10, %v1212_v29, %v1228_v6  ;;  %v1084_v17 = vadd.f32 %v1880_v8, %v1072_v40 }
 0x11c   : > { %1245 = vst.msk [vmem:[%s1896_s9] sm:$0xf] %vm1244_vm11, %v1230_v15  ;;  %v997_v18 = vpop.f32.mrf.mxu3  ;;  %v897_v35 = vpop.f32.mrf.mxu1 }
 0x11d   : > { %v1011_v61 = vadd.f32 %v997_v18, %v952_v1  ;;  %v940_v22 = vpop.f32.mrf.mxu2  ;;  %v1092_v52 = vmax.f32 %v1084_v17, 0.0  ;;  %v908_v55 = vadd.f32 %v897_v35, %v1864_v46 }
 0x11e   : > { %v953_v28 = vadd.f32 %v940_v22, %v907_v25 }
 0x11f   : > { %v1098_v57 = vmax.f32 %v1091_v24, %v1092_v52  ;;  %v1061_v9 = vadd.f32 %v1047_v26, %v1011_v61 }
 0x121   : > { %v1108_v30 = vrot.slane %v1098_v57, 2  ;;  %v1109_v32 = vrot.slane %v1098_v57, 4  ;;  %v1110_v16 = vrot.slane %v1098_v57, 6  ;;  %v1419_v43 = vrot.slane %v1098_v57, 9 }
 0x122   : > { %v1049_v34 = vpop.f32.mrf.mxu0  ;;  %v1073_v41 = vmul.f32 %v1873_v2, %v1061_v9 }
 0x123   : > { %v1420_v36 = vrot.slane %v1108_v30, 9  ;;  %v1421_v23 = vrot.slane %v1109_v32, 9  ;;  %v1422_v42 = vrot.slane %v1110_v16, 9  ;;  %v1181_v39 = vmax.f32 %v1098_v57, %v1419_v43 }
 0x124   : > { %v999_v7 = vpop.f32.mrf.mxu3  ;;  %v1085_v31 = vadd.f32 %v1880_v8, %v1073_v41  ;;  %v899_v0 = vpop.f32.mrf.mxu1 }
 0x125   : > { %v1012_v11 = vadd.f32 %v999_v7, %v953_v28  ;;  %v943_v54 = vpop.f32.mrf.mxu2  ;;  %v1182_v44 = vmax.f32 %v1108_v30, %v1420_v36  ;;  %v1183_v12 = vmax.f32 %v1109_v32, %v1421_v23  ;;  %v1184_v58 = vmax.f32 %v1110_v16, %v1422_v42 }
 0x126   : > { %v1213_v51 = vperm.slane %v1181_v39, 0  ;;  %v954_v45 = vadd.f32 %v943_v54, %v908_v55  ;;  %v1093_v46 = vmax.f32 %v1085_v31, 0.0  ;;  %v909_v21 = vadd.f32 %v899_v0, %v847_v48 }
 0x127   : > { %v1062_v49 = vadd.f32 %v1049_v34, %v1012_v11  ;;  %v1214_v20 = vperm.slane %v1182_v44, 0  ;;  %v1215_v10 = vperm.slane %v1183_v12, 0  ;;  %v1216_v56 = vperm.slane %v1184_v58, 0 }
 0x129   : > { %v1074_v37 = vmul.f32 %v1873_v2, %v1062_v49  ;;  %v1231_v27 = vsel %vm1225_vm8, %v1214_v20, %v1213_v51 }
 0x12a   : > { %v1232_v59 = vsel %vm1227_vm9, %v1215_v10, %v1231_v27  ;;  %v1052_v63 = vpop.f32.mrf.mxu0 }
 0x12b   : > { %v1086_v60 = vadd.f32 %v1880_v8, %v1074_v37  ;;  %v1233_v3 = vsel %vm1229_vm10, %v1216_v56, %v1232_v59 }
 0x12c   : > { %v1002_v53 = vpop.f32.mrf.mxu3  ;;  %1246 = vst.msk [vmem:[%s1896_s9 + $0x4] sm:$0xf] %vm1244_vm11, %v1233_v3 }
 0x12d   : > { %v1094_v62 = vmax.f32 %v1086_v60, 0.0  ;;  %v1013_v4 = vadd.f32 %v1002_v53, %v954_v45  ;;  %v945_v29 = vpop.f32.mrf.mxu2 }
 0x12e   : > { %v955_v26 = vadd.f32 %v945_v29, %v909_v21 }
 0x12f   : > { %v1099_v14 = vmax.f32 %v1093_v46, %v1094_v62  ;;  %v1063_v40 = vadd.f32 %v1052_v63, %v1013_v4 }
 0x131   : > { %v1111_v1 = vrot.slane %v1099_v14, 2  ;;  %v1112_v5 = vrot.slane %v1099_v14, 4  ;;  %v1113_v6 = vrot.slane %v1099_v14, 6  ;;  %v1423_v38 = vrot.slane %v1099_v14, 9 }
 0x132   : > { %v1075_v47 = vmul.f32 %v1873_v2, %v1063_v40  ;;  %v1054_v30 = vpop.f32.mrf.mxu0 }
 0x133   : > { %v1424_v15 = vrot.slane %v1111_v1, 9  ;;  %v1425_v17 = vrot.slane %v1112_v5, 9  ;;  %v1426_v18 = vrot.slane %v1113_v6, 9  ;;  %v1185_v61 = vmax.f32 %v1099_v14, %v1423_v38 }
 0x134   : > { %v1004_v52 = vpop.f32.mrf.mxu3  ;;  %v1087_v34 = vadd.f32 %v1880_v8, %v1075_v47 }
 0x135   : > { %v1186_v19 = vmax.f32 %v1111_v1, %v1424_v15  ;;  %v1187_v22 = vmax.f32 %v1112_v5, %v1425_v17  ;;  %v1188_v24 = vmax.f32 %v1113_v6, %v1426_v18  ;;  %v1014_v25 = vadd.f32 %v1004_v52, %v955_v26 }
 0x136   : > { %v1217_v57 = vperm.slane %v1185_v61, 0  ;;  %v1095_v42 = vmax.f32 %v1087_v34, 0.0 }
 0x137   : > { %v1218_v9 = vperm.slane %v1186_v19, 0  ;;  %v1219_v28 = vperm.slane %v1187_v22, 0  ;;  %v1064_v32 = vadd.f32 %v1054_v30, %v1014_v25  ;;  %v1220_v16 = vperm.slane %v1188_v24, 0 }
 0x139   : > { %v1234_v43 = vsel %vm1225_vm8, %v1218_v9, %v1217_v57  ;;  %v1076_v35 = vmul.f32 %v1873_v2, %v1064_v32 }
 0x13a   : > { %v1235_v33 = vsel %vm1227_vm9, %v1219_v28, %v1234_v43 }
 0x13b   : > { %v1236_v36 = vsel %vm1229_vm10, %v1220_v16, %v1235_v33  ;;  %v1088_v23 = vadd.f32 %v1880_v8, %v1076_v35 }
 0x13c   : > { %1247 = vst.msk [vmem:[%s1896_s9 + $0x8] sm:$0xf] %vm1244_vm11, %v1236_v36 }
 0x13d   : > { %v1096_v39 = vmax.f32 %v1088_v23, 0.0 }
 0x13f   : > { %v1100_v7 = vmax.f32 %v1095_v42, %v1096_v39 }
 0x141   : > { %v1114_v41 = vrot.slane %v1100_v7, 2  ;;  %v1115_v11 = vrot.slane %v1100_v7, 4  ;;  %v1116_v54 = vrot.slane %v1100_v7, 6  ;;  %v1427_v13 = vrot.slane %v1100_v7, 9 }
 0x143   : > { %v1428_v44 = vrot.slane %v1114_v41, 9  ;;  %v1429_v12 = vrot.slane %v1115_v11, 9  ;;  %v1430_v58 = vrot.slane %v1116_v54, 9  ;;  %v1189_v49 = vmax.f32 %v1100_v7, %v1427_v13 }
 0x145   : > { %v1190_v51 = vmax.f32 %v1114_v41, %v1428_v44  ;;  %v1191_v2 = vmax.f32 %v1115_v11, %v1429_v12  ;;  %v1192_v20 = vmax.f32 %v1116_v54, %v1430_v58  ;;  %v1221_v10 = vperm.slane %v1189_v49, 0 }
 0x147   : > { %v1222_v55 = vperm.slane %v1190_v51, 0  ;;  %v1223_v31 = vperm.slane %v1191_v2, 0  ;;  %v1224_v37 = vperm.slane %v1192_v20, 0 }
 0x149   : > { %v1237_v8 = vsel %vm1225_vm8, %v1222_v55, %v1221_v10 }
 0x14a   : > { %v1238_v50 = vsel %vm1227_vm9, %v1223_v31, %v1237_v8 }
 0x14b   : > { %v1239_v56 = vsel %vm1229_vm10, %v1224_v37, %v1238_v50 }
 0x14c   : > { %1248 = vst.msk [vmem:[%s1896_s9 + $0xc] sm:$0xf] %vm1244_vm11, %v1239_v56 }
 0x14d PF: > { %s15_s20 = sadd.s32 1, %s1490_s20   ;;  %s1955_s18 = smov %s1486_s19 }
 0x14e   : > { %p12_p5 = scmp.ge.s32.totalorder %s15_s20, 4   ;;  %s1956_s19 = smov %s1958_s21 }
 0x150   :  { %14 = sbr.rel (!%p12_p5) target bundleno = 2 (0x2), region = 73 }

// kernel: _lambda_.8
= control target key start
LH: loop header
LB: loop body
LE: loop exit
PB: predicated region body
PF: predicated region fallthrough
CT: control target
= control target key end

     0   :  { %s1987_s15 = smov 0   ;;  %s1989_s16 = smov 0   ;;  %s2664_s0 = inlined_call_operand.vmem [shape: bf16[2,18,18,4], index: 0, kind: input, shape index: {}, may-alias: {0,1}]   ;;  %s2665_s1 = inlined_call_operand.vmem [shape: bf16[2,18,18,4], index: 1, kind: input, shape index: {}, may-alias: {0,1}]   ;;  %s2666_s2 = inlined_call_operand.vmem [shape: bf16[3,3,4,8], index: 2, kind: input, shape index: {}]   ;;  %s2667_s3 = inlined_call_operand.vmem [shape: f32[2,2,1,8], index: 3, kind: output, shape index: {0}]   ;;  %s2668_s4 = inlined_call_operand.vmem [shape: f32[2,2,1,8], index: 4, kind: output, shape index: {1}]  }
   0x1   :  { %s1991_s17 = smov 0   ;;  %s1993_s18 = smov 0  }
   0x2   :  { %s1995_s19 = smov 0  }
   0x3 LB: > { %s24_s20 = sadd.s32 1, %s1952_s17  ;;  %s27_s21 = sadd.s32 1, %s1956_s18  ;;  %s1960_s19 = sphi %s1995_s19, %s15_s19   ;;  %s1956_s18 = sphi %s1993_s18, %s2676_s18   ;;  %s1952_s17 = sphi %s1991_s17, %s2675_s17   ;;  %s1948_s16 = sphi %s1989_s16, %s2674_s16   ;;  %s1944_s15 = sphi %s1987_s15, %s2673_s15  }
   0x4   : > { %p25_p0 = scmp.ge.s32.totalorder %s24_s20, 2  ;;  %p1725_p1 = scmp.ge.s32.totalorder %s1960_s19, 1 }
   0x5   : > { %p225_p2 = scmp.lt.s32.totalorder %s1960_s19, 5 }
   0x6   : > { %s2678_s20 = smov (%p25_p0, %s24_s20), 0  ;;  %s2680_s21 = smov (!%p25_p0, %s27_s21), %s1956_s18 }
   0x7   : > { %p226_p3 = pnand %p1725_p1, %p225_p2  ;;  %p29_p4 = scmp.ge.s32.totalorder %s2680_s21, 2 }
   0x8   : > { %s2023_s24 = sshll.u32 (!%p226_p3), %s1944_s15, 3  ;;  %p288_p5 = scmp.lt.s32.totalorder (!%p226_p3), %s1948_s16, 1 }
   0x9   : > { %s2682_s21 = smov (%p29_p4, %s2680_s21), 0  ;;  %229 = sbr.rel (%p226_p3) target bundleno = 482 (0x1e2), region = 32 }
   0xa   : > { %p290_p6 = scmp.lt.s32.totalorder (!%p226_p3), %s2023_s24, 17  ;;  %s1875_s22 = sadd.s32 (!%p226_p3), 8, %s2023_s24 }
   0xb   : > { %p308_p7 = scmp.lt.s32.totalorder (!%p226_p3), %s1875_s22, 17  ;;  %p320_p8 = scmp.lt.s32.totalorder (!%p226_p3), %s1944_s15, 1 }
   0xe   : > { %v364_v0 = vld [vmem:[%s2666_s2 + $0x2] sm:$0x3]  ;;  %vm616_vm0 = vcmask 1041408   ;;  %s2684_s16 = smov (!%p288_p5, %s1948_s16), 1  ;;  %v365_v2 = vld [vmem:[%s2666_s2 + $0x4] sm:$0x3] }
   0xf   : > { %v618_v1 = vsel %vm616_vm0, %v364_v0, 0  ;;  %s291_s27 = scalar_select %p290_p6, %s2023_s24, 17  ;;  %v901_v3 = vsel %vm616_vm0, %v365_v2, 0  ;;  %v366_v4 = vld [vmem:[%s2666_s2 + $0x6] sm:$0x3]  ;;  %vm591_vm3 = vcmask 31744  }
  0x10   : > { %1876 = vmatpush.bf16.msra.mxu1 %v618_v1  ;;  %1877 = vmatpush.bf16.msra.mxu2 %v618_v1  ;;  %s1880_s28 = smul.u32 54, %s2684_s16  ;;  %v363_v5 = vld [vmem:[%s2666_s2] sm:$0x3]  ;;  %v367_v6 = vld [vmem:[%s2666_s2 + $0x8] sm:$0x3]  ;;  %v977_v7 = vsel %vm616_vm0, %v366_v4, 0 }
  0x11   : > { %1878 = vmatpush.bf16.msra.mxu3 %v618_v1  ;;  %627 = vmatpush.bf16.msra.mxu0 %v618_v1  ;;  %s1879_s29 = smul.u32 3, %s291_s27  ;;  %v734_v8 = vsel %vm616_vm0, %v363_v5, 0  ;;  %v1075_v9 = vsel %vm616_vm0, %v367_v6, 0  ;;  %vm372_vm1 = vsmask.f32 3328  ;;  %s2686_s22 = smov (!%p308_p7, %s1875_s22), 17 }
  0x12   : > { %vm373_vm2 = vsmask.f32 7440  ;;  %s1881_s23 = smul.u32 3, %s2686_s22  ;;  %vm793_vm5 = vcmask 1042432   ;;  %vm794_vm6 = vcmask 1046532   ;;  %vm1480_vm8 = vcmask 64512  }
  0x13   : > { %s294_s10 = sadd.s32 %s1880_s28, %s1879_s29  ;;  %vm2090_vm4 = vmor %vm372_vm1, %vm373_vm2  ;;  %s2688_s15 = smov (!%p320_p8, %s1944_s15), 1  ;;  %vm1518_vm9 = vcmask 57344  }
  0x14   : > { %910 = vmatpush.bf16.msrb.mxu2 %v901_v3  ;;  %s1727_s11 = sshll.u32 %s294_s10, 2  ;;  %743 = vmatpush.bf16.msrb.mxu1 %v734_v8  ;;  %s2198_s24 = sadd.s32 %s1881_s23, %s1880_s28  ;;  %vm2249_vm7 = vmor %vm793_vm5, %vm794_vm6 }
  0x15   : > { %986 = vmatpush.bf16.msrb.mxu3 %v977_v7  ;;  %s2052_s14 = scalar_lea.vmem %s2664_s0, %s1727_s11  ;;  %1084 = vmatpush.bf16.msrb.mxu0 %v1075_v9  ;;  %s1730_s7 = sshll.u32 %s2198_s24, 2 }
  0x16   : > { %v2055_v10 = vld [vmem:[%s2052_s14 + $0x18] sm:$0xf]  ;;  %v2058_v11 = vld [vmem:[%s2052_s14 + $0x1c] sm:$0xf]  ;;  %v2061_v12 = vld [vmem:[%s2052_s14 + $0x20] sm:$0x1]  ;;  %s2381_s10 = scalar_lea.vmem %s2665_s1, %s1730_s7 }
  0x17   : > { %v424_v13 = vshrl.u32 %v2055_v10, 16  ;;  %v427_v14 = vshll.u32 %v2055_v10, 16  ;;  %v433_v15 = vshll.u32 %v2058_v11, 16  ;;  %v437_v16 = vshrl.u32 %v2058_v11, 16  ;;  %v2068_v17 = vld [vmem:[%s2052_s14 + $0x30] sm:$0xf] }
  0x18   : > { %v443_v18 = vshll.u32 %v2061_v12, 16  ;;  %v2072_v19 = vld [vmem:[%s2052_s14 + $0x34] sm:$0xf]  ;;  %v2075_v20 = vld [vmem:[%s2052_s14 + $0x38] sm:$0x1]  ;;  %v472_v21 = vshrl.u32 %v2068_v17, 16 }
  0x19   : > { %v426_v22 = vrot.slane %v424_v13, 4  ;;  %v429_v23 = vrot.slane %v427_v14, 5  ;;  %v435_v24 = vrot.slane %v433_v15, 5  ;;  %v439_v25 = vrot.slane %v437_v16, 4  ;;  %v2079_v26 = vld [vmem:[%s2052_s14 + $0x48] sm:$0xf] }
  0x1a   : > { %v445_v27 = vrot.slane %v443_v18, 5  ;;  %v474_v28 = vrot.slane %v472_v21, 4  ;;  %v475_v29 = vshll.u32 %v2068_v17, 16  ;;  %v481_v30 = vshll.u32 %v2072_v19, 16  ;;  %v2086_v35 = vld [vmem:[%s2052_s14 + $0x4c] sm:$0xf] }
  0x1b   : > { %v430_v31 = vor.u32 %v429_v23, %v426_v22  ;;  %v440_v32 = vor.u32 %v439_v25, %v435_v24  ;;  %v485_v33 = vshrl.u32 %v2072_v19, 16  ;;  %v491_v34 = vshll.u32 %v2075_v20, 16  ;;  %v2097_v46 = vld [vmem:[%s2052_s14 + $0x50] sm:$0x1]  ;;  %v2106_v54 = vld [vmem:[%s2052_s14] sm:$0xf] }
  0x1c   : > { %v477_v37 = vrot.slane %v475_v29, 5  ;;  %v483_v38 = vrot.slane %v481_v30, 5  ;;  %v520_v39 = vshrl.u32 %v2079_v26, 16  ;;  %v523_v40 = vshll.u32 %v2079_v26, 16  ;;  %v2114_v2 = vld [vmem:[%s2052_s14 + $0x4] sm:$0xf] }
  0x1d   : > { %v431_v41 = vrot.slane %v430_v31, 4  ;;  %v441_v42 = vrot.slane %v440_v32, 4  ;;  %v487_v43 = vrot.slane %v485_v33, 4  ;;  %v493_v44 = vrot.slane %v491_v34, 5  ;;  %v2120_v8 = vld [vmem:[%s2052_s14 + $0x8] sm:$0x1] }
  0x1e   : > { %v478_v45 = vor.u32 %v477_v37, %v474_v28  ;;  %v522_v47 = vrot.slane %v520_v39, 4  ;;  %v525_v48 = vrot.slane %v523_v40, 5  ;;  %v529_v49 = vshll.u32 %v2086_v35, 16  ;;  %v2128_v16 = vld [vmem:[%s2052_s14 + $0x24] sm:$0xf]  ;;  %s1731_s11 = sshll.u32 %s2684_s16, 1 }
  0x1f   : > { %v436_v50 = vsel %vm2090_vm4, %v431_v41, %v435_v24  ;;  %v446_v51 = vsel %vm2090_vm4, %v441_v42, %v445_v27  ;;  %v488_v52 = vor.u32 %v487_v43, %v483_v38  ;;  %v533_v53 = vshrl.u32 %v2086_v35, 16  ;;  %v2137_v29 = vld [vmem:[%s2052_s14 + $0x28] sm:$0xf]  ;;  %v2142_v33 = vld [vmem:[%s2052_s14 + $0x2c] sm:$0x1]  ;;  %s323_s12 = sadd.s32 %s1731_s11, %s2688_s15 }
  0x20   : > { %v571_v55 = vunpack.c.l.b16 %v436_v50  ;;  %v572_v56 = vunpack.c.l.b16 %v446_v51  ;;  %v479_v57 = vrot.slane %v478_v45, 4  ;;  %v526_v58 = vor.u32 %v525_v48, %v522_v47  ;;  %v2149_v41 = vld [vmem:[%s2052_s14 + $0x3c] sm:$0xf]  ;;  %v2157_v51 = vld [vmem:[%s2052_s14 + $0x40] sm:$0xf]  ;;  %s324_s22 = scalar_lea.vmem %s2667_s3, %s323_s12  ;;  %s331_s25 = scalar_lea.vmem %s2668_s4, %s323_s12 }
  0x21   : > { %v489_v59 = vrot.slane %v488_v52, 4  ;;  %v531_v60 = vrot.slane %v529_v49, 5  ;;  %v535_v61 = vrot.slane %v533_v53, 4  ;;  %v539_v62 = vshll.u32 %v2097_v46, 16 }
  0x22   : > { %v2109_v63 = vpack.c.b16 %v572_v56, %v571_v55  ;;  %v484_v0 = vsel %vm2090_vm4, %v479_v57, %v483_v38  ;;  %v527_v1 = vrot.slane %v526_v58, 4  ;;  %v376_v3 = vshrl.u32 %v2106_v54, 16  ;;  %v2160_v56 = vld [vmem:[%s2052_s14 + $0x44] sm:$0x1] }
  0x23   : > { %v494_v4 = vsel %vm2090_vm4, %v489_v59, %v493_v44  ;;  %v575_v5 = vunpack.c.l.b16 %v484_v0  ;;  %v536_v6 = vor.u32 %v535_v61, %v531_v60  ;;  %v541_v7 = vrot.slane %v539_v62, 5  ;;  %v2169_v62 = vld [vmem:[%s2052_s14 + $0x54] sm:$0xf] }
  0x24   : > { %1735 = vmatmul.msk.bf16.vlgmr.msra.gmra.mxu1 %vm591_vm3, %v2109_v63  ;;  %v576_v9 = vunpack.c.l.b16 %v494_v4  ;;  %v532_v13 = vsel %vm2090_vm4, %v527_v1, %v531_v60  ;;  %v378_v14 = vrot.slane %v376_v3, 4  ;;  %v379_v15 = vshll.u32 %v2106_v54, 16 }
  0x25   : > { %v537_v18 = vrot.slane %v536_v6, 4  ;;  %v579_v21 = vunpack.c.l.b16 %v532_v13  ;;  %v385_v22 = vshll.u32 %v2114_v2, 16  ;;  %v389_v23 = vshrl.u32 %v2114_v2, 16 }
  0x26   : > { %v2132_v24 = vpack.c.b16 %v576_v9, %v575_v5  ;;  %v381_v25 = vrot.slane %v379_v15, 5  ;;  %v395_v27 = vshll.u32 %v2120_v8, 16  ;;  %v801_v28 = vrot.slane %v2120_v8, 5 }
  0x27   : > { %v542_v30 = vsel %vm2090_vm4, %v537_v18, %v541_v7  ;;  %v387_v31 = vrot.slane %v385_v22, 5  ;;  %v391_v32 = vrot.slane %v389_v23, 4  ;;  %v448_v34 = vshrl.u32 %v2128_v16, 16 }
  0x28   : > { %1737 = vmatmul.msk.bf16.vlgmr.msra.gmra.mxu2 %vm591_vm3, %v2132_v24  ;;  %v580_v37 = vunpack.c.l.b16 %v542_v30  ;;  %v382_v38 = vor.u32 %v381_v25, %v378_v14  ;;  %v397_v39 = vrot.slane %v395_v27, 5  ;;  %v451_v40 = vshll.u32 %v2128_v16, 16  ;;  %v2181_v27 = vld [vmem:[%s2052_s14 + $0x58] sm:$0xf]  ;;  %v2184_v30 = vld [vmem:[%s2052_s14 + $0x5c] sm:$0x1] }
  0x29   : > { %v392_v42 = vor.u32 %v391_v32, %v387_v31  ;;  %v450_v43 = vrot.slane %v448_v34, 4  ;;  %v457_v44 = vshll.u32 %v2137_v29, 16  ;;  %v461_v45 = vshrl.u32 %v2137_v29, 16 }
  0x2a   : > { %v2153_v47 = vpack.c.b16 %v580_v37, %v579_v21  ;;  %v383_v48 = vrot.slane %v382_v38, 4  ;;  %v453_v49 = vrot.slane %v451_v40, 5  ;;  %v467_v50 = vshll.u32 %v2142_v33, 16  ;;  %v2189_v38 = vld [vmem:[%s2052_s14 + $0xc] sm:$0xf] }
  0x2b   : > { %v393_v52 = vrot.slane %v392_v42, 4  ;;  %v459_v53 = vrot.slane %v457_v44, 5  ;;  %v463_v55 = vrot.slane %v461_v45, 4  ;;  %v496_v57 = vshrl.u32 %v2149_v41, 16 }
  0x2c   : > { %1739 = vmatmul.msk.bf16.vlgmr.msra.gmra.mxu3 %vm591_vm3, %v2153_v47  ;;  %v388_v58 = vsel %vm2090_vm4, %v383_v48, %v387_v31  ;;  %v454_v59 = vor.u32 %v453_v49, %v450_v43  ;;  %v469_v60 = vrot.slane %v467_v50, 5  ;;  %v499_v61 = vshll.u32 %v2149_v41, 16 }
  0x2d   : > { %v398_v0 = vsel %vm2090_vm4, %v393_v52, %v397_v39  ;;  %v567_v1 = vunpack.c.l.b16 %v388_v58  ;;  %v464_v3 = vor.u32 %v463_v55, %v459_v53  ;;  %v498_v4 = vrot.slane %v496_v57, 4  ;;  %v2205_v55 = vld [vmem:[%s2052_s14 + $0x10] sm:$0xf] }
  0x2e   : > { %v568_v5 = vunpack.c.l.b16 %v398_v0  ;;  %v455_v6 = vrot.slane %v454_v59, 4  ;;  %v501_v7 = vrot.slane %v499_v61, 5  ;;  %v505_v9 = vshll.u32 %v2157_v51, 16  ;;  %v2209_v0 = vld [vmem:[%s2052_s14 + $0x14] sm:$0x1] }
  0x2f   : > { %v465_v13 = vrot.slane %v464_v3, 4  ;;  %v509_v14 = vshrl.u32 %v2157_v51, 16  ;;  %v515_v15 = vshll.u32 %v2160_v56, 16  ;;  %v544_v18 = vshrl.u32 %v2169_v62, 16 }
  0x30   : > { %v583_v21 = vpack.c.b16 %v568_v5, %v567_v1  ;;  %v460_v22 = vsel %vm2090_vm4, %v455_v6, %v459_v53  ;;  %v502_v23 = vor.u32 %v501_v7, %v498_v4  ;;  %v507_v25 = vrot.slane %v505_v9, 5 }
  0x31   : > { %v470_v31 = vsel %vm2090_vm4, %v465_v13, %v469_v60  ;;  %v573_v32 = vunpack.c.l.b16 %v460_v22  ;;  %v511_v34 = vrot.slane %v509_v14, 4  ;;  %v517_v37 = vrot.slane %v515_v15, 5 }
  0x32   : > { %1733 = vmatmul.msk.bf16.vlgmr.msra.gmra.mxu0 %vm591_vm3, %v583_v21  ;;  %v574_v39 = vunpack.c.l.b16 %v470_v31  ;;  %v503_v40 = vrot.slane %v502_v23, 4  ;;  %v546_v42 = vrot.slane %v544_v18, 4  ;;  %v547_v43 = vshll.u32 %v2169_v62, 16  ;;  %v369_v31 = vld [vmem:[%s2666_s2 + $0xc] sm:$0x3] }
  0x33   : > { %v512_v44 = vor.u32 %v511_v34, %v507_v25  ;;  %v553_v45 = vshll.u32 %v2181_v27, 16  ;;  %v557_v48 = vshrl.u32 %v2181_v27, 16  ;;  %v563_v49 = vshll.u32 %v2184_v30, 16 }
  0x34   : > { %v2200_v50 = vpack.c.b16 %v574_v39, %v573_v32  ;;  %v508_v52 = vsel %vm2090_vm4, %v503_v40, %v507_v25  ;;  %v549_v53 = vrot.slane %v547_v43, 5  ;;  %v400_v57 = vshrl.u32 %v2189_v38, 16  ;;  %v370_v40 = vld [vmem:[%s2666_s2 + $0xe] sm:$0x3] }
  0x35   : > { %v513_v58 = vrot.slane %v512_v44, 4  ;;  %v577_v59 = vunpack.c.l.b16 %v508_v52  ;;  %v555_v60 = vrot.slane %v553_v45, 5  ;;  %v559_v61 = vrot.slane %v557_v48, 4 }
  0x36   : > { %1736 = vmatmul.msk.bf16.gmra.mxu1 %vm591_vm3, %v2200_v50  ;;  %v550_v1 = vor.u32 %v549_v53, %v546_v42  ;;  %v565_v3 = vrot.slane %v563_v49, 5  ;;  %v402_v4 = vrot.slane %v400_v57, 4  ;;  %v403_v5 = vshll.u32 %v2189_v38, 16  ;;  %v368_v42 = vld [vmem:[%s2666_s2 + $0xa] sm:$0x3] }
  0x37   : > { %v518_v6 = vsel %vm2090_vm4, %v513_v58, %v517_v37  ;;  %v560_v7 = vor.u32 %v559_v61, %v555_v60  ;;  %v409_v9 = vshll.u32 %v2205_v55, 16  ;;  %v413_v13 = vshrl.u32 %v2205_v55, 16  ;;  %v371_v57 = vld [vmem:[%s2666_s2 + $0x10] sm:$0x3] }
  0x38   : > { %v578_v14 = vunpack.c.l.b16 %v518_v6  ;;  %v551_v15 = vrot.slane %v550_v1, 4  ;;  %v405_v18 = vrot.slane %v403_v5, 5  ;;  %v419_v21 = vshll.u32 %v2209_v0, 16 }
  0x39   : > { %v561_v22 = vrot.slane %v560_v7, 4  ;;  %v411_v23 = vrot.slane %v409_v9, 5  ;;  %v415_v25 = vrot.slane %v413_v13, 4  ;;  %v1781_v52 = vrot.slane %v2106_v54, 9 }
  0x3a   : > { %v2222_v32 = vpack.c.b16 %v578_v14, %v577_v59  ;;  %v556_v34 = vsel %vm2090_vm4, %v551_v15, %v555_v60  ;;  %v406_v37 = vor.u32 %v405_v18, %v402_v4  ;;  %v421_v39 = vrot.slane %v419_v21, 5  ;;  %v1864_v15 = vld [vmem:[%s2052_s14] sm:$0xff] }
  0x3b   : > { %v566_v43 = vsel %vm2090_vm4, %v561_v22, %v565_v3  ;;  %v581_v44 = vunpack.c.l.b16 %v556_v34  ;;  %v416_v45 = vor.u32 %v415_v25, %v411_v23  ;;  %v798_v53 = vrot.slane %v2114_v2, 5 }
  0x3c   : > { %1738 = vmatmul.msk.bf16.gmra.mxu2 %vm591_vm3, %v2222_v32  ;;  %v582_v48 = vunpack.c.l.b16 %v566_v43  ;;  %v407_v49 = vrot.slane %v406_v37, 4  ;;  %v1233_v59 = vsel %vm616_vm0, %v369_v31, 0  ;;  %v1331_v60 = vsel %vm616_vm0, %v370_v40, 0 }
  0x3d   : > { %v417_v58 = vrot.slane %v416_v45, 4  ;;  %v1157_v61 = vsel %vm616_vm0, %v368_v42, 0  ;;  %v800_v2 = vrot.slane %v798_v53, 4  ;;  %1242 = vmatpush.bf16.msra.mxu2 %v1233_v59  ;;  %1340 = vmatpush.bf16.msra.mxu3 %v1331_v60  ;;  %v1413_v6 = vsel %vm616_vm0, %v371_v57, 0  ;;  %v1865_v42 = vld [vmem:[%s2052_s14 + $0xc] sm:$0xff] }
  0x3e   : > { %v2244_v1 = vpack.c.b16 %v582_v48, %v581_v44  ;;  %v412_v3 = vsel %vm2090_vm4, %v407_v49, %v411_v23  ;;  %1166 = vmatpush.bf16.msra.mxu1 %v1157_v61  ;;  %1422 = vmatpush.bf16.msra.mxu0 %v1413_v6  ;;  %v799_v9 = vsel %vm2249_vm7, %v1781_v52, %v798_v53  ;;  %v1783_v22 = vrot.slane %v2055_v10, 9 }
  0x3f   : > { %v422_v4 = vsel %vm2090_vm4, %v417_v58, %v421_v39  ;;  %v569_v5 = vunpack.c.l.b16 %v412_v3  ;;  %v802_v13 = vsel %vm2249_vm7, %v800_v2, %v801_v28  ;;  %v852_v18 = vunpack.c.l.b16 %v799_v9  ;;  %v2325_v3 = vld [vmem:[%s2052_s14 + $0x30] sm:$0xff] }
  0x40   : > { %1740 = vmatmul.msk.bf16.gmra.mxu3 %vm591_vm3, %v2244_v1  ;;  %v570_v7 = vunpack.c.l.b16 %v422_v4  ;;  %v853_v21 = vunpack.c.l.b16 %v802_v13  ;;  %v812_v23 = vrot.slane %v2058_v11, 5  ;;  %v815_v25 = vrot.slane %v2061_v12, 5  ;;  %v2345_v13 = vld [vmem:[%s2052_s14 + $0x3c] sm:$0xff] }
  0x41   : > { %v805_v34 = vrot.slane %v2205_v55, 5  ;;  %v1782_v10 = vrot.slane %v2189_v38, 9  ;;  %v808_v12 = vrot.slane %v2209_v0, 5  ;;  %v1784_v38 = vrot.slane %v2128_v16, 9  ;;  %v2300_v16 = vld [vmem:[%s2052_s14 + $0x18] sm:$0xff] }
  0x42   : > { %v584_v14 = vpack.c.b16 %v570_v7, %v569_v5  ;;  %v868_v31 = vpack.c.b16 %v853_v21, %v852_v18  ;;  %v813_v8 = vsel %vm2249_vm7, %v1783_v22, %v812_v23  ;;  %v814_v28 = vrot.slane %v812_v23, 4 }
  0x43   : > { %v856_v37 = vunpack.c.l.b16 %v813_v8  ;;  %v807_v11 = vrot.slane %v805_v34, 4  ;;  %v806_v55 = vsel %vm2249_vm7, %v1782_v10, %v805_v34  ;;  %v819_v0 = vrot.slane %v2137_v29, 5 }
  0x44   : > { %1734 = vmatmul.msk.bf16.gmra.mxu0 %vm591_vm3, %v584_v14  ;;  %v816_v39 = vsel %vm2249_vm7, %v814_v28, %v815_v25  ;;  %v854_v45 = vunpack.c.l.b16 %v806_v55  ;;  %v822_v49 = vrot.slane %v2142_v33, 5  ;;  %v2313_v33 = vld [vmem:[%s2052_s14 + $0x24] sm:$0xff]  ;;  %v826_v61 = vrot.slane %v2072_v19, 5 }
  0x45   : > { %v857_v40 = vunpack.c.l.b16 %v816_v39  ;;  %v809_v44 = vsel %vm2249_vm7, %v807_v11, %v808_v12  ;;  %v820_v53 = vsel %vm2249_vm7, %v1784_v38, %v819_v0  ;;  %v821_v57 = vrot.slane %v819_v0, 4  ;;  %v2365_v25 = vld [vmem:[%s2052_s14 + $0x48] sm:$0xff]  ;;  %v2386_v39 = vld [vmem:[%s2381_s10] sm:$0xf]  ;;  %v2407_v38 = vld [vmem:[%s2052_s14 + $0x54] sm:$0xff] }
  0x46   : > { %1773 = vmatmul.msk.bf16.vlgmr.msrb.gmra.mxu1 %vm591_vm3, %v1864_v15  ;;  %v855_v48 = vunpack.c.l.b16 %v809_v44  ;;  %v858_v58 = vunpack.c.l.b16 %v820_v53  ;;  %v1785_v2 = vrot.slane %v2068_v17, 9  ;;  %v828_v4 = vrot.slane %v826_v61, 4 }
  0x47   : > { %v2279_v43 = vpack.c.b16 %v857_v40, %v856_v37  ;;  %v823_v59 = vsel %vm2249_vm7, %v821_v57, %v822_v49  ;;  %v829_v5 = vrot.slane %v2075_v20, 5  ;;  %v833_v20 = vrot.slane %v2157_v51, 5  ;;  %v2389_v40 = vld [vmem:[%s2381_s10 + $0x4] sm:$0xf] }
  0x48   : > { %v2291_v52 = vpack.c.b16 %v855_v48, %v854_v45  ;;  %v859_v60 = vunpack.c.l.b16 %v823_v59  ;;  %v827_v6 = vsel %vm2249_vm7, %v1785_v2, %v826_v61  ;;  %v836_v18 = vrot.slane %v2160_v56, 5  ;;  %v2412_v61 = vld [vmem:[%s2381_s10 + $0x8] sm:$0x1] }
  0x49   : > { %v830_v19 = vsel %vm2249_vm7, %v828_v4, %v829_v5  ;;  %v860_v7 = vunpack.c.l.b16 %v827_v6  ;;  %v835_v15 = vrot.slane %v833_v20, 4  ;;  %v840_v56 = vrot.slane %v2086_v35, 5 }
  0x4a   : > { %v2302_v29 = vpack.c.b16 %v859_v60, %v858_v58  ;;  %v861_v9 = vunpack.c.l.b16 %v830_v19  ;;  %v843_v28 = vrot.slane %v2097_v46, 5  ;;  %v1045_v10 = vshrl.u32 %v2386_v39, 16 }
  0x4b   : > { %v837_v51 = vsel %vm2249_vm7, %v835_v15, %v836_v18  ;;  %v842_v8 = vrot.slane %v840_v56, 4  ;;  %v1048_v11 = vshll.u32 %v2386_v39, 16  ;;  %v1054_v12 = vshll.u32 %v2389_v40, 16 }
  0x4c   : > { %1789 = vmatmul.msk.bf16.vlgmr.msrb.gmra.mxu2 %vm591_vm3, %v868_v31  ;;  %v2339_v17 = vpack.c.b16 %v861_v9, %v860_v7  ;;  %v863_v23 = vunpack.c.l.b16 %v837_v51  ;;  %v1787_v31 = vrot.slane %v2079_v26, 9  ;;  %v847_v44 = vrot.slane %v2181_v27, 5 }
  0x4d   : > { %v844_v35 = vsel %vm2249_vm7, %v842_v8, %v843_v28  ;;  %v1058_v45 = vshrl.u32 %v2389_v40, 16  ;;  %v1047_v0 = vrot.slane %v1045_v10, 4  ;;  %v1050_v49 = vrot.slane %v1048_v11, 5  ;;  %v2444_v8 = vld [vmem:[%s2381_s10] sm:$0xff] }
  0x4e   : > { %v841_v37 = vsel %vm2249_vm7, %v1787_v31, %v840_v56  ;;  %v865_v46 = vunpack.c.l.b16 %v844_v35  ;;  %v1056_v53 = vrot.slane %v1054_v12, 5  ;;  %v1788_v57 = vrot.slane %v2169_v62, 9 }
  0x4f   : > { %v864_v26 = vunpack.c.l.b16 %v841_v37  ;;  %v849_v58 = vrot.slane %v847_v44, 4  ;;  %v850_v59 = vrot.slane %v2184_v30, 5  ;;  %v1060_v60 = vrot.slane %v1058_v45, 4 }
  0x50   : > { %1801 = vmatmul.msk.bf16.vlgmr.msrb.gmra.mxu3 %vm591_vm3, %v1865_v42  ;;  %v1051_v4 = vor.u32 %v1050_v49, %v1047_v0  ;;  %v848_v5 = vsel %vm2249_vm7, %v1788_v57, %v847_v44  ;;  %v1064_v19 = vshll.u32 %v2412_v61, 16 }
  0x51   : > { %v851_v6 = vsel %vm2249_vm7, %v849_v58, %v850_v59  ;;  %v1061_v62 = vor.u32 %v1060_v60, %v1056_v53  ;;  %v866_v7 = vunpack.c.l.b16 %v848_v5 }
  0x52   : > { %v867_v9 = vunpack.c.l.b16 %v851_v6  ;;  %v1066_v18 = vrot.slane %v1064_v19, 5 }
  0x53   : > { %v1062_v15 = vrot.slane %v1061_v62, 4 }
  0x54   : > { %1809 = vmatmul.msk.bf16.vlgmr.msrb.gmra.mxu0 %vm591_vm3, %v584_v14  ;;  %v1786_v14 = vrot.slane %v2149_v41, 9  ;;  %v2431_v51 = vpack.c.b16 %v867_v9, %v866_v7 }
  0x55   : > { %v1067_v56 = vsel %vm2090_vm4, %v1062_v15, %v1066_v18 }
  0x56   : > { %1774 = vmatmul.msk.bf16.gmra.mxu1 %vm591_vm3, %v1865_v42  ;;  %v834_v21 = vsel %vm2249_vm7, %v1786_v14, %v833_v20  ;;  %v2393_v42 = vpack.c.b16 %v865_v46, %v864_v26  ;;  %v1052_v14 = vrot.slane %v1051_v4, 4  ;;  %v1069_v37 = vunpack.c.l.b16 %v1067_v56 }
  0x57   : > { %v862_v22 = vunpack.c.l.b16 %v834_v21 }
  0x59   : > { %v2359_v41 = vpack.c.b16 %v863_v23, %v862_v22  ;;  %v1057_v23 = vsel %vm2090_vm4, %v1052_v14, %v1056_v53 }
  0x5a   : > { %v1068_v28 = vunpack.c.l.b16 %v1057_v23 }
  0x5c   : > { %1790 = vmatmul.msk.bf16.gmra.mxu2 %vm591_vm3, %v2291_v52  ;;  %v2450_v26 = vpack.c.b16 %v1069_v37, %v1068_v28 }
  0x60   : > { %1802 = vmatmul.msk.bf16.gmra.mxu3 %vm591_vm3, %v2300_v16 }
  0x64   : > { %1810 = vmatmul.msk.bf16.gmra.mxu0 %vm591_vm3, %v2109_v63 }
  0x66   : > { %1775 = vmatmul.msk.bf16.gmra.mxu1 %vm591_vm3, %v2300_v16 }
  0x6c   : > { %1791 = vmatmul.msk.bf16.gmra.mxu2 %vm591_vm3, %v2279_v43 }
  0x70   : > { %1803 = vmatmul.msk.bf16.gmra.mxu3 %vm591_vm3, %v2313_v33 }
  0x74   : > { %1811 = vmatmul.msk.bf16.gmra.mxu0 %vm591_vm3, %v2200_v50 }
  0x76   : > { %1776 = vmatmul.msk.bf16.gmra.mxu1 %vm591_vm3, %v2313_v33 }
  0x7c   : > { %1792 = vmatmul.msk.bf16.gmra.mxu2 %vm591_vm3, %v2302_v29 }
  0x80   : > { %1804 = vmatmul.msk.bf16.gmra.mxu3 %vm591_vm3, %v2325_v3 }
  0x84   : > { %1812 = vmatmul.msk.bf16.gmra.mxu0 %vm591_vm3, %v2132_v24 }
  0x86   : > { %1777 = vmatmul.msk.bf16.gmra.mxu1 %vm591_vm3, %v2325_v3 }
  0x8c   : > { %1793 = vmatmul.msk.bf16.gmra.mxu2 %vm591_vm3, %v2339_v17 }
  0x90   : > { %1805 = vmatmul.msk.bf16.gmra.mxu3 %vm591_vm3, %v2345_v13 }
  0x94   : > { %1813 = vmatmul.msk.bf16.gmra.mxu0 %vm591_vm3, %v2222_v32 }
  0x96   : > { %1778 = vmatmul.msk.bf16.gmra.mxu1 %vm591_vm3, %v2345_v13 }
  0x9c   : > { %1794 = vmatmul.msk.bf16.gmra.mxu2 %vm591_vm3, %v2359_v41 }
  0xa0   : > { %1806 = vmatmul.msk.bf16.gmra.mxu3 %vm591_vm3, %v2365_v25 }
  0xa1   : > { %v2372_v34 = vpop.f32.mrf.mxu1 }
  0xa4   : > { %1814 = vmatmul.msk.bf16.gmra.mxu0 %vm591_vm3, %v2153_v47 }
  0xa6   : > { %1779 = vmatmul.msk.bf16.gmra.mxu1 %vm591_vm3, %v2365_v25 }
  0xa9   : > { %v2398_v55 = vpop.f32.mrf.mxu1 }
  0xab   : > { %v2402_v48 = vpop.f32.mrf.mxu2 }
  0xac   : > { %1795 = vmatmul.msk.bf16.gmra.mxu2 %vm591_vm3, %v2393_v42 }
  0xaf   : > { %v629_v27 = vpop.f32.mrf.mxu0  ;;  %v2414_v2 = vpop.f32.mrf.mxu3 }
  0xb0   : > { %1807 = vmatmul.msk.bf16.gmra.mxu3 %vm591_vm3, %v2407_v38 }
  0xb3   : > { %v2423_v30 = vpop.f32.mrf.mxu1  ;;  %v2427_v20 = vpop.f32.mrf.mxu2 }
  0xb4   : > { %1815 = vmatmul.msk.bf16.gmra.mxu0 %vm591_vm3, %v2244_v1 }
  0xb6   : > { %1780 = vmatmul.msk.bf16.gmra.mxu1 %vm591_vm3, %v2407_v38 }
  0xb7   : > { %v631_v21 = vpop.f32.mrf.mxu0  ;;  %v2433_v22 = vpop.f32.mrf.mxu3 }
  0xbb   : > { %v2439_v31 = vpop.f32.mrf.mxu1 }
  0xbc   : > { %1796 = vmatmul.msk.bf16.gmra.mxu2 %vm591_vm3, %v2431_v51 }
  0xbf   : > { %v2446_v35 = vpop.f32.mrf.mxu2 }
  0xc0   : > { %1808 = vmatmul.msk.bf16.gmra.mxu3 %vm591_vm3, %v2444_v8 }
  0xc1   : > { %v634_v46 = vpop.f32.mrf.mxu0 }
  0xc3   : > { %v2452_v10 = vpop.f32.mrf.mxu3  ;;  %v745_v11 = vpop.f32.mrf.mxu1 }
  0xc4   : > { %1816 = vmatmul.msk.bf16.gmra.mxu0 %vm591_vm3, %v2450_v26  ;;  %v746_v12 = vadd.f32 %v745_v11, %v629_v27 }
  0xc6   : > { %1818 = vmatmul.msk.bf16.vlgmr.msra.gmra.mxu1 %vm591_vm3, %v2291_v52 }
  0xc7   : > { %v2458_v44 = vpop.f32.mrf.mxu2 }
  0xc9   : > { %v636_v45 = vpop.f32.mrf.mxu0 }
  0xcb   : > { %v2460_v0 = vpop.f32.mrf.mxu3  ;;  %v747_v49 = vpop.f32.mrf.mxu1 }
  0xcc   : > { %1830 = vmatmul.msk.bf16.vlgmr.msra.gmra.mxu2 %vm591_vm3, %v2300_v16  ;;  %v748_v53 = vadd.f32 %v747_v49, %v631_v21 }
  0xcf   : > { %v912_v57 = vpop.f32.mrf.mxu2 }
  0xd0   : > { %1838 = vmatmul.msk.bf16.vlgmr.msra.gmra.mxu3 %vm591_vm3, %v2109_v63  ;;  %v952_v58 = vadd.f32 %v912_v57, %v746_v12 }
  0xd1   : > { %v1086_v59 = vpop.f32.mrf.mxu0 }
  0xd3   : > { %v988_v60 = vpop.f32.mrf.mxu3  ;;  %v750_v27 = vpop.f32.mrf.mxu1 }
  0xd4   : > { %1847 = vmatmul.msk.bf16.vlgmr.msra.gmra.mxu0 %vm591_vm3, %v2279_v43  ;;  %v1028_v52 = vadd.f32 %v988_v60, %v952_v58  ;;  %v751_v4 = vadd.f32 %v750_v27, %v634_v46 }
  0xd6   : > { %1819 = vmatmul.msk.bf16.gmra.mxu1 %vm591_vm3, %v2279_v43  ;;  %v2470_v5 = vadd.f32 %v1086_v59, %v1028_v52 }
  0xd7   : > { %v914_v16 = vpop.f32.mrf.mxu2 }
  0xd8   : > { %v953_v6 = vadd.f32 %v914_v16, %v748_v53 }
  0xd9   : > { %v1088_v62 = vpop.f32.mrf.mxu0 }
  0xdb   : > { %v990_v19 = vpop.f32.mrf.mxu3  ;;  %v752_v7 = vpop.f32.mrf.mxu1 }
  0xdc   : > { %v1029_v63 = vadd.f32 %v990_v19, %v953_v6  ;;  %1831 = vmatmul.msk.bf16.gmra.mxu2 %vm591_vm3, %v2313_v33  ;;  %v753_v9 = vadd.f32 %v752_v7, %v636_v45 }
  0xde   : > { %v2474_v14 = vadd.f32 %v1088_v62, %v1029_v63 }
  0xdf   : > { %v917_v15 = vpop.f32.mrf.mxu2 }
  0xe0   : > { %1839 = vmatmul.msk.bf16.gmra.mxu3 %vm591_vm3, %v2200_v50  ;;  %v954_v18 = vadd.f32 %v917_v15, %v751_v4 }
  0xe1   : > { %v1091_v43 = vpop.f32.mrf.mxu0 }
  0xe3   : > { %v993_v21 = vpop.f32.mrf.mxu3  ;;  %v755_v23 = vpop.f32.mrf.mxu1 }
  0xe4   : > { %1848 = vmatmul.msk.bf16.gmra.mxu0 %vm591_vm3, %v2302_v29  ;;  %v1030_v56 = vadd.f32 %v993_v21, %v954_v18  ;;  %v756_v28 = vadd.f32 %v755_v23, %v2372_v34 }
  0xe6   : > { %1820 = vmatmul.msk.bf16.gmra.mxu1 %vm591_vm3, %v2302_v29  ;;  %v2483_v33 = vadd.f32 %v1091_v43, %v1030_v56 }
  0xe7   : > { %v919_v37 = vpop.f32.mrf.mxu2 }
  0xe8   : > { %v955_v46 = vadd.f32 %v919_v37, %v753_v9 }
  0xe9   : > { %v1093_v11 = vpop.f32.mrf.mxu0 }
  0xeb   : > { %v995_v12 = vpop.f32.mrf.mxu3  ;;  %v757_v50 = vpop.f32.mrf.mxu1 }
  0xec   : > { %v1031_v45 = vadd.f32 %v995_v12, %v955_v46  ;;  %1832 = vmatmul.msk.bf16.gmra.mxu2 %vm591_vm3, %v2325_v3  ;;  %v758_v49 = vadd.f32 %v757_v50, %v2398_v55 }
  0xee   : > { %v2488_v53 = vadd.f32 %v1093_v11, %v1031_v45 }
  0xef   : > { %v922_v57 = vpop.f32.mrf.mxu2 }
  0xf0   : > { %1840 = vmatmul.msk.bf16.gmra.mxu3 %vm591_vm3, %v2132_v24  ;;  %v956_v29 = vadd.f32 %v922_v57, %v756_v28 }
  0xf1   : > { %v1096_v34 = vpop.f32.mrf.mxu0 }
  0xf3   : > { %v998_v58 = vpop.f32.mrf.mxu3  ;;  %v760_v59 = vpop.f32.mrf.mxu1 }
  0xf4   : > { %1849 = vmatmul.msk.bf16.gmra.mxu0 %vm591_vm3, %v2339_v17  ;;  %v1032_v60 = vadd.f32 %v998_v58, %v956_v29  ;;  %v761_v27 = vadd.f32 %v760_v59, %v2423_v30 }
  0xf6   : > { %1821 = vmatmul.msk.bf16.gmra.mxu1 %vm591_vm3, %v2339_v17  ;;  %v2497_v3 = vadd.f32 %v1096_v34, %v1032_v60 }
  0xf7   : > { %v924_v55 = vpop.f32.mrf.mxu2 }
  0xf8   : > { %v957_v52 = vadd.f32 %v924_v55, %v758_v49  ;;  %v2535_v55 = vld [vmem:[%s2381_s10 + $0xc] sm:$0xf] }
  0xf9   : > { %v1098_v4 = vpop.f32.mrf.mxu0 }
  0xfb   : > { %v1000_v16 = vpop.f32.mrf.mxu3  ;;  %v762_v24 = vpop.f32.mrf.mxu1 }
  0xfc   : > { %v1033_v6 = vadd.f32 %v1000_v16, %v957_v52  ;;  %1833 = vmatmul.msk.bf16.gmra.mxu2 %vm591_vm3, %v2345_v13  ;;  %v763_v62 = vadd.f32 %v762_v24, %v2439_v31  ;;  %v2538_v52 = vld [vmem:[%s2381_s10 + $0x10] sm:$0xf]  ;;  %v1301_v24 = vshrl.u32 %v2535_v55, 16 }
  0xfe   : > { %v2502_v19 = vadd.f32 %v1098_v4, %v1033_v6  ;;  %v1817_v6 = vrot.slane %v2386_v39, 9 }
  0xff   : > { %v927_v7 = vpop.f32.mrf.mxu2 }
 0x100   : > { %1841 = vmatmul.msk.bf16.gmra.mxu3 %vm591_vm3, %v2222_v32  ;;  %v958_v17 = vadd.f32 %v927_v7, %v761_v27  ;;  %v1145_v27 = vrot.slane %v2389_v40, 5  ;;  %v1314_v7 = vshrl.u32 %v2538_v52, 16 }
 0x101   : > { %v1101_v30 = vpop.f32.mrf.mxu0 }
 0x102   : > { %v1147_v40 = vrot.slane %v1145_v27, 4  ;;  %v1146_v39 = vsel %vm2249_vm7, %v1817_v6, %v1145_v27 }
 0x103   : > { %v1003_v63 = vpop.f32.mrf.mxu3  ;;  %v765_v9 = vpop.f32.mrf.mxu1 }
 0x104   : > { %1850 = vmatmul.msk.bf16.gmra.mxu0 %vm591_vm3, %v2359_v41  ;;  %v1034_v15 = vadd.f32 %v1003_v63, %v958_v17  ;;  %v766_v32 = vadd.f32 %v765_v9, %v2402_v48  ;;  %v1303_v9 = vrot.slane %v1301_v24, 4  ;;  %v1873_v24 = vld [vmem:[%s2381_s10 + $0xc] sm:$0xff] }
 0x106   : > { %1822 = vmatmul.msk.bf16.gmra.mxu1 %vm591_vm3, %v2359_v41  ;;  %v2510_v13 = vadd.f32 %v1101_v30, %v1034_v15 }
 0x107   : > { %v929_v31 = vpop.f32.mrf.mxu2 }
 0x108   : > { %v959_v18 = vadd.f32 %v929_v31, %v763_v62  ;;  %v1310_v62 = vshll.u32 %v2538_v52, 16 }
 0x109   : > { %v1103_v43 = vpop.f32.mrf.mxu0 }
 0x10b   : > { %v1005_v21 = vpop.f32.mrf.mxu3  ;;  %v767_v23 = vpop.f32.mrf.mxu1 }
 0x10c   : > { %v1035_v56 = vadd.f32 %v1005_v21, %v959_v18  ;;  %1834 = vmatmul.msk.bf16.gmra.mxu2 %vm591_vm3, %v2365_v25  ;;  %v768_v45 = vadd.f32 %v767_v23, %v2427_v20  ;;  %v1316_v21 = vrot.slane %v1314_v7, 4  ;;  %v362_v23 = vld [vmem:[%s2381_s10 + $0x14] sm:$0x1] }
 0x10e   : > { %v2515_v28 = vadd.f32 %v1103_v43, %v1035_v56  ;;  %v1312_v43 = vrot.slane %v1310_v62, 5 }
 0x10f   : > { %v932_v37 = vpop.f32.mrf.mxu2 }
 0x110   : > { %1842 = vmatmul.msk.bf16.gmra.mxu3 %vm591_vm3, %v2153_v47  ;;  %v960_v41 = vadd.f32 %v932_v37, %v766_v32 }
 0x111   : > { %v1106_v46 = vpop.f32.mrf.mxu0 }
 0x113   : > { %v1008_v11 = vpop.f32.mrf.mxu3  ;;  %v770_v12 = vpop.f32.mrf.mxu1 }
 0x114   : > { %1851 = vmatmul.msk.bf16.gmra.mxu0 %vm591_vm3, %v2393_v42  ;;  %v1036_v50 = vadd.f32 %v1008_v11, %v960_v41  ;;  %v771_v58 = vadd.f32 %v770_v12, %v2446_v35  ;;  %v1320_v11 = vshll.u32 %v362_v23, 16 }
 0x116   : > { %1823 = vmatmul.msk.bf16.gmra.mxu1 %vm591_vm3, %v2393_v42  ;;  %v2524_v25 = vadd.f32 %v1106_v46, %v1036_v50  ;;  %v1317_v46 = vor.u32 %v1316_v21, %v1312_v43 }
 0x117   : > { %v934_v48 = vpop.f32.mrf.mxu2 }
 0x118   : > { %v961_v49 = vadd.f32 %v934_v48, %v768_v45 }
 0x119   : > { %v1108_v47 = vpop.f32.mrf.mxu0 }
 0x11b   : > { %v1010_v57 = vpop.f32.mrf.mxu3  ;;  %v772_v29 = vpop.f32.mrf.mxu1 }
 0x11c   : > { %v1037_v34 = vadd.f32 %v1010_v57, %v961_v49  ;;  %1835 = vmatmul.msk.bf16.gmra.mxu2 %vm591_vm3, %v2407_v38  ;;  %v1148_v38 = vrot.slane %v2412_v61, 5  ;;  %v773_v17 = vadd.f32 %v772_v29, %v2458_v44  ;;  %v1318_v29 = vrot.slane %v1317_v46, 4 }
 0x11e   : > { %v2529_v59 = vadd.f32 %v1108_v47, %v1037_v34  ;;  %v1149_v18 = vsel %vm2249_vm7, %v1147_v40, %v1148_v38  ;;  %v1322_v34 = vrot.slane %v1320_v11, 5 }
 0x11f   : > { %v937_v20 = vpop.f32.mrf.mxu2  ;;  %v1151_v37 = vunpack.c.l.b16 %v1149_v18 }
 0x120   : > { %1843 = vmatmul.msk.bf16.gmra.mxu3 %vm591_vm3, %v2244_v1  ;;  %v962_v42 = vadd.f32 %v937_v20, %v771_v58  ;;  %v1304_v1 = vshll.u32 %v2535_v55, 16 }
 0x121   : > { %v1111_v60 = vpop.f32.mrf.mxu0 }
 0x122   : > { %v1306_v15 = vrot.slane %v1304_v1, 5 }
 0x123   : > { %v1013_v4 = vpop.f32.mrf.mxu3  ;;  %v775_v16 = vpop.f32.mrf.mxu1 }
 0x124   : > { %1852 = vmatmul.msk.bf16.gmra.mxu0 %vm591_vm3, %v2431_v51  ;;  %v1038_v35 = vadd.f32 %v1013_v4, %v962_v42  ;;  %v1307_v41 = vor.u32 %v1306_v15, %v1303_v9  ;;  %v776_v12 = vadd.f32 %v775_v16, %v2414_v2  ;;  %v1404_v4 = vrot.slane %v362_v23, 5 }
 0x126   : > { %1824 = vmatmul.msk.bf16.gmra.mxu1 %vm591_vm3, %v2431_v51  ;;  %v2551_v61 = vadd.f32 %v1111_v60, %v1038_v35  ;;  %v1150_v51 = vunpack.c.l.b16 %v1146_v39  ;;  %v1308_v47 = vrot.slane %v1307_v41, 4  ;;  %v1846_v60 = vrot.slane %v2535_v55, 9 }
 0x127   : > { %v939_v30 = vpop.f32.mrf.mxu2 }
 0x128   : > { %v963_v63 = vadd.f32 %v939_v30, %v773_v17  ;;  %v1152_v48 = vpack.c.b16 %v1151_v37, %v1150_v51  ;;  %v1313_v42 = vsel %vm2090_vm4, %v1308_v47, %v1312_v43 }
 0x129   : > { %v1113_v31 = vpop.f32.mrf.mxu0  ;;  %v1324_v1 = vunpack.c.l.b16 %v1313_v42 }
 0x12b   : > { %v1015_v44 = vpop.f32.mrf.mxu3  ;;  %v777_v56 = vpop.f32.mrf.mxu1 }
 0x12c   : > { %v1039_v32 = vadd.f32 %v1015_v44, %v963_v63  ;;  %1836 = vmatmul.msk.bf16.gmra.mxu2 %vm591_vm3, %v2444_v8  ;;  %v1401_v8 = vrot.slane %v2538_v52, 5  ;;  %v778_v16 = vadd.f32 %v777_v56, %v2433_v22 }
 0x12e   : > { %v2561_v50 = vadd.f32 %v1113_v31, %v1039_v32  ;;  %v1403_v27 = vrot.slane %v1401_v8, 4  ;;  %v1402_v36 = vsel %vm2249_vm7, %v1846_v60, %v1401_v8 }
 0x12f   : > { %v942_v45 = vpop.f32.mrf.mxu2  ;;  %v1406_v30 = vunpack.c.l.b16 %v1402_v36 }
 0x130   : > { %1844 = vmatmul.msk.bf16.gmra.mxu3 %vm591_vm3, %v2450_v26  ;;  %v964_v49 = vadd.f32 %v942_v45, %v776_v12  ;;  %v1323_v26 = vsel %vm2090_vm4, %v1318_v29, %v1322_v34  ;;  %v1405_v55 = vsel %vm2249_vm7, %v1403_v27, %v1404_v4 }
 0x131   : > { %v1116_v57 = vpop.f32.mrf.mxu0  ;;  %v1325_v6 = vunpack.c.l.b16 %v1323_v26  ;;  %v1407_v63 = vunpack.c.l.b16 %v1405_v55 }
 0x133   : > { %v1018_v58 = vpop.f32.mrf.mxu3  ;;  %v780_v20 = vpop.f32.mrf.mxu1  ;;  %v1326_v22 = vpack.c.b16 %v1325_v6, %v1324_v1  ;;  %v1408_v39 = vpack.c.b16 %v1407_v63, %v1406_v30 }
 0x134   : > { %1853 = vmatmul.msk.bf16.gmra.mxu0 %vm591_vm3, %v1152_v48  ;;  %v1040_v2 = vadd.f32 %v1018_v58, %v964_v49  ;;  %v781_v9 = vadd.f32 %v780_v20, %v2452_v10 }
 0x136   : > { %1825 = vmatmul.msk.bf16.gmra.mxu1 %vm591_vm3, %v1152_v48  ;;  %v2574_v52 = vadd.f32 %v1116_v57, %v1040_v2 }
 0x137   : > { %v944_v38 = vpop.f32.mrf.mxu2 }
 0x138   : > { %v965_v35 = vadd.f32 %v944_v38, %v778_v16 }
 0x139   : > { %v1118_v40 = vpop.f32.mrf.mxu0 }
 0x13b   : > { %v1020_v62 = vpop.f32.mrf.mxu3  ;;  %v782_v7 = vpop.f32.mrf.mxu1 }
 0x13c   : > { %v1041_v17 = vadd.f32 %v1020_v62, %v965_v35  ;;  %1837 = vmatmul.msk.bf16.gmra.mxu2 %vm591_vm3, %v1873_v24  ;;  %v783_v56 = vadd.f32 %v782_v7, %v2460_v0 }
 0x13e   : > { %v2583_v15 = vadd.f32 %v1118_v40, %v1041_v17 }
 0x13f   : > { %v947_v31 = vpop.f32.mrf.mxu2 }
 0x140   : > { %1845 = vmatmul.msk.bf16.gmra.mxu3 %vm591_vm3, %v1326_v22  ;;  %v966_v18 = vadd.f32 %v947_v31, %v781_v9 }
 0x141   : > { %v1121_v43 = vpop.f32.mrf.mxu0 }
 0x143   : > { %v1023_v54 = vpop.f32.mrf.mxu3  ;;  %v1168_v21 = vpop.f32.mrf.mxu1 }
 0x144   : > { %1854 = vmatmul.msk.bf16.gmra.mxu0 %vm591_vm3, %v1408_v39  ;;  %v1042_v23 = vadd.f32 %v1023_v54, %v966_v18  ;;  %v1208_v44 = vadd.f32 %v1168_v21, %v2470_v5 }
 0x146   : > { %v2589_v32 = vadd.f32 %v1121_v43, %v1042_v23 }
 0x147   : > { %v949_v10 = vpop.f32.mrf.mxu2 }
 0x148   : > { %v967_v51 = vadd.f32 %v949_v10, %v783_v56 }
 0x149   : > { %v1123_v37 = vpop.f32.mrf.mxu0 }
 0x14b   : > { %v1025_v41 = vpop.f32.mrf.mxu3  ;;  %v1170_v46 = vpop.f32.mrf.mxu1 }
 0x14c   : > { %v1043_v11 = vadd.f32 %v1025_v41, %v967_v51  ;;  %v1209_v12 = vadd.f32 %v1170_v46, %v2474_v14 }
 0x14e   : > { %v2592_v45 = vadd.f32 %v1123_v37, %v1043_v11 }
 0x14f   : > { %v1244_v48 = vpop.f32.mrf.mxu2 }
 0x150   : > { %v1284_v49 = vadd.f32 %v1244_v48, %v1208_v44 }
 0x151   : > { %v1424_v47 = vpop.f32.mrf.mxu0 }
 0x153   : > { %v1342_v57 = vpop.f32.mrf.mxu3  ;;  %v1173_v29 = vpop.f32.mrf.mxu1 }
 0x154   : > { %v1382_v5 = vadd.f32 %v1342_v57, %v1284_v49  ;;  %v1210_v0 = vadd.f32 %v1173_v29, %v2483_v33 }
 0x156   : > { %v1464_v34 = vadd.f32 %v1424_v47, %v1382_v5 }
 0x157   : > { %v1246_v8 = vpop.f32.mrf.mxu2 }
 0x158   : > { %v1285_v58 = vadd.f32 %v1246_v8, %v1209_v12  ;;  %v1520_v14 = vmul.f32 %v1464_v34, %v1464_v34  ;;  %v1481_v16 = vsel %vm1480_vm8, %v1464_v34, 0.0 }
 0x159   : > { %v1426_v20 = vpop.f32.mrf.mxu0 }
 0x15a   : > { %v1536_v6 = vsel %vm1480_vm8, %v1520_v14, 0.0 }
 0x15b   : > { %v1344_v2 = vpop.f32.mrf.mxu3  ;;  %v1175_v42 = vpop.f32.mrf.mxu1 }
 0x15c   : > { %v1383_v26 = vadd.f32 %v1344_v2, %v1285_v58  ;;  %v1211_v60 = vadd.f32 %v1175_v42, %v2488_v53 }
 0x15e   : > { %v1465_v27 = vadd.f32 %v1426_v20, %v1383_v26 }
 0x15f   : > { %v1249_v4 = vpop.f32.mrf.mxu2 }
 0x160   : > { %v1482_v38 = vsel %vm1480_vm8, %v1465_v27, 0.0  ;;  %v1521_v35 = vmul.f32 %v1465_v27, %v1465_v27  ;;  %v1286_v24 = vadd.f32 %v1249_v4, %v1210_v0 }
 0x161   : > { %v1483_v33 = vadd.f32 %v1482_v38, %v1481_v16  ;;  %v1429_v1 = vpop.f32.mrf.mxu0 }
 0x162   : > { %v1537_v40 = vsel %vm1480_vm8, %v1521_v35, 0.0 }
 0x163   : > { %v1538_v36 = vadd.f32 %v1537_v40, %v1536_v6  ;;  %v1347_v55 = vpop.f32.mrf.mxu3  ;;  %v1178_v62 = vpop.f32.mrf.mxu1 }
 0x164   : > { %v1384_v53 = vadd.f32 %v1347_v55, %v1286_v24  ;;  %v1212_v7 = vadd.f32 %v1178_v62, %v2497_v3 }
 0x166   : > { %v1466_v17 = vadd.f32 %v1429_v1, %v1384_v53 }
 0x167   : > { %v1251_v22 = vpop.f32.mrf.mxu2 }
 0x168   : > { %v1484_v30 = vsel %vm1480_vm8, %v1466_v17, 0.0  ;;  %v1522_v63 = vmul.f32 %v1466_v17, %v1466_v17  ;;  %v1287_v9 = vadd.f32 %v1251_v22, %v1211_v60 }
 0x169   : > { %v1485_v31 = vadd.f32 %v1484_v30, %v1483_v33  ;;  %v1431_v39 = vpop.f32.mrf.mxu0 }
 0x16a   : > { %v1539_v18 = vsel %vm1480_vm8, %v1522_v63, 0.0 }
 0x16b   : > { %v1540_v43 = vadd.f32 %v1539_v18, %v1538_v36  ;;  %v1349_v54 = vpop.f32.mrf.mxu3  ;;  %v1180_v21 = vpop.f32.mrf.mxu1 }
 0x16c   : > { %v1385_v23 = vadd.f32 %v1349_v54, %v1287_v9  ;;  %v1213_v57 = vadd.f32 %v1180_v21, %v2502_v19 }
 0x16e   : > { %v1467_v44 = vadd.f32 %v1431_v39, %v1385_v23 }
 0x16f   : > { %v1254_v56 = vpop.f32.mrf.mxu2 }
 0x170   : > { %v1486_v10 = vsel %vm1480_vm8, %v1467_v44, 0.0  ;;  %v1523_v51 = vmul.f32 %v1467_v44, %v1467_v44  ;;  %v1288_v3 = vadd.f32 %v1254_v56, %v1212_v7 }
 0x171   : > { %v1487_v37 = vadd.f32 %v1486_v10, %v1485_v31  ;;  %v1434_v41 = vpop.f32.mrf.mxu0 }
 0x172   : > { %v1541_v46 = vsel %vm1480_vm8, %v1523_v51, 0.0 }
 0x173   : > { %v1542_v11 = vadd.f32 %v1541_v46, %v1540_v43  ;;  %v1352_v12 = vpop.f32.mrf.mxu3  ;;  %v1183_v48 = vpop.f32.mrf.mxu1 }
 0x174   : > { %v1386_v49 = vadd.f32 %v1352_v12, %v1288_v3  ;;  %v1214_v27 = vadd.f32 %v1183_v48, %v2510_v13 }
 0x176   : > { %v1468_v47 = vadd.f32 %v1434_v41, %v1386_v49 }
 0x177   : > { %v1256_v29 = vpop.f32.mrf.mxu2 }
 0x178   : > { %v1488_v5 = vsel %vm1480_vm8, %v1468_v47, 0.0  ;;  %v1524_v0 = vmul.f32 %v1468_v47, %v1468_v47  ;;  %v1289_v34 = vadd.f32 %v1256_v29, %v1213_v57 }
 0x179   : > { %v1489_v8 = vadd.f32 %v1488_v5, %v1487_v37  ;;  %v1436_v58 = vpop.f32.mrf.mxu0 }
 0x17a   : > { %v1543_v20 = vsel %vm1480_vm8, %v1524_v0, 0.0 }
 0x17b   : > { %v1544_v2 = vadd.f32 %v1543_v20, %v1542_v11  ;;  %v1354_v42 = vpop.f32.mrf.mxu3  ;;  %v1185_v26 = vpop.f32.mrf.mxu1 }
 0x17c   : > { %v1387_v60 = vadd.f32 %v1354_v42, %v1289_v34  ;;  %v1215_v62 = vadd.f32 %v1185_v26, %v2515_v28 }
 0x17e   : > { %v1469_v14 = vadd.f32 %v1436_v58, %v1387_v60 }
 0x17f   : > { %v1259_v4 = vpop.f32.mrf.mxu2 }
 0x180   : > { %v1490_v16 = vsel %vm1480_vm8, %v1469_v14, 0.0  ;;  %v1525_v19 = vmul.f32 %v1469_v14, %v1469_v14  ;;  %v1290_v38 = vadd.f32 %v1259_v4, %v1214_v27 }
 0x181   : > { %v1491_v35 = vadd.f32 %v1490_v16, %v1489_v8  ;;  %v1439_v24 = vpop.f32.mrf.mxu0 }
 0x182   : > { %v1545_v33 = vsel %vm1480_vm8, %v1525_v19, 0.0 }
 0x183   : > { %v1546_v1 = vadd.f32 %v1545_v33, %v1544_v2  ;;  %v1357_v6 = vpop.f32.mrf.mxu3  ;;  %v1188_v40 = vpop.f32.mrf.mxu1 }
 0x184   : > { %v1388_v36 = vadd.f32 %v1357_v6, %v1290_v38  ;;  %v1216_v54 = vadd.f32 %v1188_v40, %v2524_v25 }
 0x186   : > { %v1470_v55 = vadd.f32 %v1439_v24, %v1388_v36 }
 0x187   : > { %v1261_v53 = vpop.f32.mrf.mxu2 }
 0x188   : > { %v1492_v7 = vsel %vm1480_vm8, %v1470_v55, 0.0  ;;  %v1526_v13 = vmul.f32 %v1470_v55, %v1470_v55  ;;  %v1291_v17 = vadd.f32 %v1261_v53, %v1215_v62 }
 0x189   : > { %v1493_v22 = vadd.f32 %v1492_v7, %v1491_v35  ;;  %v1441_v30 = vpop.f32.mrf.mxu0 }
 0x18a   : > { %v1547_v63 = vsel %vm1480_vm8, %v1526_v13, 0.0 }
 0x18b   : > { %v1548_v9 = vadd.f32 %v1547_v63, %v1546_v1  ;;  %v1359_v31 = vpop.f32.mrf.mxu3  ;;  %v1190_v39 = vpop.f32.mrf.mxu1 }
 0x18c   : > { %v1389_v18 = vadd.f32 %v1359_v31, %v1291_v17  ;;  %v1217_v12 = vadd.f32 %v1190_v39, %v2529_v59 }
 0x18e   : > { %v1471_v43 = vadd.f32 %v1441_v30, %v1389_v18 }
 0x18f   : > { %v1264_v21 = vpop.f32.mrf.mxu2 }
 0x190   : > { %v1494_v23 = vsel %vm1480_vm8, %v1471_v43, 0.0  ;;  %v1527_v28 = vmul.f32 %v1471_v43, %v1471_v43  ;;  %v1292_v44 = vadd.f32 %v1264_v21, %v1216_v54 }
 0x191   : > { %v1495_v56 = vadd.f32 %v1494_v23, %v1493_v22  ;;  %v1444_v10 = vpop.f32.mrf.mxu0 }
 0x192   : > { %v1549_v51 = vsel %vm1480_vm8, %v1527_v28, 0.0 }
 0x193   : > { %v1550_v3 = vadd.f32 %v1549_v51, %v1548_v9  ;;  %v1362_v37 = vpop.f32.mrf.mxu3  ;;  %v1193_v41 = vpop.f32.mrf.mxu1 }
 0x194   : > { %v1390_v46 = vadd.f32 %v1362_v37, %v1292_v44  ;;  %v1218_v2 = vadd.f32 %v1193_v41, %v2551_v61 }
 0x196   : > { %v1472_v11 = vadd.f32 %v1444_v10, %v1390_v46 }
 0x197   : > { %v1266_v48 = vpop.f32.mrf.mxu2 }
 0x198   : > { %v1496_v49 = vsel %vm1480_vm8, %v1472_v11, 0.0  ;;  %v1528_v25 = vmul.f32 %v1472_v11, %v1472_v11  ;;  %v1293_v47 = vadd.f32 %v1266_v48, %v1217_v12 }
 0x199   : > { %v1497_v57 = vadd.f32 %v1496_v49, %v1495_v56  ;;  %v1446_v29 = vpop.f32.mrf.mxu0 }
 0x19a   : > { %v1551_v5 = vsel %vm1480_vm8, %v1528_v25, 0.0 }
 0x19b   : > { %v1552_v0 = vadd.f32 %v1551_v5, %v1550_v3  ;;  %v1364_v34 = vpop.f32.mrf.mxu3  ;;  %v1195_v8 = vpop.f32.mrf.mxu1 }
 0x19c   : > { %v1391_v58 = vadd.f32 %v1364_v34, %v1293_v47  ;;  %v1219_v33 = vadd.f32 %v1195_v8, %v2561_v50 }
 0x19e   : > { %v1473_v20 = vadd.f32 %v1446_v29, %v1391_v58 }
 0x19f   : > { %v1269_v42 = vpop.f32.mrf.mxu2 }
 0x1a0   : > { %v1498_v26 = vsel %vm1480_vm8, %v1473_v20, 0.0  ;;  %v1529_v59 = vmul.f32 %v1473_v20, %v1473_v20  ;;  %v1294_v60 = vadd.f32 %v1269_v42, %v1218_v2 }
 0x1a1   : > { %v1499_v14 = vadd.f32 %v1498_v26, %v1497_v57  ;;  %v1449_v27 = vpop.f32.mrf.mxu0 }
 0x1a2   : > { %v1553_v4 = vsel %vm1480_vm8, %v1529_v59, 0.0 }
 0x1a3   : > { %v1554_v16 = vadd.f32 %v1553_v4, %v1552_v0  ;;  %v1367_v19 = vpop.f32.mrf.mxu3  ;;  %v1198_v35 = vpop.f32.mrf.mxu1 }
 0x1a4   : > { %v1392_v38 = vadd.f32 %v1367_v19, %v1294_v60  ;;  %v1220_v22 = vadd.f32 %v1198_v35, %v2574_v52 }
 0x1a6   : > { %v1474_v24 = vadd.f32 %v1449_v27, %v1392_v38 }
 0x1a7   : > { %v1271_v1 = vpop.f32.mrf.mxu2 }
 0x1a8   : > { %v1500_v6 = vsel %vm1480_vm8, %v1474_v24, 0.0  ;;  %v1530_v61 = vmul.f32 %v1474_v24, %v1474_v24  ;;  %v1295_v40 = vadd.f32 %v1271_v1, %v1219_v33 }
 0x1a9   : > { %v1501_v36 = vadd.f32 %v1500_v6, %v1499_v14  ;;  %v1451_v55 = vpop.f32.mrf.mxu0 }
 0x1aa   : > { %v1555_v62 = vsel %vm1480_vm8, %v1530_v61, 0.0 }
 0x1ab   : > { %v1556_v53 = vadd.f32 %v1555_v62, %v1554_v16  ;;  %v1369_v7 = vpop.f32.mrf.mxu3  ;;  %v1200_v30 = vpop.f32.mrf.mxu1 }
 0x1ac   : > { %v1393_v13 = vadd.f32 %v1369_v7, %v1295_v40  ;;  %v1221_v44 = vadd.f32 %v1200_v30, %v2583_v15 }
 0x1ae   : > { %v1475_v17 = vadd.f32 %v1451_v55, %v1393_v13 }
 0x1af   : > { %v1274_v63 = vpop.f32.mrf.mxu2 }
 0x1b0   : > { %v1502_v9 = vsel %vm1480_vm8, %v1475_v17, 0.0  ;;  %v1531_v50 = vmul.f32 %v1475_v17, %v1475_v17  ;;  %v1296_v31 = vadd.f32 %v1274_v63, %v1220_v22 }
 0x1b1   : > { %v1503_v39 = vadd.f32 %v1502_v9, %v1501_v36  ;;  %v1454_v18 = vpop.f32.mrf.mxu0 }
 0x1b2   : > { %v1557_v43 = vsel %vm1480_vm8, %v1531_v50, 0.0 }
 0x1b3   : > { %v1558_v54 = vadd.f32 %v1557_v43, %v1556_v53  ;;  %v1372_v21 = vpop.f32.mrf.mxu3  ;;  %v1203_v3 = vpop.f32.mrf.mxu1 }
 0x1b4   : > { %v1394_v23 = vadd.f32 %v1372_v21, %v1296_v31  ;;  %v1222_v25 = vadd.f32 %v1203_v3, %v2589_v32 }
 0x1b6   : > { %v1476_v28 = vadd.f32 %v1454_v18, %v1394_v23 }
 0x1b7   : > { %v1276_v56 = vpop.f32.mrf.mxu2 }
 0x1b8   : > { %v1504_v10 = vsel %vm1480_vm8, %v1476_v28, 0.0  ;;  %v1532_v52 = vmul.f32 %v1476_v28, %v1476_v28  ;;  %v1297_v51 = vadd.f32 %v1276_v56, %v1221_v44 }
 0x1b9   : > { %v1505_v37 = vadd.f32 %v1504_v10, %v1503_v39  ;;  %v1456_v41 = vpop.f32.mrf.mxu0 }
 0x1ba   : > { %v1559_v46 = vsel %vm1480_vm8, %v1532_v52, 0.0 }
 0x1bb   : > { %v1560_v11 = vadd.f32 %v1559_v46, %v1558_v54  ;;  %v1374_v12 = vpop.f32.mrf.mxu3  ;;  %v1205_v34 = vpop.f32.mrf.mxu1 }
 0x1bc   : > { %v1395_v48 = vadd.f32 %v1374_v12, %v1297_v51  ;;  %v1223_v26 = vadd.f32 %v1205_v34, %v2592_v45 }
 0x1be   : > { %v1477_v49 = vadd.f32 %v1456_v41, %v1395_v48 }
 0x1bf   : > { %v1279_v47 = vpop.f32.mrf.mxu2 }
 0x1c0   : > { %v1506_v57 = vsel %vm1480_vm8, %v1477_v49, 0.0  ;;  %v1533_v15 = vmul.f32 %v1477_v49, %v1477_v49  ;;  %v1298_v29 = vadd.f32 %v1279_v47, %v1222_v25 }
 0x1c1   : > { %v1507_v5 = vadd.f32 %v1506_v57, %v1505_v37  ;;  %v1459_v58 = vpop.f32.mrf.mxu0 }
 0x1c2   : > { %v1561_v0 = vsel %vm1480_vm8, %v1533_v15, 0.0 }
 0x1c3   : > { %v1562_v8 = vadd.f32 %v1561_v0, %v1560_v11  ;;  %v1377_v20 = vpop.f32.mrf.mxu3 }
 0x1c4   : > { %v1396_v2 = vadd.f32 %v1377_v20, %v1298_v29 }
 0x1c6   : > { %v1478_v42 = vadd.f32 %v1459_v58, %v1396_v2 }
 0x1c7   : > { %v1281_v59 = vpop.f32.mrf.mxu2 }
 0x1c8   : > { %v1508_v32 = vsel %vm1480_vm8, %v1478_v42, 0.0  ;;  %v1534_v60 = vmul.f32 %v1478_v42, %v1478_v42  ;;  %v1299_v14 = vadd.f32 %v1281_v59, %v1223_v26 }
 0x1c9   : > { %v1509_v27 = vadd.f32 %v1508_v32, %v1507_v5  ;;  %v1461_v35 = vpop.f32.mrf.mxu0 }
 0x1ca   : > { %v1563_v4 = vsel %vm1480_vm8, %v1534_v60, 0.0 }
 0x1cb   : > { %v1564_v16 = vadd.f32 %v1563_v4, %v1562_v8  ;;  %v1379_v19 = vpop.f32.mrf.mxu3 }
 0x1cc   : > { %v1397_v38 = vadd.f32 %v1379_v19, %v1299_v14 }
 0x1ce   : > { %v1479_v24 = vadd.f32 %v1461_v35, %v1397_v38 }
 0x1d0   : > { %v1510_v33 = vsel %vm1480_vm8, %v1479_v24, 0.0  ;;  %v1535_v1 = vmul.f32 %v1479_v24, %v1479_v24 }
 0x1d1   : > { %v1511_v45 = vadd.f32 %v1510_v33, %v1509_v27 }
 0x1d2   : > { %v1565_v6 = vsel %vm1480_vm8, %v1535_v1, 0.0 }
 0x1d3   : > { %v1512_v61 = vrot.slane %v1511_v45, 4  ;;  %v1566_v40 = vadd.f32 %v1565_v6, %v1564_v16 }
 0x1d5   : > { %v1513_v36 = vadd.f32 %v1512_v61, %v1511_v45  ;;  %v1567_v55 = vrot.slane %v1566_v40, 4 }
 0x1d7   : > { %v1514_v62 = vrot.slane %v1513_v36, 2  ;;  %v1568_v53 = vadd.f32 %v1567_v55, %v1566_v40 }
 0x1d9   : > { %v1515_v7 = vadd.f32 %v1514_v62, %v1513_v36  ;;  %v1569_v13 = vrot.slane %v1568_v53, 2 }
 0x1db   : > { %v1516_v17 = vrot.slane %v1515_v7, 1  ;;  %v1570_v22 = vadd.f32 %v1569_v13, %v1568_v53 }
 0x1dd   : > { %v1517_v30 = vadd.f32 %v1516_v17, %v1515_v7  ;;  %v1571_v63 = vrot.slane %v1570_v22, 1 }
 0x1df   : > { %1519 = vst.msk [vmem:[%s324_s22] sm:$0x1] %vm1518_vm9, %v1517_v30  ;;  %v1572_v9 = vadd.f32 %v1571_v63, %v1570_v22 }
 0x1e1   : > { %1573 = vst.msk [vmem:[%s331_s25] sm:$0x1] %vm1518_vm9, %v1572_v9 }
 0x1e2 PF: > { %s15_s19 = sadd.s32 1, %s1960_s19   ;;  %s2673_s15 = smov %s1952_s17 }
 0x1e3   : > { %p12_p9 = scmp.ge.s32.totalorder %s15_s19, 6   ;;  %s2674_s16 = smov %s1956_s18 }
 0x1e4   : > { %s2675_s17 = smov %s2678_s20  ;;  %s2676_s18 = smov %s2682_s21 }
 0x1e5   :  { %14 = sbr.rel (!%p12_p9) target bundleno = 3 (0x3), region = 77 }

// kernel: _lambda_.12
= control target key start
LH: loop header
LB: loop body
LE: loop exit
PB: predicated region body
PF: predicated region fallthrough
CT: control target
= control target key end

     0   :  { %s1515_s15 = smov 0   ;;  %s1517_s16 = smov 0   ;;  %s1954_s0 = inlined_call_operand.vmem [shape: bf16[2,10,10,24], index: 0, kind: input, shape index: {}, may-alias: {0,1}]   ;;  %s1955_s1 = inlined_call_operand.vmem [shape: bf16[2,10,10,24], index: 1, kind: input, shape index: {}, may-alias: {0,1}]   ;;  %s1956_s2 = inlined_call_operand.vmem [shape: bf16[3,3,24,8], index: 2, kind: input, shape index: {}]   ;;  %s1957_s3 = inlined_call_operand.vmem [shape: f32[2,1,1,8], index: 3, kind: output, shape index: {0}]   ;;  %s1958_s4 = inlined_call_operand.vmem [shape: f32[2,1,1,8], index: 4, kind: output, shape index: {1}]  }
   0x1   :  { %s1519_s17 = smov 0  }
   0x2 LB: > { %s27_s18 = sadd.s32 1, %s1484_s16  ;;  %p1335_p0 = scmp.ge.s32.totalorder %s1488_s17, 1  ;;  %s1488_s17 = sphi %s1519_s17, %s15_s17   ;;  %s1484_s16 = sphi %s1517_s16, %s1964_s16   ;;  %s1480_s15 = sphi %s1515_s15, %s1963_s15  }
   0x3   : > { %p29_p1 = scmp.ge.s32.totalorder %s27_s18, 2  ;;  %p225_p2 = scmp.lt.s32.totalorder %s1488_s17, 3 }
   0x5   : > { %s1966_s18 = smov (%p29_p1, %s27_s18), 0  ;;  %p226_p3 = pnand %p1335_p0, %p225_p2 }
   0x6   : > { %p286_p4 = scmp.lt.s32.totalorder (!%p226_p3), %s1480_s15, 1 }
   0x7   : > { %229 = sbr.rel (%p226_p3) target bundleno = 332 (0x14c), region = 32 }
   0xc   : > { %v354_v0 = vld [vmem:[%s1956_s2 + $0x14] sm:$0xf]  ;;  %v357_v2 = vld [vmem:[%s1956_s2 + $0x20] sm:$0xf]  ;;  %vm525_vm0 = vcmask 1043456   ;;  %s1968_s15 = smov (!%p286_p4, %s1480_s15), 1 }
   0xd   : > { %v508_v1 = vunpack.c.l.b16 %v354_v0  ;;  %v691_v3 = vunpack.c.l.b16 %v357_v2  ;;  %s1439_s23 = smul.u32 80, %s1968_s15  ;;  %v360_v6 = vld [vmem:[%s1956_s2 + $0x2c] sm:$0xf]  ;;  %v351_v7 = vld [vmem:[%s1956_s2 + $0x8] sm:$0xf]  ;;  %vm512_vm3 = vcmask 195584   ;;  %s321_s21 = scalar_lea.vmem %s1957_s3, %s1968_s15 }
   0xe   : > { %v758_v9 = vunpack.c.l.b16 %v360_v6  ;;  %v583_v10 = vunpack.c.l.b16 %v351_v7  ;;  %v363_v11 = vld [vmem:[%s1956_s2 + $0x38] sm:$0xf]  ;;  %v1425_v12 = vld [vmem:[%s1956_s2 + $0xc] sm:$0xff]  ;;  %vm376_vm1 = vsmask.f32 3328  ;;  %vm639_vm5 = vcmask 1042432   ;;  %s327_s25 = scalar_lea.vmem %s1958_s4, %s1968_s15 }
   0xf   : > { %v510_v4 = vpack.c.b16 %v508_v1, %v508_v1  ;;  %v693_v5 = vpack.c.b16 %v691_v3, %v691_v3  ;;  %s1560_s8 = scalar_lea.vmem %s1954_s0, %s1439_s23  ;;  %vm377_vm2 = vsmask.f32 7440  ;;  %v838_v14 = vunpack.c.l.b16 %v363_v11  ;;  %v1426_v45 = vld [vmem:[%s1956_s2 + $0x18] sm:$0xff]  ;;  %s1423_s6 = sadd.s32 64, %s1439_s23 }
  0x10   : > { %v1564_v15 = vld [vmem:[%s1560_s8 + $0x10] sm:$0xf]  ;;  %v1567_v16 = vld [vmem:[%s1560_s8 + $0x14] sm:$0x1]  ;;  %v1570_v17 = vld [vmem:[%s1560_s8 + $0x18] sm:$0xf]  ;;  %v1572_v18 = vpack.c.b16 %v758_v9, %v758_v9  ;;  %v1589_v28 = vpack.c.b16 %v583_v10, %v583_v10  ;;  %s1775_s9 = scalar_lea.vmem %s1955_s1, %s1423_s6 }
  0x11   : > { %v527_v8 = vsel %vm525_vm0, %v510_v4, 0  ;;  %v708_v13 = vsel %vm525_vm0, %v693_v5, 0  ;;  %v1575_v19 = vld [vmem:[%s1560_s8 + $0x1c] sm:$0x1]  ;;  %v408_v20 = vshrl.u32 %v1564_v15, 16  ;;  %v411_v21 = vshll.u32 %v1564_v15, 16  ;;  %vm1612_vm4 = vmor %vm376_vm1, %vm377_vm2 }
  0x12   : > { %1433 = vmatpush.bf16.msra.mxu1 %v527_v8  ;;  %1434 = vmatpush.bf16.msra.mxu2 %v527_v8  ;;  %v417_v22 = vshll.u32 %v1567_v16, 16  ;;  %v422_v23 = vshrl.u32 %v1570_v17, 16  ;;  %v425_v24 = vshll.u32 %v1570_v17, 16  ;;  %v431_v25 = vshll.u32 %v1575_v19, 16  ;;  %v1584_v26 = vld [vmem:[%s1560_s8 + $0x20] sm:$0xf] }
  0x13   : > { %1435 = vmatpush.bf16.msra.mxu3 %v527_v8  ;;  %535 = vmatpush.bf16.msra.mxu0 %v527_v8  ;;  %v1587_v27 = vld [vmem:[%s1560_s8 + $0x24] sm:$0x1]  ;;  %v1591_v29 = vpack.c.b16 %v838_v14, %v838_v14  ;;  %v410_v30 = vrot.slane %v408_v20, 4  ;;  %v413_v31 = vrot.slane %v411_v21, 5  ;;  %v1594_v34 = vld [vmem:[%s1560_s8 + $0x28] sm:$0xf] }
  0x14   : > { %v419_v32 = vrot.slane %v417_v22, 5  ;;  %v424_v33 = vrot.slane %v422_v23, 4  ;;  %v427_v35 = vrot.slane %v425_v24, 5  ;;  %v433_v36 = vrot.slane %v431_v25, 5  ;;  %v1597_v37 = vld [vmem:[%s1560_s8 + $0x2c] sm:$0x1] }
  0x15   : > { %v436_v38 = vshrl.u32 %v1584_v26, 16  ;;  %v439_v39 = vshll.u32 %v1584_v26, 16  ;;  %v414_v40 = vor.u32 %v413_v31, %v410_v30  ;;  %v445_v41 = vshll.u32 %v1587_v27, 16  ;;  %v1605_v44 = vld [vmem:[%s1560_s8 + $0x30] sm:$0xf] }
  0x16   : > { %1436 = vmatpush.bf16.msra.mxu1 %v1425_v12  ;;  %1437 = vmatpush.bf16.msra.mxu2 %v1425_v12  ;;  %v450_v42 = vshrl.u32 %v1594_v34, 16  ;;  %v453_v43 = vshll.u32 %v1594_v34, 16  ;;  %v428_v47 = vor.u32 %v427_v35, %v424_v33  ;;  %v459_v50 = vshll.u32 %v1597_v37, 16  ;;  %v1618_v51 = vld [vmem:[%s1560_s8 + $0x34] sm:$0x1] }
  0x17   : > { %1438 = vmatpush.bf16.msra.mxu3 %v1425_v12  ;;  %536 = vmatpush.bf16.msra.mxu0 %v1425_v12  ;;  %v438_v48 = vrot.slane %v436_v38, 4  ;;  %v441_v49 = vrot.slane %v439_v39, 5  ;;  %v415_v52 = vrot.slane %v414_v40, 4  ;;  %v447_v53 = vrot.slane %v445_v41, 5  ;;  %v1624_v62 = vld [vmem:[%s1560_s8 + $0x38] sm:$0xf] }
  0x18   : > { %v452_v54 = vrot.slane %v450_v42, 4  ;;  %v455_v55 = vrot.slane %v453_v43, 5  ;;  %v429_v56 = vrot.slane %v428_v47, 4  ;;  %v461_v58 = vrot.slane %v459_v50, 5  ;;  %v1627_v63 = vld [vmem:[%s1560_s8 + $0x3c] sm:$0x1] }
  0x19   : > { %v442_v57 = vor.u32 %v441_v49, %v438_v48  ;;  %v464_v59 = vshrl.u32 %v1605_v44, 16  ;;  %v420_v60 = vsel %vm1612_vm4, %v415_v52, %v419_v32  ;;  %v467_v0 = vshll.u32 %v1605_v44, 16  ;;  %v1638_v10 = vld [vmem:[%s1560_s8] sm:$0xf]  ;;  %v1646_v20 = vld [vmem:[%s1560_s8 + $0x4] sm:$0x1] }
  0x1a   : > { %716 = vmatpush.bf16.msrb.mxu2 %v708_v13  ;;  %v456_v61 = vor.u32 %v455_v55, %v452_v54  ;;  %v473_v1 = vshll.u32 %v1618_v51, 16  ;;  %v434_v2 = vsel %vm1612_vm4, %v429_v56, %v433_v36  ;;  %v1633_v3 = vunpack.c.l.b16 %v420_v60  ;;  %v1657_v25 = vld [vmem:[%s1560_s8 + $0x8] sm:$0xf]  ;;  %v332_v42 = vld [vmem:[%s1560_s8 + $0xc] sm:$0x1] }
  0x1b   : > { %v443_v4 = vrot.slane %v442_v57, 4  ;;  %v466_v5 = vrot.slane %v464_v59, 4  ;;  %vm640_vm6 = vcmask 1046532   ;;  %v1635_v6 = vunpack.c.l.b16 %v434_v2  ;;  %v369_v2 = vld [vmem:[%s1956_s2 + $0x50] sm:$0xf] }
  0x1c   : > { %v457_v7 = vrot.slane %v456_v61, 4  ;;  %v469_v8 = vrot.slane %v467_v0, 5  ;;  %v475_v9 = vrot.slane %v473_v1, 5  ;;  %v478_v12 = vshrl.u32 %v1624_v62, 16  ;;  %vm1698_vm7 = vmor %vm639_vm5, %vm640_vm6 }
  0x1d   : > { %v448_v11 = vsel %vm1612_vm4, %v443_v4, %v447_v53  ;;  %v481_v13 = vshll.u32 %v1624_v62, 16  ;;  %v487_v14 = vshll.u32 %v1627_v63, 16  ;;  %v1650_v21 = vpack.c.b16 %v1635_v6, %v1633_v3 }
  0x1e   : > { %717 = vmatpush.bf16.msrb.mxu2 %v1426_v45  ;;  %v462_v22 = vsel %vm1612_vm4, %v457_v7, %v461_v58  ;;  %v1654_v23 = vunpack.c.l.b16 %v448_v11  ;;  %v470_v24 = vor.u32 %v469_v8, %v466_v5  ;;  %v480_v31 = vrot.slane %v478_v12, 4  ;;  %v1427_v11 = vld [vmem:[%s1956_s2 + $0x24] sm:$0xff] }
  0x1f   : > { %v1659_v30 = vunpack.c.l.b16 %v462_v22  ;;  %v483_v32 = vrot.slane %v481_v13, 5  ;;  %v489_v33 = vrot.slane %v487_v14, 5  ;;  %1343 = vmatmul.msk.bf16.vlgmr.msra.gmra.mxu1 %vm512_vm3, %v1650_v21  ;;  %v380_v36 = vshrl.u32 %v1638_v10, 16 }
  0x20   : > { %v471_v35 = vrot.slane %v470_v24, 4  ;;  %v383_v38 = vshll.u32 %v1638_v10, 16  ;;  %v389_v39 = vshll.u32 %v1646_v20, 16  ;;  %v394_v43 = vshrl.u32 %v1657_v25, 16 }
  0x21   : > { %v1668_v40 = vpack.c.b16 %v1659_v30, %v1654_v23  ;;  %v484_v41 = vor.u32 %v483_v32, %v480_v31  ;;  %v397_v45 = vshll.u32 %v1657_v25, 16  ;;  %v382_v48 = vrot.slane %v380_v36, 4  ;;  %v372_v32 = vld [vmem:[%s1956_s2 + $0x5c] sm:$0xf] }
  0x22   : > { %v476_v47 = vsel %vm1612_vm4, %v471_v35, %v475_v9  ;;  %v385_v49 = vrot.slane %v383_v38, 5  ;;  %v391_v50 = vrot.slane %v389_v39, 5  ;;  %v396_v54 = vrot.slane %v394_v43, 4 }
  0x23   : > { %1344 = vmatmul.msk.bf16.vlgmr.msra.gmra.mxu2 %vm512_vm3, %v1668_v40  ;;  %v485_v52 = vrot.slane %v484_v41, 4  ;;  %v1677_v53 = vunpack.c.l.b16 %v476_v47  ;;  %v399_v55 = vrot.slane %v397_v45, 5  ;;  %v403_v57 = vshll.u32 %v332_v42, 16 }
  0x24   : > { %v386_v56 = vor.u32 %v385_v49, %v382_v48  ;;  %v644_v58 = vrot.slane %v1646_v20, 5  ;;  %v648_v59 = vrot.slane %v332_v42, 5  ;;  %v775_v0 = vsel %vm525_vm0, %v1572_v18, 0  ;;  %v1424_v18 = vld [vmem:[%s1956_s2] sm:$0xff] }
  0x25   : > { %v490_v60 = vsel %vm1612_vm4, %v485_v52, %v489_v33  ;;  %v400_v61 = vor.u32 %v399_v55, %v396_v54  ;;  %v600_v1 = vsel %vm525_vm0, %v1589_v28, 0  ;;  %v405_v7 = vrot.slane %v403_v57, 5  ;;  %783 = vmatpush.bf16.msrb.mxu3 %v775_v0  ;;  %v366_v33 = vld [vmem:[%s1956_s2 + $0x44] sm:$0xf] }
  0x26   : > { %v1689_v4 = vunpack.c.l.b16 %v490_v60  ;;  %v387_v5 = vrot.slane %v386_v56, 4  ;;  %608 = vmatpush.bf16.msrb.mxu1 %v600_v1  ;;  %v855_v8 = vsel %vm525_vm0, %v1591_v29, 0  ;;  %v1428_v29 = vld [vmem:[%s1956_s2 + $0x30] sm:$0xff]  ;;  %v566_v12 = vunpack.c.l.b16 %v1638_v10 }
  0x27   : > { %v401_v9 = vrot.slane %v400_v61, 4  ;;  %863 = vmatpush.bf16.msrb.mxu0 %v855_v8  ;;  %v567_v13 = vunpack.c.l.b16 %v1657_v25  ;;  %v1354_v14 = vrot.slane %v1638_v10, 9  ;;  %v1355_v24 = vrot.slane %v1657_v25, 9  ;;  %v375_v25 = vld [vmem:[%s1956_s2 + $0x68] sm:$0xf] }
  0x28   : > { %v1713_v20 = vpack.c.b16 %v1689_v4, %v1677_v53  ;;  %v392_v22 = vsel %vm1612_vm4, %v387_v5, %v391_v50  ;;  %v973_v31 = vunpack.c.l.b16 %v369_v2  ;;  %v1041_v45 = vunpack.c.l.b16 %v372_v32 }
  0x29   : > { %v406_v10 = vsel %vm1612_vm4, %v401_v9, %v405_v7  ;;  %v491_v35 = vunpack.c.l.b16 %v392_v22  ;;  %v645_v36 = vsel %vm1698_vm7, %v1354_v14, %v644_v58  ;;  %v1735_v39 = vsel %vm1698_vm7, %v1355_v24, %v648_v59  ;;  %784 = vmatpush.bf16.msrb.mxu3 %v1427_v11  ;;  %v1796_v14 = vld [vmem:[%s1775_s9] sm:$0xf] }
  0x2a   : > { %1345 = vmatmul.msk.bf16.vlgmr.msra.gmra.mxu3 %vm512_vm3, %v1713_v20  ;;  %v492_v38 = vunpack.c.l.b16 %v406_v10  ;;  %609 = vmatpush.bf16.msrb.mxu1 %v1424_v18  ;;  %v674_v41 = vunpack.c.l.b16 %v645_v36  ;;  %v675_v42 = vunpack.c.l.b16 %v1735_v39  ;;  %v975_v43 = vpack.c.b16 %v973_v31, %v973_v31  ;;  %v347_v39 = vld [vmem:[%s1775_s9 + $0x8] sm:$0xf] }
  0x2b   : > { %864 = vmatpush.bf16.msrb.mxu0 %v1428_v29  ;;  %v909_v47 = vunpack.c.l.b16 %v366_v33  ;;  %v574_v49 = vpack.c.b16 %v567_v13, %v566_v12  ;;  %v1100_v50 = vunpack.c.l.b16 %v375_v25  ;;  %v1043_v54 = vpack.c.b16 %v1041_v45, %v1041_v45  ;;  %v1429_v29 = vld [vmem:[%s1956_s2 + $0x3c] sm:$0xff]  ;;  %v1808_v25 = vld [vmem:[%s1775_s9 + $0x4] sm:$0x1] }
  0x2c   : > { %v499_v48 = vpack.c.b16 %v492_v38, %v491_v35  ;;  %v981_v52 = vsel %vm525_vm0, %v975_v43, 0  ;;  %v682_v57 = vpack.c.b16 %v675_v42, %v674_v41  ;;  %v568_v61 = vunpack.c.l.b16 %v1564_v15  ;;  %v1432_v12 = vld [vmem:[%s1956_s2 + $0x60] sm:$0xff] }
  0x2d   : > { %v911_v55 = vpack.c.b16 %v909_v47, %v909_v47  ;;  %989 = vmatpush.bf16.msra.mxu2 %v981_v52  ;;  %v1102_v56 = vpack.c.b16 %v1100_v50, %v1100_v50  ;;  %v1049_v58 = vsel %vm525_vm0, %v1043_v54, 0  ;;  %v1356_v0 = vrot.slane %v1564_v15, 9 }
  0x2e   : > { %1342 = vmatmul.msk.bf16.vlgmr.msra.gmra.mxu0 %vm512_vm3, %v499_v48  ;;  %1057 = vmatpush.bf16.msra.mxu3 %v1049_v58  ;;  %v652_v1 = vrot.slane %v1567_v16, 5  ;;  %v1357_v2 = vrot.slane %v1570_v17, 9  ;;  %v656_v5 = vrot.slane %v1575_v19, 5  ;;  %v749_v7 = vpack.c.b16 %v568_v61, %v567_v13  ;;  %v1430_v16 = vld [vmem:[%s1956_s2 + $0x48] sm:$0xff] }
  0x2f   : > { %v926_v59 = vsel %vm525_vm0, %v911_v55, 0  ;;  %1350 = vmatmul.msk.bf16.vlgmr.msrb.gmra.mxu1 %vm512_vm3, %v574_v49  ;;  %v1108_v60 = vsel %vm525_vm0, %v1102_v56, 0  ;;  %v569_v8 = vunpack.c.l.b16 %v1570_v17  ;;  %v829_v15 = vpack.c.b16 %v1633_v3, %v492_v38  ;;  %v1431_v3 = vld [vmem:[%s1956_s2 + $0x54] sm:$0xff] }
  0x30   : > { %934 = vmatpush.bf16.msra.mxu1 %v926_v59  ;;  %1116 = vmatpush.bf16.msra.mxu0 %v1108_v60  ;;  %v1755_v18 = vsel %vm1698_vm7, %v1356_v0, %v652_v1  ;;  %v1759_v9 = vsel %vm1698_vm7, %v1357_v2, %v656_v5  ;;  %v815_v22 = vshrl.u32 %v1796_v14, 16  ;;  %v818_v24 = vshll.u32 %v1796_v14, 16 }
  0x31   : > { %v676_v17 = vunpack.c.l.b16 %v1755_v18  ;;  %v677_v19 = vunpack.c.l.b16 %v1759_v9  ;;  %v1770_v11 = vpack.c.b16 %v569_v8, %v568_v61  ;;  %990 = vmatpush.bf16.msra.mxu2 %v1430_v16  ;;  %v570_v31 = vunpack.c.l.b16 %v1584_v26  ;;  %v348_v16 = vld [vmem:[%s1775_s9 + $0xc] sm:$0x1] }
  0x32   : > { %1058 = vmatpush.bf16.msra.mxu3 %v1431_v3  ;;  %v1358_v32 = vrot.slane %v1584_v26, 9  ;;  %v817_v33 = vrot.slane %v815_v22, 4  ;;  %v660_v10 = vrot.slane %v1587_v27, 5  ;;  %v1359_v35 = vrot.slane %v1594_v34, 9 }
  0x33   : > { %1366 = vmatmul.msk.bf16.vlgmr.msrb.gmra.mxu2 %vm512_vm3, %v682_v57  ;;  %v1791_v13 = vpack.c.b16 %v677_v19, %v676_v17  ;;  %v664_v36 = vrot.slane %v1597_v37, 5  ;;  %v820_v38 = vrot.slane %v818_v24, 5  ;;  %v824_v41 = vshll.u32 %v1808_v25, 16 }
  0x34   : > { %935 = vmatpush.bf16.msra.mxu1 %v1429_v29  ;;  %1117 = vmatpush.bf16.msra.mxu0 %v1432_v12  ;;  %v750_v43 = vpack.c.b16 %v570_v31, %v569_v8  ;;  %v571_v48 = vunpack.c.l.b16 %v1594_v34  ;;  %v661_v26 = vsel %vm1698_vm7, %v1358_v32, %v660_v10  ;;  %v830_v37 = vpack.c.b16 %v1654_v23, %v1635_v6 }
  0x35   : > { %v821_v45 = vor.u32 %v820_v38, %v817_v33  ;;  %v826_v47 = vrot.slane %v824_v41, 5  ;;  %v1816_v27 = vsel %vm1698_vm7, %v1359_v35, %v664_v36  ;;  %v678_v52 = vunpack.c.l.b16 %v661_v26 }
  0x36   : > { %v679_v54 = vunpack.c.l.b16 %v1816_v27  ;;  %v576_v55 = vpack.c.b16 %v571_v48, %v570_v31  ;;  %v572_v58 = vunpack.c.l.b16 %v1605_v44  ;;  %v1360_v6 = vrot.slane %v1605_v44, 9 }
  0x37   : > { %v822_v49 = vrot.slane %v821_v45, 4  ;;  %v668_v23 = vrot.slane %v1618_v51, 5  ;;  %v1361_v59 = vrot.slane %v1624_v62, 9  ;;  %v672_v60 = vrot.slane %v1627_v63, 5 }
  0x38   : > { %v684_v57 = vpack.c.b16 %v679_v54, %v678_v52  ;;  %v751_v61 = vpack.c.b16 %v572_v58, %v571_v48  ;;  %v831_v44 = vpack.c.b16 %v1677_v53, %v1659_v30  ;;  %v900_v30 = vpack.c.b16 %v676_v17, %v675_v42 }
  0x39   : > { %v827_v50 = vsel %vm1612_vm4, %v822_v49, %v826_v47  ;;  %v669_v0 = vsel %vm1698_vm7, %v1360_v6, %v668_v23  ;;  %v673_v1 = vsel %vm1698_vm7, %v1361_v59, %v672_v60  ;;  %v901_v53 = vpack.c.b16 %v678_v52, %v677_v19 }
  0x3a   : > { %1374 = vmatmul.msk.bf16.vlgmr.msrb.gmra.mxu3 %vm512_vm3, %v749_v7  ;;  %v1824_v34 = vunpack.c.l.b16 %v827_v50  ;;  %v680_v2 = vunpack.c.l.b16 %v669_v0  ;;  %v681_v51 = vunpack.c.l.b16 %v673_v1  ;;  %v1021_v8 = vshrl.u32 %v347_v39, 16 }
  0x3b   : > { %v1024_v18 = vshll.u32 %v347_v39, 16  ;;  %v897_v9 = vrot.slane %v1808_v25, 5  ;;  %v1091_v22 = vrot.slane %v348_v16, 5  ;;  %v966_v46 = vunpack.c.l.b16 %v347_v39 }
  0x3c   : > { %v832_v56 = vpack.c.b16 %v1824_v34, %v1689_v4  ;;  %v573_v4 = vunpack.c.l.b16 %v1624_v62  ;;  %v685_v63 = vpack.c.b16 %v681_v51, %v680_v2  ;;  %v748_v62 = vunpack.c.l.b16 %v1796_v14 }
  0x3d   : > { %v1023_v42 = vrot.slane %v1021_v8, 4  ;;  %v902_v10 = vpack.c.b16 %v680_v2, %v679_v54  ;;  %vm1147_vm8 = vcmask 64512   ;;  %vm1169_vm9 = vcmask 57344  }
  0x3e   : > { %1382 = vmatmul.msk.bf16.vlgmr.msrb.gmra.mxu0 %vm512_vm3, %v829_v15  ;;  %v577_v5 = vpack.c.b16 %v573_v4, %v572_v58  ;;  %v752_v7 = vpack.c.b16 %v748_v62, %v573_v4  ;;  %v1026_v15 = vrot.slane %v1024_v18, 5 }
  0x3f   : > { %1351 = vmatmul.msk.bf16.gmra.mxu1 %vm512_vm3, %v1770_v11 }
  0x40   : > { %v1027_v17 = vor.u32 %v1026_v15, %v1023_v42 }
  0x42   : > { %v1028_v19 = vrot.slane %v1027_v17, 4 }
  0x43   : > { %1367 = vmatmul.msk.bf16.gmra.mxu2 %vm512_vm3, %v1791_v13 }
  0x4a   : > { %1375 = vmatmul.msk.bf16.gmra.mxu3 %vm512_vm3, %v750_v43 }
  0x4e   : > { %1383 = vmatmul.msk.bf16.gmra.mxu0 %vm512_vm3, %v830_v37 }
  0x4f   : > { %1352 = vmatmul.msk.bf16.gmra.mxu1 %vm512_vm3, %v576_v55 }
  0x53   : > { %1368 = vmatmul.msk.bf16.gmra.mxu2 %vm512_vm3, %v684_v57 }
  0x5a   : > { %1376 = vmatmul.msk.bf16.gmra.mxu3 %vm512_vm3, %v751_v61 }
  0x5e   : > { %1384 = vmatmul.msk.bf16.gmra.mxu0 %vm512_vm3, %v831_v44 }
  0x5f   : > { %1353 = vmatmul.msk.bf16.gmra.mxu1 %vm512_vm3, %v577_v5 }
  0x63   : > { %1369 = vmatmul.msk.bf16.gmra.mxu2 %vm512_vm3, %v685_v63 }
  0x6a   : > { %1377 = vmatmul.msk.bf16.gmra.mxu3 %vm512_vm3, %v752_v7 }
  0x6e   : > { %1385 = vmatmul.msk.bf16.gmra.mxu0 %vm512_vm3, %v832_v56 }
  0x6f   : > { %1391 = vmatmul.msk.bf16.vlgmr.msra.gmra.mxu1 %vm512_vm3, %v900_v30 }
  0x73   : > { %1399 = vmatmul.msk.bf16.vlgmr.msra.gmra.mxu2 %vm512_vm3, %v1770_v11  ;;  %v1030_v11 = vshll.u32 %v348_v16, 16 }
  0x75   : > { %v1032_v3 = vrot.slane %v1030_v11, 5 }
  0x77   : > { %v1033_v12 = vsel %vm1612_vm4, %v1028_v19, %v1032_v3 }
  0x78   : > { %v1034_v24 = vunpack.c.l.b16 %v1033_v12 }
  0x7a   : > { %1407 = vmatmul.msk.bf16.vlgmr.msra.gmra.mxu3 %vm512_vm3, %v1650_v21  ;;  %v1386_v21 = vrot.slane %v1796_v14, 9  ;;  %v1035_v32 = vpack.c.b16 %v1034_v24, %v1824_v34 }
  0x7c   : > { %v898_v29 = vsel %vm1698_vm7, %v1386_v21, %v897_v9 }
  0x7d   : > { %v899_v14 = vunpack.c.l.b16 %v898_v29 }
  0x7e   : > { %1416 = vmatmul.msk.bf16.vlgmr.msra.gmra.mxu0 %vm512_vm3, %v1791_v13  ;;  %v1411_v13 = vrot.slane %v347_v39, 9 }
  0x7f   : > { %1392 = vmatmul.msk.bf16.gmra.mxu1 %vm512_vm3, %v901_v53  ;;  %v903_v28 = vpack.c.b16 %v899_v14, %v681_v51 }
  0x80   : > { %v1092_v31 = vsel %vm1698_vm7, %v1411_v13, %v1091_v22 }
  0x81   : > { %v1093_v33 = vunpack.c.l.b16 %v1092_v31 }
  0x83   : > { %1400 = vmatmul.msk.bf16.gmra.mxu2 %vm512_vm3, %v576_v55  ;;  %v1094_v35 = vpack.c.b16 %v1093_v33, %v899_v14 }
  0x8a   : > { %1408 = vmatmul.msk.bf16.gmra.mxu3 %vm512_vm3, %v1668_v40  ;;  %v967_v40 = vpack.c.b16 %v966_v46, %v748_v62 }
  0x8e   : > { %1417 = vmatmul.msk.bf16.gmra.mxu0 %vm512_vm3, %v684_v57 }
  0x8f   : > { %1393 = vmatmul.msk.bf16.gmra.mxu1 %vm512_vm3, %v902_v10 }
  0x93   : > { %1401 = vmatmul.msk.bf16.gmra.mxu2 %vm512_vm3, %v577_v5 }
  0x9a   : > { %1409 = vmatmul.msk.bf16.gmra.mxu3 %vm512_vm3, %v1713_v20 }
  0x9c   : > { %v543_v36 = vpop.f32.mrf.mxu1 }
  0x9e   : > { %1418 = vmatmul.msk.bf16.gmra.mxu0 %vm512_vm3, %v685_v63 }
  0x9f   : > { %1394 = vmatmul.msk.bf16.gmra.mxu1 %vm512_vm3, %v903_v28 }
  0xa3   : > { %1402 = vmatmul.msk.bf16.gmra.mxu2 %vm512_vm3, %v967_v40 }
  0xa4   : > { %v545_v25 = vpop.f32.mrf.mxu1 }
  0xa6   : > { %v548_v38 = vpop.f32.mrf.mxu2 }
  0xaa   : > { %1410 = vmatmul.msk.bf16.gmra.mxu3 %vm512_vm3, %v1035_v32 }
  0xab   : > { %v538_v41 = vpop.f32.mrf.mxu0 }
  0xac   : > { %v611_v45 = vpop.f32.mrf.mxu1 }
  0xad   : > { %v1887_v43 = vpop.f32.mrf.mxu3  ;;  %v612_v47 = vadd.f32 %v611_v45, %v538_v41 }
  0xae   : > { %1419 = vmatmul.msk.bf16.gmra.mxu0 %vm512_vm3, %v1094_v35  ;;  %v550_v20 = vpop.f32.mrf.mxu2 }
  0xb3   : > { %v540_v48 = vpop.f32.mrf.mxu0 }
  0xb4   : > { %v613_v27 = vpop.f32.mrf.mxu1 }
  0xb5   : > { %v1890_v26 = vpop.f32.mrf.mxu3  ;;  %v614_v37 = vadd.f32 %v613_v27, %v540_v48 }
  0xb6   : > { %v719_v49 = vpop.f32.mrf.mxu2 }
  0xb7   : > { %v739_v50 = vadd.f32 %v719_v49, %v612_v47 }
  0xbb   : > { %v866_v52 = vpop.f32.mrf.mxu0 }
  0xbc   : > { %v616_v34 = vpop.f32.mrf.mxu1 }
  0xbd   : > { %v786_v54 = vpop.f32.mrf.mxu3  ;;  %v617_v57 = vadd.f32 %v616_v34, %v543_v36 }
  0xbe   : > { %v806_v55 = vadd.f32 %v786_v54, %v739_v50  ;;  %v721_v56 = vpop.f32.mrf.mxu2 }
  0xbf   : > { %v740_v58 = vadd.f32 %v721_v56, %v614_v37 }
  0xc0   : > { %v886_v6 = vadd.f32 %v866_v52, %v806_v55 }
  0xc3   : > { %v868_v23 = vpop.f32.mrf.mxu0 }
  0xc4   : > { %v618_v60 = vpop.f32.mrf.mxu1 }
  0xc5   : > { %v788_v59 = vpop.f32.mrf.mxu3  ;;  %v619_v0 = vadd.f32 %v618_v60, %v545_v25 }
  0xc6   : > { %v807_v61 = vadd.f32 %v788_v59, %v740_v58  ;;  %v724_v4 = vpop.f32.mrf.mxu2 }
  0xc7   : > { %v741_v1 = vadd.f32 %v724_v4, %v617_v57 }
  0xc8   : > { %v887_v44 = vadd.f32 %v868_v23, %v807_v61 }
  0xcb   : > { %v871_v2 = vpop.f32.mrf.mxu0 }
  0xcc   : > { %v621_v5 = vpop.f32.mrf.mxu1 }
  0xcd   : > { %v791_v51 = vpop.f32.mrf.mxu3  ;;  %v622_v7 = vadd.f32 %v621_v5, %v548_v38 }
  0xce   : > { %v808_v63 = vadd.f32 %v791_v51, %v741_v1  ;;  %v726_v62 = vpop.f32.mrf.mxu2 }
  0xcf   : > { %v742_v30 = vadd.f32 %v726_v62, %v619_v0 }
  0xd0   : > { %v888_v53 = vadd.f32 %v871_v2, %v808_v63 }
  0xd3   : > { %v873_v39 = vpop.f32.mrf.mxu0 }
  0xd4   : > { %v623_v18 = vpop.f32.mrf.mxu1 }
  0xd5   : > { %v793_v8 = vpop.f32.mrf.mxu3  ;;  %v624_v16 = vadd.f32 %v623_v18, %v550_v20 }
  0xd6   : > { %v809_v42 = vadd.f32 %v793_v8, %v742_v30  ;;  %v729_v15 = vpop.f32.mrf.mxu2 }
  0xd7   : > { %v743_v17 = vadd.f32 %v729_v15, %v622_v7 }
  0xd8   : > { %v889_v11 = vadd.f32 %v873_v39, %v809_v42 }
  0xdb   : > { %v876_v21 = vpop.f32.mrf.mxu0 }
  0xdc   : > { %v1892_v19 = vpop.f32.mrf.mxu1 }
  0xdd   : > { %v796_v9 = vpop.f32.mrf.mxu3 }
  0xde   : > { %v810_v3 = vadd.f32 %v796_v9, %v743_v17  ;;  %v731_v29 = vpop.f32.mrf.mxu2 }
  0xdf   : > { %v744_v12 = vadd.f32 %v731_v29, %v624_v16 }
  0xe0   : > { %v890_v13 = vadd.f32 %v876_v21, %v810_v3 }
  0xe3   : > { %v878_v22 = vpop.f32.mrf.mxu0 }
  0xe4   : > { %v1894_v31 = vpop.f32.mrf.mxu1 }
  0xe5   : > { %v798_v24 = vpop.f32.mrf.mxu3 }
  0xe6   : > { %v811_v14 = vadd.f32 %v798_v24, %v744_v12  ;;  %v1896_v32 = vpop.f32.mrf.mxu2 }
  0xe8   : > { %v1898_v33 = vadd.f32 %v878_v22, %v811_v14 }
  0xeb   : > { %v1900_v10 = vpop.f32.mrf.mxu0 }
  0xec   : > { %v937_v46 = vpop.f32.mrf.mxu1 }
  0xed   : > { %v1902_v35 = vpop.f32.mrf.mxu3  ;;  %v957_v41 = vadd.f32 %v937_v46, %v886_v6 }
  0xee   : > { %v1904_v28 = vpop.f32.mrf.mxu2 }
  0xf3   : > { %v1906_v36 = vpop.f32.mrf.mxu0 }
  0xf4   : > { %v939_v25 = vpop.f32.mrf.mxu1 }
  0xf5   : > { %v1908_v40 = vpop.f32.mrf.mxu3  ;;  %v958_v37 = vadd.f32 %v939_v25, %v887_v44 }
  0xf6   : > { %v992_v38 = vpop.f32.mrf.mxu2 }
  0xf7   : > { %v1012_v20 = vadd.f32 %v992_v38, %v957_v41  ;;  %v627_v38 = vadd.f32 %v1892_v19, %v1887_v43  ;;  %v629_v19 = vadd.f32 %v1894_v31, %v1890_v26 }
  0xfb   : > { %v1119_v45 = vpop.f32.mrf.mxu0 }
  0xfc   : > { %v942_v48 = vpop.f32.mrf.mxu1 }
  0xfd   : > { %v1060_v47 = vpop.f32.mrf.mxu3  ;;  %v959_v59 = vadd.f32 %v942_v48, %v888_v53 }
  0xfe   : > { %v994_v27 = vpop.f32.mrf.mxu2  ;;  %v1080_v49 = vadd.f32 %v1060_v47, %v1012_v20  ;;  %v745_v47 = vadd.f32 %v1896_v32, %v627_v38 }
  0xff   : > { %v1013_v50 = vadd.f32 %v994_v27, %v958_v37 }
 0x100   : > { %v1139_v54 = vadd.f32 %v1119_v45, %v1080_v49  ;;  %v812_v37 = vadd.f32 %v1902_v35, %v745_v47 }
 0x102   : > { %v1171_v58 = vmul.f32 %v1139_v54, %v1139_v54  ;;  %v1148_v6 = vsel %vm1147_vm8, %v1139_v54, 0.0 }
 0x103   : > { %v1121_v52 = vpop.f32.mrf.mxu0 }
 0x104   : > { %v944_v55 = vpop.f32.mrf.mxu1  ;;  %v1179_v44 = vsel %vm1147_vm8, %v1171_v58, 0.0  ;;  %v746_v58 = vadd.f32 %v1904_v28, %v629_v19 }
 0x105   : > { %v1062_v34 = vpop.f32.mrf.mxu3  ;;  %v960_v39 = vadd.f32 %v944_v55, %v889_v11 }
 0x106   : > { %v1081_v56 = vadd.f32 %v1062_v34, %v1013_v50  ;;  %v997_v57 = vpop.f32.mrf.mxu2 }
 0x107   : > { %v1014_v4 = vadd.f32 %v997_v57, %v959_v59 }
 0x108   : > { %v1140_v23 = vadd.f32 %v1121_v52, %v1081_v56 }
 0x10a   : > { %v1149_v60 = vsel %vm1147_vm8, %v1140_v23, 0.0  ;;  %v1172_v61 = vmul.f32 %v1140_v23, %v1140_v23 }
 0x10b   : > { %v1150_v0 = vadd.f32 %v1149_v60, %v1148_v6  ;;  %v1124_v1 = vpop.f32.mrf.mxu0  ;;  %v813_v60 = vadd.f32 %v1908_v40, %v746_v58 }
 0x10c   : > { %v1180_v2 = vsel %vm1147_vm8, %v1172_v61, 0.0  ;;  %v947_v7 = vpop.f32.mrf.mxu1 }
 0x10d   : > { %v1181_v51 = vadd.f32 %v1180_v2, %v1179_v44  ;;  %v1065_v5 = vpop.f32.mrf.mxu3  ;;  %v961_v12 = vadd.f32 %v947_v7, %v890_v13 }
 0x10e   : > { %v1082_v63 = vadd.f32 %v1065_v5, %v1014_v4  ;;  %v999_v62 = vpop.f32.mrf.mxu2  ;;  %v893_v5 = vadd.f32 %v1906_v36, %v813_v60 }
 0x10f   : > { %v1015_v18 = vadd.f32 %v999_v62, %v960_v39 }
 0x110   : > { %v1141_v30 = vadd.f32 %v1124_v1, %v1082_v63 }
 0x112   : > { %v1151_v53 = vsel %vm1147_vm8, %v1141_v30, 0.0  ;;  %v1173_v8 = vmul.f32 %v1141_v30, %v1141_v30 }
 0x113   : > { %v1152_v42 = vadd.f32 %v1151_v53, %v1150_v0  ;;  %v1126_v15 = vpop.f32.mrf.mxu0 }
 0x114   : > { %v1182_v16 = vsel %vm1147_vm8, %v1173_v8, 0.0  ;;  %v949_v22 = vpop.f32.mrf.mxu1 }
 0x115   : > { %v1183_v17 = vadd.f32 %v1182_v16, %v1181_v51  ;;  %v1067_v21 = vpop.f32.mrf.mxu3  ;;  %v962_v13 = vadd.f32 %v949_v22, %v1898_v33  ;;  %v892_v33 = vadd.f32 %v1900_v10, %v812_v37 }
 0x116   : > { %v1083_v9 = vadd.f32 %v1067_v21, %v1015_v18  ;;  %v1002_v3 = vpop.f32.mrf.mxu2 }
 0x117   : > { %v1016_v46 = vadd.f32 %v1002_v3, %v961_v12 }
 0x118   : > { %v1142_v29 = vadd.f32 %v1126_v15, %v1083_v9 }
 0x11a   : > { %v1153_v24 = vsel %vm1147_vm8, %v1142_v29, 0.0  ;;  %v1174_v14 = vmul.f32 %v1142_v29, %v1142_v29 }
 0x11b   : > { %v1154_v11 = vadd.f32 %v1153_v24, %v1152_v42  ;;  %v1129_v25 = vpop.f32.mrf.mxu0 }
 0x11c   : > { %v1184_v41 = vsel %vm1147_vm8, %v1174_v14, 0.0  ;;  %v952_v34 = vpop.f32.mrf.mxu1 }
 0x11d   : > { %v1185_v45 = vadd.f32 %v1184_v41, %v1183_v17  ;;  %v1070_v20 = vpop.f32.mrf.mxu3  ;;  %v963_v6 = vadd.f32 %v952_v34, %v892_v33 }
 0x11e   : > { %v1084_v48 = vadd.f32 %v1070_v20, %v1016_v46  ;;  %v1004_v27 = vpop.f32.mrf.mxu2 }
 0x11f   : > { %v1017_v54 = vadd.f32 %v1004_v27, %v962_v13 }
 0x120   : > { %v1143_v49 = vadd.f32 %v1129_v25, %v1084_v48 }
 0x122   : > { %v1155_v50 = vsel %vm1147_vm8, %v1143_v49, 0.0  ;;  %v1175_v52 = vmul.f32 %v1143_v49, %v1143_v49 }
 0x123   : > { %v1156_v55 = vadd.f32 %v1155_v50, %v1154_v11  ;;  %v1131_v43 = vpop.f32.mrf.mxu0 }
 0x124   : > { %v1186_v56 = vsel %vm1147_vm8, %v1175_v52, 0.0  ;;  %v954_v31 = vpop.f32.mrf.mxu1 }
 0x125   : > { %v1187_v32 = vadd.f32 %v1186_v56, %v1185_v45  ;;  %v1072_v57 = vpop.f32.mrf.mxu3  ;;  %v964_v62 = vadd.f32 %v954_v31, %v893_v5 }
 0x126   : > { %v1085_v23 = vadd.f32 %v1072_v57, %v1017_v54  ;;  %v1007_v35 = vpop.f32.mrf.mxu2 }
 0x127   : > { %v1018_v0 = vadd.f32 %v1007_v35, %v963_v6 }
 0x128   : > { %v1144_v59 = vadd.f32 %v1131_v43, %v1085_v23 }
 0x12a   : > { %v1157_v61 = vsel %vm1147_vm8, %v1144_v59, 0.0  ;;  %v1176_v4 = vmul.f32 %v1144_v59, %v1144_v59 }
 0x12b   : > { %v1158_v1 = vadd.f32 %v1157_v61, %v1156_v55  ;;  %v1134_v2 = vpop.f32.mrf.mxu0 }
 0x12c   : > { %v1188_v26 = vsel %vm1147_vm8, %v1176_v4, 0.0 }
 0x12d   : > { %v1189_v44 = vadd.f32 %v1188_v26, %v1187_v32  ;;  %v1075_v51 = vpop.f32.mrf.mxu3 }
 0x12e   : > { %v1086_v28 = vadd.f32 %v1075_v51, %v1018_v0  ;;  %v1009_v10 = vpop.f32.mrf.mxu2 }
 0x12f   : > { %v1019_v30 = vadd.f32 %v1009_v10, %v964_v62 }
 0x130   : > { %v1145_v63 = vadd.f32 %v1134_v2, %v1086_v28 }
 0x132   : > { %v1159_v7 = vsel %vm1147_vm8, %v1145_v63, 0.0  ;;  %v1177_v40 = vmul.f32 %v1145_v63, %v1145_v63 }
 0x133   : > { %v1160_v39 = vadd.f32 %v1159_v7, %v1158_v1  ;;  %v1136_v15 = vpop.f32.mrf.mxu0 }
 0x134   : > { %v1190_v53 = vsel %vm1147_vm8, %v1177_v40, 0.0 }
 0x135   : > { %v1191_v8 = vadd.f32 %v1190_v53, %v1189_v44  ;;  %v1077_v18 = vpop.f32.mrf.mxu3 }
 0x136   : > { %v1087_v42 = vadd.f32 %v1077_v18, %v1019_v30 }
 0x138   : > { %v1146_v16 = vadd.f32 %v1136_v15, %v1087_v42 }
 0x13a   : > { %v1161_v17 = vsel %vm1147_vm8, %v1146_v16, 0.0  ;;  %v1178_v21 = vmul.f32 %v1146_v16, %v1146_v16 }
 0x13b   : > { %v1162_v36 = vadd.f32 %v1161_v17, %v1160_v39 }
 0x13c   : > { %v1192_v9 = vsel %vm1147_vm8, %v1178_v21, 0.0 }
 0x13d   : > { %v1163_v3 = vrot.slane %v1162_v36, 4  ;;  %v1193_v29 = vadd.f32 %v1192_v9, %v1191_v8 }
 0x13f   : > { %v1164_v12 = vadd.f32 %v1163_v3, %v1162_v36  ;;  %v1194_v22 = vrot.slane %v1193_v29, 4 }
 0x141   : > { %v1165_v24 = vrot.slane %v1164_v12, 2  ;;  %v1195_v14 = vadd.f32 %v1194_v22, %v1193_v29 }
 0x143   : > { %v1166_v46 = vadd.f32 %v1165_v24, %v1164_v12  ;;  %v1196_v11 = vrot.slane %v1195_v14, 2 }
 0x145   : > { %v1167_v25 = vrot.slane %v1166_v46, 1  ;;  %v1197_v38 = vadd.f32 %v1196_v11, %v1195_v14 }
 0x147   : > { %v1168_v41 = vadd.f32 %v1167_v25, %v1166_v46  ;;  %v1198_v45 = vrot.slane %v1197_v38, 1 }
 0x149   : > { %1170 = vst.msk [vmem:[%s321_s21] sm:$0x1] %vm1169_vm9, %v1168_v41  ;;  %v1199_v20 = vadd.f32 %v1198_v45, %v1197_v38 }
 0x14b   : > { %1200 = vst.msk [vmem:[%s327_s25] sm:$0x1] %vm1169_vm9, %v1199_v20 }
 0x14c PF: > { %s15_s17 = sadd.s32 1, %s1488_s17   ;;  %s1963_s15 = smov %s1484_s16 }
 0x14d   : > { %p12_p5 = scmp.ge.s32.totalorder %s15_s17, 4   ;;  %s1964_s16 = smov %s1966_s18 }
 0x14f   :  { %14 = sbr.rel (!%p12_p5) target bundleno = 2 (0x2), region = 77 }

// kernel: _lambda_.13
= control target key start
LH: loop header
LB: loop body
LE: loop exit
PB: predicated region body
PF: predicated region fallthrough
CT: control target
= control target key end

     0   :  { %s1510_s18 = smov 0   ;;  %s1512_s19 = smov 0   ;;  %s2006_s0 = inlined_call_operand.vmem [shape: bf16[2,10,10,24], index: 0, kind: input, shape index: {}, may-alias: {0,1}]   ;;  %s2007_s1 = inlined_call_operand.vmem [shape: bf16[2,10,10,24], index: 1, kind: input, shape index: {}, may-alias: {0,1}]   ;;  %s2008_s2 = inlined_call_operand.vmem [shape: bf16[3,3,24,8], index: 2, kind: input, shape index: {}]   ;;  %s2009_s3 = inlined_call_operand.vmem [shape: f32[1,8], index: 3, kind: input, shape index: {}]   ;;  %s2010_s4 = inlined_call_operand.vmem [shape: f32[1,8], index: 4, kind: input, shape index: {}]   ;;  %s2011_s5 = inlined_call_operand.vmem [shape: f32[2,8,8,8], index: 5, kind: output, shape index: {}]  }
   0x1   :  { %s1514_s20 = smov 0  }
   0x2 LB: > { %s27_s21 = sadd.s32 1, %s1474_s19  ;;  %p1320_p0 = scmp.ge.s32.totalorder %s1478_s20, 1  ;;  %s1478_s20 = sphi %s1514_s20, %s15_s20   ;;  %s1474_s19 = sphi %s1512_s19, %s2017_s19   ;;  %s1470_s18 = sphi %s1510_s18, %s2016_s18  }
   0x3   : > { %p29_p1 = scmp.ge.s32.totalorder %s27_s21, 2  ;;  %p245_p2 = scmp.lt.s32.totalorder %s1478_s20, 3 }
   0x5   : > { %s2019_s21 = smov (%p29_p1, %s27_s21), 0  ;;  %p246_p3 = pnand %p1320_p0, %p245_p2 }
   0x6   : > { %p305_p4 = scmp.lt.s32.totalorder (!%p246_p3), %s1470_s18, 1 }
   0x7   : > { %249 = sbr.rel (%p246_p3) target bundleno = 321 (0x141), region = 40 }
   0xc   : > { %v371_v0 = vld [vmem:[%s2008_s2 + $0x14] sm:$0xf]  ;;  %v374_v2 = vld [vmem:[%s2008_s2 + $0x20] sm:$0xf]  ;;  %vm542_vm0 = vcmask 1043456   ;;  %s2021_s18 = smov (!%p305_p4, %s1470_s18), 1 }
   0xd   : > { %v525_v1 = vunpack.c.l.b16 %v371_v0  ;;  %v708_v3 = vunpack.c.l.b16 %v374_v2  ;;  %s1427_s26 = smul.u32 80, %s2021_s18  ;;  %v377_v6 = vld [vmem:[%s2008_s2 + $0x2c] sm:$0xf]  ;;  %v368_v7 = vld [vmem:[%s2008_s2 + $0x8] sm:$0xf]  ;;  %vm529_vm3 = vcmask 195584  }
   0xe   : > { %v775_v9 = vunpack.c.l.b16 %v377_v6  ;;  %v600_v10 = vunpack.c.l.b16 %v368_v7  ;;  %v380_v11 = vld [vmem:[%s2008_s2 + $0x38] sm:$0xf]  ;;  %v1413_v12 = vld [vmem:[%s2008_s2 + $0xc] sm:$0xff]  ;;  %vm393_vm1 = vsmask.f32 3328  ;;  %vm656_vm5 = vcmask 1042432  }
   0xf   : > { %v527_v4 = vpack.c.b16 %v525_v1, %v525_v1  ;;  %v710_v5 = vpack.c.b16 %v708_v3, %v708_v3  ;;  %s1555_s12 = scalar_lea.vmem %s2006_s0, %s1427_s26  ;;  %vm394_vm2 = vsmask.f32 7440  ;;  %v855_v14 = vunpack.c.l.b16 %v380_v11  ;;  %v1414_v45 = vld [vmem:[%s2008_s2 + $0x18] sm:$0xff]  ;;  %s1410_s11 = sadd.s32 64, %s1427_s26 }
  0x10   : > { %v1559_v15 = vld [vmem:[%s1555_s12 + $0x10] sm:$0xf]  ;;  %v1562_v16 = vld [vmem:[%s1555_s12 + $0x14] sm:$0x1]  ;;  %v1565_v17 = vld [vmem:[%s1555_s12 + $0x18] sm:$0xf]  ;;  %v1567_v18 = vpack.c.b16 %v775_v9, %v775_v9  ;;  %v1584_v28 = vpack.c.b16 %v600_v10, %v600_v10  ;;  %s1770_s14 = scalar_lea.vmem %s2007_s1, %s1410_s11 }
  0x11   : > { %v544_v8 = vsel %vm542_vm0, %v527_v4, 0  ;;  %v725_v13 = vsel %vm542_vm0, %v710_v5, 0  ;;  %v1570_v19 = vld [vmem:[%s1555_s12 + $0x1c] sm:$0x1]  ;;  %v425_v20 = vshrl.u32 %v1559_v15, 16  ;;  %v428_v21 = vshll.u32 %v1559_v15, 16  ;;  %vm1607_vm4 = vmor %vm393_vm1, %vm394_vm2 }
  0x12   : > { %1421 = vmatpush.bf16.msra.mxu1 %v544_v8  ;;  %1422 = vmatpush.bf16.msra.mxu2 %v544_v8  ;;  %v434_v22 = vshll.u32 %v1562_v16, 16  ;;  %v439_v23 = vshrl.u32 %v1565_v17, 16  ;;  %v442_v24 = vshll.u32 %v1565_v17, 16  ;;  %v448_v25 = vshll.u32 %v1570_v19, 16  ;;  %v1579_v26 = vld [vmem:[%s1555_s12 + $0x20] sm:$0xf] }
  0x13   : > { %1423 = vmatpush.bf16.msra.mxu3 %v544_v8  ;;  %552 = vmatpush.bf16.msra.mxu0 %v544_v8  ;;  %v1582_v27 = vld [vmem:[%s1555_s12 + $0x24] sm:$0x1]  ;;  %v1586_v29 = vpack.c.b16 %v855_v14, %v855_v14  ;;  %v427_v30 = vrot.slane %v425_v20, 4  ;;  %v430_v31 = vrot.slane %v428_v21, 5  ;;  %v1589_v34 = vld [vmem:[%s1555_s12 + $0x28] sm:$0xf] }
  0x14   : > { %v436_v32 = vrot.slane %v434_v22, 5  ;;  %v441_v33 = vrot.slane %v439_v23, 4  ;;  %v444_v35 = vrot.slane %v442_v24, 5  ;;  %v450_v36 = vrot.slane %v448_v25, 5  ;;  %v1592_v37 = vld [vmem:[%s1555_s12 + $0x2c] sm:$0x1] }
  0x15   : > { %v453_v38 = vshrl.u32 %v1579_v26, 16  ;;  %v456_v39 = vshll.u32 %v1579_v26, 16  ;;  %v431_v40 = vor.u32 %v430_v31, %v427_v30  ;;  %v462_v41 = vshll.u32 %v1582_v27, 16  ;;  %v1600_v44 = vld [vmem:[%s1555_s12 + $0x30] sm:$0xf]  ;;  %s1411_s29 = sshll.u32 %s2021_s18, 6 }
  0x16   : > { %1424 = vmatpush.bf16.msra.mxu1 %v1413_v12  ;;  %1425 = vmatpush.bf16.msra.mxu2 %v1413_v12  ;;  %v467_v42 = vshrl.u32 %v1589_v34, 16  ;;  %v470_v43 = vshll.u32 %v1589_v34, 16  ;;  %v445_v47 = vor.u32 %v444_v35, %v441_v33  ;;  %v476_v50 = vshll.u32 %v1592_v37, 16  ;;  %v1613_v51 = vld [vmem:[%s1555_s12 + $0x34] sm:$0x1]  ;;  %s1944_s7 = scalar_lea.vmem %s2011_s5, %s1411_s29 }
  0x17   : > { %1426 = vmatpush.bf16.msra.mxu3 %v1413_v12  ;;  %553 = vmatpush.bf16.msra.mxu0 %v1413_v12  ;;  %v455_v48 = vrot.slane %v453_v38, 4  ;;  %v458_v49 = vrot.slane %v456_v39, 5  ;;  %v432_v52 = vrot.slane %v431_v40, 4  ;;  %v464_v53 = vrot.slane %v462_v41, 5  ;;  %v1619_v62 = vld [vmem:[%s1555_s12 + $0x38] sm:$0xf] }
  0x18   : > { %v469_v54 = vrot.slane %v467_v42, 4  ;;  %v472_v55 = vrot.slane %v470_v43, 5  ;;  %v446_v56 = vrot.slane %v445_v47, 4  ;;  %v478_v58 = vrot.slane %v476_v50, 5  ;;  %v1622_v63 = vld [vmem:[%s1555_s12 + $0x3c] sm:$0x1] }
  0x19   : > { %v459_v57 = vor.u32 %v458_v49, %v455_v48  ;;  %v481_v59 = vshrl.u32 %v1600_v44, 16  ;;  %v437_v60 = vsel %vm1607_vm4, %v432_v52, %v436_v32  ;;  %v484_v0 = vshll.u32 %v1600_v44, 16  ;;  %v1633_v10 = vld [vmem:[%s1555_s12] sm:$0xf]  ;;  %v1641_v20 = vld [vmem:[%s1555_s12 + $0x4] sm:$0x1] }
  0x1a   : > { %733 = vmatpush.bf16.msrb.mxu2 %v725_v13  ;;  %v473_v61 = vor.u32 %v472_v55, %v469_v54  ;;  %v490_v1 = vshll.u32 %v1613_v51, 16  ;;  %v451_v2 = vsel %vm1607_vm4, %v446_v56, %v450_v36  ;;  %v1628_v3 = vunpack.c.l.b16 %v437_v60  ;;  %v1652_v25 = vld [vmem:[%s1555_s12 + $0x8] sm:$0xf]  ;;  %v349_v42 = vld [vmem:[%s1555_s12 + $0xc] sm:$0x1] }
  0x1b   : > { %v460_v4 = vrot.slane %v459_v57, 4  ;;  %v483_v5 = vrot.slane %v481_v59, 4  ;;  %vm657_vm6 = vcmask 1046532   ;;  %v1630_v6 = vunpack.c.l.b16 %v451_v2  ;;  %v386_v2 = vld [vmem:[%s2008_s2 + $0x50] sm:$0xf] }
  0x1c   : > { %v474_v7 = vrot.slane %v473_v61, 4  ;;  %v486_v8 = vrot.slane %v484_v0, 5  ;;  %v492_v9 = vrot.slane %v490_v1, 5  ;;  %v495_v12 = vshrl.u32 %v1619_v62, 16  ;;  %vm1693_vm7 = vmor %vm656_vm5, %vm657_vm6 }
  0x1d   : > { %v465_v11 = vsel %vm1607_vm4, %v460_v4, %v464_v53  ;;  %v498_v13 = vshll.u32 %v1619_v62, 16  ;;  %v504_v14 = vshll.u32 %v1622_v63, 16  ;;  %v1645_v21 = vpack.c.b16 %v1630_v6, %v1628_v3 }
  0x1e   : > { %734 = vmatpush.bf16.msrb.mxu2 %v1414_v45  ;;  %v479_v22 = vsel %vm1607_vm4, %v474_v7, %v478_v58  ;;  %v1649_v23 = vunpack.c.l.b16 %v465_v11  ;;  %v487_v24 = vor.u32 %v486_v8, %v483_v5  ;;  %v497_v31 = vrot.slane %v495_v12, 4  ;;  %v1415_v11 = vld [vmem:[%s2008_s2 + $0x24] sm:$0xff] }
  0x1f   : > { %v1654_v30 = vunpack.c.l.b16 %v479_v22  ;;  %v500_v32 = vrot.slane %v498_v13, 5  ;;  %v506_v33 = vrot.slane %v504_v14, 5  ;;  %1330 = vmatmul.msk.bf16.vlgmr.msra.gmra.mxu1 %vm529_vm3, %v1645_v21  ;;  %v397_v36 = vshrl.u32 %v1633_v10, 16 }
  0x20   : > { %v488_v35 = vrot.slane %v487_v24, 4  ;;  %v400_v38 = vshll.u32 %v1633_v10, 16  ;;  %v406_v39 = vshll.u32 %v1641_v20, 16  ;;  %v411_v43 = vshrl.u32 %v1652_v25, 16 }
  0x21   : > { %v1663_v40 = vpack.c.b16 %v1654_v30, %v1649_v23  ;;  %v501_v41 = vor.u32 %v500_v32, %v497_v31  ;;  %v414_v45 = vshll.u32 %v1652_v25, 16  ;;  %v399_v48 = vrot.slane %v397_v36, 4  ;;  %v389_v32 = vld [vmem:[%s2008_s2 + $0x5c] sm:$0xf] }
  0x22   : > { %v493_v47 = vsel %vm1607_vm4, %v488_v35, %v492_v9  ;;  %v402_v49 = vrot.slane %v400_v38, 5  ;;  %v408_v50 = vrot.slane %v406_v39, 5  ;;  %v413_v54 = vrot.slane %v411_v43, 4 }
  0x23   : > { %1331 = vmatmul.msk.bf16.vlgmr.msra.gmra.mxu2 %vm529_vm3, %v1663_v40  ;;  %v502_v52 = vrot.slane %v501_v41, 4  ;;  %v1672_v53 = vunpack.c.l.b16 %v493_v47  ;;  %v416_v55 = vrot.slane %v414_v45, 5  ;;  %v420_v57 = vshll.u32 %v349_v42, 16 }
  0x24   : > { %v403_v56 = vor.u32 %v402_v49, %v399_v48  ;;  %v661_v58 = vrot.slane %v1641_v20, 5  ;;  %v665_v59 = vrot.slane %v349_v42, 5  ;;  %v792_v0 = vsel %vm542_vm0, %v1567_v18, 0  ;;  %v1412_v18 = vld [vmem:[%s2008_s2] sm:$0xff] }
  0x25   : > { %v507_v60 = vsel %vm1607_vm4, %v502_v52, %v506_v33  ;;  %v417_v61 = vor.u32 %v416_v55, %v413_v54  ;;  %v617_v1 = vsel %vm542_vm0, %v1584_v28, 0  ;;  %v422_v7 = vrot.slane %v420_v57, 5  ;;  %800 = vmatpush.bf16.msrb.mxu3 %v792_v0  ;;  %v383_v33 = vld [vmem:[%s2008_s2 + $0x44] sm:$0xf] }
  0x26   : > { %v1684_v4 = vunpack.c.l.b16 %v507_v60  ;;  %v404_v5 = vrot.slane %v403_v56, 4  ;;  %625 = vmatpush.bf16.msrb.mxu1 %v617_v1  ;;  %v872_v8 = vsel %vm542_vm0, %v1586_v29, 0  ;;  %v1416_v29 = vld [vmem:[%s2008_s2 + $0x30] sm:$0xff]  ;;  %v583_v12 = vunpack.c.l.b16 %v1633_v10 }
  0x27   : > { %v418_v9 = vrot.slane %v417_v61, 4  ;;  %880 = vmatpush.bf16.msrb.mxu0 %v872_v8  ;;  %v584_v13 = vunpack.c.l.b16 %v1652_v25  ;;  %v1341_v14 = vrot.slane %v1633_v10, 9  ;;  %v1342_v24 = vrot.slane %v1652_v25, 9  ;;  %v392_v25 = vld [vmem:[%s2008_s2 + $0x68] sm:$0xf] }
  0x28   : > { %v1708_v20 = vpack.c.b16 %v1684_v4, %v1672_v53  ;;  %v409_v22 = vsel %vm1607_vm4, %v404_v5, %v408_v50  ;;  %v990_v31 = vunpack.c.l.b16 %v386_v2  ;;  %v1058_v45 = vunpack.c.l.b16 %v389_v32 }
  0x29   : > { %v423_v10 = vsel %vm1607_vm4, %v418_v9, %v422_v7  ;;  %v508_v35 = vunpack.c.l.b16 %v409_v22  ;;  %v662_v36 = vsel %vm1693_vm7, %v1341_v14, %v661_v58  ;;  %v1730_v39 = vsel %vm1693_vm7, %v1342_v24, %v665_v59  ;;  %801 = vmatpush.bf16.msrb.mxu3 %v1415_v11  ;;  %v1791_v14 = vld [vmem:[%s1770_s14] sm:$0xf] }
  0x2a   : > { %1332 = vmatmul.msk.bf16.vlgmr.msra.gmra.mxu3 %vm529_vm3, %v1708_v20  ;;  %v509_v38 = vunpack.c.l.b16 %v423_v10  ;;  %626 = vmatpush.bf16.msrb.mxu1 %v1412_v18  ;;  %v691_v41 = vunpack.c.l.b16 %v662_v36  ;;  %v692_v42 = vunpack.c.l.b16 %v1730_v39  ;;  %v992_v43 = vpack.c.b16 %v990_v31, %v990_v31  ;;  %v364_v39 = vld [vmem:[%s1770_s14 + $0x8] sm:$0xf] }
  0x2b   : > { %881 = vmatpush.bf16.msrb.mxu0 %v1416_v29  ;;  %v926_v47 = vunpack.c.l.b16 %v383_v33  ;;  %v591_v49 = vpack.c.b16 %v584_v13, %v583_v12  ;;  %v1117_v50 = vunpack.c.l.b16 %v392_v25  ;;  %v1060_v54 = vpack.c.b16 %v1058_v45, %v1058_v45  ;;  %v1417_v29 = vld [vmem:[%s2008_s2 + $0x3c] sm:$0xff]  ;;  %v1803_v25 = vld [vmem:[%s1770_s14 + $0x4] sm:$0x1] }
  0x2c   : > { %v516_v48 = vpack.c.b16 %v509_v38, %v508_v35  ;;  %v998_v52 = vsel %vm542_vm0, %v992_v43, 0  ;;  %v699_v57 = vpack.c.b16 %v692_v42, %v691_v41  ;;  %v585_v61 = vunpack.c.l.b16 %v1559_v15  ;;  %v1420_v12 = vld [vmem:[%s2008_s2 + $0x60] sm:$0xff] }
  0x2d   : > { %v928_v55 = vpack.c.b16 %v926_v47, %v926_v47  ;;  %1006 = vmatpush.bf16.msra.mxu2 %v998_v52  ;;  %v1119_v56 = vpack.c.b16 %v1117_v50, %v1117_v50  ;;  %v1066_v58 = vsel %vm542_vm0, %v1060_v54, 0  ;;  %v1343_v0 = vrot.slane %v1559_v15, 9 }
  0x2e   : > { %1329 = vmatmul.msk.bf16.vlgmr.msra.gmra.mxu0 %vm529_vm3, %v516_v48  ;;  %1074 = vmatpush.bf16.msra.mxu3 %v1066_v58  ;;  %v669_v1 = vrot.slane %v1562_v16, 5  ;;  %v1344_v2 = vrot.slane %v1565_v17, 9  ;;  %v673_v5 = vrot.slane %v1570_v19, 5  ;;  %v766_v7 = vpack.c.b16 %v585_v61, %v584_v13  ;;  %v1418_v16 = vld [vmem:[%s2008_s2 + $0x48] sm:$0xff] }
  0x2f   : > { %v943_v59 = vsel %vm542_vm0, %v928_v55, 0  ;;  %1337 = vmatmul.msk.bf16.vlgmr.msrb.gmra.mxu1 %vm529_vm3, %v591_v49  ;;  %v1125_v60 = vsel %vm542_vm0, %v1119_v56, 0  ;;  %v586_v8 = vunpack.c.l.b16 %v1565_v17  ;;  %v846_v15 = vpack.c.b16 %v1628_v3, %v509_v38  ;;  %v1419_v3 = vld [vmem:[%s2008_s2 + $0x54] sm:$0xff] }
  0x30   : > { %951 = vmatpush.bf16.msra.mxu1 %v943_v59  ;;  %1133 = vmatpush.bf16.msra.mxu0 %v1125_v60  ;;  %v1750_v18 = vsel %vm1693_vm7, %v1343_v0, %v669_v1  ;;  %v1754_v9 = vsel %vm1693_vm7, %v1344_v2, %v673_v5  ;;  %v832_v22 = vshrl.u32 %v1791_v14, 16  ;;  %v835_v24 = vshll.u32 %v1791_v14, 16 }
  0x31   : > { %v693_v17 = vunpack.c.l.b16 %v1750_v18  ;;  %v694_v19 = vunpack.c.l.b16 %v1754_v9  ;;  %v1765_v11 = vpack.c.b16 %v586_v8, %v585_v61  ;;  %1007 = vmatpush.bf16.msra.mxu2 %v1418_v16  ;;  %v587_v31 = vunpack.c.l.b16 %v1579_v26  ;;  %v365_v16 = vld [vmem:[%s1770_s14 + $0xc] sm:$0x1] }
  0x32   : > { %1075 = vmatpush.bf16.msra.mxu3 %v1419_v3  ;;  %v1345_v32 = vrot.slane %v1579_v26, 9  ;;  %v834_v33 = vrot.slane %v832_v22, 4  ;;  %v677_v10 = vrot.slane %v1582_v27, 5  ;;  %v1346_v35 = vrot.slane %v1589_v34, 9 }
  0x33   : > { %1353 = vmatmul.msk.bf16.vlgmr.msrb.gmra.mxu2 %vm529_vm3, %v699_v57  ;;  %v1786_v13 = vpack.c.b16 %v694_v19, %v693_v17  ;;  %v681_v36 = vrot.slane %v1592_v37, 5  ;;  %v837_v38 = vrot.slane %v835_v24, 5  ;;  %v841_v41 = vshll.u32 %v1803_v25, 16 }
  0x34   : > { %952 = vmatpush.bf16.msra.mxu1 %v1417_v29  ;;  %1134 = vmatpush.bf16.msra.mxu0 %v1420_v12  ;;  %v767_v43 = vpack.c.b16 %v587_v31, %v586_v8  ;;  %v588_v48 = vunpack.c.l.b16 %v1589_v34  ;;  %v678_v26 = vsel %vm1693_vm7, %v1345_v32, %v677_v10  ;;  %v847_v37 = vpack.c.b16 %v1649_v23, %v1630_v6 }
  0x35   : > { %v838_v45 = vor.u32 %v837_v38, %v834_v33  ;;  %v843_v47 = vrot.slane %v841_v41, 5  ;;  %v1811_v27 = vsel %vm1693_vm7, %v1346_v35, %v681_v36  ;;  %v695_v52 = vunpack.c.l.b16 %v678_v26 }
  0x36   : > { %v696_v54 = vunpack.c.l.b16 %v1811_v27  ;;  %v593_v55 = vpack.c.b16 %v588_v48, %v587_v31  ;;  %v589_v58 = vunpack.c.l.b16 %v1600_v44  ;;  %v1347_v6 = vrot.slane %v1600_v44, 9 }
  0x37   : > { %v839_v49 = vrot.slane %v838_v45, 4  ;;  %v685_v23 = vrot.slane %v1613_v51, 5  ;;  %v1348_v59 = vrot.slane %v1619_v62, 9  ;;  %v689_v60 = vrot.slane %v1622_v63, 5 }
  0x38   : > { %v701_v57 = vpack.c.b16 %v696_v54, %v695_v52  ;;  %v768_v61 = vpack.c.b16 %v589_v58, %v588_v48  ;;  %v848_v44 = vpack.c.b16 %v1672_v53, %v1654_v30  ;;  %v917_v30 = vpack.c.b16 %v693_v17, %v692_v42 }
  0x39   : > { %v844_v50 = vsel %vm1607_vm4, %v839_v49, %v843_v47  ;;  %v686_v0 = vsel %vm1693_vm7, %v1347_v6, %v685_v23  ;;  %v690_v1 = vsel %vm1693_vm7, %v1348_v59, %v689_v60  ;;  %v918_v53 = vpack.c.b16 %v695_v52, %v694_v19 }
  0x3a   : > { %1361 = vmatmul.msk.bf16.vlgmr.msrb.gmra.mxu3 %vm529_vm3, %v766_v7  ;;  %v1819_v34 = vunpack.c.l.b16 %v844_v50  ;;  %v697_v2 = vunpack.c.l.b16 %v686_v0  ;;  %v698_v51 = vunpack.c.l.b16 %v690_v1  ;;  %v1038_v8 = vshrl.u32 %v364_v39, 16 }
  0x3b   : > { %v1041_v18 = vshll.u32 %v364_v39, 16  ;;  %v914_v9 = vrot.slane %v1803_v25, 5  ;;  %v1108_v22 = vrot.slane %v365_v16, 5  ;;  %v983_v46 = vunpack.c.l.b16 %v364_v39 }
  0x3c   : > { %v849_v56 = vpack.c.b16 %v1819_v34, %v1684_v4  ;;  %v590_v4 = vunpack.c.l.b16 %v1619_v62  ;;  %v702_v63 = vpack.c.b16 %v698_v51, %v697_v2  ;;  %v765_v62 = vunpack.c.l.b16 %v1791_v14 }
  0x3d   : > { %v1040_v42 = vrot.slane %v1038_v8, 4  ;;  %v919_v10 = vpack.c.b16 %v697_v2, %v696_v54  ;;  %vm1196_vm8 = vcmask 64512  }
  0x3e   : > { %1369 = vmatmul.msk.bf16.vlgmr.msrb.gmra.mxu0 %vm529_vm3, %v846_v15  ;;  %v594_v5 = vpack.c.b16 %v590_v4, %v589_v58  ;;  %v769_v7 = vpack.c.b16 %v765_v62, %v590_v4  ;;  %v1043_v15 = vrot.slane %v1041_v18, 5 }
  0x3f   : > { %1338 = vmatmul.msk.bf16.gmra.mxu1 %vm529_vm3, %v1765_v11 }
  0x40   : > { %v1044_v17 = vor.u32 %v1043_v15, %v1040_v42 }
  0x42   : > { %v1045_v19 = vrot.slane %v1044_v17, 4 }
  0x43   : > { %1354 = vmatmul.msk.bf16.gmra.mxu2 %vm529_vm3, %v1786_v13 }
  0x4a   : > { %1362 = vmatmul.msk.bf16.gmra.mxu3 %vm529_vm3, %v767_v43 }
  0x4e   : > { %1370 = vmatmul.msk.bf16.gmra.mxu0 %vm529_vm3, %v847_v37 }
  0x4f   : > { %1339 = vmatmul.msk.bf16.gmra.mxu1 %vm529_vm3, %v593_v55 }
  0x53   : > { %1355 = vmatmul.msk.bf16.gmra.mxu2 %vm529_vm3, %v701_v57 }
  0x5a   : > { %1363 = vmatmul.msk.bf16.gmra.mxu3 %vm529_vm3, %v768_v61 }
  0x5e   : > { %1371 = vmatmul.msk.bf16.gmra.mxu0 %vm529_vm3, %v848_v44 }
  0x5f   : > { %1340 = vmatmul.msk.bf16.gmra.mxu1 %vm529_vm3, %v594_v5 }
  0x63   : > { %1356 = vmatmul.msk.bf16.gmra.mxu2 %vm529_vm3, %v702_v63 }
  0x6a   : > { %1364 = vmatmul.msk.bf16.gmra.mxu3 %vm529_vm3, %v769_v7 }
  0x6e   : > { %1372 = vmatmul.msk.bf16.gmra.mxu0 %vm529_vm3, %v849_v56 }
  0x6f   : > { %1378 = vmatmul.msk.bf16.vlgmr.msra.gmra.mxu1 %vm529_vm3, %v917_v30 }
  0x73   : > { %1386 = vmatmul.msk.bf16.vlgmr.msra.gmra.mxu2 %vm529_vm3, %v1765_v11  ;;  %v1047_v11 = vshll.u32 %v365_v16, 16 }
  0x75   : > { %v1049_v3 = vrot.slane %v1047_v11, 5 }
  0x77   : > { %v1050_v12 = vsel %vm1607_vm4, %v1045_v19, %v1049_v3 }
  0x78   : > { %v1051_v24 = vunpack.c.l.b16 %v1050_v12 }
  0x7a   : > { %1394 = vmatmul.msk.bf16.vlgmr.msra.gmra.mxu3 %vm529_vm3, %v1645_v21  ;;  %v1373_v21 = vrot.slane %v1791_v14, 9  ;;  %v1052_v32 = vpack.c.b16 %v1051_v24, %v1819_v34 }
  0x7c   : > { %v915_v29 = vsel %vm1693_vm7, %v1373_v21, %v914_v9 }
  0x7d   : > { %v916_v14 = vunpack.c.l.b16 %v915_v29 }
  0x7e   : > { %1403 = vmatmul.msk.bf16.vlgmr.msra.gmra.mxu0 %vm529_vm3, %v1786_v13  ;;  %v1398_v13 = vrot.slane %v364_v39, 9 }
  0x7f   : > { %1379 = vmatmul.msk.bf16.gmra.mxu1 %vm529_vm3, %v918_v53  ;;  %v920_v28 = vpack.c.b16 %v916_v14, %v698_v51 }
  0x80   : > { %v1109_v31 = vsel %vm1693_vm7, %v1398_v13, %v1108_v22 }
  0x81   : > { %v1110_v33 = vunpack.c.l.b16 %v1109_v31 }
  0x83   : > { %1387 = vmatmul.msk.bf16.gmra.mxu2 %vm529_vm3, %v593_v55  ;;  %v1111_v35 = vpack.c.b16 %v1110_v33, %v916_v14  ;;  %v1930_v33 = vld [vmem:[%s2009_s3] ss:$0 sm:$0xff] }
  0x8a   : > { %1395 = vmatmul.msk.bf16.gmra.mxu3 %vm529_vm3, %v1663_v40  ;;  %v984_v40 = vpack.c.b16 %v983_v46, %v765_v62 }
  0x8e   : > { %1404 = vmatmul.msk.bf16.gmra.mxu0 %vm529_vm3, %v701_v57 }
  0x8f   : > { %1380 = vmatmul.msk.bf16.gmra.mxu1 %vm529_vm3, %v919_v10 }
  0x93   : > { %1388 = vmatmul.msk.bf16.gmra.mxu2 %vm529_vm3, %v594_v5 }
  0x9a   : > { %1396 = vmatmul.msk.bf16.gmra.mxu3 %vm529_vm3, %v1708_v20 }
  0x9c   : > { %v560_v36 = vpop.f32.mrf.mxu1 }
  0x9e   : > { %1405 = vmatmul.msk.bf16.gmra.mxu0 %vm529_vm3, %v702_v63 }
  0x9f   : > { %1381 = vmatmul.msk.bf16.gmra.mxu1 %vm529_vm3, %v920_v28  ;;  %v1935_v28 = vld [vmem:[%s2010_s4] ss:$0 sm:$0xff] }
  0xa3   : > { %1389 = vmatmul.msk.bf16.gmra.mxu2 %vm529_vm3, %v984_v40 }
  0xa4   : > { %v1881_v25 = vpop.f32.mrf.mxu1 }
  0xa6   : > { %v1883_v38 = vpop.f32.mrf.mxu2 }
  0xaa   : > { %1397 = vmatmul.msk.bf16.gmra.mxu3 %vm529_vm3, %v1052_v32 }
  0xab   : > { %v555_v41 = vpop.f32.mrf.mxu0 }
  0xac   : > { %v628_v20 = vpop.f32.mrf.mxu1 }
  0xad   : > { %v1886_v43 = vpop.f32.mrf.mxu3  ;;  %v629_v30 = vadd.f32 %v628_v20, %v555_v41 }
  0xae   : > { %1406 = vmatmul.msk.bf16.gmra.mxu0 %vm529_vm3, %v1111_v35  ;;  %v1889_v45 = vpop.f32.mrf.mxu2 }
  0xb3   : > { %v557_v47 = vpop.f32.mrf.mxu0 }
  0xb4   : > { %v630_v26 = vpop.f32.mrf.mxu1 }
  0xb5   : > { %v1891_v48 = vpop.f32.mrf.mxu3  ;;  %v631_v16 = vadd.f32 %v630_v26, %v557_v47 }
  0xb6   : > { %v736_v27 = vpop.f32.mrf.mxu2 }
  0xb7   : > { %v756_v8 = vadd.f32 %v736_v27, %v629_v30 }
  0xbb   : > { %v883_v49 = vpop.f32.mrf.mxu0 }
  0xbc   : > { %v633_v50 = vpop.f32.mrf.mxu1 }
  0xbd   : > { %v803_v37 = vpop.f32.mrf.mxu3  ;;  %v634_v22 = vadd.f32 %v633_v50, %v560_v36 }
  0xbe   : > { %v738_v52 = vpop.f32.mrf.mxu2  ;;  %v823_v42 = vadd.f32 %v803_v37, %v756_v8 }
  0xbf   : > { %v757_v21 = vadd.f32 %v738_v52, %v631_v16 }
  0xc0   : > { %v903_v9 = vadd.f32 %v883_v49, %v823_v42 }
  0xc3   : > { %v885_v54 = vpop.f32.mrf.mxu0 }
  0xc4   : > { %v635_v55 = vpop.f32.mrf.mxu1 }
  0xc5   : > { %v805_v34 = vpop.f32.mrf.mxu3  ;;  %v636_v26 = vadd.f32 %v635_v55, %v1881_v25 }
  0xc6   : > { %v741_v56 = vpop.f32.mrf.mxu2  ;;  %v824_v29 = vadd.f32 %v805_v34, %v757_v21 }
  0xc7   : > { %v758_v14 = vadd.f32 %v741_v56, %v634_v22 }
  0xc8   : > { %v904_v10 = vadd.f32 %v885_v54, %v824_v29 }
  0xcb   : > { %v888_v57 = vpop.f32.mrf.mxu0 }
  0xcc   : > { %v1893_v6 = vpop.f32.mrf.mxu1 }
  0xcd   : > { %v808_v58 = vpop.f32.mrf.mxu3  ;;  %v639_v42 = vadd.f32 %v1893_v6, %v1883_v38 }
  0xce   : > { %v743_v23 = vpop.f32.mrf.mxu2  ;;  %v825_v41 = vadd.f32 %v808_v58, %v758_v14 }
  0xcf   : > { %v759_v50 = vadd.f32 %v743_v23, %v636_v26 }
  0xd0   : > { %v905_v34 = vadd.f32 %v888_v57, %v825_v41 }
  0xd3   : > { %v1895_v59 = vpop.f32.mrf.mxu0 }
  0xd4   : > { %v1897_v61 = vpop.f32.mrf.mxu1 }
  0xd5   : > { %v810_v60 = vpop.f32.mrf.mxu3 }
  0xd6   : > { %v1899_v4 = vpop.f32.mrf.mxu2  ;;  %v826_v58 = vadd.f32 %v810_v60, %v759_v50 }
  0xdb   : > { %v1901_v0 = vpop.f32.mrf.mxu0 }
  0xdc   : > { %v1905_v44 = vpop.f32.mrf.mxu1 }
  0xdd   : > { %v1903_v1 = vpop.f32.mrf.mxu3 }
  0xde   : > { %v1907_v2 = vpop.f32.mrf.mxu2 }
  0xe3   : > { %v1909_v51 = vpop.f32.mrf.mxu0 }
  0xe4   : > { %v1913_v63 = vpop.f32.mrf.mxu1 }
  0xe5   : > { %v1911_v5 = vpop.f32.mrf.mxu3 }
  0xe6   : > { %v1915_v62 = vpop.f32.mrf.mxu2 }
  0xeb   : > { %v1917_v7 = vpop.f32.mrf.mxu0 }
  0xec   : > { %v954_v39 = vpop.f32.mrf.mxu1 }
  0xed   : > { %v1919_v53 = vpop.f32.mrf.mxu3  ;;  %v974_v3 = vadd.f32 %v954_v39, %v903_v9  ;;  %v906_v9 = vadd.f32 %v1895_v59, %v826_v58 }
  0xee   : > { %v1921_v18 = vpop.f32.mrf.mxu2 }
  0xf3   : > { %v1923_v15 = vpop.f32.mrf.mxu0 }
  0xf4   : > { %v956_v11 = vpop.f32.mrf.mxu1 }
  0xf5   : > { %v1925_v17 = vpop.f32.mrf.mxu3  ;;  %v975_v40 = vadd.f32 %v956_v11, %v904_v10  ;;  %v760_v11 = vadd.f32 %v1899_v4, %v639_v42  ;;  %v641_v4 = vadd.f32 %v1897_v61, %v1889_v45 }
  0xf6   : > { %v1009_v19 = vpop.f32.mrf.mxu2 }
  0xf7   : > { %v1029_v12 = vadd.f32 %v1009_v19, %v974_v3  ;;  %v761_v59 = vadd.f32 %v1907_v2, %v641_v4  ;;  %v644_v2 = vadd.f32 %v1905_v44, %v1886_v43 }
  0xfb   : > { %v1136_v13 = vpop.f32.mrf.mxu0 }
  0xfc   : > { %v959_v31 = vpop.f32.mrf.mxu1 }
  0xfd   : > { %v1077_v24 = vpop.f32.mrf.mxu3  ;;  %v976_v55 = vadd.f32 %v959_v31, %v905_v34 }
  0xfe   : > { %v1097_v32 = vadd.f32 %v1077_v24, %v1029_v12  ;;  %v1011_v35 = vpop.f32.mrf.mxu2  ;;  %v827_v12 = vadd.f32 %v1903_v1, %v760_v11 }
  0xff   : > { %v1030_v20 = vadd.f32 %v1011_v35, %v975_v40  ;;  %v828_v40 = vadd.f32 %v1911_v5, %v761_v59 }
 0x100   : > { %v1156_v46 = vadd.f32 %v1136_v13, %v1097_v32  ;;  %v907_v32 = vadd.f32 %v1901_v0, %v827_v12  ;;  %v762_v0 = vadd.f32 %v1915_v62, %v644_v2  ;;  %v646_v62 = vadd.f32 %v1913_v63, %v1891_v48 }
 0x102   : > { %v1168_v36 = vmul.f32 %v1930_v33, %v1156_v46  ;;  %v829_v50 = vadd.f32 %v1919_v53, %v762_v0 }
 0x103   : > { %v1138_v47 = vpop.f32.mrf.mxu0 }
 0x104   : > { %v1180_v27 = vadd.f32 %v1935_v28, %v1168_v36  ;;  %v961_v37 = vpop.f32.mrf.mxu1  ;;  %v909_v58 = vadd.f32 %v1917_v7, %v829_v50 }
 0x105   : > { %v1079_v49 = vpop.f32.mrf.mxu3  ;;  %v977_v29 = vadd.f32 %v961_v37, %v906_v9 }
 0x106   : > { %v1188_v52 = vmax.f32 %v1180_v27, 0.0  ;;  %v1098_v54 = vadd.f32 %v1079_v49, %v1030_v20  ;;  %v1014_v56 = vpop.f32.mrf.mxu2  ;;  %v908_v27 = vadd.f32 %v1909_v51, %v828_v40  ;;  %v763_v51 = vadd.f32 %v1921_v18, %v646_v62 }
 0x107   : > { %v1031_v39 = vadd.f32 %v1014_v56, %v976_v55 }
 0x108   : > { %1197 = vst.msk [vmem:[%s1944_s7] sm:$0xff] %vm1196_vm8, %v1188_v52  ;;  %v1157_v25 = vadd.f32 %v1138_v47, %v1098_v54 }
 0x10a   : > { %v1169_v30 = vmul.f32 %v1930_v33, %v1157_v25 }
 0x10b   : > { %v1141_v8 = vpop.f32.mrf.mxu0 }
 0x10c   : > { %v1181_v16 = vadd.f32 %v1935_v28, %v1169_v30  ;;  %v964_v3 = vpop.f32.mrf.mxu1 }
 0x10d   : > { %v1082_v23 = vpop.f32.mrf.mxu3  ;;  %v978_v35 = vadd.f32 %v964_v3, %v907_v32 }
 0x10e   : > { %v1189_v57 = vmax.f32 %v1181_v16, 0.0  ;;  %v1099_v21 = vadd.f32 %v1082_v23, %v1031_v39  ;;  %v1016_v19 = vpop.f32.mrf.mxu2 }
 0x10f   : > { %v1032_v6 = vadd.f32 %v1016_v19, %v977_v29 }
 0x110   : > { %1198 = vst.msk [vmem:[%s1944_s7 + $0x8] sm:$0xff] %vm1196_vm8, %v1189_v57  ;;  %v1158_v60 = vadd.f32 %v1141_v8, %v1099_v21  ;;  %v830_v8 = vadd.f32 %v1925_v17, %v763_v51 }
 0x112   : > { %v1170_v38 = vmul.f32 %v1930_v33, %v1158_v60  ;;  %v910_v7 = vadd.f32 %v1923_v15, %v830_v8 }
 0x113   : > { %v1143_v13 = vpop.f32.mrf.mxu0 }
 0x114   : > { %v1182_v22 = vadd.f32 %v1935_v28, %v1170_v38  ;;  %v966_v46 = vpop.f32.mrf.mxu1 }
 0x115   : > { %v1084_v24 = vpop.f32.mrf.mxu3  ;;  %v979_v37 = vadd.f32 %v966_v46, %v908_v27 }
 0x116   : > { %v1190_v31 = vmax.f32 %v1182_v22, 0.0  ;;  %v1100_v14 = vadd.f32 %v1084_v24, %v1032_v6  ;;  %v1019_v10 = vpop.f32.mrf.mxu2 }
 0x117   : > { %v1033_v61 = vadd.f32 %v1019_v10, %v978_v35 }
 0x118   : > { %1199 = vst.msk [vmem:[%s1944_s7 + $0x10] sm:$0xff] %vm1196_vm8, %v1190_v31  ;;  %v1159_v1 = vadd.f32 %v1143_v13, %v1100_v14 }
 0x11a   : > { %v1171_v45 = vmul.f32 %v1930_v33, %v1159_v1 }
 0x11b   : > { %v1146_v41 = vpop.f32.mrf.mxu0 }
 0x11c   : > { %v1183_v36 = vadd.f32 %v1935_v28, %v1171_v45  ;;  %v969_v44 = vpop.f32.mrf.mxu1 }
 0x11d   : > { %v1087_v20 = vpop.f32.mrf.mxu3  ;;  %v980_v39 = vadd.f32 %v969_v44, %v909_v58 }
 0x11e   : > { %v1191_v47 = vmax.f32 %v1183_v36, 0.0  ;;  %v1101_v26 = vadd.f32 %v1087_v20, %v1033_v61  ;;  %v1021_v49 = vpop.f32.mrf.mxu2 }
 0x11f   : > { %v1034_v43 = vadd.f32 %v1021_v49, %v979_v37 }
 0x120   : > { %1200 = vst.msk [vmem:[%s1944_s7 + $0x18] sm:$0xff] %vm1196_vm8, %v1191_v47  ;;  %v1160_v5 = vadd.f32 %v1146_v41, %v1101_v26 }
 0x122   : > { %v1172_v52 = vmul.f32 %v1930_v33, %v1160_v5 }
 0x123   : > { %v1148_v54 = vpop.f32.mrf.mxu0 }
 0x124   : > { %v1184_v34 = vadd.f32 %v1935_v28, %v1172_v52  ;;  %v971_v16 = vpop.f32.mrf.mxu1 }
 0x125   : > { %v1089_v56 = vpop.f32.mrf.mxu3  ;;  %v981_v19 = vadd.f32 %v971_v16, %v910_v7 }
 0x126   : > { %v1192_v25 = vmax.f32 %v1184_v34, 0.0  ;;  %v1102_v55 = vadd.f32 %v1089_v56, %v1034_v43  ;;  %v1024_v30 = vpop.f32.mrf.mxu2 }
 0x127   : > { %v1035_v48 = vadd.f32 %v1024_v30, %v980_v39 }
 0x128   : > { %1201 = vst.msk [vmem:[%s1944_s7 + $0x20] sm:$0xff] %vm1196_vm8, %v1192_v25  ;;  %v1161_v53 = vadd.f32 %v1148_v54, %v1102_v55 }
 0x12a   : > { %v1173_v42 = vmul.f32 %v1930_v33, %v1161_v53 }
 0x12b   : > { %v1151_v23 = vpop.f32.mrf.mxu0 }
 0x12c   : > { %v1185_v63 = vadd.f32 %v1935_v28, %v1173_v42 }
 0x12d   : > { %v1092_v18 = vpop.f32.mrf.mxu3 }
 0x12e   : > { %v1193_v11 = vmax.f32 %v1185_v63, 0.0  ;;  %v1103_v57 = vadd.f32 %v1092_v18, %v1035_v48  ;;  %v1026_v21 = vpop.f32.mrf.mxu2 }
 0x12f   : > { %v1036_v3 = vadd.f32 %v1026_v21, %v981_v19 }
 0x130   : > { %1202 = vst.msk [vmem:[%s1944_s7 + $0x28] sm:$0xff] %vm1196_vm8, %v1193_v11  ;;  %v1162_v9 = vadd.f32 %v1151_v23, %v1103_v57 }
 0x132   : > { %v1174_v17 = vmul.f32 %v1930_v33, %v1162_v9 }
 0x133   : > { %v1153_v6 = vpop.f32.mrf.mxu0 }
 0x134   : > { %v1186_v60 = vadd.f32 %v1935_v28, %v1174_v17 }
 0x135   : > { %v1094_v29 = vpop.f32.mrf.mxu3 }
 0x136   : > { %v1194_v12 = vmax.f32 %v1186_v60, 0.0  ;;  %v1104_v38 = vadd.f32 %v1094_v29, %v1036_v3 }
 0x138   : > { %1203 = vst.msk [vmem:[%s1944_s7 + $0x30] sm:$0xff] %vm1196_vm8, %v1194_v12  ;;  %v1163_v13 = vadd.f32 %v1153_v6, %v1104_v38 }
 0x13a   : > { %v1175_v15 = vmul.f32 %v1930_v33, %v1163_v13 }
 0x13c   : > { %v1187_v4 = vadd.f32 %v1935_v28, %v1175_v15 }
 0x13e   : > { %v1195_v22 = vmax.f32 %v1187_v4, 0.0 }
 0x140   : > { %1204 = vst.msk [vmem:[%s1944_s7 + $0x38] sm:$0xff] %vm1196_vm8, %v1195_v22 }
 0x141 PF: > { %s15_s20 = sadd.s32 1, %s1478_s20   ;;  %s2016_s18 = smov %s1474_s19 }
 0x142   : > { %p12_p5 = scmp.ge.s32.totalorder %s15_s20, 4   ;;  %s2017_s19 = smov %s2019_s21 }
 0x144   :  { %14 = sbr.rel (!%p12_p5) target bundleno = 2 (0x2), region = 73 }

// kernel: _lambda_.14
= control target key start
LH: loop header
LB: loop body
LE: loop exit
PB: predicated region body
PF: predicated region fallthrough
CT: control target
= control target key end

     0   :  { %s2086_s15 = smov 0   ;;  %s2088_s16 = smov 0   ;;  %s2808_s0 = inlined_call_operand.vmem [shape: bf16[2,18,18,12], index: 0, kind: input, shape index: {}, may-alias: {0,1}]   ;;  %s2809_s1 = inlined_call_operand.vmem [shape: bf16[2,18,18,12], index: 1, kind: input, shape index: {}, may-alias: {0,1}]   ;;  %s2810_s2 = inlined_call_operand.vmem [shape: bf16[3,3,12,3], index: 2, kind: input, shape index: {}]   ;;  %s2811_s3 = inlined_call_operand.vmem [shape: f32[2,2,1,3], index: 3, kind: output, shape index: {0}]   ;;  %s2812_s4 = inlined_call_operand.vmem [shape: f32[2,2,1,3], index: 4, kind: output, shape index: {1}]  }
   0x1   :  { %s2090_s17 = smov 0   ;;  %s2092_s18 = smov 0  }
   0x2   :  { %s2094_s19 = smov 0  }
   0x3 LB: > { %s24_s20 = sadd.s32 1, %s2051_s17  ;;  %s27_s21 = sadd.s32 1, %s2055_s18  ;;  %s2059_s19 = sphi %s2094_s19, %s15_s19   ;;  %s2055_s18 = sphi %s2092_s18, %s2820_s18   ;;  %s2051_s17 = sphi %s2090_s17, %s2819_s17   ;;  %s2047_s16 = sphi %s2088_s16, %s2818_s16   ;;  %s2043_s15 = sphi %s2086_s15, %s2817_s15  }
   0x4   : > { %p25_p0 = scmp.ge.s32.totalorder %s24_s20, 2  ;;  %p1779_p1 = scmp.ge.s32.totalorder %s2059_s19, 1 }
   0x5   : > { %p225_p2 = scmp.lt.s32.totalorder %s2059_s19, 5 }
   0x6   : > { %s2822_s20 = smov (%p25_p0, %s24_s20), 0  ;;  %s2824_s21 = smov (!%p25_p0, %s27_s21), %s2055_s18 }
   0x7   : > { %p226_p3 = pnand %p1779_p1, %p225_p2  ;;  %p29_p4 = scmp.ge.s32.totalorder %s2824_s21, 2 }
   0x8   : > { %s2125_s26 = sshll.u32 (!%p226_p3), %s2043_s15, 3  ;;  %p288_p5 = scmp.lt.s32.totalorder (!%p226_p3), %s2047_s16, 1 }
   0x9   : > { %s2826_s21 = smov (%p29_p4, %s2824_s21), 0  ;;  %229 = sbr.rel (%p226_p3) target bundleno = 483 (0x1e3), region = 32 }
   0xa   : > { %p290_p6 = scmp.lt.s32.totalorder (!%p226_p3), %s2125_s26, 17  ;;  %s1974_s8 = sadd.s32 (!%p226_p3), 8, %s2125_s26 }
   0xb   : > { %p308_p7 = scmp.lt.s32.totalorder (!%p226_p3), %s1974_s8, 17  ;;  %p320_p8 = scmp.lt.s32.totalorder (!%p226_p3), %s2043_s15, 1 }
   0xe   : > { %v1789_v0 = vld [vmem:[%s2810_s2 + $0x8] sm:$0xf]  ;;  %v1965_v1 = vld [vmem:[%s2810_s2 + $0x8] sm:$0x30]  ;;  %vm630_vm0 = vcmask 1045504   ;;  %s2828_s16 = smov (!%p288_p5, %s2047_s16), 1 }
   0xf   : > { %v1790_v2 = vor.u32 %v1965_v1, %v1789_v0  ;;  %v1853_v3 = vld [vmem:[%s2810_s2 + $0x10] sm:$0xf]  ;;  %v1966_v4 = vld [vmem:[%s2810_s2 + $0x10] sm:$0x30]  ;;  %s291_s5 = scalar_select %p290_p6, %s2125_s26, 17  ;;  %vm605_vm3 = vcmask 97280  }
  0x10   : > { %v1854_v6 = vor.u32 %v1966_v4, %v1853_v3  ;;  %s1979_s6 = smul.u32 54, %s2828_s16  ;;  %v1869_v8 = vld [vmem:[%s2810_s2 + $0x18] sm:$0xf]  ;;  %v1967_v9 = vld [vmem:[%s2810_s2 + $0x18] sm:$0x30]  ;;  %s2830_s8 = smov (!%p308_p7, %s1974_s8), 17 }
  0x11   : > { %v632_v5 = vsel %vm630_vm0, %v1790_v2, 0  ;;  %s1978_s7 = smul.u32 3, %s291_s5  ;;  %vm381_vm1 = vsmask.f32 3328  ;;  %vm382_vm2 = vsmask.f32 7440  ;;  %v1870_v10 = vor.u32 %v1967_v9, %v1869_v8 }
  0x12   : > { %1975 = vmatpush.bf16.msra.mxu1 %v632_v5  ;;  %1976 = vmatpush.bf16.msra.mxu2 %v632_v5  ;;  %v925_v7 = vsel %vm630_vm0, %v1854_v6, 0  ;;  %v2151_v11 = vld [vmem:[%s2810_s2] sm:$0xf]  ;;  %v2156_v12 = vld [vmem:[%s2810_s2] sm:$0x30]  ;;  %vm2214_vm4 = vmor %vm381_vm1, %vm382_vm2  ;;  %s1980_s26 = smul.u32 3, %s2830_s8 }
  0x13   : > { %1977 = vmatpush.bf16.msra.mxu3 %v632_v5  ;;  %641 = vmatpush.bf16.msra.mxu0 %v632_v5  ;;  %s294_s12 = sadd.s32 %s1979_s6, %s1978_s7  ;;  %v1006_v13 = vsel %vm630_vm0, %v1870_v10, 0  ;;  %v2167_v14 = vld [vmem:[%s2810_s2 + $0x20] sm:$0xf]  ;;  %v2172_v15 = vld [vmem:[%s2810_s2 + $0x20] sm:$0x30]  ;;  %v1834_v28 = vor.u32 %v2156_v12, %v2151_v11  ;;  %vm812_vm5 = vcmask 1042432  }
  0x14   : > { %s1781_s13 = sshll.u32 %s294_s12, 2  ;;  %v1882_v29 = vor.u32 %v2172_v15, %v2167_v14  ;;  %s2334_s9 = sadd.s32 %s1980_s26, %s1979_s6  ;;  %vm813_vm6 = vcmask 1046532   ;;  %vm1534_vm8 = vcmask 23552   ;;  %vm1572_vm9 = vcmask 16384  }
  0x15   : > { %s2161_s28 = scalar_lea.vmem %s2808_s0, %s1781_s13  ;;  %vm2380_vm7 = vmor %vm812_vm5, %vm813_vm6  ;;  %s1784_s26 = sshll.u32 %s2334_s9, 2 }
  0x16   : > { %934 = vmatpush.bf16.msrb.mxu2 %v925_v7  ;;  %v2175_v16 = vld [vmem:[%s2161_s28 + $0x18] sm:$0xf]  ;;  %v2178_v17 = vld [vmem:[%s2161_s28 + $0x1c] sm:$0xf]  ;;  %v2181_v18 = vld [vmem:[%s2161_s28 + $0x20] sm:$0x1]  ;;  %s2525_s11 = scalar_lea.vmem %s2809_s1, %s1784_s26 }
  0x17   : > { %1015 = vmatpush.bf16.msrb.mxu3 %v1006_v13  ;;  %v433_v19 = vshrl.u32 %v2175_v16, 16  ;;  %v436_v20 = vshll.u32 %v2175_v16, 16  ;;  %v442_v21 = vshll.u32 %v2178_v17, 16  ;;  %v446_v22 = vshrl.u32 %v2178_v17, 16  ;;  %v2188_v23 = vld [vmem:[%s2161_s28 + $0x30] sm:$0xf] }
  0x18   : > { %v452_v24 = vshll.u32 %v2181_v18, 16  ;;  %v2192_v25 = vld [vmem:[%s2161_s28 + $0x34] sm:$0xf]  ;;  %v2195_v26 = vld [vmem:[%s2161_s28 + $0x38] sm:$0x1]  ;;  %v481_v27 = vshrl.u32 %v2188_v23, 16 }
  0x19   : > { %v435_v30 = vrot.slane %v433_v19, 4  ;;  %v438_v31 = vrot.slane %v436_v20, 5  ;;  %v444_v32 = vrot.slane %v442_v21, 5  ;;  %v448_v33 = vrot.slane %v446_v22, 4  ;;  %v2203_v34 = vld [vmem:[%s2161_s28 + $0x48] sm:$0xf] }
  0x1a   : > { %v454_v35 = vrot.slane %v452_v24, 5  ;;  %v483_v36 = vrot.slane %v481_v27, 4  ;;  %v484_v37 = vshll.u32 %v2188_v23, 16  ;;  %v490_v38 = vshll.u32 %v2192_v25, 16  ;;  %v2210_v43 = vld [vmem:[%s2161_s28 + $0x4c] sm:$0xf] }
  0x1b   : > { %v439_v39 = vor.u32 %v438_v31, %v435_v30  ;;  %v449_v40 = vor.u32 %v448_v33, %v444_v32  ;;  %v494_v41 = vshrl.u32 %v2192_v25, 16  ;;  %v500_v42 = vshll.u32 %v2195_v26, 16  ;;  %v2221_v54 = vld [vmem:[%s2161_s28 + $0x50] sm:$0x1]  ;;  %v2230_v62 = vld [vmem:[%s2161_s28] sm:$0xf] }
  0x1c   : > { %v486_v45 = vrot.slane %v484_v37, 5  ;;  %v492_v46 = vrot.slane %v490_v38, 5  ;;  %v529_v47 = vshrl.u32 %v2203_v34, 16  ;;  %v532_v48 = vshll.u32 %v2203_v34, 16  ;;  %v2238_v10 = vld [vmem:[%s2161_s28 + $0x4] sm:$0xf] }
  0x1d   : > { %v440_v49 = vrot.slane %v439_v39, 4  ;;  %v450_v50 = vrot.slane %v449_v40, 4  ;;  %v496_v51 = vrot.slane %v494_v41, 4  ;;  %v502_v52 = vrot.slane %v500_v42, 5  ;;  %v2244_v24 = vld [vmem:[%s2161_s28 + $0x8] sm:$0x1] }
  0x1e   : > { %v487_v53 = vor.u32 %v486_v45, %v483_v36  ;;  %v531_v55 = vrot.slane %v529_v47, 4  ;;  %v534_v56 = vrot.slane %v532_v48, 5  ;;  %v538_v57 = vshll.u32 %v2210_v43, 16  ;;  %v2254_v38 = vld [vmem:[%s2161_s28 + $0x24] sm:$0xf]  ;;  %s2832_s15 = smov (!%p320_p8, %s2043_s15), 1 }
  0x1f   : > { %v445_v58 = vsel %vm2214_vm4, %v440_v49, %v444_v32  ;;  %v455_v59 = vsel %vm2214_vm4, %v450_v50, %v454_v35  ;;  %v497_v60 = vor.u32 %v496_v51, %v492_v46  ;;  %v542_v61 = vshrl.u32 %v2210_v43, 16  ;;  %v2261_v45 = vld [vmem:[%s2161_s28 + $0x28] sm:$0xf]  ;;  %v2270_v50 = vld [vmem:[%s2161_s28 + $0x2c] sm:$0x1] }
  0x20   : > { %v580_v63 = vunpack.c.l.b16 %v445_v58  ;;  %v581_v0 = vunpack.c.l.b16 %v455_v59  ;;  %v488_v1 = vrot.slane %v487_v53, 4  ;;  %v535_v2 = vor.u32 %v534_v56, %v531_v55 }
  0x21   : > { %v498_v3 = vrot.slane %v497_v60, 4  ;;  %v540_v4 = vrot.slane %v538_v57, 5  ;;  %v544_v5 = vrot.slane %v542_v61, 4  ;;  %v548_v6 = vshll.u32 %v2221_v54, 16  ;;  %v2282_v57 = vld [vmem:[%s2161_s28 + $0x3c] sm:$0xf] }
  0x22   : > { %v2233_v7 = vpack.c.b16 %v581_v0, %v580_v63  ;;  %v493_v8 = vsel %vm2214_vm4, %v488_v1, %v492_v46  ;;  %v536_v9 = vrot.slane %v535_v2, 4  ;;  %v385_v13 = vshrl.u32 %v2230_v62, 16  ;;  %v2289_v0 = vld [vmem:[%s2161_s28 + $0x40] sm:$0xf] }
  0x23   : > { %v503_v19 = vsel %vm2214_vm4, %v498_v3, %v502_v52  ;;  %v584_v20 = vunpack.c.l.b16 %v493_v8  ;;  %v545_v21 = vor.u32 %v544_v5, %v540_v4  ;;  %v550_v22 = vrot.slane %v548_v6, 5 }
  0x24   : > { %1793 = vmatmul.msk.bf16.vlgmr.msra.gmra.mxu1 %vm605_vm3, %v2233_v7  ;;  %v585_v27 = vunpack.c.l.b16 %v503_v19  ;;  %v541_v30 = vsel %vm2214_vm4, %v536_v9, %v540_v4  ;;  %v387_v31 = vrot.slane %v385_v13, 4  ;;  %v388_v32 = vshll.u32 %v2230_v62, 16  ;;  %v2296_v4 = vld [vmem:[%s2161_s28 + $0x44] sm:$0x1]  ;;  %v2303_v19 = vld [vmem:[%s2161_s28 + $0x54] sm:$0xf] }
  0x25   : > { %v546_v33 = vrot.slane %v545_v21, 4  ;;  %v588_v35 = vunpack.c.l.b16 %v541_v30  ;;  %v394_v36 = vshll.u32 %v2238_v10, 16  ;;  %v398_v37 = vshrl.u32 %v2238_v10, 16 }
  0x26   : > { %v2256_v39 = vpack.c.b16 %v585_v27, %v584_v20  ;;  %v390_v40 = vrot.slane %v388_v32, 5  ;;  %v404_v41 = vshll.u32 %v2244_v24, 16  ;;  %v820_v42 = vrot.slane %v2244_v24, 5 }
  0x27   : > { %v551_v46 = vsel %vm2214_vm4, %v546_v33, %v550_v22  ;;  %v396_v47 = vrot.slane %v394_v36, 5  ;;  %v400_v48 = vrot.slane %v398_v37, 4  ;;  %v753_v49 = vsel %vm630_vm0, %v1834_v28, 0 }
  0x28   : > { %1795 = vmatmul.msk.bf16.vlgmr.msra.gmra.mxu2 %vm605_vm3, %v2256_v39  ;;  %v589_v51 = vunpack.c.l.b16 %v551_v46  ;;  %v391_v52 = vor.u32 %v390_v40, %v387_v31  ;;  %v406_v53 = vrot.slane %v404_v41, 5  ;;  %762 = vmatpush.bf16.msrb.mxu1 %v753_v49  ;;  %v1109_v55 = vsel %vm630_vm0, %v1882_v29, 0  ;;  %v2310_v40 = vld [vmem:[%s2161_s28 + $0x58] sm:$0xf] }
  0x29   : > { %v401_v56 = vor.u32 %v400_v48, %v396_v47  ;;  %1118 = vmatpush.bf16.msrb.mxu0 %v1109_v55  ;;  %v457_v11 = vshrl.u32 %v2254_v38, 16  ;;  %v460_v12 = vshll.u32 %v2254_v38, 16  ;;  %v466_v28 = vshll.u32 %v2261_v45, 16 }
  0x2a   : > { %v2284_v58 = vpack.c.b16 %v589_v51, %v588_v35  ;;  %v392_v59 = vrot.slane %v391_v52, 4  ;;  %v470_v60 = vshrl.u32 %v2261_v45, 16  ;;  %v476_v14 = vshll.u32 %v2270_v50, 16  ;;  %v2316_v51 = vld [vmem:[%s2161_s28 + $0x5c] sm:$0x1] }
  0x2b   : > { %v402_v15 = vrot.slane %v401_v56, 4  ;;  %v459_v29 = vrot.slane %v457_v11, 4  ;;  %v462_v61 = vrot.slane %v460_v12, 5  ;;  %v468_v63 = vrot.slane %v466_v28, 5  ;;  %v2319_v52 = vld [vmem:[%s2161_s28 + $0xc] sm:$0xf] }
  0x2c   : > { %1797 = vmatmul.msk.bf16.vlgmr.msra.gmra.mxu3 %vm605_vm3, %v2284_v58  ;;  %v397_v1 = vsel %vm2214_vm4, %v392_v59, %v396_v47  ;;  %v472_v2 = vrot.slane %v470_v60, 4  ;;  %v478_v3 = vrot.slane %v476_v14, 5  ;;  %v505_v5 = vshrl.u32 %v2282_v57, 16 }
  0x2d   : > { %v407_v6 = vsel %vm2214_vm4, %v402_v15, %v406_v53  ;;  %v576_v8 = vunpack.c.l.b16 %v397_v1  ;;  %v463_v9 = vor.u32 %v462_v61, %v459_v29  ;;  %v508_v13 = vshll.u32 %v2282_v57, 16  ;;  %v2329_v61 = vld [vmem:[%s2161_s28 + $0x10] sm:$0xf] }
  0x2e   : > { %v577_v20 = vunpack.c.l.b16 %v407_v6  ;;  %v473_v21 = vor.u32 %v472_v2, %v468_v63  ;;  %v507_v22 = vrot.slane %v505_v5, 4  ;;  %v514_v27 = vshll.u32 %v2289_v0, 16 }
  0x2f   : > { %v464_v30 = vrot.slane %v463_v9, 4  ;;  %v510_v31 = vrot.slane %v508_v13, 5  ;;  %v518_v32 = vshrl.u32 %v2289_v0, 16  ;;  %v524_v33 = vshll.u32 %v2296_v4, 16 }
  0x30   : > { %v592_v35 = vpack.c.b16 %v577_v20, %v576_v8  ;;  %v474_v36 = vrot.slane %v473_v21, 4  ;;  %v516_v37 = vrot.slane %v514_v27, 5  ;;  %v553_v41 = vshrl.u32 %v2303_v19, 16  ;;  %v2341_v20 = vld [vmem:[%s2161_s28 + $0x14] sm:$0x1] }
  0x31   : > { %v469_v46 = vsel %vm2214_vm4, %v464_v30, %v468_v63  ;;  %v511_v47 = vor.u32 %v510_v31, %v507_v22  ;;  %v520_v48 = vrot.slane %v518_v32, 4  ;;  %v526_v49 = vrot.slane %v524_v33, 5 }
  0x32   : > { %1791 = vmatmul.msk.bf16.vlgmr.msra.gmra.mxu0 %vm605_vm3, %v592_v35  ;;  %v479_v53 = vsel %vm2214_vm4, %v474_v36, %v478_v3  ;;  %v582_v55 = vunpack.c.l.b16 %v469_v46  ;;  %v555_v56 = vrot.slane %v553_v41, 4  ;;  %v556_v11 = vshll.u32 %v2303_v19, 16  ;;  %v1910_v36 = vld [vmem:[%s2810_s2 + $0x30] sm:$0xf] }
  0x33   : > { %v583_v12 = vunpack.c.l.b16 %v479_v53  ;;  %v512_v28 = vrot.slane %v511_v47, 4  ;;  %v521_v59 = vor.u32 %v520_v48, %v516_v37  ;;  %v562_v60 = vshll.u32 %v2310_v40, 16  ;;  %v1970_v47 = vld [vmem:[%s2810_s2 + $0x30] sm:$0x30] }
  0x34   : > { %v558_v14 = vrot.slane %v556_v11, 5  ;;  %v566_v15 = vshrl.u32 %v2310_v40, 16  ;;  %v572_v29 = vshll.u32 %v2316_v51, 16  ;;  %v409_v63 = vshrl.u32 %v2319_v52, 16  ;;  %v1971_v11 = vld [vmem:[%s2810_s2 + $0x38] sm:$0x30] }
  0x35   : > { %v2336_v1 = vpack.c.b16 %v583_v12, %v582_v55  ;;  %v517_v2 = vsel %vm2214_vm4, %v512_v28, %v516_v37  ;;  %v522_v3 = vrot.slane %v521_v59, 4  ;;  %v564_v5 = vrot.slane %v562_v60, 5  ;;  %v1894_v60 = vld [vmem:[%s2810_s2 + $0x28] sm:$0xf] }
  0x36   : > { %v586_v6 = vunpack.c.l.b16 %v517_v2  ;;  %v559_v8 = vor.u32 %v558_v14, %v555_v56  ;;  %v568_v9 = vrot.slane %v566_v15, 4  ;;  %v574_v13 = vrot.slane %v572_v29, 5  ;;  %v1922_v56 = vld [vmem:[%s2810_s2 + $0x38] sm:$0xf]  ;;  %v1969_v14 = vld [vmem:[%s2810_s2 + $0x28] sm:$0x30] }
  0x37   : > { %1794 = vmatmul.msk.bf16.gmra.mxu1 %vm605_vm3, %v2336_v1  ;;  %v527_v21 = vsel %vm2214_vm4, %v522_v3, %v526_v49  ;;  %v411_v22 = vrot.slane %v409_v63, 4  ;;  %v412_v27 = vshll.u32 %v2319_v52, 16  ;;  %v418_v30 = vshll.u32 %v2329_v61, 16 }
  0x38   : > { %v587_v31 = vunpack.c.l.b16 %v527_v21  ;;  %v560_v32 = vrot.slane %v559_v8, 4  ;;  %v569_v33 = vor.u32 %v568_v9, %v564_v5  ;;  %v422_v35 = vshrl.u32 %v2329_v61, 16 }
  0x39   : > { %v414_v37 = vrot.slane %v412_v27, 5  ;;  %v420_v41 = vrot.slane %v418_v30, 5  ;;  %v428_v46 = vshll.u32 %v2341_v20, 16  ;;  %v1843_v63 = vrot.slane %v2230_v62, 9  ;;  %v1972_v62 = vld [vmem:[%s2810_s2 + $0x40] sm:$0x30] }
  0x3a   : > { %v2357_v48 = vpack.c.b16 %v587_v31, %v586_v6  ;;  %v565_v49 = vsel %vm2214_vm4, %v560_v32, %v564_v5  ;;  %v570_v53 = vrot.slane %v569_v33, 4  ;;  %v424_v55 = vrot.slane %v422_v35, 4 }
  0x3b   : > { %v590_v12 = vunpack.c.l.b16 %v565_v49  ;;  %v415_v28 = vor.u32 %v414_v37, %v411_v22  ;;  %v430_v59 = vrot.slane %v428_v46, 5  ;;  %v817_v2 = vrot.slane %v2238_v10, 5 }
  0x3c   : > { %1796 = vmatmul.msk.bf16.gmra.mxu2 %vm605_vm3, %v2357_v48  ;;  %v575_v15 = vsel %vm2214_vm4, %v570_v53, %v574_v13  ;;  %v425_v29 = vor.u32 %v424_v55, %v420_v41  ;;  %v1911_v8 = vor.u32 %v1970_v47, %v1910_v36  ;;  %v1923_v9 = vor.u32 %v1971_v11, %v1922_v56  ;;  %v1935_v13 = vld [vmem:[%s2810_s2 + $0x40] sm:$0xf] }
  0x3d   : > { %v591_v3 = vunpack.c.l.b16 %v575_v15  ;;  %v416_v5 = vrot.slane %v415_v28, 4  ;;  %v819_v22 = vrot.slane %v817_v2, 4  ;;  %v1895_v27 = vor.u32 %v1969_v14, %v1894_v60  ;;  %v1954_v53 = vld [vmem:[%s2161_s28] sm:$0xff] }
  0x3e   : > { %v426_v21 = vrot.slane %v425_v29, 4  ;;  %v1277_v31 = vsel %vm630_vm0, %v1911_v8, 0  ;;  %v818_v35 = vsel %vm2380_vm7, %v1843_v63, %v817_v2  ;;  %v1380_v36 = vsel %vm630_vm0, %v1923_v9, 0  ;;  %v1955_v2 = vld [vmem:[%s2161_s28 + $0xc] sm:$0xff] }
  0x3f   : > { %v2390_v10 = vpack.c.b16 %v591_v3, %v590_v12  ;;  %v421_v30 = vsel %vm2214_vm4, %v416_v5, %v420_v41  ;;  %1286 = vmatpush.bf16.msra.mxu2 %v1277_v31  ;;  %v821_v41 = vsel %vm2380_vm7, %v819_v22, %v820_v42  ;;  %v1196_v46 = vsel %vm630_vm0, %v1895_v27, 0  ;;  %1389 = vmatpush.bf16.msra.mxu3 %v1380_v36  ;;  %v2444_v31 = vld [vmem:[%s2161_s28 + $0x18] sm:$0xff] }
  0x40   : > { %v431_v32 = vsel %vm2214_vm4, %v426_v21, %v430_v59  ;;  %v578_v33 = vunpack.c.l.b16 %v421_v30  ;;  %v1936_v47 = vor.u32 %v1972_v62, %v1935_v13  ;;  %1205 = vmatpush.bf16.msra.mxu1 %v1196_v46  ;;  %v871_v56 = vunpack.c.l.b16 %v818_v35 }
  0x41   : > { %1798 = vmatmul.msk.bf16.gmra.mxu3 %vm605_vm3, %v2390_v10  ;;  %v579_v37 = vunpack.c.l.b16 %v431_v32  ;;  %v872_v11 = vunpack.c.l.b16 %v821_v41  ;;  %v1845_v24 = vrot.slane %v2175_v16, 9  ;;  %v831_v42 = vrot.slane %v2178_v17, 5 }
  0x42   : > { %v1467_v55 = vsel %vm630_vm0, %v1936_v47, 0  ;;  %v834_v12 = vrot.slane %v2181_v18, 5  ;;  %v824_v59 = vrot.slane %v2329_v61, 5  ;;  %v1844_v16 = vrot.slane %v2319_v52, 9 }
  0x43   : > { %v593_v49 = vpack.c.b16 %v579_v37, %v578_v33  ;;  %1476 = vmatpush.bf16.msra.mxu0 %v1467_v55  ;;  %v887_v28 = vpack.c.b16 %v872_v11, %v871_v56  ;;  %v832_v60 = vsel %vm2380_vm7, %v1845_v24, %v831_v42  ;;  %v833_v14 = vrot.slane %v831_v42, 4  ;;  %v2469_v33 = vld [vmem:[%s2161_s28 + $0x30] sm:$0xff] }
  0x44   : > { %v875_v15 = vunpack.c.l.b16 %v832_v60  ;;  %v826_v17 = vrot.slane %v824_v59, 4  ;;  %v827_v18 = vrot.slane %v2341_v20, 5  ;;  %v825_v61 = vsel %vm2380_vm7, %v1844_v16, %v824_v59 }
  0x45   : > { %1792 = vmatmul.msk.bf16.gmra.mxu0 %vm605_vm3, %v593_v49  ;;  %v835_v29 = vsel %vm2380_vm7, %v833_v14, %v834_v12  ;;  %v873_v8 = vunpack.c.l.b16 %v825_v61  ;;  %v1846_v52 = vrot.slane %v2254_v38, 9  ;;  %v838_v20 = vrot.slane %v2261_v45, 5  ;;  %v2509_v12 = vld [vmem:[%s2161_s28 + $0x48] sm:$0xff] }
  0x46   : > { %v876_v63 = vunpack.c.l.b16 %v835_v29  ;;  %v828_v5 = vsel %vm2380_vm7, %v826_v17, %v827_v18  ;;  %v841_v21 = vrot.slane %v2270_v50, 5  ;;  %v2457_v50 = vld [vmem:[%s2161_s28 + $0x24] sm:$0xff]  ;;  %v845_v32 = vrot.slane %v2192_v25, 5 }
  0x47   : > { %1835 = vmatmul.msk.bf16.vlgmr.msrb.gmra.mxu1 %vm605_vm3, %v1954_v53  ;;  %v874_v9 = vunpack.c.l.b16 %v828_v5  ;;  %v839_v27 = vsel %vm2380_vm7, %v1846_v52, %v838_v20  ;;  %v840_v13 = vrot.slane %v838_v20, 4  ;;  %v1847_v35 = vrot.slane %v2188_v23, 9  ;;  %v2551_v52 = vld [vmem:[%s2161_s28 + $0x54] sm:$0xff] }
  0x48   : > { %v2423_v3 = vpack.c.b16 %v876_v63, %v875_v15  ;;  %v877_v62 = vunpack.c.l.b16 %v839_v27  ;;  %v847_v36 = vrot.slane %v845_v32, 4  ;;  %v848_v37 = vrot.slane %v2195_v26, 5 }
  0x49   : > { %v2435_v22 = vpack.c.b16 %v874_v9, %v873_v8  ;;  %v842_v30 = vsel %vm2380_vm7, %v840_v13, %v841_v21  ;;  %v846_v41 = vsel %vm2380_vm7, %v1847_v35, %v845_v32  ;;  %v852_v26 = vrot.slane %v2289_v0, 5  ;;  %v2556_v32 = vld [vmem:[%s2525_s11 + $0x8] sm:$0x1] }
  0x4a   : > { %v878_v38 = vunpack.c.l.b16 %v842_v30  ;;  %v849_v25 = vsel %vm2380_vm7, %v847_v36, %v848_v37  ;;  %v879_v46 = vunpack.c.l.b16 %v846_v41  ;;  %v1848_v53 = vrot.slane %v2282_v57, 9 }
  0x4b   : > { %v880_v47 = vunpack.c.l.b16 %v849_v25  ;;  %v854_v55 = vrot.slane %v852_v26, 4  ;;  %v855_v56 = vrot.slane %v2296_v4, 5  ;;  %v859_v4 = vrot.slane %v2210_v43, 5 }
  0x4c   : > { %1855 = vmatmul.msk.bf16.vlgmr.msrb.gmra.mxu2 %vm605_vm3, %v887_v28  ;;  %v2446_v45 = vpack.c.b16 %v878_v38, %v877_v62  ;;  %v853_v11 = vsel %vm2380_vm7, %v1848_v53, %v852_v26  ;;  %v1849_v28 = vrot.slane %v2203_v34, 9  ;;  %v862_v60 = vrot.slane %v2221_v54, 5  ;;  %v2532_v34 = vld [vmem:[%s2525_s11] sm:$0xf]  ;;  %v2535_v54 = vld [vmem:[%s2525_s11 + $0x4] sm:$0xf] }
  0x4d   : > { %v2483_v23 = vpack.c.b16 %v880_v47, %v879_v46  ;;  %v856_v0 = vsel %vm2380_vm7, %v854_v55, %v855_v56  ;;  %v881_v24 = vunpack.c.l.b16 %v853_v11  ;;  %v861_v59 = vrot.slane %v859_v4, 4 }
  0x4e   : > { %v882_v42 = vunpack.c.l.b16 %v856_v0  ;;  %v860_v15 = vsel %vm2380_vm7, %v1849_v28, %v859_v4  ;;  %v866_v16 = vrot.slane %v2310_v40, 5  ;;  %v1074_v18 = vshrl.u32 %v2532_v34, 16 }
  0x4f   : > { %v863_v43 = vsel %vm2380_vm7, %v861_v59, %v862_v60  ;;  %v883_v29 = vunpack.c.l.b16 %v860_v15  ;;  %v1077_v61 = vshll.u32 %v2532_v34, 16  ;;  %v1083_v5 = vshll.u32 %v2535_v54, 16  ;;  %v2588_v59 = vld [vmem:[%s2525_s11] sm:$0xff] }
  0x50   : > { %v2503_v57 = vpack.c.b16 %v882_v42, %v881_v24  ;;  %v884_v63 = vunpack.c.l.b16 %v863_v43  ;;  %v1087_v8 = vshrl.u32 %v2535_v54, 16  ;;  %v1850_v40 = vrot.slane %v2303_v19, 9 }
  0x51   : > { %1871 = vmatmul.msk.bf16.vlgmr.msrb.gmra.mxu3 %vm605_vm3, %v1955_v2  ;;  %v868_v20 = vrot.slane %v866_v16, 4  ;;  %v869_v21 = vrot.slane %v2316_v51, 5  ;;  %v1076_v27 = vrot.slane %v1074_v18, 4  ;;  %v1079_v13 = vrot.slane %v1077_v61, 5 }
  0x52   : > { %v1085_v62 = vrot.slane %v1083_v5, 5  ;;  %v1089_v30 = vrot.slane %v1087_v8, 4  ;;  %v867_v36 = vsel %vm2380_vm7, %v1850_v40, %v866_v16  ;;  %v1093_v41 = vshll.u32 %v2556_v32, 16 }
  0x53   : > { %v870_v19 = vsel %vm2380_vm7, %v868_v20, %v869_v21  ;;  %v1080_v37 = vor.u32 %v1079_v13, %v1076_v27  ;;  %v885_v46 = vunpack.c.l.b16 %v867_v36 }
  0x54   : > { %v1090_v51 = vor.u32 %v1089_v30, %v1085_v62  ;;  %v886_v47 = vunpack.c.l.b16 %v870_v19  ;;  %v1095_v56 = vrot.slane %v1093_v41, 5 }
  0x55   : > { %1883 = vmatmul.msk.bf16.vlgmr.msrb.gmra.mxu0 %vm605_vm3, %v593_v49  ;;  %v2489_v49 = vld [vmem:[%s2161_s28 + $0x3c] sm:$0xff]  ;;  %v1081_v53 = vrot.slane %v1080_v37, 4  ;;  %s1785_s28 = sshll.u32 %s2828_s16, 1 }
  0x56   : > { %v1091_v55 = vrot.slane %v1090_v51, 4  ;;  %v2575_v0 = vpack.c.b16 %v886_v47, %v885_v46  ;;  %s323_s9 = sadd.s32 %s1785_s28, %s2832_s15 }
  0x57   : > { %1836 = vmatmul.msk.bf16.gmra.mxu1 %vm605_vm3, %v1955_v2  ;;  %v2537_v2 = vpack.c.b16 %v884_v63, %v883_v29  ;;  %v1086_v42 = vsel %vm2214_vm4, %v1081_v53, %v1085_v62  ;;  %s324_s14 = scalar_lea.vmem %s2811_s3, %s323_s9  ;;  %s331_s24 = scalar_lea.vmem %s2812_s4, %s323_s9 }
  0x58   : > { %v1096_v4 = vsel %vm2214_vm4, %v1091_v55, %v1095_v56  ;;  %v1097_v60 = vunpack.c.l.b16 %v1086_v42 }
  0x59   : > { %v1098_v15 = vunpack.c.l.b16 %v1096_v4 }
  0x5b   : > { %v2594_v29 = vpack.c.b16 %v1098_v15, %v1097_v60 }
  0x5c   : > { %1856 = vmatmul.msk.bf16.gmra.mxu2 %vm605_vm3, %v2435_v22 }
  0x61   : > { %1872 = vmatmul.msk.bf16.gmra.mxu3 %vm605_vm3, %v2444_v31 }
  0x65   : > { %1884 = vmatmul.msk.bf16.gmra.mxu0 %vm605_vm3, %v2233_v7 }
  0x67   : > { %1837 = vmatmul.msk.bf16.gmra.mxu1 %vm605_vm3, %v2444_v31 }
  0x6c   : > { %1857 = vmatmul.msk.bf16.gmra.mxu2 %vm605_vm3, %v2423_v3 }
  0x71   : > { %1873 = vmatmul.msk.bf16.gmra.mxu3 %vm605_vm3, %v2457_v50 }
  0x75   : > { %1885 = vmatmul.msk.bf16.gmra.mxu0 %vm605_vm3, %v2336_v1 }
  0x77   : > { %1838 = vmatmul.msk.bf16.gmra.mxu1 %vm605_vm3, %v2457_v50 }
  0x7c   : > { %1858 = vmatmul.msk.bf16.gmra.mxu2 %vm605_vm3, %v2446_v45 }
  0x81   : > { %1874 = vmatmul.msk.bf16.gmra.mxu3 %vm605_vm3, %v2469_v33 }
  0x85   : > { %1886 = vmatmul.msk.bf16.gmra.mxu0 %vm605_vm3, %v2256_v39 }
  0x87   : > { %1839 = vmatmul.msk.bf16.gmra.mxu1 %vm605_vm3, %v2469_v33 }
  0x8c   : > { %1859 = vmatmul.msk.bf16.gmra.mxu2 %vm605_vm3, %v2483_v23 }
  0x91   : > { %1875 = vmatmul.msk.bf16.gmra.mxu3 %vm605_vm3, %v2489_v49 }
  0x95   : > { %1887 = vmatmul.msk.bf16.gmra.mxu0 %vm605_vm3, %v2357_v48 }
  0x97   : > { %1840 = vmatmul.msk.bf16.gmra.mxu1 %vm605_vm3, %v2489_v49 }
  0x9c   : > { %1860 = vmatmul.msk.bf16.gmra.mxu2 %vm605_vm3, %v2503_v57 }
  0xa1   : > { %1876 = vmatmul.msk.bf16.gmra.mxu3 %vm605_vm3, %v2509_v12  ;;  %v2515_v14 = vpop.f32.mrf.mxu1 }
  0xa5   : > { %1888 = vmatmul.msk.bf16.gmra.mxu0 %vm605_vm3, %v2284_v58 }
  0xa7   : > { %1841 = vmatmul.msk.bf16.gmra.mxu1 %vm605_vm3, %v2509_v12 }
  0xa9   : > { %v2540_v17 = vpop.f32.mrf.mxu1 }
  0xab   : > { %v2546_v9 = vpop.f32.mrf.mxu2 }
  0xac   : > { %1861 = vmatmul.msk.bf16.gmra.mxu2 %vm605_vm3, %v2537_v2 }
  0xaf   : > { %v643_v38 = vpop.f32.mrf.mxu0  ;;  %v2558_v35 = vpop.f32.mrf.mxu3 }
  0xb1   : > { %1877 = vmatmul.msk.bf16.gmra.mxu3 %vm605_vm3, %v2551_v52 }
  0xb3   : > { %v2571_v26 = vpop.f32.mrf.mxu2 }
  0xb4   : > { %v2567_v25 = vpop.f32.mrf.mxu1 }
  0xb5   : > { %1889 = vmatmul.msk.bf16.gmra.mxu0 %vm605_vm3, %v2390_v10 }
  0xb7   : > { %1842 = vmatmul.msk.bf16.gmra.mxu1 %vm605_vm3, %v2551_v52  ;;  %v645_v11 = vpop.f32.mrf.mxu0  ;;  %v2577_v24 = vpop.f32.mrf.mxu3 }
  0xbc   : > { %1862 = vmatmul.msk.bf16.gmra.mxu2 %vm605_vm3, %v2575_v0  ;;  %v2585_v28 = vpop.f32.mrf.mxu1 }
  0xbf   : > { %v2590_v43 = vpop.f32.mrf.mxu2 }
  0xc1   : > { %1878 = vmatmul.msk.bf16.gmra.mxu3 %vm605_vm3, %v2588_v59 }
  0xc2   : > { %v648_v63 = vpop.f32.mrf.mxu0 }
  0xc4   : > { %v2596_v16 = vpop.f32.mrf.mxu3  ;;  %v764_v18 = vpop.f32.mrf.mxu1 }
  0xc5   : > { %1890 = vmatmul.msk.bf16.gmra.mxu0 %vm605_vm3, %v2594_v29  ;;  %v765_v61 = vadd.f32 %v764_v18, %v643_v38 }
  0xc7   : > { %v2600_v5 = vpop.f32.mrf.mxu2  ;;  %1896 = vmatmul.msk.bf16.vlgmr.msra.gmra.mxu1 %vm605_vm3, %v2435_v22 }
  0xca   : > { %v650_v8 = vpop.f32.mrf.mxu0 }
  0xcc   : > { %v2604_v40 = vpop.f32.mrf.mxu3  ;;  %1912 = vmatmul.msk.bf16.vlgmr.msra.gmra.mxu2 %vm605_vm3, %v2444_v31  ;;  %v766_v20 = vpop.f32.mrf.mxu1 }
  0xcd   : > { %v767_v21 = vadd.f32 %v766_v20, %v645_v11 }
  0xcf   : > { %v936_v27 = vpop.f32.mrf.mxu2 }
  0xd0   : > { %v976_v13 = vadd.f32 %v936_v27, %v765_v61 }
  0xd1   : > { %1924 = vmatmul.msk.bf16.vlgmr.msra.gmra.mxu3 %vm605_vm3, %v2233_v7 }
  0xd2   : > { %v1120_v62 = vpop.f32.mrf.mxu0 }
  0xd4   : > { %v1017_v30 = vpop.f32.mrf.mxu3  ;;  %v769_v38 = vpop.f32.mrf.mxu1 }
  0xd5   : > { %1937 = vmatmul.msk.bf16.vlgmr.msra.gmra.mxu0 %vm605_vm3, %v2423_v3  ;;  %v1057_v22 = vadd.f32 %v1017_v30, %v976_v13  ;;  %v770_v36 = vadd.f32 %v769_v38, %v648_v63 }
  0xd7   : > { %v938_v19 = vpop.f32.mrf.mxu2  ;;  %1897 = vmatmul.msk.bf16.gmra.mxu1 %vm605_vm3, %v2423_v3  ;;  %v2614_v31 = vadd.f32 %v1120_v62, %v1057_v22 }
  0xd8   : > { %v977_v37 = vadd.f32 %v938_v19, %v767_v21 }
  0xda   : > { %v1122_v51 = vpop.f32.mrf.mxu0 }
  0xdc   : > { %v1019_v41 = vpop.f32.mrf.mxu3  ;;  %1913 = vmatmul.msk.bf16.gmra.mxu2 %vm605_vm3, %v2457_v50  ;;  %v771_v7 = vpop.f32.mrf.mxu1 }
  0xdd   : > { %v1058_v46 = vadd.f32 %v1019_v41, %v977_v37  ;;  %v772_v47 = vadd.f32 %v771_v7, %v650_v8 }
  0xdf   : > { %v941_v53 = vpop.f32.mrf.mxu2  ;;  %v2618_v55 = vadd.f32 %v1122_v51, %v1058_v46 }
  0xe0   : > { %v978_v56 = vadd.f32 %v941_v53, %v770_v36 }
  0xe1   : > { %1925 = vmatmul.msk.bf16.gmra.mxu3 %vm605_vm3, %v2336_v1 }
  0xe2   : > { %v1125_v11 = vpop.f32.mrf.mxu0 }
  0xe4   : > { %v1022_v3 = vpop.f32.mrf.mxu3  ;;  %v774_v42 = vpop.f32.mrf.mxu1 }
  0xe5   : > { %1938 = vmatmul.msk.bf16.gmra.mxu0 %vm605_vm3, %v2446_v45  ;;  %v1059_v4 = vadd.f32 %v1022_v3, %v978_v56  ;;  %v775_v60 = vadd.f32 %v774_v42, %v2515_v14 }
  0xe7   : > { %v943_v50 = vpop.f32.mrf.mxu2  ;;  %1898 = vmatmul.msk.bf16.gmra.mxu1 %vm605_vm3, %v2446_v45  ;;  %v2627_v15 = vadd.f32 %v1125_v11, %v1059_v4 }
  0xe8   : > { %v979_v63 = vadd.f32 %v943_v50, %v772_v47 }
  0xea   : > { %v1127_v18 = vpop.f32.mrf.mxu0 }
  0xec   : > { %v1024_v61 = vpop.f32.mrf.mxu3  ;;  %1914 = vmatmul.msk.bf16.gmra.mxu2 %vm605_vm3, %v2469_v33  ;;  %v776_v1 = vpop.f32.mrf.mxu1 }
  0xed   : > { %v1060_v8 = vadd.f32 %v1024_v61, %v979_v63  ;;  %v777_v20 = vadd.f32 %v776_v1, %v2540_v17 }
  0xef   : > { %v946_v21 = vpop.f32.mrf.mxu2  ;;  %v2632_v27 = vadd.f32 %v1127_v18, %v1060_v8 }
  0xf0   : > { %v980_v14 = vadd.f32 %v946_v21, %v775_v60 }
  0xf1   : > { %1926 = vmatmul.msk.bf16.gmra.mxu3 %vm605_vm3, %v2256_v39 }
  0xf2   : > { %v1130_v45 = vpop.f32.mrf.mxu0 }
  0xf4   : > { %v1027_v13 = vpop.f32.mrf.mxu3  ;;  %v779_v62 = vpop.f32.mrf.mxu1 }
  0xf5   : > { %1939 = vmatmul.msk.bf16.gmra.mxu0 %vm605_vm3, %v2483_v23  ;;  %v1061_v30 = vadd.f32 %v1027_v13, %v980_v14  ;;  %v780_v33 = vadd.f32 %v779_v62, %v2567_v25 }
  0xf7   : > { %v948_v38 = vpop.f32.mrf.mxu2  ;;  %1899 = vmatmul.msk.bf16.gmra.mxu1 %vm605_vm3, %v2483_v23  ;;  %v2641_v17 = vadd.f32 %v1130_v45, %v1061_v30 }
  0xf8   : > { %v981_v22 = vadd.f32 %v948_v38, %v777_v20  ;;  %v2679_v38 = vld [vmem:[%s2525_s11 + $0xc] sm:$0xf] }
  0xfa   : > { %v1132_v36 = vpop.f32.mrf.mxu0 }
  0xfc   : > { %v1029_v19 = vpop.f32.mrf.mxu3  ;;  %1915 = vmatmul.msk.bf16.gmra.mxu2 %vm605_vm3, %v2489_v49  ;;  %v781_v39 = vpop.f32.mrf.mxu1 }
  0xfd   : > { %v1062_v37 = vadd.f32 %v1029_v19, %v981_v22  ;;  %v782_v51 = vadd.f32 %v781_v39, %v2585_v28  ;;  %v2682_v22 = vld [vmem:[%s2525_s11 + $0x10] sm:$0xf]  ;;  %v1891_v39 = vrot.slane %v2532_v34, 9 }
  0xff   : > { %v951_v41 = vpop.f32.mrf.mxu2  ;;  %v2646_v7 = vadd.f32 %v1132_v36, %v1062_v37  ;;  %v1345_v37 = vshrl.u32 %v2679_v38, 16 }
 0x100   : > { %v982_v25 = vadd.f32 %v951_v41, %v780_v33  ;;  %v1179_v33 = vrot.slane %v2535_v54, 5  ;;  %v1354_v41 = vshll.u32 %v2682_v22, 16 }
 0x101   : > { %1927 = vmatmul.msk.bf16.gmra.mxu3 %vm605_vm3, %v2357_v48  ;;  %v1347_v34 = vrot.slane %v1345_v37, 4 }
 0x102   : > { %v1135_v23 = vpop.f32.mrf.mxu0 }
 0x104   : > { %v1032_v46 = vpop.f32.mrf.mxu3  ;;  %v784_v47 = vpop.f32.mrf.mxu1 }
 0x105   : > { %1940 = vmatmul.msk.bf16.gmra.mxu0 %vm605_vm3, %v2503_v57  ;;  %v1063_v53 = vadd.f32 %v1032_v46, %v982_v25  ;;  %v785_v4 = vadd.f32 %v784_v47, %v2546_v9 }
 0x107   : > { %v953_v56 = vpop.f32.mrf.mxu2  ;;  %1900 = vmatmul.msk.bf16.gmra.mxu1 %vm605_vm3, %v2503_v57  ;;  %v2654_v49 = vadd.f32 %v1135_v23, %v1063_v53 }
 0x108   : > { %v983_v28 = vadd.f32 %v953_v56, %v782_v51  ;;  %v1181_v51 = vrot.slane %v1179_v33, 4  ;;  %v1180_v56 = vsel %vm2380_vm7, %v1891_v39, %v1179_v33  ;;  %v1963_v39 = vld [vmem:[%s2525_s11 + $0xc] sm:$0xff] }
 0x10a   : > { %v1137_v11 = vpop.f32.mrf.mxu0 }
 0x10c   : > { %v1034_v3 = vpop.f32.mrf.mxu3  ;;  %1916 = vmatmul.msk.bf16.gmra.mxu2 %vm605_vm3, %v2509_v12  ;;  %v786_v48 = vpop.f32.mrf.mxu1 }
 0x10d   : > { %v1064_v42 = vadd.f32 %v1034_v3, %v983_v28  ;;  %v787_v12 = vadd.f32 %v786_v48, %v2571_v26  ;;  %v1356_v28 = vrot.slane %v1354_v41, 5  ;;  %v362_v3 = vld [vmem:[%s2525_s11 + $0x14] sm:$0x1] }
 0x10f   : > { %v956_v60 = vpop.f32.mrf.mxu2  ;;  %v2659_v50 = vadd.f32 %v1137_v11, %v1064_v42 }
 0x110   : > { %v984_v63 = vadd.f32 %v956_v60, %v785_v4  ;;  %v1184_v4 = vunpack.c.l.b16 %v1180_v56 }
 0x111   : > { %1928 = vmatmul.msk.bf16.gmra.mxu3 %vm605_vm3, %v2284_v58 }
 0x112   : > { %v1140_v57 = vpop.f32.mrf.mxu0 }
 0x114   : > { %v1037_v18 = vpop.f32.mrf.mxu3  ;;  %v789_v61 = vpop.f32.mrf.mxu1 }
 0x115   : > { %1941 = vmatmul.msk.bf16.gmra.mxu0 %vm605_vm3, %v2537_v2  ;;  %v1065_v1 = vadd.f32 %v1037_v18, %v984_v63  ;;  %v790_v13 = vadd.f32 %v789_v61, %v2590_v43  ;;  %v1364_v61 = vshll.u32 %v362_v3, 16 }
 0x117   : > { %v958_v8 = vpop.f32.mrf.mxu2  ;;  %1901 = vmatmul.msk.bf16.gmra.mxu1 %vm605_vm3, %v2537_v2  ;;  %v2668_v9 = vadd.f32 %v1140_v57, %v1065_v1 }
 0x118   : > { %v985_v20 = vadd.f32 %v958_v8, %v787_v12 }
 0x11a   : > { %v1142_v21 = vpop.f32.mrf.mxu0 }
 0x11c   : > { %v1039_v58 = vpop.f32.mrf.mxu3  ;;  %1917 = vmatmul.msk.bf16.gmra.mxu2 %vm605_vm3, %v2551_v52  ;;  %v791_v14 = vpop.f32.mrf.mxu1  ;;  %v1182_v52 = vrot.slane %v2556_v32, 5  ;;  %v1358_v32 = vshrl.u32 %v2682_v22, 16 }
 0x11d   : > { %v1066_v45 = vadd.f32 %v1039_v58, %v985_v20  ;;  %v792_v54 = vadd.f32 %v791_v14, %v2600_v5  ;;  %v1366_v14 = vrot.slane %v1364_v61, 5 }
 0x11e   : > { %v1183_v5 = vsel %vm2380_vm7, %v1181_v51, %v1182_v52  ;;  %v1360_v11 = vrot.slane %v1358_v32, 4 }
 0x11f   : > { %v961_v62 = vpop.f32.mrf.mxu2  ;;  %v2673_v26 = vadd.f32 %v1142_v21, %v1066_v45  ;;  %v1185_v60 = vunpack.c.l.b16 %v1183_v5  ;;  %v1450_v45 = vrot.slane %v2682_v22, 5 }
 0x120   : > { %v986_v30 = vadd.f32 %v961_v62, %v790_v13  ;;  %v1361_v18 = vor.u32 %v1360_v11, %v1356_v28 }
 0x121   : > { %1929 = vmatmul.msk.bf16.gmra.mxu3 %vm605_vm3, %v2390_v10  ;;  %v1348_v10 = vshll.u32 %v2679_v38, 16  ;;  %v1186_v20 = vpack.c.b16 %v1185_v60, %v1184_v4  ;;  %v1452_v52 = vrot.slane %v1450_v45, 4 }
 0x122   : > { %v1145_v2 = vpop.f32.mrf.mxu0 }
 0x123   : > { %v1350_v47 = vrot.slane %v1348_v10, 5 }
 0x124   : > { %v1042_v36 = vpop.f32.mrf.mxu3  ;;  %v794_v19 = vpop.f32.mrf.mxu1 }
 0x125   : > { %1942 = vmatmul.msk.bf16.gmra.mxu0 %vm605_vm3, %v2575_v0  ;;  %v1067_v43 = vadd.f32 %v1042_v36, %v986_v30  ;;  %v1351_v63 = vor.u32 %v1350_v47, %v1347_v34  ;;  %v795_v57 = vadd.f32 %v794_v19, %v2558_v35  ;;  %v1453_v36 = vrot.slane %v362_v3, 5 }
 0x127   : > { %v963_v25 = vpop.f32.mrf.mxu2  ;;  %1902 = vmatmul.msk.bf16.gmra.mxu1 %vm605_vm3, %v2575_v0  ;;  %v2695_v23 = vadd.f32 %v1145_v2, %v1067_v43  ;;  %v1352_v21 = vrot.slane %v1351_v63, 4  ;;  %v1932_v2 = vrot.slane %v2679_v38, 9 }
 0x128   : > { %v987_v46 = vadd.f32 %v963_v25, %v792_v54 }
 0x129   : > { %v1357_v30 = vsel %vm2214_vm4, %v1352_v21, %v1356_v28  ;;  %v1451_v38 = vsel %vm2380_vm7, %v1932_v2, %v1450_v45 }
 0x12a   : > { %v1147_v53 = vpop.f32.mrf.mxu0  ;;  %v1368_v37 = vunpack.c.l.b16 %v1357_v30  ;;  %v1455_v25 = vunpack.c.l.b16 %v1451_v38 }
 0x12c   : > { %v1044_v48 = vpop.f32.mrf.mxu3  ;;  %1918 = vmatmul.msk.bf16.gmra.mxu2 %vm605_vm3, %v2588_v59  ;;  %v796_v0 = vpop.f32.mrf.mxu1  ;;  %v1362_v59 = vrot.slane %v1361_v18, 4 }
 0x12d   : > { %v1068_v42 = vadd.f32 %v1044_v48, %v987_v46 }
 0x12e   : > { %v1367_v33 = vsel %vm2214_vm4, %v1362_v59, %v1366_v14 }
 0x12f   : > { %v966_v1 = vpop.f32.mrf.mxu2  ;;  %v2705_v12 = vadd.f32 %v1147_v53, %v1068_v42  ;;  %v1369_v10 = vunpack.c.l.b16 %v1367_v33 }
 0x130   : > { %v988_v8 = vadd.f32 %v966_v1, %v795_v57 }
 0x131   : > { %1930 = vmatmul.msk.bf16.gmra.mxu3 %vm605_vm3, %v2594_v29  ;;  %v797_v29 = vadd.f32 %v796_v0, %v2577_v24  ;;  %v1454_v24 = vsel %vm2380_vm7, %v1452_v52, %v1453_v36  ;;  %v1370_v32 = vpack.c.b16 %v1369_v10, %v1368_v37 }
 0x132   : > { %v1150_v58 = vpop.f32.mrf.mxu0  ;;  %v1456_v46 = vunpack.c.l.b16 %v1454_v24 }
 0x134   : > { %v1047_v13 = vpop.f32.mrf.mxu3  ;;  %v799_v62 = vpop.f32.mrf.mxu1  ;;  %v1457_v5 = vpack.c.b16 %v1456_v46, %v1455_v25 }
 0x135   : > { %1943 = vmatmul.msk.bf16.gmra.mxu0 %vm605_vm3, %v1186_v20  ;;  %v1069_v35 = vadd.f32 %v1047_v13, %v988_v8  ;;  %v800_v34 = vadd.f32 %v799_v62, %v2596_v16 }
 0x137   : > { %v968_v19 = vpop.f32.mrf.mxu2  ;;  %1903 = vmatmul.msk.bf16.gmra.mxu1 %vm605_vm3, %v1186_v20  ;;  %v2718_v22 = vadd.f32 %v1150_v58, %v1069_v35 }
 0x138   : > { %v989_v43 = vadd.f32 %v968_v19, %v797_v29 }
 0x13a   : > { %v1152_v54 = vpop.f32.mrf.mxu0 }
 0x13c   : > { %v1049_v44 = vpop.f32.mrf.mxu3  ;;  %1919 = vmatmul.msk.bf16.gmra.mxu2 %vm605_vm3, %v1963_v39  ;;  %v801_v51 = vpop.f32.mrf.mxu1 }
 0x13d   : > { %v1070_v41 = vadd.f32 %v1049_v44, %v989_v43  ;;  %v802_v0 = vadd.f32 %v801_v51, %v2604_v40 }
 0x13f   : > { %v971_v47 = vpop.f32.mrf.mxu2  ;;  %v2727_v53 = vadd.f32 %v1152_v54, %v1070_v41 }
 0x140   : > { %v990_v56 = vadd.f32 %v971_v47, %v800_v34 }
 0x141   : > { %1931 = vmatmul.msk.bf16.gmra.mxu3 %vm605_vm3, %v1370_v32 }
 0x142   : > { %v1155_v28 = vpop.f32.mrf.mxu0 }
 0x144   : > { %v1052_v6 = vpop.f32.mrf.mxu3  ;;  %v1207_v11 = vpop.f32.mrf.mxu1 }
 0x145   : > { %1944 = vmatmul.msk.bf16.gmra.mxu0 %vm605_vm3, %v1457_v5  ;;  %v1071_v3 = vadd.f32 %v1052_v6, %v990_v56  ;;  %v1247_v48 = vadd.f32 %v1207_v11, %v2614_v31 }
 0x147   : > { %v973_v42 = vpop.f32.mrf.mxu2  ;;  %v2733_v4 = vadd.f32 %v1155_v28, %v1071_v3 }
 0x148   : > { %v991_v16 = vadd.f32 %v973_v42, %v802_v0 }
 0x14a   : > { %v1157_v60 = vpop.f32.mrf.mxu0 }
 0x14c   : > { %v1054_v63 = vpop.f32.mrf.mxu3  ;;  %v1209_v57 = vpop.f32.mrf.mxu1 }
 0x14d   : > { %v1072_v18 = vadd.f32 %v1054_v63, %v991_v16  ;;  %v1248_v61 = vadd.f32 %v1209_v57, %v2618_v55 }
 0x14f   : > { %v1288_v1 = vpop.f32.mrf.mxu2  ;;  %v2736_v8 = vadd.f32 %v1157_v60, %v1072_v18 }
 0x150   : > { %v1328_v20 = vadd.f32 %v1288_v1, %v1247_v48 }
 0x152   : > { %v1478_v21 = vpop.f32.mrf.mxu0 }
 0x154   : > { %v1391_v58 = vpop.f32.mrf.mxu3  ;;  %v1212_v59 = vpop.f32.mrf.mxu1 }
 0x155   : > { %v1431_v31 = vadd.f32 %v1391_v58, %v1328_v20  ;;  %v1249_v40 = vadd.f32 %v1212_v59, %v2627_v15 }
 0x157   : > { %v1518_v14 = vadd.f32 %v1478_v21, %v1431_v31  ;;  %v1290_v45 = vpop.f32.mrf.mxu2 }
 0x158   : > { %v1329_v13 = vadd.f32 %v1290_v45, %v1248_v61 }
 0x159   : > { %v1574_v55 = vmul.f32 %v1518_v14, %v1518_v14  ;;  %v1535_v19 = vsel %vm1534_vm8, %v1518_v14, 0.0 }
 0x15a   : > { %v1480_v62 = vpop.f32.mrf.mxu0 }
 0x15b   : > { %v1590_v10 = vsel %vm1534_vm8, %v1574_v55, 0.0 }
 0x15c   : > { %v1393_v35 = vpop.f32.mrf.mxu3  ;;  %v1214_v30 = vpop.f32.mrf.mxu1 }
 0x15d   : > { %v1432_v2 = vadd.f32 %v1393_v35, %v1329_v13  ;;  %v1250_v29 = vadd.f32 %v1214_v30, %v2632_v27 }
 0x15f   : > { %v1519_v33 = vadd.f32 %v1480_v62, %v1432_v2  ;;  %v1293_v52 = vpop.f32.mrf.mxu2 }
 0x160   : > { %v1330_v36 = vadd.f32 %v1293_v52, %v1249_v40 }
 0x161   : > { %v1536_v43 = vsel %vm1534_vm8, %v1519_v33, 0.0  ;;  %v1575_v39 = vmul.f32 %v1519_v33, %v1519_v33 }
 0x162   : > { %v1537_v15 = vadd.f32 %v1536_v43, %v1535_v19  ;;  %v1483_v37 = vpop.f32.mrf.mxu0 }
 0x163   : > { %v1591_v54 = vsel %vm1534_vm8, %v1575_v39, 0.0 }
 0x164   : > { %v1592_v38 = vadd.f32 %v1591_v54, %v1590_v10  ;;  %v1396_v24 = vpop.f32.mrf.mxu3  ;;  %v1217_v44 = vpop.f32.mrf.mxu1 }
 0x165   : > { %v1433_v27 = vadd.f32 %v1396_v24, %v1330_v36  ;;  %v1251_v51 = vadd.f32 %v1217_v44, %v2641_v17 }
 0x167   : > { %v1520_v41 = vadd.f32 %v1483_v37, %v1433_v27  ;;  %v1295_v32 = vpop.f32.mrf.mxu2 }
 0x168   : > { %v1331_v25 = vadd.f32 %v1295_v32, %v1250_v29 }
 0x169   : > { %v1538_v46 = vsel %vm1534_vm8, %v1520_v41, 0.0  ;;  %v1576_v34 = vmul.f32 %v1520_v41, %v1520_v41 }
 0x16a   : > { %v1539_v47 = vadd.f32 %v1538_v46, %v1537_v15  ;;  %v1485_v56 = vpop.f32.mrf.mxu0 }
 0x16b   : > { %v1593_v5 = vsel %vm1534_vm8, %v1576_v34, 0.0 }
 0x16c   : > { %v1594_v28 = vadd.f32 %v1593_v5, %v1592_v38  ;;  %v1398_v6 = vpop.f32.mrf.mxu3  ;;  %v1219_v11 = vpop.f32.mrf.mxu1 }
 0x16d   : > { %v1434_v3 = vadd.f32 %v1398_v6, %v1331_v25  ;;  %v1252_v58 = vadd.f32 %v1219_v11, %v2646_v7 }
 0x16f   : > { %v1521_v48 = vadd.f32 %v1485_v56, %v1434_v3  ;;  %v1298_v0 = vpop.f32.mrf.mxu2 }
 0x170   : > { %v1332_v42 = vadd.f32 %v1298_v0, %v1251_v51 }
 0x171   : > { %v1540_v16 = vsel %vm1534_vm8, %v1521_v48, 0.0  ;;  %v1577_v17 = vmul.f32 %v1521_v48, %v1521_v48 }
 0x172   : > { %v1541_v60 = vadd.f32 %v1540_v16, %v1539_v47  ;;  %v1488_v63 = vpop.f32.mrf.mxu0 }
 0x173   : > { %v1595_v57 = vsel %vm1534_vm8, %v1577_v17, 0.0 }
 0x174   : > { %v1596_v18 = vadd.f32 %v1595_v57, %v1594_v28  ;;  %v1401_v61 = vpop.f32.mrf.mxu3  ;;  %v1222_v1 = vpop.f32.mrf.mxu1 }
 0x175   : > { %v1435_v20 = vadd.f32 %v1401_v61, %v1332_v42  ;;  %v1253_v33 = vadd.f32 %v1222_v1, %v2654_v49 }
 0x177   : > { %v1522_v21 = vadd.f32 %v1488_v63, %v1435_v20  ;;  %v1300_v59 = vpop.f32.mrf.mxu2 }
 0x178   : > { %v1333_v14 = vadd.f32 %v1300_v59, %v1252_v58 }
 0x179   : > { %v1542_v31 = vsel %vm1534_vm8, %v1522_v21, 0.0  ;;  %v1578_v40 = vmul.f32 %v1522_v21, %v1522_v21 }
 0x17a   : > { %v1543_v45 = vadd.f32 %v1542_v31, %v1541_v60  ;;  %v1490_v13 = vpop.f32.mrf.mxu0 }
 0x17b   : > { %v1597_v62 = vsel %vm1534_vm8, %v1578_v40, 0.0 }
 0x17c   : > { %v1598_v35 = vadd.f32 %v1597_v62, %v1596_v18  ;;  %v1403_v30 = vpop.f32.mrf.mxu3  ;;  %v1224_v2 = vpop.f32.mrf.mxu1 }
 0x17d   : > { %v1436_v29 = vadd.f32 %v1403_v30, %v1333_v14  ;;  %v1254_v44 = vadd.f32 %v1224_v2, %v2659_v50 }
 0x17f   : > { %v1523_v55 = vadd.f32 %v1490_v13, %v1436_v29  ;;  %v1303_v52 = vpop.f32.mrf.mxu2 }
 0x180   : > { %v1334_v19 = vadd.f32 %v1303_v52, %v1253_v33 }
 0x181   : > { %v1544_v36 = vsel %vm1534_vm8, %v1523_v55, 0.0  ;;  %v1579_v7 = vmul.f32 %v1523_v55, %v1523_v55 }
 0x182   : > { %v1545_v43 = vadd.f32 %v1544_v36, %v1543_v45  ;;  %v1493_v39 = vpop.f32.mrf.mxu0 }
 0x183   : > { %v1599_v15 = vsel %vm1534_vm8, %v1579_v7, 0.0 }
 0x184   : > { %v1600_v37 = vadd.f32 %v1599_v15, %v1598_v35  ;;  %v1406_v10 = vpop.f32.mrf.mxu3  ;;  %v1227_v54 = vpop.f32.mrf.mxu1 }
 0x185   : > { %v1437_v38 = vadd.f32 %v1406_v10, %v1334_v19  ;;  %v1255_v6 = vadd.f32 %v1227_v54, %v2668_v9 }
 0x187   : > { %v1524_v24 = vadd.f32 %v1493_v39, %v1437_v38  ;;  %v1305_v27 = vpop.f32.mrf.mxu2 }
 0x188   : > { %v1335_v41 = vadd.f32 %v1305_v27, %v1254_v44 }
 0x189   : > { %v1546_v51 = vsel %vm1534_vm8, %v1524_v24, 0.0  ;;  %v1580_v49 = vmul.f32 %v1524_v24, %v1524_v24 }
 0x18a   : > { %v1547_v32 = vadd.f32 %v1546_v51, %v1545_v43  ;;  %v1495_v25 = vpop.f32.mrf.mxu0 }
 0x18b   : > { %v1601_v46 = vsel %vm1534_vm8, %v1580_v49, 0.0 }
 0x18c   : > { %v1602_v34 = vadd.f32 %v1601_v46, %v1600_v37  ;;  %v1408_v47 = vpop.f32.mrf.mxu3  ;;  %v1229_v56 = vpop.f32.mrf.mxu1 }
 0x18d   : > { %v1438_v5 = vadd.f32 %v1408_v47, %v1335_v41  ;;  %v1256_v61 = vadd.f32 %v1229_v56, %v2673_v26 }
 0x18f   : > { %v1525_v28 = vadd.f32 %v1495_v25, %v1438_v5  ;;  %v1308_v11 = vpop.f32.mrf.mxu2 }
 0x190   : > { %v1336_v48 = vadd.f32 %v1308_v11, %v1255_v6 }
 0x191   : > { %v1548_v3 = vsel %vm1534_vm8, %v1525_v28, 0.0  ;;  %v1581_v50 = vmul.f32 %v1525_v28, %v1525_v28 }
 0x192   : > { %v1549_v0 = vadd.f32 %v1548_v3, %v1547_v32  ;;  %v1498_v42 = vpop.f32.mrf.mxu0 }
 0x193   : > { %v1603_v16 = vsel %vm1534_vm8, %v1581_v50, 0.0 }
 0x194   : > { %v1604_v17 = vadd.f32 %v1603_v16, %v1602_v34  ;;  %v1411_v60 = vpop.f32.mrf.mxu3  ;;  %v1232_v63 = vpop.f32.mrf.mxu1 }
 0x195   : > { %v1439_v57 = vadd.f32 %v1411_v60, %v1336_v48  ;;  %v1257_v35 = vadd.f32 %v1232_v63, %v2695_v23 }
 0x197   : > { %v1526_v18 = vadd.f32 %v1498_v42, %v1439_v57  ;;  %v1310_v1 = vpop.f32.mrf.mxu2 }
 0x198   : > { %v1337_v21 = vadd.f32 %v1310_v1, %v1256_v61 }
 0x199   : > { %v1550_v20 = vsel %vm1534_vm8, %v1526_v18, 0.0  ;;  %v1582_v9 = vmul.f32 %v1526_v18, %v1526_v18 }
 0x19a   : > { %v1551_v58 = vadd.f32 %v1550_v20, %v1549_v0  ;;  %v1500_v59 = vpop.f32.mrf.mxu0 }
 0x19b   : > { %v1605_v31 = vsel %vm1534_vm8, %v1582_v9, 0.0 }
 0x19c   : > { %v1606_v40 = vadd.f32 %v1605_v31, %v1604_v17  ;;  %v1413_v14 = vpop.f32.mrf.mxu3  ;;  %v1234_v45 = vpop.f32.mrf.mxu1 }
 0x19d   : > { %v1440_v13 = vadd.f32 %v1413_v14, %v1337_v21  ;;  %v1258_v15 = vadd.f32 %v1234_v45, %v2705_v12 }
 0x19f   : > { %v1527_v62 = vadd.f32 %v1500_v59, %v1440_v13  ;;  %v1313_v30 = vpop.f32.mrf.mxu2 }
 0x1a0   : > { %v1338_v29 = vadd.f32 %v1313_v30, %v1257_v35 }
 0x1a1   : > { %v1552_v2 = vsel %vm1534_vm8, %v1527_v62, 0.0  ;;  %v1583_v26 = vmul.f32 %v1527_v62, %v1527_v62 }
 0x1a2   : > { %v1553_v55 = vadd.f32 %v1552_v2, %v1551_v58  ;;  %v1503_v33 = vpop.f32.mrf.mxu0 }
 0x1a3   : > { %v1607_v52 = vsel %vm1534_vm8, %v1583_v26, 0.0 }
 0x1a4   : > { %v1608_v36 = vadd.f32 %v1607_v52, %v1606_v40  ;;  %v1416_v7 = vpop.f32.mrf.mxu3  ;;  %v1237_v43 = vpop.f32.mrf.mxu1 }
 0x1a5   : > { %v1441_v19 = vadd.f32 %v1416_v7, %v1338_v29  ;;  %v1259_v32 = vadd.f32 %v1237_v43, %v2718_v22 }
 0x1a7   : > { %v1528_v39 = vadd.f32 %v1503_v33, %v1441_v19  ;;  %v1315_v37 = vpop.f32.mrf.mxu2 }
 0x1a8   : > { %v1339_v54 = vadd.f32 %v1315_v37, %v1258_v15 }
 0x1a9   : > { %v1554_v10 = vsel %vm1534_vm8, %v1528_v39, 0.0  ;;  %v1584_v23 = vmul.f32 %v1528_v39, %v1528_v39 }
 0x1aa   : > { %v1555_v38 = vadd.f32 %v1554_v10, %v1553_v55  ;;  %v1505_v24 = vpop.f32.mrf.mxu0 }
 0x1ab   : > { %v1609_v44 = vsel %vm1534_vm8, %v1584_v23, 0.0 }
 0x1ac   : > { %v1610_v27 = vadd.f32 %v1609_v44, %v1608_v36  ;;  %v1418_v51 = vpop.f32.mrf.mxu3  ;;  %v1239_v46 = vpop.f32.mrf.mxu1 }
 0x1ad   : > { %v1442_v49 = vadd.f32 %v1418_v51, %v1339_v54  ;;  %v1260_v48 = vadd.f32 %v1239_v46, %v2727_v53 }
 0x1af   : > { %v1529_v41 = vadd.f32 %v1505_v24, %v1442_v49  ;;  %v1318_v25 = vpop.f32.mrf.mxu2 }
 0x1b0   : > { %v1340_v47 = vadd.f32 %v1318_v25, %v1259_v32 }
 0x1b1   : > { %v1556_v34 = vsel %vm1534_vm8, %v1529_v41, 0.0  ;;  %v1585_v12 = vmul.f32 %v1529_v41, %v1529_v41 }
 0x1b2   : > { %v1557_v56 = vadd.f32 %v1556_v34, %v1555_v38  ;;  %v1508_v5 = vpop.f32.mrf.mxu0 }
 0x1b3   : > { %v1611_v28 = vsel %vm1534_vm8, %v1585_v12, 0.0 }
 0x1b4   : > { %v1612_v6 = vadd.f32 %v1611_v28, %v1610_v27  ;;  %v1421_v11 = vpop.f32.mrf.mxu3  ;;  %v1242_v17 = vpop.f32.mrf.mxu1 }
 0x1b5   : > { %v1443_v3 = vadd.f32 %v1421_v11, %v1340_v47  ;;  %v1261_v9 = vadd.f32 %v1242_v17, %v2733_v4 }
 0x1b7   : > { %v1530_v50 = vadd.f32 %v1508_v5, %v1443_v3  ;;  %v1320_v0 = vpop.f32.mrf.mxu2 }
 0x1b8   : > { %v1341_v16 = vadd.f32 %v1320_v0, %v1260_v48 }
 0x1b9   : > { %v1558_v42 = vsel %vm1534_vm8, %v1530_v50, 0.0  ;;  %v1586_v22 = vmul.f32 %v1530_v50, %v1530_v50 }
 0x1ba   : > { %v1559_v60 = vadd.f32 %v1558_v42, %v1557_v56  ;;  %v1510_v63 = vpop.f32.mrf.mxu0 }
 0x1bb   : > { %v1613_v57 = vsel %vm1534_vm8, %v1586_v22, 0.0 }
 0x1bc   : > { %v1614_v18 = vadd.f32 %v1613_v57, %v1612_v6  ;;  %v1423_v61 = vpop.f32.mrf.mxu3  ;;  %v1244_v14 = vpop.f32.mrf.mxu1 }
 0x1bd   : > { %v1444_v1 = vadd.f32 %v1423_v61, %v1341_v16  ;;  %v1262_v2 = vadd.f32 %v1244_v14, %v2736_v8 }
 0x1bf   : > { %v1531_v20 = vadd.f32 %v1510_v63, %v1444_v1  ;;  %v1323_v21 = vpop.f32.mrf.mxu2 }
 0x1c0   : > { %v1342_v59 = vadd.f32 %v1323_v21, %v1261_v9 }
 0x1c1   : > { %v1560_v58 = vsel %vm1534_vm8, %v1531_v20, 0.0  ;;  %v1587_v53 = vmul.f32 %v1531_v20, %v1531_v20 }
 0x1c2   : > { %v1561_v31 = vadd.f32 %v1560_v58, %v1559_v60  ;;  %v1513_v13 = vpop.f32.mrf.mxu0 }
 0x1c3   : > { %v1615_v40 = vsel %vm1534_vm8, %v1587_v53, 0.0 }
 0x1c4   : > { %v1616_v45 = vadd.f32 %v1615_v40, %v1614_v18  ;;  %v1426_v62 = vpop.f32.mrf.mxu3 }
 0x1c5   : > { %v1445_v35 = vadd.f32 %v1426_v62, %v1342_v59 }
 0x1c7   : > { %v1532_v30 = vadd.f32 %v1513_v13, %v1445_v35  ;;  %v1325_v26 = vpop.f32.mrf.mxu2 }
 0x1c8   : > { %v1343_v55 = vadd.f32 %v1325_v26, %v1262_v2 }
 0x1c9   : > { %v1562_v4 = vsel %vm1534_vm8, %v1532_v30, 0.0  ;;  %v1588_v29 = vmul.f32 %v1532_v30, %v1532_v30 }
 0x1ca   : > { %v1563_v33 = vadd.f32 %v1562_v4, %v1561_v31  ;;  %v1515_v43 = vpop.f32.mrf.mxu0 }
 0x1cb   : > { %v1617_v52 = vsel %vm1534_vm8, %v1588_v29, 0.0 }
 0x1cc   : > { %v1618_v36 = vadd.f32 %v1617_v52, %v1616_v45  ;;  %v1428_v7 = vpop.f32.mrf.mxu3 }
 0x1cd   : > { %v1446_v19 = vadd.f32 %v1428_v7, %v1343_v55 }
 0x1cf   : > { %v1533_v39 = vadd.f32 %v1515_v43, %v1446_v19 }
 0x1d1   : > { %v1564_v15 = vsel %vm1534_vm8, %v1533_v39, 0.0  ;;  %v1589_v37 = vmul.f32 %v1533_v39, %v1533_v39 }
 0x1d2   : > { %v1565_v8 = vadd.f32 %v1564_v15, %v1563_v33 }
 0x1d3   : > { %v1619_v10 = vsel %vm1534_vm8, %v1589_v37, 0.0 }
 0x1d4   : > { %v1566_v23 = vrot.slane %v1565_v8, 4  ;;  %v1620_v54 = vadd.f32 %v1619_v10, %v1618_v36 }
 0x1d6   : > { %v1567_v38 = vadd.f32 %v1566_v23, %v1565_v8  ;;  %v1621_v24 = vrot.slane %v1620_v54, 4 }
 0x1d8   : > { %v1568_v44 = vrot.slane %v1567_v38, 2  ;;  %v1622_v27 = vadd.f32 %v1621_v24, %v1620_v54 }
 0x1da   : > { %v1569_v51 = vadd.f32 %v1568_v44, %v1567_v38  ;;  %v1623_v49 = vrot.slane %v1622_v27, 2 }
 0x1dc   : > { %v1570_v41 = vrot.slane %v1569_v51, 1  ;;  %v1624_v32 = vadd.f32 %v1623_v49, %v1622_v27 }
 0x1de   : > { %v1571_v25 = vadd.f32 %v1570_v41, %v1569_v51  ;;  %v1625_v46 = vrot.slane %v1624_v32, 1 }
 0x1e0   : > { %1573 = vst.msk [vmem:[%s324_s14] sm:$0x1] %vm1572_vm9, %v1571_v25  ;;  %v1626_v34 = vadd.f32 %v1625_v46, %v1624_v32 }
 0x1e2   : > { %1627 = vst.msk [vmem:[%s331_s24] sm:$0x1] %vm1572_vm9, %v1626_v34 }
 0x1e3 PF: > { %s15_s19 = sadd.s32 1, %s2059_s19   ;;  %s2817_s15 = smov %s2051_s17 }
 0x1e4   : > { %p12_p9 = scmp.ge.s32.totalorder %s15_s19, 6   ;;  %s2818_s16 = smov %s2055_s18 }
 0x1e5   : > { %s2819_s17 = smov %s2822_s20  ;;  %s2820_s18 = smov %s2826_s21 }
 0x1e6   :  { %14 = sbr.rel (!%p12_p9) target bundleno = 3 (0x3), region = 77 }

// kernel: _lambda_.15
= control target key start
LH: loop header
LB: loop body
LE: loop exit
PB: predicated region body
PF: predicated region fallthrough
CT: control target
= control target key end

     0   :  { %s2112_s18 = smov 0   ;;  %s2114_s19 = smov 0   ;;  %s2869_s0 = inlined_call_operand.vmem [shape: bf16[2,18,18,12], index: 0, kind: input, shape index: {}, may-alias: {0,1}]   ;;  %s2870_s1 = inlined_call_operand.vmem [shape: bf16[2,18,18,12], index: 1, kind: input, shape index: {}, may-alias: {0,1}]   ;;  %s2871_s2 = inlined_call_operand.vmem [shape: bf16[3,3,12,3], index: 2, kind: input, shape index: {}]   ;;  %s2872_s3 = inlined_call_operand.vmem [shape: f32[1,3], index: 3, kind: input, shape index: {}]   ;;  %s2873_s4 = inlined_call_operand.vmem [shape: f32[1,3], index: 4, kind: input, shape index: {}]   ;;  %s2874_s5 = inlined_call_operand.vmem [shape: f32[2,16,16,3], index: 5, kind: output, shape index: {}]  }
   0x1   :  { %s2116_s20 = smov 0   ;;  %s2118_s21 = smov 0  }
   0x2   :  { %s2120_s22 = smov 0  }
   0x3 LB: > { %s24_s23 = sadd.s32 1, %s2072_s20  ;;  %s27_s24 = sadd.s32 1, %s2076_s21  ;;  %s2080_s22 = sphi %s2120_s22, %s15_s22   ;;  %s2076_s21 = sphi %s2118_s21, %s2882_s21   ;;  %s2072_s20 = sphi %s2116_s20, %s2881_s20   ;;  %s2068_s19 = sphi %s2114_s19, %s2880_s19   ;;  %s2064_s18 = sphi %s2112_s18, %s2879_s18  }
   0x4   : > { %p25_p0 = scmp.ge.s32.totalorder %s24_s23, 2  ;;  %p1764_p1 = scmp.ge.s32.totalorder %s2080_s22, 1 }
   0x5   : > { %p245_p2 = scmp.lt.s32.totalorder %s2080_s22, 5 }
   0x6   : > { %s2884_s23 = smov (%p25_p0, %s24_s23), 0  ;;  %s2886_s24 = smov (!%p25_p0, %s27_s24), %s2076_s21 }
   0x7   : > { %p246_p3 = pnand %p1764_p1, %p245_p2  ;;  %p29_p4 = scmp.ge.s32.totalorder %s2886_s24, 2 }
   0x8   : > { %s2148_s29 = sshll.u32 (!%p246_p3), %s2064_s18, 3  ;;  %p306_p5 = scmp.lt.s32.totalorder (!%p246_p3), %s2068_s19, 1 }
   0x9   : > { %s2888_s24 = smov (%p29_p4, %s2886_s24), 0  ;;  %249 = sbr.rel (%p246_p3) target bundleno = 479 (0x1df), region = 40 }
   0xa   : > { %p308_p6 = scmp.lt.s32.totalorder (!%p246_p3), %s2148_s29, 17  ;;  %s1961_s12 = sadd.s32 (!%p246_p3), 8, %s2148_s29 }
   0xb   : > { %p326_p7 = scmp.lt.s32.totalorder (!%p246_p3), %s1961_s12, 17  ;;  %p339_p8 = scmp.lt.s32.totalorder (!%p246_p3), %s2148_s29, 15 }
   0xe   : > { %v1776_v0 = vld [vmem:[%s2871_s2 + $0x8] sm:$0xf]  ;;  %v1952_v1 = vld [vmem:[%s2871_s2 + $0x8] sm:$0x30]  ;;  %vm645_vm0 = vcmask 1045504   ;;  %s2890_s19 = smov (!%p306_p5, %s2068_s19), 1 }
   0xf   : > { %v1777_v2 = vor.u32 %v1952_v1, %v1776_v0  ;;  %v1840_v3 = vld [vmem:[%s2871_s2 + $0x10] sm:$0xf]  ;;  %v1953_v4 = vld [vmem:[%s2871_s2 + $0x10] sm:$0x30]  ;;  %s309_s9 = scalar_select %p308_p6, %s2148_s29, 17  ;;  %vm620_vm3 = vcmask 97280  }
  0x10   : > { %v1841_v6 = vor.u32 %v1953_v4, %v1840_v3  ;;  %s1966_s10 = smul.u32 54, %s2890_s19  ;;  %v1856_v8 = vld [vmem:[%s2871_s2 + $0x18] sm:$0xf]  ;;  %v1954_v9 = vld [vmem:[%s2871_s2 + $0x18] sm:$0x30]  ;;  %vm827_vm5 = vcmask 1042432  }
  0x11   : > { %v647_v5 = vsel %vm645_vm0, %v1777_v2, 0  ;;  %s1965_s11 = smul.u32 3, %s309_s9  ;;  %vm396_vm1 = vsmask.f32 3328  ;;  %vm397_vm2 = vsmask.f32 7440  ;;  %v1857_v10 = vor.u32 %v1954_v9, %v1856_v8 }
  0x12   : > { %1962 = vmatpush.bf16.msra.mxu1 %v647_v5  ;;  %1963 = vmatpush.bf16.msra.mxu2 %v647_v5  ;;  %v940_v7 = vsel %vm645_vm0, %v1841_v6, 0  ;;  %v2174_v11 = vld [vmem:[%s2871_s2] sm:$0xf]  ;;  %v2179_v12 = vld [vmem:[%s2871_s2] sm:$0x30]  ;;  %vm2237_vm4 = vmor %vm396_vm1, %vm397_vm2  ;;  %vm828_vm6 = vcmask 1046532  }
  0x13   : > { %1964 = vmatpush.bf16.msra.mxu3 %v647_v5  ;;  %656 = vmatpush.bf16.msra.mxu0 %v647_v5  ;;  %s312_s16 = sadd.s32 %s1966_s10, %s1965_s11  ;;  %v1021_v13 = vsel %vm645_vm0, %v1857_v10, 0  ;;  %v2190_v14 = vld [vmem:[%s2871_s2 + $0x20] sm:$0xf]  ;;  %v2195_v15 = vld [vmem:[%s2871_s2 + $0x20] sm:$0x30]  ;;  %v1821_v28 = vor.u32 %v2179_v12, %v2174_v11  ;;  %vm2398_vm7 = vmor %vm827_vm5, %vm828_vm6  ;;  %s2892_s12 = smov (!%p326_p7, %s1961_s12), 17 }
  0x14   : > { %s1766_s17 = sshll.u32 %s312_s16, 2  ;;  %v1869_v29 = vor.u32 %v2195_v15, %v2190_v14  ;;  %s1967_s13 = smul.u32 3, %s2892_s12  ;;  %vm1621_vm8 = vcmask 23552  }
  0x15   : > { %s2184_s6 = scalar_lea.vmem %s2869_s0, %s1766_s17  ;;  %s2894_s29 = smov (!%p339_p8, %s2148_s29), 15 }
  0x16   : > { %949 = vmatpush.bf16.msrb.mxu2 %v940_v7  ;;  %v2198_v16 = vld [vmem:[%s2184_s6 + $0x18] sm:$0xf]  ;;  %v2201_v17 = vld [vmem:[%s2184_s6 + $0x1c] sm:$0xf]  ;;  %v2204_v18 = vld [vmem:[%s2184_s6 + $0x20] sm:$0x1]  ;;  %s330_s14 = sadd.s32 %s1967_s13, %s1966_s10 }
  0x17   : > { %1030 = vmatpush.bf16.msrb.mxu3 %v1021_v13  ;;  %v448_v19 = vshrl.u32 %v2198_v16, 16  ;;  %v451_v20 = vshll.u32 %v2198_v16, 16  ;;  %v457_v21 = vshll.u32 %v2201_v17, 16  ;;  %v461_v22 = vshrl.u32 %v2201_v17, 16  ;;  %v2211_v23 = vld [vmem:[%s2184_s6 + $0x30] sm:$0xf] }
  0x18   : > { %v467_v24 = vshll.u32 %v2204_v18, 16  ;;  %v2215_v25 = vld [vmem:[%s2184_s6 + $0x34] sm:$0xf]  ;;  %v2218_v26 = vld [vmem:[%s2184_s6 + $0x38] sm:$0x1]  ;;  %v496_v27 = vshrl.u32 %v2211_v23, 16 }
  0x19   : > { %v450_v30 = vrot.slane %v448_v19, 4  ;;  %v453_v31 = vrot.slane %v451_v20, 5  ;;  %v459_v32 = vrot.slane %v457_v21, 5  ;;  %v463_v33 = vrot.slane %v461_v22, 4  ;;  %v2226_v34 = vld [vmem:[%s2184_s6 + $0x48] sm:$0xf] }
  0x1a   : > { %v469_v35 = vrot.slane %v467_v24, 5  ;;  %v498_v36 = vrot.slane %v496_v27, 4  ;;  %v499_v37 = vshll.u32 %v2211_v23, 16  ;;  %v505_v38 = vshll.u32 %v2215_v25, 16  ;;  %v2233_v43 = vld [vmem:[%s2184_s6 + $0x4c] sm:$0xf] }
  0x1b   : > { %v454_v39 = vor.u32 %v453_v31, %v450_v30  ;;  %v464_v40 = vor.u32 %v463_v33, %v459_v32  ;;  %v509_v41 = vshrl.u32 %v2215_v25, 16  ;;  %v515_v42 = vshll.u32 %v2218_v26, 16  ;;  %v2244_v54 = vld [vmem:[%s2184_s6 + $0x50] sm:$0x1]  ;;  %v2253_v62 = vld [vmem:[%s2184_s6] sm:$0xf] }
  0x1c   : > { %v501_v45 = vrot.slane %v499_v37, 5  ;;  %v507_v46 = vrot.slane %v505_v38, 5  ;;  %v544_v47 = vshrl.u32 %v2226_v34, 16  ;;  %v547_v48 = vshll.u32 %v2226_v34, 16  ;;  %v2261_v10 = vld [vmem:[%s2184_s6 + $0x4] sm:$0xf] }
  0x1d   : > { %v455_v49 = vrot.slane %v454_v39, 4  ;;  %v465_v50 = vrot.slane %v464_v40, 4  ;;  %v511_v51 = vrot.slane %v509_v41, 4  ;;  %v517_v52 = vrot.slane %v515_v42, 5  ;;  %v2267_v24 = vld [vmem:[%s2184_s6 + $0x8] sm:$0x1] }
  0x1e   : > { %v502_v53 = vor.u32 %v501_v45, %v498_v36  ;;  %v546_v55 = vrot.slane %v544_v47, 4  ;;  %v549_v56 = vrot.slane %v547_v48, 5  ;;  %v553_v57 = vshll.u32 %v2233_v43, 16  ;;  %v2277_v38 = vld [vmem:[%s2184_s6 + $0x24] sm:$0xf]  ;;  %s1769_s15 = sshll.u32 %s330_s14, 2 }
  0x1f   : > { %v460_v58 = vsel %vm2237_vm4, %v455_v49, %v459_v32  ;;  %v470_v59 = vsel %vm2237_vm4, %v465_v50, %v469_v35  ;;  %v512_v60 = vor.u32 %v511_v51, %v507_v46  ;;  %v557_v61 = vshrl.u32 %v2233_v43, 16  ;;  %v2284_v45 = vld [vmem:[%s2184_s6 + $0x28] sm:$0xf]  ;;  %v2293_v50 = vld [vmem:[%s2184_s6 + $0x2c] sm:$0x1]  ;;  %s2545_s18 = scalar_lea.vmem %s2870_s1, %s1769_s15  ;;  %s1771_s27 = sshll.u32 %s2894_s29, 1 }
  0x20   : > { %v595_v63 = vunpack.c.l.b16 %v460_v58  ;;  %v596_v0 = vunpack.c.l.b16 %v470_v59  ;;  %v503_v1 = vrot.slane %v502_v53, 4  ;;  %v550_v2 = vor.u32 %v549_v56, %v546_v55  ;;  %s1772_s28 = sshll.u32 %s2890_s19, 5 }
  0x21   : > { %v513_v3 = vrot.slane %v512_v60, 4  ;;  %v555_v4 = vrot.slane %v553_v57, 5  ;;  %v559_v5 = vrot.slane %v557_v61, 4  ;;  %v563_v6 = vshll.u32 %v2244_v54, 16  ;;  %v2305_v57 = vld [vmem:[%s2184_s6 + $0x3c] sm:$0xf]  ;;  %s343_s30 = sadd.s32 %s1772_s28, %s1771_s27 }
  0x22   : > { %v2256_v7 = vpack.c.b16 %v596_v0, %v595_v63  ;;  %v508_v8 = vsel %vm2237_vm4, %v503_v1, %v507_v46  ;;  %v551_v9 = vrot.slane %v550_v2, 4  ;;  %v400_v13 = vshrl.u32 %v2253_v62, 16  ;;  %v2312_v0 = vld [vmem:[%s2184_s6 + $0x40] sm:$0xf]  ;;  %s1773_s7 = sshll.u32 %s343_s30, 3 }
  0x23   : > { %v518_v19 = vsel %vm2237_vm4, %v513_v3, %v517_v52  ;;  %v599_v20 = vunpack.c.l.b16 %v508_v8  ;;  %v560_v21 = vor.u32 %v559_v5, %v555_v4  ;;  %v565_v22 = vrot.slane %v563_v6, 5  ;;  %s2778_s8 = scalar_lea.vmem %s2874_s5, %s1773_s7 }
  0x24   : > { %1780 = vmatmul.msk.bf16.vlgmr.msra.gmra.mxu1 %vm620_vm3, %v2256_v7  ;;  %v600_v27 = vunpack.c.l.b16 %v518_v19  ;;  %v556_v30 = vsel %vm2237_vm4, %v551_v9, %v555_v4  ;;  %v402_v31 = vrot.slane %v400_v13, 4  ;;  %v403_v32 = vshll.u32 %v2253_v62, 16  ;;  %v2319_v4 = vld [vmem:[%s2184_s6 + $0x44] sm:$0x1]  ;;  %v2326_v19 = vld [vmem:[%s2184_s6 + $0x54] sm:$0xf] }
  0x25   : > { %v561_v33 = vrot.slane %v560_v21, 4  ;;  %v603_v35 = vunpack.c.l.b16 %v556_v30  ;;  %v409_v36 = vshll.u32 %v2261_v10, 16  ;;  %v413_v37 = vshrl.u32 %v2261_v10, 16 }
  0x26   : > { %v2279_v39 = vpack.c.b16 %v600_v27, %v599_v20  ;;  %v405_v40 = vrot.slane %v403_v32, 5  ;;  %v419_v41 = vshll.u32 %v2267_v24, 16  ;;  %v835_v42 = vrot.slane %v2267_v24, 5 }
  0x27   : > { %v566_v46 = vsel %vm2237_vm4, %v561_v33, %v565_v22  ;;  %v411_v47 = vrot.slane %v409_v36, 5  ;;  %v415_v48 = vrot.slane %v413_v37, 4  ;;  %v768_v49 = vsel %vm645_vm0, %v1821_v28, 0 }
  0x28   : > { %1782 = vmatmul.msk.bf16.vlgmr.msra.gmra.mxu2 %vm620_vm3, %v2279_v39  ;;  %v604_v51 = vunpack.c.l.b16 %v566_v46  ;;  %v406_v52 = vor.u32 %v405_v40, %v402_v31  ;;  %v421_v53 = vrot.slane %v419_v41, 5  ;;  %777 = vmatpush.bf16.msrb.mxu1 %v768_v49  ;;  %v1124_v55 = vsel %vm645_vm0, %v1869_v29, 0  ;;  %v2332_v40 = vld [vmem:[%s2184_s6 + $0x58] sm:$0xf] }
  0x29   : > { %v416_v56 = vor.u32 %v415_v48, %v411_v47  ;;  %1133 = vmatpush.bf16.msrb.mxu0 %v1124_v55  ;;  %v472_v11 = vshrl.u32 %v2277_v38, 16  ;;  %v475_v12 = vshll.u32 %v2277_v38, 16  ;;  %v481_v28 = vshll.u32 %v2284_v45, 16 }
  0x2a   : > { %v2307_v58 = vpack.c.b16 %v604_v51, %v603_v35  ;;  %v407_v59 = vrot.slane %v406_v52, 4  ;;  %v485_v60 = vshrl.u32 %v2284_v45, 16  ;;  %v491_v14 = vshll.u32 %v2293_v50, 16  ;;  %v2338_v51 = vld [vmem:[%s2184_s6 + $0x5c] sm:$0x1] }
  0x2b   : > { %v417_v15 = vrot.slane %v416_v56, 4  ;;  %v474_v29 = vrot.slane %v472_v11, 4  ;;  %v477_v61 = vrot.slane %v475_v12, 5  ;;  %v483_v63 = vrot.slane %v481_v28, 5  ;;  %v2341_v52 = vld [vmem:[%s2184_s6 + $0xc] sm:$0xf] }
  0x2c   : > { %1784 = vmatmul.msk.bf16.vlgmr.msra.gmra.mxu3 %vm620_vm3, %v2307_v58  ;;  %v412_v1 = vsel %vm2237_vm4, %v407_v59, %v411_v47  ;;  %v487_v2 = vrot.slane %v485_v60, 4  ;;  %v493_v3 = vrot.slane %v491_v14, 5  ;;  %v520_v5 = vshrl.u32 %v2305_v57, 16 }
  0x2d   : > { %v422_v6 = vsel %vm2237_vm4, %v417_v15, %v421_v53  ;;  %v591_v8 = vunpack.c.l.b16 %v412_v1  ;;  %v478_v9 = vor.u32 %v477_v61, %v474_v29  ;;  %v523_v13 = vshll.u32 %v2305_v57, 16  ;;  %v2351_v61 = vld [vmem:[%s2184_s6 + $0x10] sm:$0xf] }
  0x2e   : > { %v592_v20 = vunpack.c.l.b16 %v422_v6  ;;  %v488_v21 = vor.u32 %v487_v2, %v483_v63  ;;  %v522_v22 = vrot.slane %v520_v5, 4  ;;  %v529_v27 = vshll.u32 %v2312_v0, 16 }
  0x2f   : > { %v479_v30 = vrot.slane %v478_v9, 4  ;;  %v525_v31 = vrot.slane %v523_v13, 5  ;;  %v533_v32 = vshrl.u32 %v2312_v0, 16  ;;  %v539_v33 = vshll.u32 %v2319_v4, 16 }
  0x30   : > { %v607_v35 = vpack.c.b16 %v592_v20, %v591_v8  ;;  %v489_v36 = vrot.slane %v488_v21, 4  ;;  %v531_v37 = vrot.slane %v529_v27, 5  ;;  %v568_v41 = vshrl.u32 %v2326_v19, 16  ;;  %v2359_v20 = vld [vmem:[%s2184_s6 + $0x14] sm:$0x1] }
  0x31   : > { %v484_v46 = vsel %vm2237_vm4, %v479_v30, %v483_v63  ;;  %v526_v47 = vor.u32 %v525_v31, %v522_v22  ;;  %v535_v48 = vrot.slane %v533_v32, 4  ;;  %v541_v49 = vrot.slane %v539_v33, 5 }
  0x32   : > { %1778 = vmatmul.msk.bf16.vlgmr.msra.gmra.mxu0 %vm620_vm3, %v607_v35  ;;  %v494_v53 = vsel %vm2237_vm4, %v489_v36, %v493_v3  ;;  %v597_v55 = vunpack.c.l.b16 %v484_v46  ;;  %v570_v56 = vrot.slane %v568_v41, 4  ;;  %v571_v11 = vshll.u32 %v2326_v19, 16  ;;  %v1897_v36 = vld [vmem:[%s2871_s2 + $0x30] sm:$0xf] }
  0x33   : > { %v598_v12 = vunpack.c.l.b16 %v494_v53  ;;  %v527_v28 = vrot.slane %v526_v47, 4  ;;  %v536_v59 = vor.u32 %v535_v48, %v531_v37  ;;  %v577_v60 = vshll.u32 %v2332_v40, 16  ;;  %v1957_v47 = vld [vmem:[%s2871_s2 + $0x30] sm:$0x30] }
  0x34   : > { %v573_v14 = vrot.slane %v571_v11, 5  ;;  %v581_v15 = vshrl.u32 %v2332_v40, 16  ;;  %v587_v29 = vshll.u32 %v2338_v51, 16  ;;  %v424_v63 = vshrl.u32 %v2341_v52, 16  ;;  %v1958_v11 = vld [vmem:[%s2871_s2 + $0x38] sm:$0x30] }
  0x35   : > { %v2354_v1 = vpack.c.b16 %v598_v12, %v597_v55  ;;  %v532_v2 = vsel %vm2237_vm4, %v527_v28, %v531_v37  ;;  %v537_v3 = vrot.slane %v536_v59, 4  ;;  %v579_v5 = vrot.slane %v577_v60, 5  ;;  %v1881_v60 = vld [vmem:[%s2871_s2 + $0x28] sm:$0xf] }
  0x36   : > { %v601_v6 = vunpack.c.l.b16 %v532_v2  ;;  %v574_v8 = vor.u32 %v573_v14, %v570_v56  ;;  %v583_v9 = vrot.slane %v581_v15, 4  ;;  %v589_v13 = vrot.slane %v587_v29, 5  ;;  %v1909_v56 = vld [vmem:[%s2871_s2 + $0x38] sm:$0xf]  ;;  %v1956_v14 = vld [vmem:[%s2871_s2 + $0x28] sm:$0x30] }
  0x37   : > { %1781 = vmatmul.msk.bf16.gmra.mxu1 %vm620_vm3, %v2354_v1  ;;  %v542_v21 = vsel %vm2237_vm4, %v537_v3, %v541_v49  ;;  %v426_v22 = vrot.slane %v424_v63, 4  ;;  %v427_v27 = vshll.u32 %v2341_v52, 16  ;;  %v433_v30 = vshll.u32 %v2351_v61, 16 }
  0x38   : > { %v602_v31 = vunpack.c.l.b16 %v542_v21  ;;  %v575_v32 = vrot.slane %v574_v8, 4  ;;  %v584_v33 = vor.u32 %v583_v9, %v579_v5  ;;  %v437_v35 = vshrl.u32 %v2351_v61, 16 }
  0x39   : > { %v429_v37 = vrot.slane %v427_v27, 5  ;;  %v435_v41 = vrot.slane %v433_v30, 5  ;;  %v443_v46 = vshll.u32 %v2359_v20, 16  ;;  %v1830_v63 = vrot.slane %v2253_v62, 9  ;;  %v1959_v62 = vld [vmem:[%s2871_s2 + $0x40] sm:$0x30] }
  0x3a   : > { %v2375_v48 = vpack.c.b16 %v602_v31, %v601_v6  ;;  %v580_v49 = vsel %vm2237_vm4, %v575_v32, %v579_v5  ;;  %v585_v53 = vrot.slane %v584_v33, 4  ;;  %v439_v55 = vrot.slane %v437_v35, 4 }
  0x3b   : > { %v605_v12 = vunpack.c.l.b16 %v580_v49  ;;  %v430_v28 = vor.u32 %v429_v37, %v426_v22  ;;  %v445_v59 = vrot.slane %v443_v46, 5  ;;  %v832_v2 = vrot.slane %v2261_v10, 5 }
  0x3c   : > { %1783 = vmatmul.msk.bf16.gmra.mxu2 %vm620_vm3, %v2375_v48  ;;  %v590_v15 = vsel %vm2237_vm4, %v585_v53, %v589_v13  ;;  %v440_v29 = vor.u32 %v439_v55, %v435_v41  ;;  %v1898_v8 = vor.u32 %v1957_v47, %v1897_v36  ;;  %v1910_v9 = vor.u32 %v1958_v11, %v1909_v56  ;;  %v1922_v13 = vld [vmem:[%s2871_s2 + $0x40] sm:$0xf] }
  0x3d   : > { %v606_v3 = vunpack.c.l.b16 %v590_v15  ;;  %v431_v5 = vrot.slane %v430_v28, 4  ;;  %v834_v22 = vrot.slane %v832_v2, 4  ;;  %v1882_v27 = vor.u32 %v1956_v14, %v1881_v60  ;;  %v1941_v53 = vld [vmem:[%s2184_s6] sm:$0xff] }
  0x3e   : > { %v441_v21 = vrot.slane %v440_v29, 4  ;;  %v1292_v31 = vsel %vm645_vm0, %v1898_v8, 0  ;;  %v833_v35 = vsel %vm2398_vm7, %v1830_v63, %v832_v2  ;;  %v1395_v36 = vsel %vm645_vm0, %v1910_v9, 0  ;;  %v1942_v2 = vld [vmem:[%s2184_s6 + $0xc] sm:$0xff] }
  0x3f   : > { %v2408_v10 = vpack.c.b16 %v606_v3, %v605_v12  ;;  %v436_v30 = vsel %vm2237_vm4, %v431_v5, %v435_v41  ;;  %1301 = vmatpush.bf16.msra.mxu2 %v1292_v31  ;;  %v836_v41 = vsel %vm2398_vm7, %v834_v22, %v835_v42  ;;  %v1211_v46 = vsel %vm645_vm0, %v1882_v27, 0  ;;  %1404 = vmatpush.bf16.msra.mxu3 %v1395_v36  ;;  %v2462_v31 = vld [vmem:[%s2184_s6 + $0x18] sm:$0xff] }
  0x40   : > { %v446_v32 = vsel %vm2237_vm4, %v441_v21, %v445_v59  ;;  %v593_v33 = vunpack.c.l.b16 %v436_v30  ;;  %v1923_v47 = vor.u32 %v1959_v62, %v1922_v13  ;;  %1220 = vmatpush.bf16.msra.mxu1 %v1211_v46  ;;  %v886_v56 = vunpack.c.l.b16 %v833_v35 }
  0x41   : > { %1785 = vmatmul.msk.bf16.gmra.mxu3 %vm620_vm3, %v2408_v10  ;;  %v594_v37 = vunpack.c.l.b16 %v446_v32  ;;  %v887_v11 = vunpack.c.l.b16 %v836_v41  ;;  %v1832_v24 = vrot.slane %v2198_v16, 9  ;;  %v846_v42 = vrot.slane %v2201_v17, 5 }
  0x42   : > { %v1482_v55 = vsel %vm645_vm0, %v1923_v47, 0  ;;  %v849_v12 = vrot.slane %v2204_v18, 5  ;;  %v839_v59 = vrot.slane %v2351_v61, 5  ;;  %v1831_v16 = vrot.slane %v2341_v52, 9 }
  0x43   : > { %v608_v49 = vpack.c.b16 %v594_v37, %v593_v33  ;;  %1491 = vmatpush.bf16.msra.mxu0 %v1482_v55  ;;  %v902_v28 = vpack.c.b16 %v887_v11, %v886_v56  ;;  %v847_v60 = vsel %vm2398_vm7, %v1832_v24, %v846_v42  ;;  %v848_v14 = vrot.slane %v846_v42, 4  ;;  %v2487_v33 = vld [vmem:[%s2184_s6 + $0x30] sm:$0xff] }
  0x44   : > { %v890_v15 = vunpack.c.l.b16 %v847_v60  ;;  %v841_v17 = vrot.slane %v839_v59, 4  ;;  %v842_v18 = vrot.slane %v2359_v20, 5  ;;  %v840_v61 = vsel %vm2398_vm7, %v1831_v16, %v839_v59 }
  0x45   : > { %1779 = vmatmul.msk.bf16.gmra.mxu0 %vm620_vm3, %v608_v49  ;;  %v850_v29 = vsel %vm2398_vm7, %v848_v14, %v849_v12  ;;  %v888_v8 = vunpack.c.l.b16 %v840_v61  ;;  %v1833_v52 = vrot.slane %v2277_v38, 9  ;;  %v853_v20 = vrot.slane %v2284_v45, 5  ;;  %v2528_v12 = vld [vmem:[%s2184_s6 + $0x48] sm:$0xff] }
  0x46   : > { %v891_v63 = vunpack.c.l.b16 %v850_v29  ;;  %v843_v5 = vsel %vm2398_vm7, %v841_v17, %v842_v18  ;;  %v856_v21 = vrot.slane %v2293_v50, 5  ;;  %v2475_v50 = vld [vmem:[%s2184_s6 + $0x24] sm:$0xff]  ;;  %v860_v32 = vrot.slane %v2215_v25, 5 }
  0x47   : > { %1822 = vmatmul.msk.bf16.vlgmr.msrb.gmra.mxu1 %vm620_vm3, %v1941_v53  ;;  %v889_v9 = vunpack.c.l.b16 %v843_v5  ;;  %v854_v27 = vsel %vm2398_vm7, %v1833_v52, %v853_v20  ;;  %v855_v13 = vrot.slane %v853_v20, 4  ;;  %v1834_v35 = vrot.slane %v2211_v23, 9  ;;  %v2571_v52 = vld [vmem:[%s2184_s6 + $0x54] sm:$0xff] }
  0x48   : > { %v2441_v3 = vpack.c.b16 %v891_v63, %v890_v15  ;;  %v892_v62 = vunpack.c.l.b16 %v854_v27  ;;  %v862_v36 = vrot.slane %v860_v32, 4  ;;  %v863_v37 = vrot.slane %v2218_v26, 5  ;;  %v2555_v63 = vld [vmem:[%s2545_s18 + $0x4] sm:$0xf] }
  0x49   : > { %v2453_v22 = vpack.c.b16 %v889_v9, %v888_v8  ;;  %v857_v30 = vsel %vm2398_vm7, %v855_v13, %v856_v21  ;;  %v861_v41 = vsel %vm2398_vm7, %v1834_v35, %v860_v32  ;;  %v867_v26 = vrot.slane %v2312_v0, 5  ;;  %v2576_v32 = vld [vmem:[%s2545_s18 + $0x8] sm:$0x1] }
  0x4a   : > { %v893_v38 = vunpack.c.l.b16 %v857_v30  ;;  %v864_v25 = vsel %vm2398_vm7, %v862_v36, %v863_v37  ;;  %v894_v46 = vunpack.c.l.b16 %v861_v41  ;;  %v1835_v53 = vrot.slane %v2305_v57, 9 }
  0x4b   : > { %v895_v47 = vunpack.c.l.b16 %v864_v25  ;;  %v869_v55 = vrot.slane %v867_v26, 4  ;;  %v870_v56 = vrot.slane %v2319_v4, 5  ;;  %v874_v4 = vrot.slane %v2233_v43, 5 }
  0x4c   : > { %1842 = vmatmul.msk.bf16.vlgmr.msrb.gmra.mxu2 %vm620_vm3, %v902_v28  ;;  %v2464_v45 = vpack.c.b16 %v893_v38, %v892_v62  ;;  %v868_v11 = vsel %vm2398_vm7, %v1835_v53, %v867_v26  ;;  %v1836_v28 = vrot.slane %v2226_v34, 9  ;;  %v877_v60 = vrot.slane %v2244_v54, 5  ;;  %v2552_v54 = vld [vmem:[%s2545_s18] sm:$0xf] }
  0x4d   : > { %v2501_v23 = vpack.c.b16 %v895_v47, %v894_v46  ;;  %v871_v0 = vsel %vm2398_vm7, %v869_v55, %v870_v56  ;;  %v896_v24 = vunpack.c.l.b16 %v868_v11  ;;  %v876_v59 = vrot.slane %v874_v4, 4 }
  0x4e   : > { %v897_v42 = vunpack.c.l.b16 %v871_v0  ;;  %v875_v43 = vsel %vm2398_vm7, %v1836_v28, %v874_v4  ;;  %v881_v16 = vrot.slane %v2332_v40, 5  ;;  %v1089_v18 = vshrl.u32 %v2552_v54, 16 }
  0x4f   : > { %v878_v15 = vsel %vm2398_vm7, %v876_v59, %v877_v60  ;;  %v898_v29 = vunpack.c.l.b16 %v875_v43  ;;  %v1092_v61 = vshll.u32 %v2552_v54, 16  ;;  %v1098_v5 = vshll.u32 %v2555_v63, 16  ;;  %v2608_v59 = vld [vmem:[%s2545_s18] sm:$0xff] }
  0x50   : > { %v2522_v57 = vpack.c.b16 %v897_v42, %v896_v24  ;;  %v899_v34 = vunpack.c.l.b16 %v878_v15  ;;  %v1102_v8 = vshrl.u32 %v2555_v63, 16  ;;  %v1837_v40 = vrot.slane %v2326_v19, 9 }
  0x51   : > { %1858 = vmatmul.msk.bf16.vlgmr.msrb.gmra.mxu3 %vm620_vm3, %v1942_v2  ;;  %v883_v20 = vrot.slane %v881_v16, 4  ;;  %v884_v21 = vrot.slane %v2338_v51, 5  ;;  %v1091_v27 = vrot.slane %v1089_v18, 4  ;;  %v1094_v13 = vrot.slane %v1092_v61, 5 }
  0x52   : > { %v1100_v62 = vrot.slane %v1098_v5, 5  ;;  %v1104_v30 = vrot.slane %v1102_v8, 4  ;;  %v882_v36 = vsel %vm2398_vm7, %v1837_v40, %v881_v16  ;;  %v1108_v41 = vshll.u32 %v2576_v32, 16 }
  0x53   : > { %v885_v19 = vsel %vm2398_vm7, %v883_v20, %v884_v21  ;;  %v1095_v37 = vor.u32 %v1094_v13, %v1091_v27  ;;  %v900_v46 = vunpack.c.l.b16 %v882_v36 }
  0x54   : > { %v1105_v51 = vor.u32 %v1104_v30, %v1100_v62  ;;  %v901_v47 = vunpack.c.l.b16 %v885_v19  ;;  %v1110_v56 = vrot.slane %v1108_v41, 5 }
  0x55   : > { %1870 = vmatmul.msk.bf16.vlgmr.msrb.gmra.mxu0 %vm620_vm3, %v608_v49  ;;  %v2507_v49 = vld [vmem:[%s2184_s6 + $0x3c] sm:$0xff]  ;;  %v1096_v53 = vrot.slane %v1095_v37, 4 }
  0x56   : > { %v1106_v55 = vrot.slane %v1105_v51, 4  ;;  %v2595_v0 = vpack.c.b16 %v901_v47, %v900_v46 }
  0x57   : > { %1823 = vmatmul.msk.bf16.gmra.mxu1 %vm620_vm3, %v1942_v2  ;;  %v2557_v2 = vpack.c.b16 %v899_v34, %v898_v29  ;;  %v1101_v42 = vsel %vm2237_vm4, %v1096_v53, %v1100_v62 }
  0x58   : > { %v1111_v4 = vsel %vm2237_vm4, %v1106_v55, %v1110_v56  ;;  %v1112_v60 = vunpack.c.l.b16 %v1101_v42 }
  0x59   : > { %v1113_v43 = vunpack.c.l.b16 %v1111_v4 }
  0x5b   : > { %v2614_v29 = vpack.c.b16 %v1113_v43, %v1112_v60 }
  0x5c   : > { %1843 = vmatmul.msk.bf16.gmra.mxu2 %vm620_vm3, %v2453_v22 }
  0x61   : > { %1859 = vmatmul.msk.bf16.gmra.mxu3 %vm620_vm3, %v2462_v31 }
  0x65   : > { %1871 = vmatmul.msk.bf16.gmra.mxu0 %vm620_vm3, %v2256_v7 }
  0x67   : > { %1824 = vmatmul.msk.bf16.gmra.mxu1 %vm620_vm3, %v2462_v31 }
  0x6c   : > { %1844 = vmatmul.msk.bf16.gmra.mxu2 %vm620_vm3, %v2441_v3 }
  0x71   : > { %1860 = vmatmul.msk.bf16.gmra.mxu3 %vm620_vm3, %v2475_v50 }
  0x75   : > { %1872 = vmatmul.msk.bf16.gmra.mxu0 %vm620_vm3, %v2354_v1 }
  0x77   : > { %1825 = vmatmul.msk.bf16.gmra.mxu1 %vm620_vm3, %v2475_v50 }
  0x7c   : > { %1845 = vmatmul.msk.bf16.gmra.mxu2 %vm620_vm3, %v2464_v45 }
  0x81   : > { %1861 = vmatmul.msk.bf16.gmra.mxu3 %vm620_vm3, %v2487_v33 }
  0x85   : > { %1873 = vmatmul.msk.bf16.gmra.mxu0 %vm620_vm3, %v2279_v39 }
  0x87   : > { %1826 = vmatmul.msk.bf16.gmra.mxu1 %vm620_vm3, %v2487_v33 }
  0x8c   : > { %1846 = vmatmul.msk.bf16.gmra.mxu2 %vm620_vm3, %v2501_v23 }
  0x91   : > { %1862 = vmatmul.msk.bf16.gmra.mxu3 %vm620_vm3, %v2507_v49 }
  0x95   : > { %1874 = vmatmul.msk.bf16.gmra.mxu0 %vm620_vm3, %v2375_v48 }
  0x97   : > { %1827 = vmatmul.msk.bf16.gmra.mxu1 %vm620_vm3, %v2507_v49 }
  0x9c   : > { %1847 = vmatmul.msk.bf16.gmra.mxu2 %vm620_vm3, %v2522_v57 }
  0xa1   : > { %1863 = vmatmul.msk.bf16.gmra.mxu3 %vm620_vm3, %v2528_v12  ;;  %v2536_v14 = vpop.f32.mrf.mxu1 }
  0xa5   : > { %1875 = vmatmul.msk.bf16.gmra.mxu0 %vm620_vm3, %v2307_v58 }
  0xa7   : > { %1828 = vmatmul.msk.bf16.gmra.mxu1 %vm620_vm3, %v2528_v12 }
  0xa9   : > { %v2560_v17 = vpop.f32.mrf.mxu1 }
  0xab   : > { %v2566_v9 = vpop.f32.mrf.mxu2 }
  0xac   : > { %1848 = vmatmul.msk.bf16.gmra.mxu2 %vm620_vm3, %v2557_v2 }
  0xaf   : > { %v658_v38 = vpop.f32.mrf.mxu0  ;;  %v2578_v35 = vpop.f32.mrf.mxu3 }
  0xb1   : > { %1864 = vmatmul.msk.bf16.gmra.mxu3 %vm620_vm3, %v2571_v52 }
  0xb3   : > { %v2591_v26 = vpop.f32.mrf.mxu2 }
  0xb4   : > { %v2587_v25 = vpop.f32.mrf.mxu1 }
  0xb5   : > { %1876 = vmatmul.msk.bf16.gmra.mxu0 %vm620_vm3, %v2408_v10 }
  0xb7   : > { %1829 = vmatmul.msk.bf16.gmra.mxu1 %vm620_vm3, %v2571_v52  ;;  %v660_v11 = vpop.f32.mrf.mxu0  ;;  %v2597_v24 = vpop.f32.mrf.mxu3 }
  0xbc   : > { %1849 = vmatmul.msk.bf16.gmra.mxu2 %vm620_vm3, %v2595_v0  ;;  %v2605_v28 = vpop.f32.mrf.mxu1 }
  0xbf   : > { %v2610_v15 = vpop.f32.mrf.mxu2 }
  0xc1   : > { %1865 = vmatmul.msk.bf16.gmra.mxu3 %vm620_vm3, %v2608_v59 }
  0xc2   : > { %v663_v34 = vpop.f32.mrf.mxu0 }
  0xc4   : > { %v2616_v16 = vpop.f32.mrf.mxu3  ;;  %v779_v18 = vpop.f32.mrf.mxu1 }
  0xc5   : > { %1877 = vmatmul.msk.bf16.gmra.mxu0 %vm620_vm3, %v2614_v29  ;;  %v780_v61 = vadd.f32 %v779_v18, %v658_v38 }
  0xc7   : > { %v2620_v5 = vpop.f32.mrf.mxu2  ;;  %1883 = vmatmul.msk.bf16.vlgmr.msra.gmra.mxu1 %vm620_vm3, %v2453_v22 }
  0xca   : > { %v665_v8 = vpop.f32.mrf.mxu0 }
  0xcc   : > { %v2624_v40 = vpop.f32.mrf.mxu3  ;;  %1899 = vmatmul.msk.bf16.vlgmr.msra.gmra.mxu2 %vm620_vm3, %v2462_v31  ;;  %v781_v20 = vpop.f32.mrf.mxu1 }
  0xcd   : > { %v782_v21 = vadd.f32 %v781_v20, %v660_v11 }
  0xcf   : > { %v951_v27 = vpop.f32.mrf.mxu2 }
  0xd0   : > { %v991_v13 = vadd.f32 %v951_v27, %v780_v61 }
  0xd1   : > { %1911 = vmatmul.msk.bf16.vlgmr.msra.gmra.mxu3 %vm620_vm3, %v2256_v7 }
  0xd2   : > { %v1135_v62 = vpop.f32.mrf.mxu0 }
  0xd4   : > { %v1032_v30 = vpop.f32.mrf.mxu3  ;;  %v784_v38 = vpop.f32.mrf.mxu1 }
  0xd5   : > { %1924 = vmatmul.msk.bf16.vlgmr.msra.gmra.mxu0 %vm620_vm3, %v2441_v3  ;;  %v1072_v22 = vadd.f32 %v1032_v30, %v991_v13  ;;  %v785_v36 = vadd.f32 %v784_v38, %v663_v34 }
  0xd7   : > { %v953_v19 = vpop.f32.mrf.mxu2  ;;  %1884 = vmatmul.msk.bf16.gmra.mxu1 %vm620_vm3, %v2441_v3  ;;  %v2634_v31 = vadd.f32 %v1135_v62, %v1072_v22 }
  0xd8   : > { %v992_v37 = vadd.f32 %v953_v19, %v782_v21 }
  0xda   : > { %v1137_v51 = vpop.f32.mrf.mxu0 }
  0xdc   : > { %v1034_v41 = vpop.f32.mrf.mxu3  ;;  %1900 = vmatmul.msk.bf16.gmra.mxu2 %vm620_vm3, %v2475_v50  ;;  %v786_v7 = vpop.f32.mrf.mxu1 }
  0xdd   : > { %v1073_v46 = vadd.f32 %v1034_v41, %v992_v37  ;;  %v787_v47 = vadd.f32 %v786_v7, %v665_v8 }
  0xdf   : > { %v956_v53 = vpop.f32.mrf.mxu2  ;;  %v2638_v55 = vadd.f32 %v1137_v51, %v1073_v46 }
  0xe0   : > { %v993_v56 = vadd.f32 %v956_v53, %v785_v36 }
  0xe1   : > { %1912 = vmatmul.msk.bf16.gmra.mxu3 %vm620_vm3, %v2354_v1 }
  0xe2   : > { %v1140_v11 = vpop.f32.mrf.mxu0 }
  0xe4   : > { %v1037_v3 = vpop.f32.mrf.mxu3  ;;  %v789_v42 = vpop.f32.mrf.mxu1 }
  0xe5   : > { %1925 = vmatmul.msk.bf16.gmra.mxu0 %vm620_vm3, %v2464_v45  ;;  %v1074_v4 = vadd.f32 %v1037_v3, %v993_v56  ;;  %v790_v60 = vadd.f32 %v789_v42, %v2536_v14 }
  0xe7   : > { %v958_v50 = vpop.f32.mrf.mxu2  ;;  %1885 = vmatmul.msk.bf16.gmra.mxu1 %vm620_vm3, %v2464_v45  ;;  %v2647_v43 = vadd.f32 %v1140_v11, %v1074_v4 }
  0xe8   : > { %v994_v34 = vadd.f32 %v958_v50, %v787_v47 }
  0xea   : > { %v1142_v18 = vpop.f32.mrf.mxu0 }
  0xec   : > { %v1039_v61 = vpop.f32.mrf.mxu3  ;;  %1901 = vmatmul.msk.bf16.gmra.mxu2 %vm620_vm3, %v2487_v33  ;;  %v791_v1 = vpop.f32.mrf.mxu1 }
  0xed   : > { %v1075_v8 = vadd.f32 %v1039_v61, %v994_v34  ;;  %v792_v20 = vadd.f32 %v791_v1, %v2560_v17 }
  0xef   : > { %v961_v21 = vpop.f32.mrf.mxu2  ;;  %v2652_v27 = vadd.f32 %v1142_v18, %v1075_v8 }
  0xf0   : > { %v995_v14 = vadd.f32 %v961_v21, %v790_v60 }
  0xf1   : > { %1913 = vmatmul.msk.bf16.gmra.mxu3 %vm620_vm3, %v2279_v39 }
  0xf2   : > { %v1145_v45 = vpop.f32.mrf.mxu0 }
  0xf4   : > { %v1042_v13 = vpop.f32.mrf.mxu3  ;;  %v794_v62 = vpop.f32.mrf.mxu1 }
  0xf5   : > { %1926 = vmatmul.msk.bf16.gmra.mxu0 %vm620_vm3, %v2501_v23  ;;  %v1076_v30 = vadd.f32 %v1042_v13, %v995_v14  ;;  %v795_v33 = vadd.f32 %v794_v62, %v2587_v25 }
  0xf7   : > { %v963_v38 = vpop.f32.mrf.mxu2  ;;  %1886 = vmatmul.msk.bf16.gmra.mxu1 %vm620_vm3, %v2501_v23  ;;  %v2661_v17 = vadd.f32 %v1145_v45, %v1076_v30 }
  0xf8   : > { %v996_v22 = vadd.f32 %v963_v38, %v792_v20  ;;  %v2699_v38 = vld [vmem:[%s2545_s18 + $0xc] sm:$0xf] }
  0xfa   : > { %v1147_v36 = vpop.f32.mrf.mxu0 }
  0xfc   : > { %v1044_v19 = vpop.f32.mrf.mxu3  ;;  %1902 = vmatmul.msk.bf16.gmra.mxu2 %vm620_vm3, %v2507_v49  ;;  %v796_v39 = vpop.f32.mrf.mxu1 }
  0xfd   : > { %v1077_v37 = vadd.f32 %v1044_v19, %v996_v22  ;;  %v797_v51 = vadd.f32 %v796_v39, %v2605_v28  ;;  %v2702_v22 = vld [vmem:[%s2545_s18 + $0x10] sm:$0xf]  ;;  %v1878_v39 = vrot.slane %v2552_v54, 9 }
  0xff   : > { %v966_v41 = vpop.f32.mrf.mxu2  ;;  %v2666_v7 = vadd.f32 %v1147_v36, %v1077_v37  ;;  %v1360_v37 = vshrl.u32 %v2699_v38, 16 }
 0x100   : > { %v997_v25 = vadd.f32 %v966_v41, %v795_v33  ;;  %v1194_v33 = vrot.slane %v2555_v63, 5  ;;  %v1369_v41 = vshll.u32 %v2702_v22, 16 }
 0x101   : > { %1914 = vmatmul.msk.bf16.gmra.mxu3 %vm620_vm3, %v2375_v48  ;;  %v1362_v54 = vrot.slane %v1360_v37, 4 }
 0x102   : > { %v1150_v23 = vpop.f32.mrf.mxu0 }
 0x104   : > { %v1047_v46 = vpop.f32.mrf.mxu3  ;;  %v799_v47 = vpop.f32.mrf.mxu1 }
 0x105   : > { %1927 = vmatmul.msk.bf16.gmra.mxu0 %vm620_vm3, %v2522_v57  ;;  %v1078_v53 = vadd.f32 %v1047_v46, %v997_v25  ;;  %v800_v4 = vadd.f32 %v799_v47, %v2566_v9 }
 0x107   : > { %v968_v56 = vpop.f32.mrf.mxu2  ;;  %1887 = vmatmul.msk.bf16.gmra.mxu1 %vm620_vm3, %v2522_v57  ;;  %v2674_v49 = vadd.f32 %v1150_v23, %v1078_v53 }
 0x108   : > { %v998_v28 = vadd.f32 %v968_v56, %v797_v51  ;;  %v1196_v51 = vrot.slane %v1194_v33, 4  ;;  %v1195_v56 = vsel %vm2398_vm7, %v1878_v39, %v1194_v33  ;;  %v1950_v39 = vld [vmem:[%s2545_s18 + $0xc] sm:$0xff] }
 0x10a   : > { %v1152_v11 = vpop.f32.mrf.mxu0 }
 0x10c   : > { %v1049_v3 = vpop.f32.mrf.mxu3  ;;  %1903 = vmatmul.msk.bf16.gmra.mxu2 %vm620_vm3, %v2528_v12  ;;  %v801_v48 = vpop.f32.mrf.mxu1 }
 0x10d   : > { %v1079_v42 = vadd.f32 %v1049_v3, %v998_v28  ;;  %v802_v12 = vadd.f32 %v801_v48, %v2591_v26  ;;  %v1371_v28 = vrot.slane %v1369_v41, 5  ;;  %v377_v3 = vld [vmem:[%s2545_s18 + $0x14] sm:$0x1] }
 0x10f   : > { %v971_v60 = vpop.f32.mrf.mxu2  ;;  %v2679_v50 = vadd.f32 %v1152_v11, %v1079_v42 }
 0x110   : > { %v999_v34 = vadd.f32 %v971_v60, %v800_v4  ;;  %v1199_v4 = vunpack.c.l.b16 %v1195_v56 }
 0x111   : > { %1915 = vmatmul.msk.bf16.gmra.mxu3 %vm620_vm3, %v2307_v58 }
 0x112   : > { %v1155_v57 = vpop.f32.mrf.mxu0 }
 0x114   : > { %v1052_v18 = vpop.f32.mrf.mxu3  ;;  %v804_v61 = vpop.f32.mrf.mxu1 }
 0x115   : > { %1928 = vmatmul.msk.bf16.gmra.mxu0 %vm620_vm3, %v2557_v2  ;;  %v1080_v1 = vadd.f32 %v1052_v18, %v999_v34  ;;  %v805_v13 = vadd.f32 %v804_v61, %v2610_v15  ;;  %v1379_v61 = vshll.u32 %v377_v3, 16 }
 0x117   : > { %v973_v8 = vpop.f32.mrf.mxu2  ;;  %1888 = vmatmul.msk.bf16.gmra.mxu1 %vm620_vm3, %v2557_v2  ;;  %v2688_v9 = vadd.f32 %v1155_v57, %v1080_v1 }
 0x118   : > { %v1000_v20 = vadd.f32 %v973_v8, %v802_v12 }
 0x11a   : > { %v1157_v21 = vpop.f32.mrf.mxu0 }
 0x11c   : > { %v1054_v58 = vpop.f32.mrf.mxu3  ;;  %1904 = vmatmul.msk.bf16.gmra.mxu2 %vm620_vm3, %v2571_v52  ;;  %v806_v14 = vpop.f32.mrf.mxu1  ;;  %v1197_v52 = vrot.slane %v2576_v32, 5  ;;  %v1373_v32 = vshrl.u32 %v2702_v22, 16 }
 0x11d   : > { %v1081_v45 = vadd.f32 %v1054_v58, %v1000_v20  ;;  %v807_v63 = vadd.f32 %v806_v14, %v2620_v5  ;;  %v1381_v14 = vrot.slane %v1379_v61, 5 }
 0x11e   : > { %v1198_v5 = vsel %vm2398_vm7, %v1196_v51, %v1197_v52  ;;  %v1375_v11 = vrot.slane %v1373_v32, 4 }
 0x11f   : > { %v976_v62 = vpop.f32.mrf.mxu2  ;;  %v2693_v26 = vadd.f32 %v1157_v21, %v1081_v45  ;;  %v1200_v60 = vunpack.c.l.b16 %v1198_v5  ;;  %v1465_v45 = vrot.slane %v2702_v22, 5 }
 0x120   : > { %v1001_v30 = vadd.f32 %v976_v62, %v805_v13  ;;  %v1376_v18 = vor.u32 %v1375_v11, %v1371_v28 }
 0x121   : > { %1916 = vmatmul.msk.bf16.gmra.mxu3 %vm620_vm3, %v2408_v10  ;;  %v1363_v10 = vshll.u32 %v2699_v38, 16  ;;  %v1201_v20 = vpack.c.b16 %v1200_v60, %v1199_v4  ;;  %v1467_v52 = vrot.slane %v1465_v45, 4 }
 0x122   : > { %v1160_v2 = vpop.f32.mrf.mxu0 }
 0x123   : > { %v1365_v47 = vrot.slane %v1363_v10, 5 }
 0x124   : > { %v1057_v36 = vpop.f32.mrf.mxu3  ;;  %v809_v19 = vpop.f32.mrf.mxu1 }
 0x125   : > { %1929 = vmatmul.msk.bf16.gmra.mxu0 %vm620_vm3, %v2595_v0  ;;  %v1082_v15 = vadd.f32 %v1057_v36, %v1001_v30  ;;  %v1366_v34 = vor.u32 %v1365_v47, %v1362_v54  ;;  %v810_v57 = vadd.f32 %v809_v19, %v2578_v35  ;;  %v1468_v36 = vrot.slane %v377_v3, 5 }
 0x127   : > { %v978_v25 = vpop.f32.mrf.mxu2  ;;  %1889 = vmatmul.msk.bf16.gmra.mxu1 %vm620_vm3, %v2595_v0  ;;  %v2715_v23 = vadd.f32 %v1160_v2, %v1082_v15  ;;  %v1367_v21 = vrot.slane %v1366_v34, 4  ;;  %v1919_v2 = vrot.slane %v2699_v38, 9 }
 0x128   : > { %v1002_v46 = vadd.f32 %v978_v25, %v807_v63 }
 0x129   : > { %v1372_v30 = vsel %vm2237_vm4, %v1367_v21, %v1371_v28  ;;  %v1466_v38 = vsel %vm2398_vm7, %v1919_v2, %v1465_v45 }
 0x12a   : > { %v1162_v53 = vpop.f32.mrf.mxu0  ;;  %v1383_v37 = vunpack.c.l.b16 %v1372_v30  ;;  %v1470_v25 = vunpack.c.l.b16 %v1466_v38 }
 0x12c   : > { %v1059_v48 = vpop.f32.mrf.mxu3  ;;  %1905 = vmatmul.msk.bf16.gmra.mxu2 %vm620_vm3, %v2608_v59  ;;  %v811_v0 = vpop.f32.mrf.mxu1  ;;  %v1377_v59 = vrot.slane %v1376_v18, 4 }
 0x12d   : > { %v1083_v42 = vadd.f32 %v1059_v48, %v1002_v46 }
 0x12e   : > { %v1382_v33 = vsel %vm2237_vm4, %v1377_v59, %v1381_v14  ;;  %v2761_v59 = vld [vmem:[%s2872_s3] ss:$0 sm:$0xff] }
 0x12f   : > { %v981_v1 = vpop.f32.mrf.mxu2  ;;  %v2725_v12 = vadd.f32 %v1162_v53, %v1083_v42  ;;  %v1384_v10 = vunpack.c.l.b16 %v1382_v33 }
 0x130   : > { %v1003_v8 = vadd.f32 %v981_v1, %v810_v57 }
 0x131   : > { %1917 = vmatmul.msk.bf16.gmra.mxu3 %vm620_vm3, %v2614_v29  ;;  %v812_v29 = vadd.f32 %v811_v0, %v2597_v24  ;;  %v1469_v24 = vsel %vm2398_vm7, %v1467_v52, %v1468_v36  ;;  %v1385_v32 = vpack.c.b16 %v1384_v10, %v1383_v37 }
 0x132   : > { %v1165_v58 = vpop.f32.mrf.mxu0  ;;  %v1471_v46 = vunpack.c.l.b16 %v1469_v24 }
 0x134   : > { %v1062_v13 = vpop.f32.mrf.mxu3  ;;  %v814_v62 = vpop.f32.mrf.mxu1  ;;  %v1472_v5 = vpack.c.b16 %v1471_v46, %v1470_v25 }
 0x135   : > { %1930 = vmatmul.msk.bf16.gmra.mxu0 %vm620_vm3, %v1201_v20  ;;  %v1084_v35 = vadd.f32 %v1062_v13, %v1003_v8  ;;  %v815_v54 = vadd.f32 %v814_v62, %v2616_v16 }
 0x137   : > { %v983_v19 = vpop.f32.mrf.mxu2  ;;  %1890 = vmatmul.msk.bf16.gmra.mxu1 %vm620_vm3, %v1201_v20  ;;  %v2738_v22 = vadd.f32 %v1165_v58, %v1084_v35 }
 0x138   : > { %v1004_v15 = vadd.f32 %v983_v19, %v812_v29 }
 0x13a   : > { %v1167_v63 = vpop.f32.mrf.mxu0 }
 0x13c   : > { %v1064_v44 = vpop.f32.mrf.mxu3  ;;  %1906 = vmatmul.msk.bf16.gmra.mxu2 %vm620_vm3, %v1950_v39  ;;  %v816_v51 = vpop.f32.mrf.mxu1 }
 0x13d   : > { %v1085_v41 = vadd.f32 %v1064_v44, %v1004_v15  ;;  %v817_v48 = vadd.f32 %v816_v51, %v2624_v40 }
 0x13f   : > { %v986_v47 = vpop.f32.mrf.mxu2  ;;  %v2747_v53 = vadd.f32 %v1167_v63, %v1085_v41 }
 0x140   : > { %v1005_v56 = vadd.f32 %v986_v47, %v815_v54 }
 0x141   : > { %1918 = vmatmul.msk.bf16.gmra.mxu3 %vm620_vm3, %v1385_v32 }
 0x142   : > { %v1170_v28 = vpop.f32.mrf.mxu0 }
 0x144   : > { %v1067_v6 = vpop.f32.mrf.mxu3  ;;  %v1222_v11 = vpop.f32.mrf.mxu1 }
 0x145   : > { %1931 = vmatmul.msk.bf16.gmra.mxu0 %vm620_vm3, %v1472_v5  ;;  %v1086_v3 = vadd.f32 %v1067_v6, %v1005_v56  ;;  %v1262_v18 = vadd.f32 %v1222_v11, %v2634_v31  ;;  %v2767_v31 = vld [vmem:[%s2873_s4] ss:$0 sm:$0xff] }
 0x147   : > { %v988_v0 = vpop.f32.mrf.mxu2  ;;  %v2752_v42 = vadd.f32 %v1170_v28, %v1086_v3 }
 0x148   : > { %v1006_v16 = vadd.f32 %v988_v0, %v817_v48 }
 0x14a   : > { %v1172_v4 = vpop.f32.mrf.mxu0 }
 0x14c   : > { %v1069_v60 = vpop.f32.mrf.mxu3  ;;  %v1224_v34 = vpop.f32.mrf.mxu1 }
 0x14d   : > { %v1087_v57 = vadd.f32 %v1069_v60, %v1006_v16  ;;  %v1263_v45 = vadd.f32 %v1224_v34, %v2638_v55 }
 0x14f   : > { %v1303_v61 = vpop.f32.mrf.mxu2  ;;  %v2755_v1 = vadd.f32 %v1172_v4, %v1087_v57 }
 0x150   : > { %v1343_v8 = vadd.f32 %v1303_v61, %v1262_v18 }
 0x152   : > { %v1493_v20 = vpop.f32.mrf.mxu0 }
 0x154   : > { %v1406_v21 = vpop.f32.mrf.mxu3  ;;  %v1227_v40 = vpop.f32.mrf.mxu1 }
 0x155   : > { %v1446_v58 = vadd.f32 %v1406_v21, %v1343_v8  ;;  %v1264_v15 = vadd.f32 %v1227_v40, %v2647_v43 }
 0x157   : > { %v1533_v14 = vadd.f32 %v1493_v20, %v1446_v58  ;;  %v1305_v13 = vpop.f32.mrf.mxu2 }
 0x158   : > { %v1344_v35 = vadd.f32 %v1305_v13, %v1263_v45 }
 0x159   : > { %v1553_v62 = vmul.f32 %v2761_v59, %v1533_v14 }
 0x15a   : > { %v1495_v30 = vpop.f32.mrf.mxu0 }
 0x15b   : > { %v1573_v2 = vadd.f32 %v2767_v31, %v1553_v62 }
 0x15c   : > { %v1408_v29 = vpop.f32.mrf.mxu3  ;;  %v1229_v33 = vpop.f32.mrf.mxu1 }
 0x15d   : > { %v1589_v52 = vmax.f32 %v1573_v2, 0.0  ;;  %v1447_v36 = vadd.f32 %v1408_v29, %v1344_v35  ;;  %v1265_v32 = vadd.f32 %v1229_v33, %v2652_v27 }
 0x15f   : > { %2010 = vtanh.f32 %v1589_v52  ;;  %v1534_v19 = vadd.f32 %v1495_v30, %v1447_v36  ;;  %v1308_v39 = vpop.f32.mrf.mxu2 }
 0x160   : > { %v1345_v37 = vadd.f32 %v1308_v39, %v1264_v15 }
 0x161   : > { %v1554_v55 = vmul.f32 %v2761_v59, %v1534_v19 }
 0x162   : > { %v1498_v10 = vpop.f32.mrf.mxu0 }
 0x163   : > { %v1574_v63 = vadd.f32 %v2767_v31, %v1554_v55 }
 0x164   : > { %v1411_v38 = vpop.f32.mrf.mxu3  ;;  %v1232_v24 = vpop.f32.mrf.mxu1 }
 0x165   : > { %v2011_v44 = vpop.eup %2010  ;;  %v1590_v51 = vmax.f32 %v1574_v63, 0.0  ;;  %v1448_v43 = vadd.f32 %v1411_v38, %v1345_v37  ;;  %v1266_v0 = vadd.f32 %v1232_v24, %v2661_v17 }
 0x166   : > { %1622 = vst.msk [vmem:[%s2778_s8] sm:$0xff] %vm1621_vm8, %v2011_v44 }
 0x167   : > { %2012 = vtanh.f32 %v1590_v51  ;;  %v1535_v41 = vadd.f32 %v1498_v10, %v1448_v43  ;;  %v1310_v25 = vpop.f32.mrf.mxu2 }
 0x168   : > { %v1346_v54 = vadd.f32 %v1310_v25, %v1265_v32 }
 0x169   : > { %v1555_v46 = vmul.f32 %v2761_v59, %v1535_v41 }
 0x16a   : > { %v1500_v47 = vpop.f32.mrf.mxu0 }
 0x16b   : > { %v1575_v56 = vadd.f32 %v2767_v31, %v1555_v46 }
 0x16c   : > { %v1413_v5 = vpop.f32.mrf.mxu3  ;;  %v1234_v28 = vpop.f32.mrf.mxu1 }
 0x16d   : > { %v2013_v6 = vpop.eup %2012  ;;  %v1591_v11 = vmax.f32 %v1575_v56, 0.0  ;;  %v1449_v3 = vadd.f32 %v1413_v5, %v1346_v54  ;;  %v1267_v40 = vadd.f32 %v1234_v28, %v2666_v7 }
 0x16e   : > { %1623 = vst.msk [vmem:[%s2778_s8 + $0x8] sm:$0xff] %vm1621_vm8, %v2013_v6 }
 0x16f   : > { %2014 = vtanh.f32 %v1591_v11  ;;  %v1536_v48 = vadd.f32 %v1500_v47, %v1449_v3  ;;  %v1313_v27 = vpop.f32.mrf.mxu2 }
 0x170   : > { %v1347_v4 = vadd.f32 %v1313_v27, %v1266_v0 }
 0x171   : > { %v1556_v16 = vmul.f32 %v2761_v59, %v1536_v48 }
 0x172   : > { %v1503_v60 = vpop.f32.mrf.mxu0 }
 0x173   : > { %v1576_v34 = vadd.f32 %v2767_v31, %v1556_v16 }
 0x174   : > { %v1416_v57 = vpop.f32.mrf.mxu3  ;;  %v1237_v18 = vpop.f32.mrf.mxu1 }
 0x175   : > { %v2015_v61 = vpop.eup %2014  ;;  %v1592_v8 = vmax.f32 %v1576_v34, 0.0  ;;  %v1450_v20 = vadd.f32 %v1416_v57, %v1347_v4  ;;  %v1268_v52 = vadd.f32 %v1237_v18, %v2674_v49 }
 0x176   : > { %1624 = vst.msk [vmem:[%s2778_s8 + $0x10] sm:$0xff] %vm1621_vm8, %v2015_v61 }
 0x177   : > { %2016 = vtanh.f32 %v1592_v8  ;;  %v1537_v21 = vadd.f32 %v1503_v60, %v1450_v20  ;;  %v1315_v17 = vpop.f32.mrf.mxu2 }
 0x178   : > { %v1348_v14 = vadd.f32 %v1315_v17, %v1267_v40 }
 0x179   : > { %v1557_v58 = vmul.f32 %v2761_v59, %v1537_v21 }
 0x17a   : > { %v1505_v45 = vpop.f32.mrf.mxu0 }
 0x17b   : > { %v1577_v13 = vadd.f32 %v2767_v31, %v1557_v58 }
 0x17c   : > { %v1418_v62 = vpop.f32.mrf.mxu3  ;;  %v1239_v35 = vpop.f32.mrf.mxu1 }
 0x17d   : > { %v2017_v30 = vpop.eup %2016  ;;  %v1593_v2 = vmax.f32 %v1577_v13, 0.0  ;;  %v1451_v29 = vadd.f32 %v1418_v62, %v1348_v14  ;;  %v1269_v44 = vadd.f32 %v1239_v35, %v2679_v50 }
 0x17e   : > { %1625 = vst.msk [vmem:[%s2778_s8 + $0x18] sm:$0xff] %vm1621_vm8, %v2017_v30 }
 0x17f   : > { %2018 = vtanh.f32 %v1593_v2  ;;  %v1538_v33 = vadd.f32 %v1505_v45, %v1451_v29  ;;  %v1318_v7 = vpop.f32.mrf.mxu2 }
 0x180   : > { %v1349_v19 = vadd.f32 %v1318_v7, %v1268_v52 }
 0x181   : > { %v1558_v36 = vmul.f32 %v2761_v59, %v1538_v33 }
 0x182   : > { %v1508_v15 = vpop.f32.mrf.mxu0 }
 0x183   : > { %v1578_v39 = vadd.f32 %v2767_v31, %v1558_v36 }
 0x184   : > { %v1421_v55 = vpop.f32.mrf.mxu3  ;;  %v1242_v37 = vpop.f32.mrf.mxu1 }
 0x185   : > { %v2019_v10 = vpop.eup %2018  ;;  %v1594_v63 = vmax.f32 %v1578_v39, 0.0  ;;  %v1452_v38 = vadd.f32 %v1421_v55, %v1349_v19  ;;  %v1270_v28 = vadd.f32 %v1242_v37, %v2688_v9 }
 0x186   : > { %1626 = vst.msk [vmem:[%s2778_s8 + $0x20] sm:$0xff] %vm1621_vm8, %v2019_v10 }
 0x187   : > { %2020 = vtanh.f32 %v1594_v63  ;;  %v1539_v24 = vadd.f32 %v1508_v15, %v1452_v38  ;;  %v1320_v49 = vpop.f32.mrf.mxu2 }
 0x188   : > { %v1350_v43 = vadd.f32 %v1320_v49, %v1269_v44 }
 0x189   : > { %v1559_v51 = vmul.f32 %v2761_v59, %v1539_v24 }
 0x18a   : > { %v1510_v41 = vpop.f32.mrf.mxu0 }
 0x18b   : > { %v1579_v32 = vadd.f32 %v2767_v31, %v1559_v51 }
 0x18c   : > { %v1423_v25 = vpop.f32.mrf.mxu3  ;;  %v1244_v46 = vpop.f32.mrf.mxu1 }
 0x18d   : > { %v2021_v54 = vpop.eup %2020  ;;  %v1595_v47 = vmax.f32 %v1579_v32, 0.0  ;;  %v1453_v56 = vadd.f32 %v1423_v25, %v1350_v43  ;;  %v1271_v57 = vadd.f32 %v1244_v46, %v2693_v26 }
 0x18e   : > { %1627 = vst.msk [vmem:[%s2778_s8 + $0x28] sm:$0xff] %vm1621_vm8, %v2021_v54 }
 0x18f   : > { %2022 = vtanh.f32 %v1595_v47  ;;  %v1540_v5 = vadd.f32 %v1510_v41, %v1453_v56  ;;  %v1323_v50 = vpop.f32.mrf.mxu2 }
 0x190   : > { %v1351_v11 = vadd.f32 %v1323_v50, %v1270_v28 }
 0x191   : > { %v1560_v6 = vmul.f32 %v2761_v59, %v1540_v5 }
 0x192   : > { %v1513_v3 = vpop.f32.mrf.mxu0 }
 0x193   : > { %v1580_v48 = vadd.f32 %v2767_v31, %v1560_v6 }
 0x194   : > { %v1426_v0 = vpop.f32.mrf.mxu3  ;;  %v1247_v27 = vpop.f32.mrf.mxu1 }
 0x195   : > { %v2023_v16 = vpop.eup %2022  ;;  %v1596_v4 = vmax.f32 %v1580_v48, 0.0  ;;  %v1454_v60 = vadd.f32 %v1426_v0, %v1351_v11  ;;  %v1272_v13 = vadd.f32 %v1247_v27, %v2715_v23 }
 0x196   : > { %1628 = vst.msk [vmem:[%s2778_s8 + $0x30] sm:$0xff] %vm1621_vm8, %v2023_v16 }
 0x197   : > { %2024 = vtanh.f32 %v1596_v4  ;;  %v1541_v34 = vadd.f32 %v1513_v3, %v1454_v60  ;;  %v1325_v9 = vpop.f32.mrf.mxu2 }
 0x198   : > { %v1352_v61 = vadd.f32 %v1325_v9, %v1271_v57 }
 0x199   : > { %v1561_v18 = vmul.f32 %v2761_v59, %v1541_v34 }
 0x19a   : > { %v1515_v8 = vpop.f32.mrf.mxu0 }
 0x19b   : > { %v1581_v20 = vadd.f32 %v2767_v31, %v1561_v18 }
 0x19c   : > { %v1428_v21 = vpop.f32.mrf.mxu3  ;;  %v1249_v40 = vpop.f32.mrf.mxu1 }
 0x19d   : > { %v2025_v17 = vpop.eup %2024  ;;  %v1597_v58 = vmax.f32 %v1581_v20, 0.0  ;;  %v1455_v14 = vadd.f32 %v1428_v21, %v1352_v61  ;;  %v1273_v15 = vadd.f32 %v1249_v40, %v2725_v12 }
 0x19e   : > { %1629 = vst.msk [vmem:[%s2778_s8 + $0x38] sm:$0xff] %vm1621_vm8, %v2025_v17 }
 0x19f   : > { %2026 = vtanh.f32 %v1597_v58  ;;  %v1542_v45 = vadd.f32 %v1515_v8, %v1455_v14  ;;  %v1328_v26 = vpop.f32.mrf.mxu2 }
 0x1a0   : > { %v1353_v35 = vadd.f32 %v1328_v26, %v1272_v13 }
 0x1a1   : > { %v1562_v62 = vmul.f32 %v2761_v59, %v1542_v45 }
 0x1a2   : > { %v1518_v30 = vpop.f32.mrf.mxu0 }
 0x1a3   : > { %v1582_v2 = vadd.f32 %v2767_v31, %v1562_v62 }
 0x1a4   : > { %v1431_v29 = vpop.f32.mrf.mxu3  ;;  %v1252_v36 = vpop.f32.mrf.mxu1 }
 0x1a5   : > { %v2027_v33 = vpop.eup %2026  ;;  %v1598_v52 = vmax.f32 %v1582_v2, 0.0  ;;  %v1456_v7 = vadd.f32 %v1431_v29, %v1353_v35  ;;  %v1274_v51 = vadd.f32 %v1252_v36, %v2738_v22 }
 0x1a6   : > { %1630 = vst.msk [vmem:[%s2778_s8 + $0x40] sm:$0xff] %vm1621_vm8, %v2027_v33 }
 0x1a7   : > { %2028 = vtanh.f32 %v1598_v52  ;;  %v1543_v19 = vadd.f32 %v1518_v30, %v1456_v7  ;;  %v1330_v23 = vpop.f32.mrf.mxu2 }
 0x1a8   : > { %v1354_v55 = vadd.f32 %v1330_v23, %v1273_v15 }
 0x1a9   : > { %v1563_v39 = vmul.f32 %v2761_v59, %v1543_v19 }
 0x1aa   : > { %v1520_v37 = vpop.f32.mrf.mxu0 }
 0x1ab   : > { %v1583_v10 = vadd.f32 %v2767_v31, %v1563_v39 }
 0x1ac   : > { %v1433_v63 = vpop.f32.mrf.mxu3  ;;  %v1254_v12 = vpop.f32.mrf.mxu1 }
 0x1ad   : > { %v2029_v38 = vpop.eup %2028  ;;  %v1599_v24 = vmax.f32 %v1583_v10, 0.0  ;;  %v1457_v44 = vadd.f32 %v1433_v63, %v1354_v55  ;;  %v1275_v50 = vadd.f32 %v1254_v12, %v2747_v53 }
 0x1ae   : > { %1631 = vst.msk [vmem:[%s2778_s8 + $0x48] sm:$0xff] %vm1621_vm8, %v2029_v38 }
 0x1af   : > { %2030 = vtanh.f32 %v1599_v24  ;;  %v1544_v49 = vadd.f32 %v1520_v37, %v1457_v44  ;;  %v1333_v43 = vpop.f32.mrf.mxu2 }
 0x1b0   : > { %v1355_v32 = vadd.f32 %v1333_v43, %v1274_v51 }
 0x1b1   : > { %v1564_v41 = vmul.f32 %v2761_v59, %v1544_v49 }
 0x1b2   : > { %v1523_v25 = vpop.f32.mrf.mxu0 }
 0x1b3   : > { %v1584_v46 = vadd.f32 %v2767_v31, %v1564_v41 }
 0x1b4   : > { %v1436_v54 = vpop.f32.mrf.mxu3  ;;  %v1257_v3 = vpop.f32.mrf.mxu1 }
 0x1b5   : > { %v2031_v47 = vpop.eup %2030  ;;  %v1600_v56 = vmax.f32 %v1584_v46, 0.0  ;;  %v1458_v5 = vadd.f32 %v1436_v54, %v1355_v32  ;;  %v1276_v57 = vadd.f32 %v1257_v3, %v2752_v42 }
 0x1b6   : > { %1632 = vst.msk [vmem:[%s2778_s8 + $0x50] sm:$0xff] %vm1621_vm8, %v2031_v47 }
 0x1b7   : > { %2032 = vtanh.f32 %v1600_v56  ;;  %v1545_v28 = vadd.f32 %v1523_v25, %v1458_v5  ;;  %v1335_v22 = vpop.f32.mrf.mxu2 }
 0x1b8   : > { %v1356_v11 = vadd.f32 %v1335_v22, %v1275_v50 }
 0x1b9   : > { %v1565_v6 = vmul.f32 %v2761_v59, %v1545_v28 }
 0x1ba   : > { %v1525_v48 = vpop.f32.mrf.mxu0 }
 0x1bb   : > { %v1585_v0 = vadd.f32 %v2767_v31, %v1565_v6 }
 0x1bc   : > { %v1438_v27 = vpop.f32.mrf.mxu3  ;;  %v1259_v8 = vpop.f32.mrf.mxu1 }
 0x1bd   : > { %v2033_v16 = vpop.eup %2032  ;;  %v1601_v4 = vmax.f32 %v1585_v0, 0.0  ;;  %v1459_v60 = vadd.f32 %v1438_v27, %v1356_v11  ;;  %v1277_v45 = vadd.f32 %v1259_v8, %v2755_v1 }
 0x1be   : > { %1633 = vst.msk [vmem:[%s2778_s8 + $0x58] sm:$0xff] %vm1621_vm8, %v2033_v16 }
 0x1bf   : > { %2034 = vtanh.f32 %v1601_v4  ;;  %v1546_v34 = vadd.f32 %v1525_v48, %v1459_v60  ;;  %v1338_v53 = vpop.f32.mrf.mxu2 }
 0x1c0   : > { %v1357_v18 = vadd.f32 %v1338_v53, %v1276_v57 }
 0x1c1   : > { %v1566_v9 = vmul.f32 %v2761_v59, %v1546_v34 }
 0x1c2   : > { %v1528_v20 = vpop.f32.mrf.mxu0 }
 0x1c3   : > { %v1586_v61 = vadd.f32 %v2767_v31, %v1566_v9 }
 0x1c4   : > { %v1441_v21 = vpop.f32.mrf.mxu3 }
 0x1c5   : > { %v2035_v40 = vpop.eup %2034  ;;  %v1602_v17 = vmax.f32 %v1586_v61, 0.0  ;;  %v1460_v58 = vadd.f32 %v1441_v21, %v1357_v18 }
 0x1c6   : > { %1634 = vst.msk [vmem:[%s2778_s8 + $0x60] sm:$0xff] %vm1621_vm8, %v2035_v40 }
 0x1c7   : > { %2036 = vtanh.f32 %v1602_v17  ;;  %v1547_v14 = vadd.f32 %v1528_v20, %v1460_v58  ;;  %v1340_v42 = vpop.f32.mrf.mxu2 }
 0x1c8   : > { %v1358_v26 = vadd.f32 %v1340_v42, %v1277_v45 }
 0x1c9   : > { %v1567_v13 = vmul.f32 %v2761_v59, %v1547_v14 }
 0x1ca   : > { %v1530_v33 = vpop.f32.mrf.mxu0 }
 0x1cb   : > { %v1587_v62 = vadd.f32 %v2767_v31, %v1567_v13 }
 0x1cc   : > { %v1443_v35 = vpop.f32.mrf.mxu3 }
 0x1cd   : > { %v2037_v30 = vpop.eup %2036  ;;  %v1603_v2 = vmax.f32 %v1587_v62, 0.0  ;;  %v1461_v29 = vadd.f32 %v1443_v35, %v1358_v26 }
 0x1ce   : > { %1635 = vst.msk [vmem:[%s2778_s8 + $0x68] sm:$0xff] %vm1621_vm8, %v2037_v30 }
 0x1cf   : > { %2038 = vtanh.f32 %v1603_v2  ;;  %v1548_v52 = vadd.f32 %v1530_v33, %v1461_v29 }
 0x1d1   : > { %v1568_v7 = vmul.f32 %v2761_v59, %v1548_v52 }
 0x1d3   : > { %v1588_v1 = vadd.f32 %v2767_v31, %v1568_v7 }
 0x1d5   : > { %v2039_v36 = vpop.eup %2038  ;;  %v1604_v19 = vmax.f32 %v1588_v1, 0.0 }
 0x1d6   : > { %1636 = vst.msk [vmem:[%s2778_s8 + $0x70] sm:$0xff] %vm1621_vm8, %v2039_v36 }
 0x1d7   : > { %2040 = vtanh.f32 %v1604_v19 }
 0x1dd   : > { %v2041_v15 = vpop.eup %2040 }
 0x1de   : > { %1637 = vst.msk [vmem:[%s2778_s8 + $0x78] sm:$0xff] %vm1621_vm8, %v2041_v15 }
 0x1df PF: > { %s15_s22 = sadd.s32 1, %s2080_s22   ;;  %s2879_s18 = smov %s2072_s20 }
 0x1e0   : > { %p12_p9 = scmp.ge.s32.totalorder %s15_s22, 6   ;;  %s2880_s19 = smov %s2076_s21 }
 0x1e1   : > { %s2881_s20 = smov %s2884_s23  ;;  %s2882_s21 = smov %s2888_s24 }
 0x1e2   :  { %14 = sbr.rel (!%p12_p9) target bundleno = 3 (0x3), region = 73 }

</bundles_post_ra>
